<compile_context>
chip_gen: v5e
topology: v5e:2x2
jax: 0.10.0
libtpu: 0.0.40
codegen_flags: <defaults>
</compile_context>

<pallas_src>
import functools

import jax
import jax.numpy as jnp
from jax import lax
from jax.experimental import pallas as pl
from jax.experimental.pallas import tpu as pltpu


# ------------------------------ fused kernel -------------------------------

def _inception_net_kernel(*refs, plan, K, pad, L, Bt):
    """Whole InceptionTime classifier for one (model, batch-tile) grid cell."""
    it = iter(refs)
    x_ref = next(it)                                      # (Bt, L, Cin)
    blk_refs = []
    for bp in plan:
        rd = {}
        if bp["use_neck"]:
            rd["w_neck"] = next(it)                       # (Cin_d, C)
        rd["w_full"] = next(it)                           # ((K+1)*C, 128)
        rd["shift"] = next(it)                            # (1, 128)
        if bp["residual"] and bp["has_proj"]:
            rd["w_proj"] = next(it)                       # (Cin_d, 128)
            rd["proj_shift"] = next(it)                   # (1, 128)
        blk_refs.append(rd)
    fc_w_ref = next(it)                                   # (128, ncls)
    fc_b_ref = next(it)                                   # (1, ncls)
    o_ref = next(it)                                      # (Bt, 1, ncls)
    xpad_ref = next(it)                                   # (Bt*L + 2*pad_s, Cmax)

    n = Bt * L
    pad_s = max(pad, 1)
    c_max = xpad_ref.shape[1]

    # Zero halos once; the middle window is rewritten by every block.
    zeros = jnp.zeros((pad_s, c_max), jnp.float32)
    xpad_ref[0:pad_s, :] = zeros
    xpad_ref[pad_s + n:pad_s + n + pad_s, :] = zeros

    # Per-row position inside its own sequence: conv windows / maxpool must
    # not leak across sequence boundaries in the flat (batch*time) layout.
    t = lax.broadcasted_iota(jnp.int32, (n, 1), 0) % L

    act = x_ref[...].reshape(n, x_ref.shape[2]).astype(jnp.float32)

    for bp, rd in zip(plan, blk_refs):
        # --- bottleneck 1x1 conv (no bias) ---
        if bp["use_neck"]:
            xin = jnp.dot(act.astype(jnp.bfloat16), rd["w_neck"][...],
                          preferred_element_type=jnp.float32)
        else:
            xin = act
        C = xin.shape[1]

        # 'same'-padded copy of the bottleneck output (flat over batch*time).
        xpad_ref[pad_s:pad_s + n, :C] = xin

        # MaxPool1d(kernel=3, stride=1, padding=1) with per-sequence edges
        # (out-of-range neighbours replaced by the centre value == -inf pad).
        left = jnp.where(t >= 1, xpad_ref[pad_s - 1:pad_s - 1 + n, :C], xin)
        right = jnp.where(t <= L - 2, xpad_ref[pad_s + 1:pad_s + 1 + n, :C], xin)
        mp = jnp.maximum(jnp.maximum(left, xin), right)

        # Four branches (3 convs + maxpool->1x1) accumulated tap by tap into a
        # lane-dense (n, 128) f32 accumulator -> no lane concatenation glue.
        w_full = rd["w_full"]
        acc = jnp.dot(mp.astype(jnp.bfloat16), w_full[K * C:(K + 1) * C, :],
                      preferred_element_type=jnp.float32)
        for k in range(K):
            start = pad_s - pad + k
            win = xpad_ref[start:start + n, :C]
            if Bt > 1 and k < pad:        # would leak into previous sequence
                win = jnp.where(t >= pad - k, win, 0.0)
            elif Bt > 1 and k > pad:      # would leak into next sequence
                win = jnp.where(t < L + pad - k, win, 0.0)
            acc += jnp.dot(win.astype(jnp.bfloat16),
                           w_full[k * C:(k + 1) * C, :],
                           preferred_element_type=jnp.float32)

        # --- folded (eval-mode) BatchNorm + ReLU epilogue ---
        y = jnp.maximum(acc + rd["shift"][...], 0.0)

        # --- residual add + ReLU (identity or 1x1-conv+BN projection) ---
        if bp["residual"]:
            if bp["has_proj"]:
                sc = (jnp.dot(act.astype(jnp.bfloat16), rd["w_proj"][...],
                              preferred_element_type=jnp.float32)
                      + rd["proj_shift"][...])
            else:
                sc = act
            y = jnp.maximum(y + sc, 0.0)
        act = y

    # --- head: GAP over time + FC + log_softmax (all f32) ---
    gap = jnp.mean(act.reshape(Bt, L, act.shape[1]), axis=1)    # (Bt, 128)
    logits = jnp.dot(gap, fc_w_ref[...],
                     preferred_element_type=jnp.float32) + fc_b_ref[...]
    z = logits - jnp.max(logits, axis=-1, keepdims=True)
    logp = z - jnp.log(jnp.sum(jnp.exp(z), axis=-1, keepdims=True))
    o_ref[:, 0, :] = logp.astype(o_ref.dtype)


# ------------------------------ host wrapper --------------------------------

def run_ensemble(x_blc, params, *, bt=None):
    """x_blc: (B, L, Cin) channels-last input -> (M, B, ncls) log-probs."""
    B, L, Cin = x_blc.shape
    blocks = params["blocks"]
    fc_w, fc_b = params["fc_w"], params["fc_b"]
    M, _, ncls = fc_w.shape
    K = blocks[0]["K"]
    pad = K // 2
    pad_s = max(pad, 1)

    # Static per-block plan (flags + channel counts) for the kernel trace.
    plan, c_max = [], 1
    for bp in blocks:
        use_neck = bp["w_neck"] is not None
        C = bp["w_neck"].shape[2] if use_neck else bp["cin"]
        c_max = max(c_max, C)
        plan.append({"use_neck": use_neck, "residual": bp["residual"],
                     "has_proj": bp["w_proj"] is not None,
                     "C": C, "cin": bp["cin"]})
    plan = tuple(plan)

    # Batch-tile so each grid step feeds the MXU with >= ~256 rows and the
    # per-grid-step fixed cost is amortised; pad B to a multiple of the tile.
    if bt is None:
        bt = min(B, max(1, -(-256 // L)))
    n_bt = -(-B // bt)
    b_pad = n_bt * bt
    if b_pad != B:
        x_blc = jnp.concatenate(
            [x_blc, jnp.zeros((b_pad - B, L, Cin), x_blc.dtype)], axis=0)

    w_map = lambda m, b: (m, 0, 0)
    inputs = [x_blc]
    in_specs = [pl.BlockSpec((bt, L, Cin), lambda m, b: (b, 0, 0))]
    weight_bytes = 0
    for bp, pb in zip(blocks, plan):
        names = (["w_neck"] if pb["use_neck"] else []) + ["w_full", "shift"]
        if pb["residual"] and pb["has_proj"]:
            names += ["w_proj", "proj_shift"]
        for nm in names:
            arr = bp[nm]
            inputs.append(arr)
            in_specs.append(pl.BlockSpec((None,) + arr.shape[1:], w_map))
            weight_bytes += (arr.size // arr.shape[0]) * arr.dtype.itemsize
    for arr in (fc_w, fc_b):
        inputs.append(arr)
        in_specs.append(pl.BlockSpec((None,) + arr.shape[1:], w_map))
        weight_bytes += (arr.size // arr.shape[0]) * arr.dtype.itemsize

    out_shape = jax.ShapeDtypeStruct((M, b_pad, 1, ncls), jnp.float32)
    out_spec = pl.BlockSpec((None, bt, 1, ncls), lambda m, b: (m, b, 0, 0))

    # VMEM budget from the actual tiles (not hard-coded), clamped for v7x.
    n = bt * L
    x_tile = bt * L * Cin * 4
    out_tile = bt * ncls * 4
    scratch = (n + 2 * pad_s) * c_max * 4
    act_tmp = n * 128 * 4
    est = 2 * (x_tile + out_tile + weight_bytes) + scratch + 16 * act_tmp
    vmem_limit = int(min(max(est, 32 * 1024 * 1024), 48 * 1024 * 1024))

    # Advisory cost estimate for the XLA scheduler.
    flops = 0
    for pb in plan:
        if pb["use_neck"]:
            flops += 2 * n * pb["cin"] * pb["C"]
        flops += 2 * n * (K + 1) * pb["C"] * 128
        if pb["residual"] and pb["has_proj"]:
            flops += 2 * n * pb["cin"] * 128
    flops += 2 * bt * 128 * ncls
    cost = pl.CostEstimate(
        flops=int(flops) * M * n_bt,
        transcendentals=int(bt * ncls) * M * n_bt,
        bytes_accessed=int((x_tile + out_tile) * M * n_bt + weight_bytes * M))

    kernel = functools.partial(_inception_net_kernel, plan=plan, K=K, pad=pad,
                               L=L, Bt=bt)
    grid_spec = pltpu.PrefetchScalarGridSpec(
        num_scalar_prefetch=0,
        grid=(M, n_bt),                 # batch-tiles innermost: weights stay
        in_specs=in_specs,              # VMEM-resident across them
        out_specs=out_spec,
        scratch_shapes=[pltpu.VMEM((n + 2 * pad_s, c_max), jnp.float32)],
    )
    out = pl.pallas_call(
        kernel, out_shape=out_shape, grid_spec=grid_spec,
        compiler_params=pltpu.CompilerParams(
            dimension_semantics=("parallel", "parallel"),
            vmem_limit_bytes=vmem_limit),
        cost_estimate=cost,
    )(*inputs)
    return out[:, :B, 0, :]


def ensemble_fwd(x_ncw, params, *, bt=None):
    # PyTorch NCW (B, C, L) -> channels-last (B, L, C).
    x = jnp.transpose(x_ncw, (0, 2, 1))
    logp = run_ensemble(x, params, bt=bt)            # (M, B, ncls)
    # torch.stack([m(x) for m in models], 0).mean(0) on log_softmax outputs.
    return jnp.mean(logp, axis=0)


# --------------------------- parameter building ----------------------------

def _make_odd(k: int) -> int:
    return k if k % 2 else k - 1


def _conv_w(key, k, cin, cout):
    std = (2.0 / (cin * k)) ** 0.5
    return std * jax.random.normal(key, (k, cin, cout), jnp.float32)


def _bn_fold(key, c, eps=1e-5):
    # Eval-mode BatchNorm (running stats) folded to a per-channel affine.
    k1, k2 = jax.random.split(key)
    gamma = 1.0 + 0.1 * jax.random.normal(k1, (c,), jnp.float32)
    beta = 0.1 * jax.random.normal(k2, (c,), jnp.float32)
    mean = jnp.zeros((c,), jnp.float32)
    var = jnp.ones((c,), jnp.float32)
    scale = gamma / jnp.sqrt(var + eps)
    shift = beta - mean * scale
    return scale, shift


def _build_block_params(key, in_ch, nb_filters, *, base_kernel_size,
                        bottleneck_channels, use_bottleneck, residual):
    keys = jax.random.split(key, 8)
    use_neck = use_bottleneck and in_ch > 1
    cin = bottleneck_channels if use_neck else in_ch
    out4 = nb_filters * 4

    w_neck = (_conv_w(keys[0], 1, in_ch, bottleneck_channels)[0]
              if use_neck else None)                        # (in_ch, Cneck)

    kernel_sizes = [_make_odd(base_kernel_size // (2 ** i)) for i in range(3)]
    K = max(kernel_sizes)
    branch_ws = [_conv_w(keys[1 + i], k, cin, nb_filters)
                 for i, k in enumerate(kernel_sizes)]
    mp_w = _conv_w(keys[4], 1, cin, nb_filters)[0]          # (cin, nb_filters)
    scale, shift = _bn_fold(keys[5], out4)

    # Fused weight: rows = (tap, cin) for taps 0..K-1 plus one virtual "tap"
    # for the maxpool branch; columns = channel-concat of the 4 branches.
    # Smaller odd kernels are centre-padded to K == 'same' conv result.
    w_full = jnp.zeros((K + 1, cin, out4), jnp.float32)
    for i, w in enumerate(branch_ws):
        k = w.shape[0]
        off = (K - k) // 2
        w_full = w_full.at[off:off + k, :,
                           i * nb_filters:(i + 1) * nb_filters].set(w)
    w_full = w_full.at[K, :, 3 * nb_filters:].set(mp_w)
    w_full = w_full.reshape((K + 1) * cin, out4) * scale[None, :]   # fold BN

    p = {"K": K, "residual": residual, "cin": in_ch,
         "w_neck": None if w_neck is None else w_neck.astype(jnp.bfloat16),
         "w_full": w_full.astype(jnp.bfloat16),
         "shift": shift.reshape(1, out4),
         "w_proj": None, "proj_shift": None}
    if residual and in_ch != out4:
        w_proj = _conv_w(keys[6], 1, in_ch, out4)[0]
        pscale, pshift = _bn_fold(keys[7], out4)
        p["w_proj"] = (w_proj * pscale[None, :]).astype(jnp.bfloat16)
        p["proj_shift"] = pshift.reshape(1, out4)
    return p


def init_ensemble(key, n_models, input_channels, nb_classes, *, depth=6,
                  nb_filters=32, base_kernel_size=39, use_residual=True,
                  use_bottleneck=True, bottleneck_channels=32):
    model_keys = jax.random.split(key, n_models)
    per_model = []
    for mk in model_keys:
        keys = jax.random.split(mk, depth + 1)
        blocks = []
        in_ch = input_channels
        for d in range(depth):
            residual = use_residual and d % 3 == 2
            blocks.append(_build_block_params(
                keys[d], in_ch, nb_filters,
                base_kernel_size=base_kernel_size,
                bottleneck_channels=bottleneck_channels,
                use_bottleneck=use_bottleneck, residual=residual))
            in_ch = nb_filters * 4
        kf1, kf2 = jax.random.split(keys[depth])
        fc_w = (in_ch ** -0.5) * jax.random.normal(kf1, (in_ch, nb_classes),
                                                   jnp.float32)
        fc_b = (in_ch ** -0.5) * jax.random.normal(kf2, (nb_classes,),
                                                   jnp.float32)
        per_model.append({"blocks": blocks, "fc_w": fc_w,
                          "fc_b": fc_b.reshape(1, nb_classes)})

    def stack(get):
        return jnp.stack([get(m) for m in per_model], axis=0)

    stacked_blocks = []
    for d in range(depth):
        b0 = per_model[0]["blocks"][d]
        stacked_blocks.append({
            "K": b0["K"], "residual": b0["residual"], "cin": b0["cin"],
            "w_full": stack(lambda m: m["blocks"][d]["w_full"]),
            "shift": stack(lambda m: m["blocks"][d]["shift"]),
            "w_neck": (None if b0["w_neck"] is None
                       else stack(lambda m: m["blocks"][d]["w_neck"])),
            "w_proj": (None if b0["w_proj"] is None
                       else stack(lambda m: m["blocks"][d]["w_proj"])),
            "proj_shift": (None if b0["proj_shift"] is None
                           else stack(lambda m: m["blocks"][d]["proj_shift"])),
        })
    return {"blocks": stacked_blocks,
            "fc_w": stack(lambda m: m["fc_w"]),
            "fc_b": stack(lambda m: m["fc_b"])}


# --------------------------- pure-JAX reference -----------------------------

def _ref_ensemble(x_ncw, params):
    """f32 reference of the same (BN-folded, eval-mode) forward pass."""
    x = jnp.transpose(x_ncw, (0, 2, 1)).astype(jnp.float32)   # (B, L, Cin)
    _, L, _ = x.shape
    blocks = params["blocks"]
    M = params["fc_w"].shape[0]
    K = blocks[0]["K"]
    pad = K // 2
    outs = []
    for m in range(M):
        act = x
        for bp in blocks:
            w_full = bp["w_full"][m].astype(jnp.float32)
            xin = (act @ bp["w_neck"][m].astype(jnp.float32)
                   if bp["w_neck"] is not None else act)
            C = xin.shape[-1]
            xpad = jnp.pad(xin, ((0, 0), (pad, pad), (0, 0)))
            acc = jnp.zeros(act.shape[:2] + (w_full.shape[1],), jnp.float32)
            for k in range(K):
                acc = acc + xpad[:, k:k + L, :] @ w_full[k * C:(k + 1) * C, :]
            left = jnp.concatenate([xin[:, :1], xin[:, :L - 1]], axis=1)
            right = jnp.concatenate([xin[:, 1:], xin[:, L - 1:]], axis=1)
            mp = jnp.maximum(jnp.maximum(left, xin), right)
            acc = acc + mp @ w_full[K * C:, :]
            y = jnp.maximum(acc + bp["shift"][m], 0.0)
            if bp["residual"]:
                if bp["w_proj"] is not None:
                    sc = (act @ bp["w_proj"][m].astype(jnp.float32)
                          + bp["proj_shift"][m])
                else:
                    sc = act
                y = jnp.maximum(y + sc, 0.0)
            act = y
        gap = jnp.mean(act, axis=1)
        logits = gap @ params["fc_w"][m] + params["fc_b"][m]
        outs.append(jax.nn.log_softmax(logits, axis=-1))
    return jnp.mean(jnp.stack(outs, axis=0), axis=0)


# ----------------------------------- main -----------------------------------

if __name__ == "__main__":
    key = jax.random.PRNGKey(0)
    k_x, k_p = jax.random.split(key)

    B, C_IN, L = 8, 4, 64
    N_MODELS, N_CLASSES = 2, 5
    DEPTH, NB_FILTERS, BASE_K = 3, 32, 9   # 4*NB_FILTERS = 128 -> lane-dense

    x = jax.random.normal(k_x, (B, C_IN, L), jnp.float32)   # PyTorch NCW input
    params = init_ensemble(k_p, N_MODELS, C_IN, N_CLASSES, depth=DEPTH,
                           nb_filters=NB_FILTERS, base_kernel_size=BASE_K)

    fwd = jax.jit(lambda xx: ensemble_fwd(xx, params))
    out = jax.block_until_ready(fwd(x))

    assert out.shape == (B, N_CLASSES)
    assert bool(jnp.all(jnp.isfinite(out)))

    # Loose numeric check vs the f32 reference (kernel matmuls are bf16 with
    # f32 accumulation, so allow a small tolerance).
    ref = jax.block_until_ready(_ref_ensemble(x, params))
    tol = 2e-2 + 2e-2 * float(jnp.max(jnp.abs(ref)))
    assert float(jnp.max(jnp.abs(out - ref))) < tol, "mismatch vs reference"

    print("KERNEL_OK")
</pallas_src>

<mosaic_0001>
module attributes {stable_mosaic.version = 11 : i64} {
  func.func @_inception_net_kernel(%arg0: i32, %arg1: i32, %arg2: memref<4x64x4xf32, #tpu.memory_space<vmem>>, %arg3: memref<1x4x32xbf16, #tpu.memory_space<vmem>>, %arg4: memref<1x320x128xbf16, #tpu.memory_space<vmem>>, %arg5: memref<1x1x128xf32, #tpu.memory_space<vmem>>, %arg6: memref<1x128x32xbf16, #tpu.memory_space<vmem>>, %arg7: memref<1x320x128xbf16, #tpu.memory_space<vmem>>, %arg8: memref<1x1x128xf32, #tpu.memory_space<vmem>>, %arg9: memref<1x128x32xbf16, #tpu.memory_space<vmem>>, %arg10: memref<1x320x128xbf16, #tpu.memory_space<vmem>>, %arg11: memref<1x1x128xf32, #tpu.memory_space<vmem>>, %arg12: memref<1x128x5xf32, #tpu.memory_space<vmem>>, %arg13: memref<1x1x5xf32, #tpu.memory_space<vmem>>, %arg14: memref<1x4x1x5xf32, #tpu.memory_space<vmem>>, %arg15: memref<264x32xf32, #tpu.memory_space<vmem>>) attributes {dimension_semantics = [#tpu.dimension_semantics<parallel>, #tpu.dimension_semantics<parallel>], iteration_bounds = array<i64: 2, 2>, scalar_prefetch = 0 : i64, scratch_operands = 1 : i64, tpu.core_type = #tpu.core_type<tc>, window_params = [{transform_indices = @transform_0, window_bounds = array<i64: 4, 64, 4>}, {transform_indices = @transform_1, window_bounds = array<i64: 1, 4, 32>}, {transform_indices = @transform_2, window_bounds = array<i64: 1, 320, 128>}, {transform_indices = @transform_3, window_bounds = array<i64: 1, 1, 128>}, {transform_indices = @transform_4, window_bounds = array<i64: 1, 128, 32>}, {transform_indices = @transform_5, window_bounds = array<i64: 1, 320, 128>}, {transform_indices = @transform_6, window_bounds = array<i64: 1, 1, 128>}, {transform_indices = @transform_7, window_bounds = array<i64: 1, 128, 32>}, {transform_indices = @transform_8, window_bounds = array<i64: 1, 320, 128>}, {transform_indices = @transform_9, window_bounds = array<i64: 1, 1, 128>}, {transform_indices = @transform_10, window_bounds = array<i64: 1, 128, 5>}, {transform_indices = @transform_11, window_bounds = array<i64: 1, 1, 5>}, {transform_indices = @transform_12, window_bounds = array<i64: 1, 4, 1, 5>}]} {
    %cst = arith.constant 0.000000e+00 : f32
    %0 = vector.broadcast %cst : f32 to vector<4x32xf32>
    %c0 = arith.constant 0 : index
    %c0_0 = arith.constant 0 : index
    %1 = vector.load %arg15[%c0, %c0_0] : memref<264x32xf32, #tpu.memory_space<vmem>>, vector<4x32xf32>
    tpu.vector_store %arg15[%c0, %c0_0], %0 {strides = array<i32>} : memref<264x32xf32, #tpu.memory_space<vmem>>, vector<4x32xf32>,
    %c260 = arith.constant 260 : index
    %c0_1 = arith.constant 0 : index
    %2 = vector.load %arg15[%c260, %c0_1] : memref<264x32xf32, #tpu.memory_space<vmem>>, vector<4x32xf32>
    tpu.vector_store %arg15[%c260, %c0_1], %0 {strides = array<i32>} : memref<264x32xf32, #tpu.memory_space<vmem>>, vector<4x32xf32>,
    %3 = tpu.iota {dimensions = array<i32: 0>} : vector<256x1xi32>
    %c64_i32 = arith.constant 64 : i32
    %c0_i32 = arith.constant 0 : i32
    %4 = arith.cmpi eq, %c64_i32, %c0_i32 : i32
    %c1_i32 = arith.constant 1 : i32
    %5 = arith.select %4, %c1_i32, %c64_i32 : i32
    %6 = vector.broadcast %5 : i32 to vector<256x1xi32>
    %7 = arith.remsi %3, %6 : vector<256x1xi32>
    %c0_i32_2 = arith.constant 0 : i32
    %8 = vector.broadcast %c0_i32_2 : i32 to vector<256x1xi32>
    %9 = arith.cmpi ne, %7, %8 : vector<256x1xi32>
    %c0_i32_3 = arith.constant 0 : i32
    %10 = vector.broadcast %c0_i32_3 : i32 to vector<256x1xi32>
    %11 = arith.cmpi slt, %7, %10 : vector<256x1xi32>
    %c0_i32_4 = arith.constant 0 : i32
    %12 = arith.cmpi slt, %5, %c0_i32_4 : i32
    %13 = vector.broadcast %12 : i1 to vector<256x1xi1>
    %14 = vector.broadcast %13 : vector<256x1xi1> to vector<256x1xi1>
    %15 = arith.xori %11, %14 : vector<256x1xi1>
    %16 = arith.andi %15, %9 : vector<256x1xi1>
    %17 = vector.broadcast %5 : i32 to vector<256x1xi32>
    %18 = arith.addi %7, %17 : vector<256x1xi32>
    %19 = arith.select %16, %18, %7 : vector<256x1xi1>, vector<256x1xi32>
    %c0_5 = arith.constant 0 : index
    %c0_6 = arith.constant 0 : index
    %c0_7 = arith.constant 0 : index
    %20 = vector.load %arg2[%c0_5, %c0_6, %c0_7] : memref<4x64x4xf32, #tpu.memory_space<vmem>>, vector<4x64x4xf32>
    %21 = vector.shape_cast %20 : vector<4x64x4xf32> to vector<256x4xf32>
    %22 = arith.truncf %21 : vector<256x4xf32> to vector<256x4xbf16>
    %c0_8 = arith.constant 0 : index
    %c0_9 = arith.constant 0 : index
    %c0_10 = arith.constant 0 : index
    %23 = vector.load %arg3[%c0_8, %c0_9, %c0_10] : memref<1x4x32xbf16, #tpu.memory_space<vmem>>, vector<1x4x32xbf16>
    %24 = vector.shape_cast %23 : vector<1x4x32xbf16> to vector<4x32xbf16>
    %cst_11 = arith.constant dense<0.000000e+00> : vector<256x32xf32>
    %25 = tpu.matmul %22, %24, %cst_11 {dimension_numbers = #tpu.dot_dimension_numbers<[1], [0], [0], [1], [0, 0, 1, 1], [], []>} : vector<256x4xbf16>, vector<4x32xbf16>, vector<256x32xf32> -> vector<256x32xf32>
    %c4 = arith.constant 4 : index
    %c0_12 = arith.constant 0 : index
    %26 = vector.load %arg15[%c4, %c0_12] : memref<264x32xf32, #tpu.memory_space<vmem>>, vector<256x32xf32>
    tpu.vector_store %arg15[%c4, %c0_12], %25 {strides = array<i32>} : memref<264x32xf32, #tpu.memory_space<vmem>>, vector<256x32xf32>,
    %c1_i32_13 = arith.constant 1 : i32
    %27 = vector.broadcast %c1_i32_13 : i32 to vector<256x1xi32>
    %28 = arith.cmpi sge, %19, %27 : vector<256x1xi32>
    %c3 = arith.constant 3 : index
    %c0_14 = arith.constant 0 : index
    %29 = vector.load %arg15[%c3, %c0_14] : memref<264x32xf32, #tpu.memory_space<vmem>>, vector<256x32xf32>
    %30 = vector.shape_cast %28 : vector<256x1xi1> to vector<256x1xi1>
    %31 = vector.broadcast %30 : vector<256x1xi1> to vector<256x32xi1>
    %32 = arith.select %31, %29, %25 : vector<256x32xi1>, vector<256x32xf32>
    %c62_i32 = arith.constant 62 : i32
    %33 = vector.broadcast %c62_i32 : i32 to vector<256x1xi32>
    %34 = arith.cmpi sle, %19, %33 : vector<256x1xi32>
    %c5 = arith.constant 5 : index
    %c0_15 = arith.constant 0 : index
    %35 = vector.load %arg15[%c5, %c0_15] : memref<264x32xf32, #tpu.memory_space<vmem>>, vector<256x32xf32>
    %36 = vector.shape_cast %34 : vector<256x1xi1> to vector<256x1xi1>
    %37 = vector.broadcast %36 : vector<256x1xi1> to vector<256x32xi1>
    %38 = arith.select %37, %35, %25 : vector<256x32xi1>, vector<256x32xf32>
    %39 = arith.maximumf %32, %25 : vector<256x32xf32>
    %40 = arith.maximumf %39, %38 : vector<256x32xf32>
    %41 = arith.truncf %40 : vector<256x32xf32> to vector<256x32xbf16>
    %c0_16 = arith.constant 0 : index
    %c288 = arith.constant 288 : index
    %c0_17 = arith.constant 0 : index
    %42 = vector.load %arg4[%c0_16, %c288, %c0_17] : memref<1x320x128xbf16, #tpu.memory_space<vmem>>, vector<1x32x128xbf16>
    %43 = vector.shape_cast %42 : vector<1x32x128xbf16> to vector<32x128xbf16>
    %cst_18 = arith.constant dense<0.000000e+00> : vector<256x128xf32>
    %44 = tpu.matmul %41, %43, %cst_18 {dimension_numbers = #tpu.dot_dimension_numbers<[1], [0], [0], [1], [0, 0, 1, 1], [], []>} : vector<256x32xbf16>, vector<32x128xbf16>, vector<256x128xf32> -> vector<256x128xf32>
    %c0_19 = arith.constant 0 : index
    %c0_20 = arith.constant 0 : index
    %45 = vector.load %arg15[%c0_19, %c0_20] : memref<264x32xf32, #tpu.memory_space<vmem>>, vector<256x32xf32>
    %c4_i32 = arith.constant 4 : i32
    %46 = vector.broadcast %c4_i32 : i32 to vector<256x1xi32>
    %47 = arith.cmpi sge, %19, %46 : vector<256x1xi32>
    %cst_21 = arith.constant 0.000000e+00 : f32
    %48 = vector.shape_cast %47 : vector<256x1xi1> to vector<256x1xi1>
    %49 = vector.broadcast %48 : vector<256x1xi1> to vector<256x32xi1>
    %50 = vector.broadcast %cst_21 : f32 to vector<256x32xf32>
    %51 = arith.select %49, %45, %50 : vector<256x32xi1>, vector<256x32xf32>
    %52 = arith.truncf %51 : vector<256x32xf32> to vector<256x32xbf16>
    %c0_22 = arith.constant 0 : index
    %c0_23 = arith.constant 0 : index
    %c0_24 = arith.constant 0 : index
    %53 = vector.load %arg4[%c0_22, %c0_23, %c0_24] : memref<1x320x128xbf16, #tpu.memory_space<vmem>>, vector<1x32x128xbf16>
    %54 = vector.shape_cast %53 : vector<1x32x128xbf16> to vector<32x128xbf16>
    %cst_25 = arith.constant dense<0.000000e+00> : vector<256x128xf32>
    %55 = tpu.matmul %52, %54, %cst_25 {dimension_numbers = #tpu.dot_dimension_numbers<[1], [0], [0], [1], [0, 0, 1, 1], [], []>} : vector<256x32xbf16>, vector<32x128xbf16>, vector<256x128xf32> -> vector<256x128xf32>
    %56 = arith.addf %44, %55 : vector<256x128xf32>
    %c1 = arith.constant 1 : index
    %c0_26 = arith.constant 0 : index
    %57 = vector.load %arg15[%c1, %c0_26] : memref<264x32xf32, #tpu.memory_space<vmem>>, vector<256x32xf32>
    %c3_i32 = arith.constant 3 : i32
    %58 = vector.broadcast %c3_i32 : i32 to vector<256x1xi32>
    %59 = arith.cmpi sge, %19, %58 : vector<256x1xi32>
    %cst_27 = arith.constant 0.000000e+00 : f32
    %60 = vector.shape_cast %59 : vector<256x1xi1> to vector<256x1xi1>
    %61 = vector.broadcast %60 : vector<256x1xi1> to vector<256x32xi1>
    %62 = vector.broadcast %cst_27 : f32 to vector<256x32xf32>
    %63 = arith.select %61, %57, %62 : vector<256x32xi1>, vector<256x32xf32>
    %64 = arith.truncf %63 : vector<256x32xf32> to vector<256x32xbf16>
    %c0_28 = arith.constant 0 : index
    %c32 = arith.constant 32 : index
    %c0_29 = arith.constant 0 : index
    %65 = vector.load %arg4[%c0_28, %c32, %c0_29] : memref<1x320x128xbf16, #tpu.memory_space<vmem>>, vector<1x32x128xbf16>
    %66 = vector.shape_cast %65 : vector<1x32x128xbf16> to vector<32x128xbf16>
    %cst_30 = arith.constant dense<0.000000e+00> : vector<256x128xf32>
    %67 = tpu.matmul %64, %66, %cst_30 {dimension_numbers = #tpu.dot_dimension_numbers<[1], [0], [0], [1], [0, 0, 1, 1], [], []>} : vector<256x32xbf16>, vector<32x128xbf16>, vector<256x128xf32> -> vector<256x128xf32>
    %68 = arith.addf %56, %67 : vector<256x128xf32>
    %c2 = arith.constant 2 : index
    %c0_31 = arith.constant 0 : index
    %69 = vector.load %arg15[%c2, %c0_31] : memref<264x32xf32, #tpu.memory_space<vmem>>, vector<256x32xf32>
    %c2_i32 = arith.constant 2 : i32
    %70 = vector.broadcast %c2_i32 : i32 to vector<256x1xi32>
    %71 = arith.cmpi sge, %19, %70 : vector<256x1xi32>
    %cst_32 = arith.constant 0.000000e+00 : f32
    %72 = vector.shape_cast %71 : vector<256x1xi1> to vector<256x1xi1>
    %73 = vector.broadcast %72 : vector<256x1xi1> to vector<256x32xi1>
    %74 = vector.broadcast %cst_32 : f32 to vector<256x32xf32>
    %75 = arith.select %73, %69, %74 : vector<256x32xi1>, vector<256x32xf32>
    %76 = arith.truncf %75 : vector<256x32xf32> to vector<256x32xbf16>
    %c0_33 = arith.constant 0 : index
    %c64 = arith.constant 64 : index
    %c0_34 = arith.constant 0 : index
    %77 = vector.load %arg4[%c0_33, %c64, %c0_34] : memref<1x320x128xbf16, #tpu.memory_space<vmem>>, vector<1x32x128xbf16>
    %78 = vector.shape_cast %77 : vector<1x32x128xbf16> to vector<32x128xbf16>
    %cst_35 = arith.constant dense<0.000000e+00> : vector<256x128xf32>
    %79 = tpu.matmul %76, %78, %cst_35 {dimension_numbers = #tpu.dot_dimension_numbers<[1], [0], [0], [1], [0, 0, 1, 1], [], []>} : vector<256x32xbf16>, vector<32x128xbf16>, vector<256x128xf32> -> vector<256x128xf32>
    %80 = arith.addf %68, %79 : vector<256x128xf32>
    %c3_36 = arith.constant 3 : index
    %c0_37 = arith.constant 0 : index
    %81 = vector.load %arg15[%c3_36, %c0_37] : memref<264x32xf32, #tpu.memory_space<vmem>>, vector<256x32xf32>
    %c1_i32_38 = arith.constant 1 : i32
    %82 = vector.broadcast %c1_i32_38 : i32 to vector<256x1xi32>
    %83 = arith.cmpi sge, %19, %82 : vector<256x1xi32>
    %cst_39 = arith.constant 0.000000e+00 : f32
    %84 = vector.shape_cast %83 : vector<256x1xi1> to vector<256x1xi1>
    %85 = vector.broadcast %84 : vector<256x1xi1> to vector<256x32xi1>
    %86 = vector.broadcast %cst_39 : f32 to vector<256x32xf32>
    %87 = arith.select %85, %81, %86 : vector<256x32xi1>, vector<256x32xf32>
    %88 = arith.truncf %87 : vector<256x32xf32> to vector<256x32xbf16>
    %c0_40 = arith.constant 0 : index
    %c96 = arith.constant 96 : index
    %c0_41 = arith.constant 0 : index
    %89 = vector.load %arg4[%c0_40, %c96, %c0_41] : memref<1x320x128xbf16, #tpu.memory_space<vmem>>, vector<1x32x128xbf16>
    %90 = vector.shape_cast %89 : vector<1x32x128xbf16> to vector<32x128xbf16>
    %cst_42 = arith.constant dense<0.000000e+00> : vector<256x128xf32>
    %91 = tpu.matmul %88, %90, %cst_42 {dimension_numbers = #tpu.dot_dimension_numbers<[1], [0], [0], [1], [0, 0, 1, 1], [], []>} : vector<256x32xbf16>, vector<32x128xbf16>, vector<256x128xf32> -> vector<256x128xf32>
    %92 = arith.addf %80, %91 : vector<256x128xf32>
    %c4_43 = arith.constant 4 : index
    %c0_44 = arith.constant 0 : index
    %93 = vector.load %arg15[%c4_43, %c0_44] : memref<264x32xf32, #tpu.memory_space<vmem>>, vector<256x32xf32>
    %94 = arith.truncf %93 : vector<256x32xf32> to vector<256x32xbf16>
    %c0_45 = arith.constant 0 : index
    %c128 = arith.constant 128 : index
    %c0_46 = arith.constant 0 : index
    %95 = vector.load %arg4[%c0_45, %c128, %c0_46] : memref<1x320x128xbf16, #tpu.memory_space<vmem>>, vector<1x32x128xbf16>
    %96 = vector.shape_cast %95 : vector<1x32x128xbf16> to vector<32x128xbf16>
    %cst_47 = arith.constant dense<0.000000e+00> : vector<256x128xf32>
    %97 = tpu.matmul %94, %96, %cst_47 {dimension_numbers = #tpu.dot_dimension_numbers<[1], [0], [0], [1], [0, 0, 1, 1], [], []>} : vector<256x32xbf16>, vector<32x128xbf16>, vector<256x128xf32> -> vector<256x128xf32>
    %98 = arith.addf %92, %97 : vector<256x128xf32>
    %c5_48 = arith.constant 5 : index
    %c0_49 = arith.constant 0 : index
    %99 = vector.load %arg15[%c5_48, %c0_49] : memref<264x32xf32, #tpu.memory_space<vmem>>, vector<256x32xf32>
    %c63_i32 = arith.constant 63 : i32
    %100 = vector.broadcast %c63_i32 : i32 to vector<256x1xi32>
    %101 = arith.cmpi slt, %19, %100 : vector<256x1xi32>
    %cst_50 = arith.constant 0.000000e+00 : f32
    %102 = vector.shape_cast %101 : vector<256x1xi1> to vector<256x1xi1>
    %103 = vector.broadcast %102 : vector<256x1xi1> to vector<256x32xi1>
    %104 = vector.broadcast %cst_50 : f32 to vector<256x32xf32>
    %105 = arith.select %103, %99, %104 : vector<256x32xi1>, vector<256x32xf32>
    %106 = arith.truncf %105 : vector<256x32xf32> to vector<256x32xbf16>
    %c0_51 = arith.constant 0 : index
    %c160 = arith.constant 160 : index
    %c0_52 = arith.constant 0 : index
    %107 = vector.load %arg4[%c0_51, %c160, %c0_52] : memref<1x320x128xbf16, #tpu.memory_space<vmem>>, vector<1x32x128xbf16>
    %108 = vector.shape_cast %107 : vector<1x32x128xbf16> to vector<32x128xbf16>
    %cst_53 = arith.constant dense<0.000000e+00> : vector<256x128xf32>
    %109 = tpu.matmul %106, %108, %cst_53 {dimension_numbers = #tpu.dot_dimension_numbers<[1], [0], [0], [1], [0, 0, 1, 1], [], []>} : vector<256x32xbf16>, vector<32x128xbf16>, vector<256x128xf32> -> vector<256x128xf32>
    %110 = arith.addf %98, %109 : vector<256x128xf32>
    %c6 = arith.constant 6 : index
    %c0_54 = arith.constant 0 : index
    %111 = vector.load %arg15[%c6, %c0_54] : memref<264x32xf32, #tpu.memory_space<vmem>>, vector<256x32xf32>
    %c62_i32_55 = arith.constant 62 : i32
    %112 = vector.broadcast %c62_i32_55 : i32 to vector<256x1xi32>
    %113 = arith.cmpi slt, %19, %112 : vector<256x1xi32>
    %cst_56 = arith.constant 0.000000e+00 : f32
    %114 = vector.shape_cast %113 : vector<256x1xi1> to vector<256x1xi1>
    %115 = vector.broadcast %114 : vector<256x1xi1> to vector<256x32xi1>
    %116 = vector.broadcast %cst_56 : f32 to vector<256x32xf32>
    %117 = arith.select %115, %111, %116 : vector<256x32xi1>, vector<256x32xf32>
    %118 = arith.truncf %117 : vector<256x32xf32> to vector<256x32xbf16>
    %c0_57 = arith.constant 0 : index
    %c192 = arith.constant 192 : index
    %c0_58 = arith.constant 0 : index
    %119 = vector.load %arg4[%c0_57, %c192, %c0_58] : memref<1x320x128xbf16, #tpu.memory_space<vmem>>, vector<1x32x128xbf16>
    %120 = vector.shape_cast %119 : vector<1x32x128xbf16> to vector<32x128xbf16>
    %cst_59 = arith.constant dense<0.000000e+00> : vector<256x128xf32>
    %121 = tpu.matmul %118, %120, %cst_59 {dimension_numbers = #tpu.dot_dimension_numbers<[1], [0], [0], [1], [0, 0, 1, 1], [], []>} : vector<256x32xbf16>, vector<32x128xbf16>, vector<256x128xf32> -> vector<256x128xf32>
    %122 = arith.addf %110, %121 : vector<256x128xf32>
    %c7 = arith.constant 7 : index
    %c0_60 = arith.constant 0 : index
    %123 = vector.load %arg15[%c7, %c0_60] : memref<264x32xf32, #tpu.memory_space<vmem>>, vector<256x32xf32>
    %c61_i32 = arith.constant 61 : i32
    %124 = vector.broadcast %c61_i32 : i32 to vector<256x1xi32>
    %125 = arith.cmpi slt, %19, %124 : vector<256x1xi32>
    %cst_61 = arith.constant 0.000000e+00 : f32
    %126 = vector.shape_cast %125 : vector<256x1xi1> to vector<256x1xi1>
    %127 = vector.broadcast %126 : vector<256x1xi1> to vector<256x32xi1>
    %128 = vector.broadcast %cst_61 : f32 to vector<256x32xf32>
    %129 = arith.select %127, %123, %128 : vector<256x32xi1>, vector<256x32xf32>
    %130 = arith.truncf %129 : vector<256x32xf32> to vector<256x32xbf16>
    %c0_62 = arith.constant 0 : index
    %c224 = arith.constant 224 : index
    %c0_63 = arith.constant 0 : index
    %131 = vector.load %arg4[%c0_62, %c224, %c0_63] : memref<1x320x128xbf16, #tpu.memory_space<vmem>>, vector<1x32x128xbf16>
    %132 = vector.shape_cast %131 : vector<1x32x128xbf16> to vector<32x128xbf16>
    %cst_64 = arith.constant dense<0.000000e+00> : vector<256x128xf32>
    %133 = tpu.matmul %130, %132, %cst_64 {dimension_numbers = #tpu.dot_dimension_numbers<[1], [0], [0], [1], [0, 0, 1, 1], [], []>} : vector<256x32xbf16>, vector<32x128xbf16>, vector<256x128xf32> -> vector<256x128xf32>
    %134 = arith.addf %122, %133 : vector<256x128xf32>
    %c8 = arith.constant 8 : index
    %c0_65 = arith.constant 0 : index
    %135 = vector.load %arg15[%c8, %c0_65] : memref<264x32xf32, #tpu.memory_space<vmem>>, vector<256x32xf32>
    %c60_i32 = arith.constant 60 : i32
    %136 = vector.broadcast %c60_i32 : i32 to vector<256x1xi32>
    %137 = arith.cmpi slt, %19, %136 : vector<256x1xi32>
    %cst_66 = arith.constant 0.000000e+00 : f32
    %138 = vector.shape_cast %137 : vector<256x1xi1> to vector<256x1xi1>
    %139 = vector.broadcast %138 : vector<256x1xi1> to vector<256x32xi1>
    %140 = vector.broadcast %cst_66 : f32 to vector<256x32xf32>
    %141 = arith.select %139, %135, %140 : vector<256x32xi1>, vector<256x32xf32>
    %142 = arith.truncf %141 : vector<256x32xf32> to vector<256x32xbf16>
    %c0_67 = arith.constant 0 : index
    %c256 = arith.constant 256 : index
    %c0_68 = arith.constant 0 : index
    %143 = vector.load %arg4[%c0_67, %c256, %c0_68] : memref<1x320x128xbf16, #tpu.memory_space<vmem>>, vector<1x32x128xbf16>
    %144 = vector.shape_cast %143 : vector<1x32x128xbf16> to vector<32x128xbf16>
    %cst_69 = arith.constant dense<0.000000e+00> : vector<256x128xf32>
    %145 = tpu.matmul %142, %144, %cst_69 {dimension_numbers = #tpu.dot_dimension_numbers<[1], [0], [0], [1], [0, 0, 1, 1], [], []>} : vector<256x32xbf16>, vector<32x128xbf16>, vector<256x128xf32> -> vector<256x128xf32>
    %146 = arith.addf %134, %145 : vector<256x128xf32>
    %c0_70 = arith.constant 0 : index
    %c0_71 = arith.constant 0 : index
    %c0_72 = arith.constant 0 : index
    %147 = vector.load %arg5[%c0_70, %c0_71, %c0_72] : memref<1x1x128xf32, #tpu.memory_space<vmem>>, vector<1x1x128xf32>
    %148 = vector.shape_cast %147 : vector<1x1x128xf32> to vector<1x128xf32>
    %149 = vector.broadcast %148 : vector<1x128xf32> to vector<256x128xf32>
    %150 = arith.addf %146, %149 : vector<256x128xf32>
    %cst_73 = arith.constant 0.000000e+00 : f32
    %151 = vector.broadcast %cst_73 : f32 to vector<256x128xf32>
    %152 = arith.maximumf %150, %151 : vector<256x128xf32>
    %153 = arith.truncf %152 : vector<256x128xf32> to vector<256x128xbf16>
    %c0_74 = arith.constant 0 : index
    %c0_75 = arith.constant 0 : index
    %c0_76 = arith.constant 0 : index
    %154 = vector.load %arg6[%c0_74, %c0_75, %c0_76] : memref<1x128x32xbf16, #tpu.memory_space<vmem>>, vector<1x128x32xbf16>
    %155 = vector.shape_cast %154 : vector<1x128x32xbf16> to vector<128x32xbf16>
    %cst_77 = arith.constant dense<0.000000e+00> : vector<256x32xf32>
    %156 = tpu.matmul %153, %155, %cst_77 {dimension_numbers = #tpu.dot_dimension_numbers<[1], [0], [0], [1], [0, 0, 1, 1], [], []>} : vector<256x128xbf16>, vector<128x32xbf16>, vector<256x32xf32> -> vector<256x32xf32>
    %c4_78 = arith.constant 4 : index
    %c0_79 = arith.constant 0 : index
    %157 = vector.load %arg15[%c4_78, %c0_79] : memref<264x32xf32, #tpu.memory_space<vmem>>, vector<256x32xf32>
    tpu.vector_store %arg15[%c4_78, %c0_79], %156 {strides = array<i32>} : memref<264x32xf32, #tpu.memory_space<vmem>>, vector<256x32xf32>,
    %c1_i32_80 = arith.constant 1 : i32
    %158 = vector.broadcast %c1_i32_80 : i32 to vector<256x1xi32>
    %159 = arith.cmpi sge, %19, %158 : vector<256x1xi32>
    %c3_81 = arith.constant 3 : index
    %c0_82 = arith.constant 0 : index
    %160 = vector.load %arg15[%c3_81, %c0_82] : memref<264x32xf32, #tpu.memory_space<vmem>>, vector<256x32xf32>
    %161 = vector.shape_cast %159 : vector<256x1xi1> to vector<256x1xi1>
    %162 = vector.broadcast %161 : vector<256x1xi1> to vector<256x32xi1>
    %163 = arith.select %162, %160, %156 : vector<256x32xi1>, vector<256x32xf32>
    %c62_i32_83 = arith.constant 62 : i32
    %164 = vector.broadcast %c62_i32_83 : i32 to vector<256x1xi32>
    %165 = arith.cmpi sle, %19, %164 : vector<256x1xi32>
    %c5_84 = arith.constant 5 : index
    %c0_85 = arith.constant 0 : index
    %166 = vector.load %arg15[%c5_84, %c0_85] : memref<264x32xf32, #tpu.memory_space<vmem>>, vector<256x32xf32>
    %167 = vector.shape_cast %165 : vector<256x1xi1> to vector<256x1xi1>
    %168 = vector.broadcast %167 : vector<256x1xi1> to vector<256x32xi1>
    %169 = arith.select %168, %166, %156 : vector<256x32xi1>, vector<256x32xf32>
    %170 = arith.maximumf %163, %156 : vector<256x32xf32>
    %171 = arith.maximumf %170, %169 : vector<256x32xf32>
    %172 = arith.truncf %171 : vector<256x32xf32> to vector<256x32xbf16>
    %c0_86 = arith.constant 0 : index
    %c288_87 = arith.constant 288 : index
    %c0_88 = arith.constant 0 : index
    %173 = vector.load %arg7[%c0_86, %c288_87, %c0_88] : memref<1x320x128xbf16, #tpu.memory_space<vmem>>, vector<1x32x128xbf16>
    %174 = vector.shape_cast %173 : vector<1x32x128xbf16> to vector<32x128xbf16>
    %cst_89 = arith.constant dense<0.000000e+00> : vector<256x128xf32>
    %175 = tpu.matmul %172, %174, %cst_89 {dimension_numbers = #tpu.dot_dimension_numbers<[1], [0], [0], [1], [0, 0, 1, 1], [], []>} : vector<256x32xbf16>, vector<32x128xbf16>, vector<256x128xf32> -> vector<256x128xf32>
    %c0_90 = arith.constant 0 : index
    %c0_91 = arith.constant 0 : index
    %176 = vector.load %arg15[%c0_90, %c0_91] : memref<264x32xf32, #tpu.memory_space<vmem>>, vector<256x32xf32>
    %c4_i32_92 = arith.constant 4 : i32
    %177 = vector.broadcast %c4_i32_92 : i32 to vector<256x1xi32>
    %178 = arith.cmpi sge, %19, %177 : vector<256x1xi32>
    %cst_93 = arith.constant 0.000000e+00 : f32
    %179 = vector.shape_cast %178 : vector<256x1xi1> to vector<256x1xi1>
    %180 = vector.broadcast %179 : vector<256x1xi1> to vector<256x32xi1>
    %181 = vector.broadcast %cst_93 : f32 to vector<256x32xf32>
    %182 = arith.select %180, %176, %181 : vector<256x32xi1>, vector<256x32xf32>
    %183 = arith.truncf %182 : vector<256x32xf32> to vector<256x32xbf16>
    %c0_94 = arith.constant 0 : index
    %c0_95 = arith.constant 0 : index
    %c0_96 = arith.constant 0 : index
    %184 = vector.load %arg7[%c0_94, %c0_95, %c0_96] : memref<1x320x128xbf16, #tpu.memory_space<vmem>>, vector<1x32x128xbf16>
    %185 = vector.shape_cast %184 : vector<1x32x128xbf16> to vector<32x128xbf16>
    %cst_97 = arith.constant dense<0.000000e+00> : vector<256x128xf32>
    %186 = tpu.matmul %183, %185, %cst_97 {dimension_numbers = #tpu.dot_dimension_numbers<[1], [0], [0], [1], [0, 0, 1, 1], [], []>} : vector<256x32xbf16>, vector<32x128xbf16>, vector<256x128xf32> -> vector<256x128xf32>
    %187 = arith.addf %175, %186 : vector<256x128xf32>
    %c1_98 = arith.constant 1 : index
    %c0_99 = arith.constant 0 : index
    %188 = vector.load %arg15[%c1_98, %c0_99] : memref<264x32xf32, #tpu.memory_space<vmem>>, vector<256x32xf32>
    %c3_i32_100 = arith.constant 3 : i32
    %189 = vector.broadcast %c3_i32_100 : i32 to vector<256x1xi32>
    %190 = arith.cmpi sge, %19, %189 : vector<256x1xi32>
    %cst_101 = arith.constant 0.000000e+00 : f32
    %191 = vector.shape_cast %190 : vector<256x1xi1> to vector<256x1xi1>
    %192 = vector.broadcast %191 : vector<256x1xi1> to vector<256x32xi1>
    %193 = vector.broadcast %cst_101 : f32 to vector<256x32xf32>
    %194 = arith.select %192, %188, %193 : vector<256x32xi1>, vector<256x32xf32>
    %195 = arith.truncf %194 : vector<256x32xf32> to vector<256x32xbf16>
    %c0_102 = arith.constant 0 : index
    %c32_103 = arith.constant 32 : index
    %c0_104 = arith.constant 0 : index
    %196 = vector.load %arg7[%c0_102, %c32_103, %c0_104] : memref<1x320x128xbf16, #tpu.memory_space<vmem>>, vector<1x32x128xbf16>
    %197 = vector.shape_cast %196 : vector<1x32x128xbf16> to vector<32x128xbf16>
    %cst_105 = arith.constant dense<0.000000e+00> : vector<256x128xf32>
    %198 = tpu.matmul %195, %197, %cst_105 {dimension_numbers = #tpu.dot_dimension_numbers<[1], [0], [0], [1], [0, 0, 1, 1], [], []>} : vector<256x32xbf16>, vector<32x128xbf16>, vector<256x128xf32> -> vector<256x128xf32>
    %199 = arith.addf %187, %198 : vector<256x128xf32>
    %c2_106 = arith.constant 2 : index
    %c0_107 = arith.constant 0 : index
    %200 = vector.load %arg15[%c2_106, %c0_107] : memref<264x32xf32, #tpu.memory_space<vmem>>, vector<256x32xf32>
    %c2_i32_108 = arith.constant 2 : i32
    %201 = vector.broadcast %c2_i32_108 : i32 to vector<256x1xi32>
    %202 = arith.cmpi sge, %19, %201 : vector<256x1xi32>
    %cst_109 = arith.constant 0.000000e+00 : f32
    %203 = vector.shape_cast %202 : vector<256x1xi1> to vector<256x1xi1>
    %204 = vector.broadcast %203 : vector<256x1xi1> to vector<256x32xi1>
    %205 = vector.broadcast %cst_109 : f32 to vector<256x32xf32>
    %206 = arith.select %204, %200, %205 : vector<256x32xi1>, vector<256x32xf32>
    %207 = arith.truncf %206 : vector<256x32xf32> to vector<256x32xbf16>
    %c0_110 = arith.constant 0 : index
    %c64_111 = arith.constant 64 : index
    %c0_112 = arith.constant 0 : index
    %208 = vector.load %arg7[%c0_110, %c64_111, %c0_112] : memref<1x320x128xbf16, #tpu.memory_space<vmem>>, vector<1x32x128xbf16>
    %209 = vector.shape_cast %208 : vector<1x32x128xbf16> to vector<32x128xbf16>
    %cst_113 = arith.constant dense<0.000000e+00> : vector<256x128xf32>
    %210 = tpu.matmul %207, %209, %cst_113 {dimension_numbers = #tpu.dot_dimension_numbers<[1], [0], [0], [1], [0, 0, 1, 1], [], []>} : vector<256x32xbf16>, vector<32x128xbf16>, vector<256x128xf32> -> vector<256x128xf32>
    %211 = arith.addf %199, %210 : vector<256x128xf32>
    %c3_114 = arith.constant 3 : index
    %c0_115 = arith.constant 0 : index
    %212 = vector.load %arg15[%c3_114, %c0_115] : memref<264x32xf32, #tpu.memory_space<vmem>>, vector<256x32xf32>
    %c1_i32_116 = arith.constant 1 : i32
    %213 = vector.broadcast %c1_i32_116 : i32 to vector<256x1xi32>
    %214 = arith.cmpi sge, %19, %213 : vector<256x1xi32>
    %cst_117 = arith.constant 0.000000e+00 : f32
    %215 = vector.shape_cast %214 : vector<256x1xi1> to vector<256x1xi1>
    %216 = vector.broadcast %215 : vector<256x1xi1> to vector<256x32xi1>
    %217 = vector.broadcast %cst_117 : f32 to vector<256x32xf32>
    %218 = arith.select %216, %212, %217 : vector<256x32xi1>, vector<256x32xf32>
    %219 = arith.truncf %218 : vector<256x32xf32> to vector<256x32xbf16>
    %c0_118 = arith.constant 0 : index
    %c96_119 = arith.constant 96 : index
    %c0_120 = arith.constant 0 : index
    %220 = vector.load %arg7[%c0_118, %c96_119, %c0_120] : memref<1x320x128xbf16, #tpu.memory_space<vmem>>, vector<1x32x128xbf16>
    %221 = vector.shape_cast %220 : vector<1x32x128xbf16> to vector<32x128xbf16>
    %cst_121 = arith.constant dense<0.000000e+00> : vector<256x128xf32>
    %222 = tpu.matmul %219, %221, %cst_121 {dimension_numbers = #tpu.dot_dimension_numbers<[1], [0], [0], [1], [0, 0, 1, 1], [], []>} : vector<256x32xbf16>, vector<32x128xbf16>, vector<256x128xf32> -> vector<256x128xf32>
    %223 = arith.addf %211, %222 : vector<256x128xf32>
    %c4_122 = arith.constant 4 : index
    %c0_123 = arith.constant 0 : index
    %224 = vector.load %arg15[%c4_122, %c0_123] : memref<264x32xf32, #tpu.memory_space<vmem>>, vector<256x32xf32>
    %225 = arith.truncf %224 : vector<256x32xf32> to vector<256x32xbf16>
    %c0_124 = arith.constant 0 : index
    %c128_125 = arith.constant 128 : index
    %c0_126 = arith.constant 0 : index
    %226 = vector.load %arg7[%c0_124, %c128_125, %c0_126] : memref<1x320x128xbf16, #tpu.memory_space<vmem>>, vector<1x32x128xbf16>
    %227 = vector.shape_cast %226 : vector<1x32x128xbf16> to vector<32x128xbf16>
    %cst_127 = arith.constant dense<0.000000e+00> : vector<256x128xf32>
    %228 = tpu.matmul %225, %227, %cst_127 {dimension_numbers = #tpu.dot_dimension_numbers<[1], [0], [0], [1], [0, 0, 1, 1], [], []>} : vector<256x32xbf16>, vector<32x128xbf16>, vector<256x128xf32> -> vector<256x128xf32>
    %229 = arith.addf %223, %228 : vector<256x128xf32>
    %c5_128 = arith.constant 5 : index
    %c0_129 = arith.constant 0 : index
    %230 = vector.load %arg15[%c5_128, %c0_129] : memref<264x32xf32, #tpu.memory_space<vmem>>, vector<256x32xf32>
    %c63_i32_130 = arith.constant 63 : i32
    %231 = vector.broadcast %c63_i32_130 : i32 to vector<256x1xi32>
    %232 = arith.cmpi slt, %19, %231 : vector<256x1xi32>
    %cst_131 = arith.constant 0.000000e+00 : f32
    %233 = vector.shape_cast %232 : vector<256x1xi1> to vector<256x1xi1>
    %234 = vector.broadcast %233 : vector<256x1xi1> to vector<256x32xi1>
    %235 = vector.broadcast %cst_131 : f32 to vector<256x32xf32>
    %236 = arith.select %234, %230, %235 : vector<256x32xi1>, vector<256x32xf32>
    %237 = arith.truncf %236 : vector<256x32xf32> to vector<256x32xbf16>
    %c0_132 = arith.constant 0 : index
    %c160_133 = arith.constant 160 : index
    %c0_134 = arith.constant 0 : index
    %238 = vector.load %arg7[%c0_132, %c160_133, %c0_134] : memref<1x320x128xbf16, #tpu.memory_space<vmem>>, vector<1x32x128xbf16>
    %239 = vector.shape_cast %238 : vector<1x32x128xbf16> to vector<32x128xbf16>
    %cst_135 = arith.constant dense<0.000000e+00> : vector<256x128xf32>
    %240 = tpu.matmul %237, %239, %cst_135 {dimension_numbers = #tpu.dot_dimension_numbers<[1], [0], [0], [1], [0, 0, 1, 1], [], []>} : vector<256x32xbf16>, vector<32x128xbf16>, vector<256x128xf32> -> vector<256x128xf32>
    %241 = arith.addf %229, %240 : vector<256x128xf32>
    %c6_136 = arith.constant 6 : index
    %c0_137 = arith.constant 0 : index
    %242 = vector.load %arg15[%c6_136, %c0_137] : memref<264x32xf32, #tpu.memory_space<vmem>>, vector<256x32xf32>
    %c62_i32_138 = arith.constant 62 : i32
    %243 = vector.broadcast %c62_i32_138 : i32 to vector<256x1xi32>
    %244 = arith.cmpi slt, %19, %243 : vector<256x1xi32>
    %cst_139 = arith.constant 0.000000e+00 : f32
    %245 = vector.shape_cast %244 : vector<256x1xi1> to vector<256x1xi1>
    %246 = vector.broadcast %245 : vector<256x1xi1> to vector<256x32xi1>
    %247 = vector.broadcast %cst_139 : f32 to vector<256x32xf32>
    %248 = arith.select %246, %242, %247 : vector<256x32xi1>, vector<256x32xf32>
    %249 = arith.truncf %248 : vector<256x32xf32> to vector<256x32xbf16>
    %c0_140 = arith.constant 0 : index
    %c192_141 = arith.constant 192 : index
    %c0_142 = arith.constant 0 : index
    %250 = vector.load %arg7[%c0_140, %c192_141, %c0_142] : memref<1x320x128xbf16, #tpu.memory_space<vmem>>, vector<1x32x128xbf16>
    %251 = vector.shape_cast %250 : vector<1x32x128xbf16> to vector<32x128xbf16>
    %cst_143 = arith.constant dense<0.000000e+00> : vector<256x128xf32>
    %252 = tpu.matmul %249, %251, %cst_143 {dimension_numbers = #tpu.dot_dimension_numbers<[1], [0], [0], [1], [0, 0, 1, 1], [], []>} : vector<256x32xbf16>, vector<32x128xbf16>, vector<256x128xf32> -> vector<256x128xf32>
    %253 = arith.addf %241, %252 : vector<256x128xf32>
    %c7_144 = arith.constant 7 : index
    %c0_145 = arith.constant 0 : index
    %254 = vector.load %arg15[%c7_144, %c0_145] : memref<264x32xf32, #tpu.memory_space<vmem>>, vector<256x32xf32>
    %c61_i32_146 = arith.constant 61 : i32
    %255 = vector.broadcast %c61_i32_146 : i32 to vector<256x1xi32>
    %256 = arith.cmpi slt, %19, %255 : vector<256x1xi32>
    %cst_147 = arith.constant 0.000000e+00 : f32
    %257 = vector.shape_cast %256 : vector<256x1xi1> to vector<256x1xi1>
    %258 = vector.broadcast %257 : vector<256x1xi1> to vector<256x32xi1>
    %259 = vector.broadcast %cst_147 : f32 to vector<256x32xf32>
    %260 = arith.select %258, %254, %259 : vector<256x32xi1>, vector<256x32xf32>
    %261 = arith.truncf %260 : vector<256x32xf32> to vector<256x32xbf16>
    %c0_148 = arith.constant 0 : index
    %c224_149 = arith.constant 224 : index
    %c0_150 = arith.constant 0 : index
    %262 = vector.load %arg7[%c0_148, %c224_149, %c0_150] : memref<1x320x128xbf16, #tpu.memory_space<vmem>>, vector<1x32x128xbf16>
    %263 = vector.shape_cast %262 : vector<1x32x128xbf16> to vector<32x128xbf16>
    %cst_151 = arith.constant dense<0.000000e+00> : vector<256x128xf32>
    %264 = tpu.matmul %261, %263, %cst_151 {dimension_numbers = #tpu.dot_dimension_numbers<[1], [0], [0], [1], [0, 0, 1, 1], [], []>} : vector<256x32xbf16>, vector<32x128xbf16>, vector<256x128xf32> -> vector<256x128xf32>
    %265 = arith.addf %253, %264 : vector<256x128xf32>
    %c8_152 = arith.constant 8 : index
    %c0_153 = arith.constant 0 : index
    %266 = vector.load %arg15[%c8_152, %c0_153] : memref<264x32xf32, #tpu.memory_space<vmem>>, vector<256x32xf32>
    %c60_i32_154 = arith.constant 60 : i32
    %267 = vector.broadcast %c60_i32_154 : i32 to vector<256x1xi32>
    %268 = arith.cmpi slt, %19, %267 : vector<256x1xi32>
    %cst_155 = arith.constant 0.000000e+00 : f32
    %269 = vector.shape_cast %268 : vector<256x1xi1> to vector<256x1xi1>
    %270 = vector.broadcast %269 : vector<256x1xi1> to vector<256x32xi1>
    %271 = vector.broadcast %cst_155 : f32 to vector<256x32xf32>
    %272 = arith.select %270, %266, %271 : vector<256x32xi1>, vector<256x32xf32>
    %273 = arith.truncf %272 : vector<256x32xf32> to vector<256x32xbf16>
    %c0_156 = arith.constant 0 : index
    %c256_157 = arith.constant 256 : index
    %c0_158 = arith.constant 0 : index
    %274 = vector.load %arg7[%c0_156, %c256_157, %c0_158] : memref<1x320x128xbf16, #tpu.memory_space<vmem>>, vector<1x32x128xbf16>
    %275 = vector.shape_cast %274 : vector<1x32x128xbf16> to vector<32x128xbf16>
    %cst_159 = arith.constant dense<0.000000e+00> : vector<256x128xf32>
    %276 = tpu.matmul %273, %275, %cst_159 {dimension_numbers = #tpu.dot_dimension_numbers<[1], [0], [0], [1], [0, 0, 1, 1], [], []>} : vector<256x32xbf16>, vector<32x128xbf16>, vector<256x128xf32> -> vector<256x128xf32>
    %277 = arith.addf %265, %276 : vector<256x128xf32>
    %c0_160 = arith.constant 0 : index
    %c0_161 = arith.constant 0 : index
    %c0_162 = arith.constant 0 : index
    %278 = vector.load %arg8[%c0_160, %c0_161, %c0_162] : memref<1x1x128xf32, #tpu.memory_space<vmem>>, vector<1x1x128xf32>
    %279 = vector.shape_cast %278 : vector<1x1x128xf32> to vector<1x128xf32>
    %280 = vector.broadcast %279 : vector<1x128xf32> to vector<256x128xf32>
    %281 = arith.addf %277, %280 : vector<256x128xf32>
    %cst_163 = arith.constant 0.000000e+00 : f32
    %282 = vector.broadcast %cst_163 : f32 to vector<256x128xf32>
    %283 = arith.maximumf %281, %282 : vector<256x128xf32>
    %284 = arith.truncf %283 : vector<256x128xf32> to vector<256x128xbf16>
    %c0_164 = arith.constant 0 : index
    %c0_165 = arith.constant 0 : index
    %c0_166 = arith.constant 0 : index
    %285 = vector.load %arg9[%c0_164, %c0_165, %c0_166] : memref<1x128x32xbf16, #tpu.memory_space<vmem>>, vector<1x128x32xbf16>
    %286 = vector.shape_cast %285 : vector<1x128x32xbf16> to vector<128x32xbf16>
    %cst_167 = arith.constant dense<0.000000e+00> : vector<256x32xf32>
    %287 = tpu.matmul %284, %286, %cst_167 {dimension_numbers = #tpu.dot_dimension_numbers<[1], [0], [0], [1], [0, 0, 1, 1], [], []>} : vector<256x128xbf16>, vector<128x32xbf16>, vector<256x32xf32> -> vector<256x32xf32>
    %c4_168 = arith.constant 4 : index
    %c0_169 = arith.constant 0 : index
    %288 = vector.load %arg15[%c4_168, %c0_169] : memref<264x32xf32, #tpu.memory_space<vmem>>, vector<256x32xf32>
    tpu.vector_store %arg15[%c4_168, %c0_169], %287 {strides = array<i32>} : memref<264x32xf32, #tpu.memory_space<vmem>>, vector<256x32xf32>,
    %c1_i32_170 = arith.constant 1 : i32
    %289 = vector.broadcast %c1_i32_170 : i32 to vector<256x1xi32>
    %290 = arith.cmpi sge, %19, %289 : vector<256x1xi32>
    %c3_171 = arith.constant 3 : index
    %c0_172 = arith.constant 0 : index
    %291 = vector.load %arg15[%c3_171, %c0_172] : memref<264x32xf32, #tpu.memory_space<vmem>>, vector<256x32xf32>
    %292 = vector.shape_cast %290 : vector<256x1xi1> to vector<256x1xi1>
    %293 = vector.broadcast %292 : vector<256x1xi1> to vector<256x32xi1>
    %294 = arith.select %293, %291, %287 : vector<256x32xi1>, vector<256x32xf32>
    %c62_i32_173 = arith.constant 62 : i32
    %295 = vector.broadcast %c62_i32_173 : i32 to vector<256x1xi32>
    %296 = arith.cmpi sle, %19, %295 : vector<256x1xi32>
    %c5_174 = arith.constant 5 : index
    %c0_175 = arith.constant 0 : index
    %297 = vector.load %arg15[%c5_174, %c0_175] : memref<264x32xf32, #tpu.memory_space<vmem>>, vector<256x32xf32>
    %298 = vector.shape_cast %296 : vector<256x1xi1> to vector<256x1xi1>
    %299 = vector.broadcast %298 : vector<256x1xi1> to vector<256x32xi1>
    %300 = arith.select %299, %297, %287 : vector<256x32xi1>, vector<256x32xf32>
    %301 = arith.maximumf %294, %287 : vector<256x32xf32>
    %302 = arith.maximumf %301, %300 : vector<256x32xf32>
    %303 = arith.truncf %302 : vector<256x32xf32> to vector<256x32xbf16>
    %c0_176 = arith.constant 0 : index
    %c288_177 = arith.constant 288 : index
    %c0_178 = arith.constant 0 : index
    %304 = vector.load %arg10[%c0_176, %c288_177, %c0_178] : memref<1x320x128xbf16, #tpu.memory_space<vmem>>, vector<1x32x128xbf16>
    %305 = vector.shape_cast %304 : vector<1x32x128xbf16> to vector<32x128xbf16>
    %cst_179 = arith.constant dense<0.000000e+00> : vector<256x128xf32>
    %306 = tpu.matmul %303, %305, %cst_179 {dimension_numbers = #tpu.dot_dimension_numbers<[1], [0], [0], [1], [0, 0, 1, 1], [], []>} : vector<256x32xbf16>, vector<32x128xbf16>, vector<256x128xf32> -> vector<256x128xf32>
    %c0_180 = arith.constant 0 : index
    %c0_181 = arith.constant 0 : index
    %307 = vector.load %arg15[%c0_180, %c0_181] : memref<264x32xf32, #tpu.memory_space<vmem>>, vector<256x32xf32>
    %c4_i32_182 = arith.constant 4 : i32
    %308 = vector.broadcast %c4_i32_182 : i32 to vector<256x1xi32>
    %309 = arith.cmpi sge, %19, %308 : vector<256x1xi32>
    %cst_183 = arith.constant 0.000000e+00 : f32
    %310 = vector.shape_cast %309 : vector<256x1xi1> to vector<256x1xi1>
    %311 = vector.broadcast %310 : vector<256x1xi1> to vector<256x32xi1>
    %312 = vector.broadcast %cst_183 : f32 to vector<256x32xf32>
    %313 = arith.select %311, %307, %312 : vector<256x32xi1>, vector<256x32xf32>
    %314 = arith.truncf %313 : vector<256x32xf32> to vector<256x32xbf16>
    %c0_184 = arith.constant 0 : index
    %c0_185 = arith.constant 0 : index
    %c0_186 = arith.constant 0 : index
    %315 = vector.load %arg10[%c0_184, %c0_185, %c0_186] : memref<1x320x128xbf16, #tpu.memory_space<vmem>>, vector<1x32x128xbf16>
    %316 = vector.shape_cast %315 : vector<1x32x128xbf16> to vector<32x128xbf16>
    %cst_187 = arith.constant dense<0.000000e+00> : vector<256x128xf32>
    %317 = tpu.matmul %314, %316, %cst_187 {dimension_numbers = #tpu.dot_dimension_numbers<[1], [0], [0], [1], [0, 0, 1, 1], [], []>} : vector<256x32xbf16>, vector<32x128xbf16>, vector<256x128xf32> -> vector<256x128xf32>
    %318 = arith.addf %306, %317 : vector<256x128xf32>
    %c1_188 = arith.constant 1 : index
    %c0_189 = arith.constant 0 : index
    %319 = vector.load %arg15[%c1_188, %c0_189] : memref<264x32xf32, #tpu.memory_space<vmem>>, vector<256x32xf32>
    %c3_i32_190 = arith.constant 3 : i32
    %320 = vector.broadcast %c3_i32_190 : i32 to vector<256x1xi32>
    %321 = arith.cmpi sge, %19, %320 : vector<256x1xi32>
    %cst_191 = arith.constant 0.000000e+00 : f32
    %322 = vector.shape_cast %321 : vector<256x1xi1> to vector<256x1xi1>
    %323 = vector.broadcast %322 : vector<256x1xi1> to vector<256x32xi1>
    %324 = vector.broadcast %cst_191 : f32 to vector<256x32xf32>
    %325 = arith.select %323, %319, %324 : vector<256x32xi1>, vector<256x32xf32>
    %326 = arith.truncf %325 : vector<256x32xf32> to vector<256x32xbf16>
    %c0_192 = arith.constant 0 : index
    %c32_193 = arith.constant 32 : index
    %c0_194 = arith.constant 0 : index
    %327 = vector.load %arg10[%c0_192, %c32_193, %c0_194] : memref<1x320x128xbf16, #tpu.memory_space<vmem>>, vector<1x32x128xbf16>
    %328 = vector.shape_cast %327 : vector<1x32x128xbf16> to vector<32x128xbf16>
    %cst_195 = arith.constant dense<0.000000e+00> : vector<256x128xf32>
    %329 = tpu.matmul %326, %328, %cst_195 {dimension_numbers = #tpu.dot_dimension_numbers<[1], [0], [0], [1], [0, 0, 1, 1], [], []>} : vector<256x32xbf16>, vector<32x128xbf16>, vector<256x128xf32> -> vector<256x128xf32>
    %330 = arith.addf %318, %329 : vector<256x128xf32>
    %c2_196 = arith.constant 2 : index
    %c0_197 = arith.constant 0 : index
    %331 = vector.load %arg15[%c2_196, %c0_197] : memref<264x32xf32, #tpu.memory_space<vmem>>, vector<256x32xf32>
    %c2_i32_198 = arith.constant 2 : i32
    %332 = vector.broadcast %c2_i32_198 : i32 to vector<256x1xi32>
    %333 = arith.cmpi sge, %19, %332 : vector<256x1xi32>
    %cst_199 = arith.constant 0.000000e+00 : f32
    %334 = vector.shape_cast %333 : vector<256x1xi1> to vector<256x1xi1>
    %335 = vector.broadcast %334 : vector<256x1xi1> to vector<256x32xi1>
    %336 = vector.broadcast %cst_199 : f32 to vector<256x32xf32>
    %337 = arith.select %335, %331, %336 : vector<256x32xi1>, vector<256x32xf32>
    %338 = arith.truncf %337 : vector<256x32xf32> to vector<256x32xbf16>
    %c0_200 = arith.constant 0 : index
    %c64_201 = arith.constant 64 : index
    %c0_202 = arith.constant 0 : index
    %339 = vector.load %arg10[%c0_200, %c64_201, %c0_202] : memref<1x320x128xbf16, #tpu.memory_space<vmem>>, vector<1x32x128xbf16>
    %340 = vector.shape_cast %339 : vector<1x32x128xbf16> to vector<32x128xbf16>
    %cst_203 = arith.constant dense<0.000000e+00> : vector<256x128xf32>
    %341 = tpu.matmul %338, %340, %cst_203 {dimension_numbers = #tpu.dot_dimension_numbers<[1], [0], [0], [1], [0, 0, 1, 1], [], []>} : vector<256x32xbf16>, vector<32x128xbf16>, vector<256x128xf32> -> vector<256x128xf32>
    %342 = arith.addf %330, %341 : vector<256x128xf32>
    %c3_204 = arith.constant 3 : index
    %c0_205 = arith.constant 0 : index
    %343 = vector.load %arg15[%c3_204, %c0_205] : memref<264x32xf32, #tpu.memory_space<vmem>>, vector<256x32xf32>
    %c1_i32_206 = arith.constant 1 : i32
    %344 = vector.broadcast %c1_i32_206 : i32 to vector<256x1xi32>
    %345 = arith.cmpi sge, %19, %344 : vector<256x1xi32>
    %cst_207 = arith.constant 0.000000e+00 : f32
    %346 = vector.shape_cast %345 : vector<256x1xi1> to vector<256x1xi1>
    %347 = vector.broadcast %346 : vector<256x1xi1> to vector<256x32xi1>
    %348 = vector.broadcast %cst_207 : f32 to vector<256x32xf32>
    %349 = arith.select %347, %343, %348 : vector<256x32xi1>, vector<256x32xf32>
    %350 = arith.truncf %349 : vector<256x32xf32> to vector<256x32xbf16>
    %c0_208 = arith.constant 0 : index
    %c96_209 = arith.constant 96 : index
    %c0_210 = arith.constant 0 : index
    %351 = vector.load %arg10[%c0_208, %c96_209, %c0_210] : memref<1x320x128xbf16, #tpu.memory_space<vmem>>, vector<1x32x128xbf16>
    %352 = vector.shape_cast %351 : vector<1x32x128xbf16> to vector<32x128xbf16>
    %cst_211 = arith.constant dense<0.000000e+00> : vector<256x128xf32>
    %353 = tpu.matmul %350, %352, %cst_211 {dimension_numbers = #tpu.dot_dimension_numbers<[1], [0], [0], [1], [0, 0, 1, 1], [], []>} : vector<256x32xbf16>, vector<32x128xbf16>, vector<256x128xf32> -> vector<256x128xf32>
    %354 = arith.addf %342, %353 : vector<256x128xf32>
    %c4_212 = arith.constant 4 : index
    %c0_213 = arith.constant 0 : index
    %355 = vector.load %arg15[%c4_212, %c0_213] : memref<264x32xf32, #tpu.memory_space<vmem>>, vector<256x32xf32>
    %356 = arith.truncf %355 : vector<256x32xf32> to vector<256x32xbf16>
    %c0_214 = arith.constant 0 : index
    %c128_215 = arith.constant 128 : index
    %c0_216 = arith.constant 0 : index
    %357 = vector.load %arg10[%c0_214, %c128_215, %c0_216] : memref<1x320x128xbf16, #tpu.memory_space<vmem>>, vector<1x32x128xbf16>
    %358 = vector.shape_cast %357 : vector<1x32x128xbf16> to vector<32x128xbf16>
    %cst_217 = arith.constant dense<0.000000e+00> : vector<256x128xf32>
    %359 = tpu.matmul %356, %358, %cst_217 {dimension_numbers = #tpu.dot_dimension_numbers<[1], [0], [0], [1], [0, 0, 1, 1], [], []>} : vector<256x32xbf16>, vector<32x128xbf16>, vector<256x128xf32> -> vector<256x128xf32>
    %360 = arith.addf %354, %359 : vector<256x128xf32>
    %c5_218 = arith.constant 5 : index
    %c0_219 = arith.constant 0 : index
    %361 = vector.load %arg15[%c5_218, %c0_219] : memref<264x32xf32, #tpu.memory_space<vmem>>, vector<256x32xf32>
    %c63_i32_220 = arith.constant 63 : i32
    %362 = vector.broadcast %c63_i32_220 : i32 to vector<256x1xi32>
    %363 = arith.cmpi slt, %19, %362 : vector<256x1xi32>
    %cst_221 = arith.constant 0.000000e+00 : f32
    %364 = vector.shape_cast %363 : vector<256x1xi1> to vector<256x1xi1>
    %365 = vector.broadcast %364 : vector<256x1xi1> to vector<256x32xi1>
    %366 = vector.broadcast %cst_221 : f32 to vector<256x32xf32>
    %367 = arith.select %365, %361, %366 : vector<256x32xi1>, vector<256x32xf32>
    %368 = arith.truncf %367 : vector<256x32xf32> to vector<256x32xbf16>
    %c0_222 = arith.constant 0 : index
    %c160_223 = arith.constant 160 : index
    %c0_224 = arith.constant 0 : index
    %369 = vector.load %arg10[%c0_222, %c160_223, %c0_224] : memref<1x320x128xbf16, #tpu.memory_space<vmem>>, vector<1x32x128xbf16>
    %370 = vector.shape_cast %369 : vector<1x32x128xbf16> to vector<32x128xbf16>
    %cst_225 = arith.constant dense<0.000000e+00> : vector<256x128xf32>
    %371 = tpu.matmul %368, %370, %cst_225 {dimension_numbers = #tpu.dot_dimension_numbers<[1], [0], [0], [1], [0, 0, 1, 1], [], []>} : vector<256x32xbf16>, vector<32x128xbf16>, vector<256x128xf32> -> vector<256x128xf32>
    %372 = arith.addf %360, %371 : vector<256x128xf32>
    %c6_226 = arith.constant 6 : index
    %c0_227 = arith.constant 0 : index
    %373 = vector.load %arg15[%c6_226, %c0_227] : memref<264x32xf32, #tpu.memory_space<vmem>>, vector<256x32xf32>
    %c62_i32_228 = arith.constant 62 : i32
    %374 = vector.broadcast %c62_i32_228 : i32 to vector<256x1xi32>
    %375 = arith.cmpi slt, %19, %374 : vector<256x1xi32>
    %cst_229 = arith.constant 0.000000e+00 : f32
    %376 = vector.shape_cast %375 : vector<256x1xi1> to vector<256x1xi1>
    %377 = vector.broadcast %376 : vector<256x1xi1> to vector<256x32xi1>
    %378 = vector.broadcast %cst_229 : f32 to vector<256x32xf32>
    %379 = arith.select %377, %373, %378 : vector<256x32xi1>, vector<256x32xf32>
    %380 = arith.truncf %379 : vector<256x32xf32> to vector<256x32xbf16>
    %c0_230 = arith.constant 0 : index
    %c192_231 = arith.constant 192 : index
    %c0_232 = arith.constant 0 : index
    %381 = vector.load %arg10[%c0_230, %c192_231, %c0_232] : memref<1x320x128xbf16, #tpu.memory_space<vmem>>, vector<1x32x128xbf16>
    %382 = vector.shape_cast %381 : vector<1x32x128xbf16> to vector<32x128xbf16>
    %cst_233 = arith.constant dense<0.000000e+00> : vector<256x128xf32>
    %383 = tpu.matmul %380, %382, %cst_233 {dimension_numbers = #tpu.dot_dimension_numbers<[1], [0], [0], [1], [0, 0, 1, 1], [], []>} : vector<256x32xbf16>, vector<32x128xbf16>, vector<256x128xf32> -> vector<256x128xf32>
    %384 = arith.addf %372, %383 : vector<256x128xf32>
    %c7_234 = arith.constant 7 : index
    %c0_235 = arith.constant 0 : index
    %385 = vector.load %arg15[%c7_234, %c0_235] : memref<264x32xf32, #tpu.memory_space<vmem>>, vector<256x32xf32>
    %c61_i32_236 = arith.constant 61 : i32
    %386 = vector.broadcast %c61_i32_236 : i32 to vector<256x1xi32>
    %387 = arith.cmpi slt, %19, %386 : vector<256x1xi32>
    %cst_237 = arith.constant 0.000000e+00 : f32
    %388 = vector.shape_cast %387 : vector<256x1xi1> to vector<256x1xi1>
    %389 = vector.broadcast %388 : vector<256x1xi1> to vector<256x32xi1>
    %390 = vector.broadcast %cst_237 : f32 to vector<256x32xf32>
    %391 = arith.select %389, %385, %390 : vector<256x32xi1>, vector<256x32xf32>
    %392 = arith.truncf %391 : vector<256x32xf32> to vector<256x32xbf16>
    %c0_238 = arith.constant 0 : index
    %c224_239 = arith.constant 224 : index
    %c0_240 = arith.constant 0 : index
    %393 = vector.load %arg10[%c0_238, %c224_239, %c0_240] : memref<1x320x128xbf16, #tpu.memory_space<vmem>>, vector<1x32x128xbf16>
    %394 = vector.shape_cast %393 : vector<1x32x128xbf16> to vector<32x128xbf16>
    %cst_241 = arith.constant dense<0.000000e+00> : vector<256x128xf32>
    %395 = tpu.matmul %392, %394, %cst_241 {dimension_numbers = #tpu.dot_dimension_numbers<[1], [0], [0], [1], [0, 0, 1, 1], [], []>} : vector<256x32xbf16>, vector<32x128xbf16>, vector<256x128xf32> -> vector<256x128xf32>
    %396 = arith.addf %384, %395 : vector<256x128xf32>
    %c8_242 = arith.constant 8 : index
    %c0_243 = arith.constant 0 : index
    %397 = vector.load %arg15[%c8_242, %c0_243] : memref<264x32xf32, #tpu.memory_space<vmem>>, vector<256x32xf32>
    %c60_i32_244 = arith.constant 60 : i32
    %398 = vector.broadcast %c60_i32_244 : i32 to vector<256x1xi32>
    %399 = arith.cmpi slt, %19, %398 : vector<256x1xi32>
    %cst_245 = arith.constant 0.000000e+00 : f32
    %400 = vector.shape_cast %399 : vector<256x1xi1> to vector<256x1xi1>
    %401 = vector.broadcast %400 : vector<256x1xi1> to vector<256x32xi1>
    %402 = vector.broadcast %cst_245 : f32 to vector<256x32xf32>
    %403 = arith.select %401, %397, %402 : vector<256x32xi1>, vector<256x32xf32>
    %404 = arith.truncf %403 : vector<256x32xf32> to vector<256x32xbf16>
    %c0_246 = arith.constant 0 : index
    %c256_247 = arith.constant 256 : index
    %c0_248 = arith.constant 0 : index
    %405 = vector.load %arg10[%c0_246, %c256_247, %c0_248] : memref<1x320x128xbf16, #tpu.memory_space<vmem>>, vector<1x32x128xbf16>
    %406 = vector.shape_cast %405 : vector<1x32x128xbf16> to vector<32x128xbf16>
    %cst_249 = arith.constant dense<0.000000e+00> : vector<256x128xf32>
    %407 = tpu.matmul %404, %406, %cst_249 {dimension_numbers = #tpu.dot_dimension_numbers<[1], [0], [0], [1], [0, 0, 1, 1], [], []>} : vector<256x32xbf16>, vector<32x128xbf16>, vector<256x128xf32> -> vector<256x128xf32>
    %408 = arith.addf %396, %407 : vector<256x128xf32>
    %c0_250 = arith.constant 0 : index
    %c0_251 = arith.constant 0 : index
    %c0_252 = arith.constant 0 : index
    %409 = vector.load %arg11[%c0_250, %c0_251, %c0_252] : memref<1x1x128xf32, #tpu.memory_space<vmem>>, vector<1x1x128xf32>
    %410 = vector.shape_cast %409 : vector<1x1x128xf32> to vector<1x128xf32>
    %411 = vector.broadcast %410 : vector<1x128xf32> to vector<256x128xf32>
    %412 = arith.addf %408, %411 : vector<256x128xf32>
    %cst_253 = arith.constant 0.000000e+00 : f32
    %413 = vector.broadcast %cst_253 : f32 to vector<256x128xf32>
    %414 = arith.maximumf %412, %413 : vector<256x128xf32>
    %415 = arith.addf %414, %283 : vector<256x128xf32>
    %cst_254 = arith.constant 0.000000e+00 : f32
    %416 = vector.broadcast %cst_254 : f32 to vector<256x128xf32>
    %417 = arith.maximumf %415, %416 : vector<256x128xf32>
    %418 = vector.shape_cast %417 : vector<256x128xf32> to vector<4x64x128xf32>
    %cst_255 = arith.constant dense<0.000000e+00> : vector<4x128xf32>
    %419 = vector.multi_reduction <add>, %418, %cst_255 [1] : vector<4x64x128xf32> to vector<4x128xf32>
    %cst_256 = arith.constant 6.400000e+01 : f32
    %420 = vector.broadcast %cst_256 : f32 to vector<4x128xf32>
    %421 = arith.divf %419, %420 : vector<4x128xf32>
    %c0_257 = arith.constant 0 : index
    %c0_258 = arith.constant 0 : index
    %c0_259 = arith.constant 0 : index
    %422 = vector.load %arg12[%c0_257, %c0_258, %c0_259] : memref<1x128x5xf32, #tpu.memory_space<vmem>>, vector<1x128x5xf32>
    %423 = vector.shape_cast %422 : vector<1x128x5xf32> to vector<128x5xf32>
    %cst_260 = arith.constant dense<0.000000e+00> : vector<4x5xf32>
    %424 = tpu.matmul %421, %423, %cst_260 {dimension_numbers = #tpu.dot_dimension_numbers<[1], [0], [0], [1], [0, 0, 1, 1], [], []>} : vector<4x128xf32>, vector<128x5xf32>, vector<4x5xf32> -> vector<4x5xf32>
    %c0_261 = arith.constant 0 : index
    %c0_262 = arith.constant 0 : index
    %c0_263 = arith.constant 0 : index
    %425 = vector.load %arg13[%c0_261, %c0_262, %c0_263] : memref<1x1x5xf32, #tpu.memory_space<vmem>>, vector<1x1x5xf32>
    %426 = vector.shape_cast %425 : vector<1x1x5xf32> to vector<1x5xf32>
    %427 = vector.broadcast %426 : vector<1x5xf32> to vector<4x5xf32>
    %428 = arith.addf %424, %427 : vector<4x5xf32>
    %cst_264 = arith.constant dense<0xFF800000> : vector<4xf32>
    %429 = vector.multi_reduction <maximumf>, %428, %cst_264 [1] : vector<4x5xf32> to vector<4xf32>
    %430 = vector.shape_cast %429 : vector<4xf32> to vector<4x1xf32>
    %431 = vector.broadcast %430 : vector<4x1xf32> to vector<4x5xf32>
    %432 = arith.subf %428, %431 : vector<4x5xf32>
    %433 = math.exp %432 : vector<4x5xf32>
    %cst_265 = arith.constant dense<0.000000e+00> : vector<4xf32>
    %434 = vector.multi_reduction <add>, %433, %cst_265 [1] : vector<4x5xf32> to vector<4xf32>
    %435 = vector.shape_cast %434 : vector<4xf32> to vector<4x1xf32>
    %436 = math.log %435 : vector<4x1xf32>
    %437 = vector.broadcast %436 : vector<4x1xf32> to vector<4x5xf32>
    %438 = arith.subf %432, %437 : vector<4x5xf32>
    %c0_266 = arith.constant 0 : index
    %c0_267 = arith.constant 0 : index
    %c0_268 = arith.constant 0 : index
    %c0_269 = arith.constant 0 : index
    %439 = vector.load %arg14[%c0_266, %c0_267, %c0_268, %c0_269] : memref<1x4x1x5xf32, #tpu.memory_space<vmem>>, vector<1x4x1x5xf32>
    %440 = vector.shape_cast %439 : vector<1x4x1x5xf32> to vector<4x5xf32>
    %441 = vector.shape_cast %438 : vector<4x5xf32> to vector<1x4x1x5xf32>
    tpu.vector_store %arg14[%c0_266, %c0_267, %c0_268, %c0_269], %441 {strides = array<i32>} : memref<1x4x1x5xf32, #tpu.memory_space<vmem>>, vector<1x4x1x5xf32>,
    return
  }
  func.func @transform_0(%arg0: i32, %arg1: i32) -> (i32, i32, i32) {
    %c0_i32 = arith.constant 0 : i32
    %c0_i32_0 = arith.constant 0 : i32
    %c0_i32_1 = arith.constant 0 : i32
    return %arg1, %c0_i32, %c0_i32_0 : i32, i32, i32
  }
  func.func @transform_1(%arg0: i32, %arg1: i32) -> (i32, i32, i32) {
    %c0_i32 = arith.constant 0 : i32
    %c0_i32_0 = arith.constant 0 : i32
    %c0_i32_1 = arith.constant 0 : i32
    return %arg0, %c0_i32, %c0_i32_0 : i32, i32, i32
  }
  func.func @transform_2(%arg0: i32, %arg1: i32) -> (i32, i32, i32) {
    %c0_i32 = arith.constant 0 : i32
    %c0_i32_0 = arith.constant 0 : i32
    %c0_i32_1 = arith.constant 0 : i32
    return %arg0, %c0_i32, %c0_i32_0 : i32, i32, i32
  }
  func.func @transform_3(%arg0: i32, %arg1: i32) -> (i32, i32, i32) {
    %c0_i32 = arith.constant 0 : i32
    %c0_i32_0 = arith.constant 0 : i32
    %c0_i32_1 = arith.constant 0 : i32
    return %arg0, %c0_i32, %c0_i32_0 : i32, i32, i32
  }
  func.func @transform_4(%arg0: i32, %arg1: i32) -> (i32, i32, i32) {
    %c0_i32 = arith.constant 0 : i32
    %c0_i32_0 = arith.constant 0 : i32
    %c0_i32_1 = arith.constant 0 : i32
    return %arg0, %c0_i32, %c0_i32_0 : i32, i32, i32
  }
  func.func @transform_5(%arg0: i32, %arg1: i32) -> (i32, i32, i32) {
    %c0_i32 = arith.constant 0 : i32
    %c0_i32_0 = arith.constant 0 : i32
    %c0_i32_1 = arith.constant 0 : i32
    return %arg0, %c0_i32, %c0_i32_0 : i32, i32, i32
  }
  func.func @transform_6(%arg0: i32, %arg1: i32) -> (i32, i32, i32) {
    %c0_i32 = arith.constant 0 : i32
    %c0_i32_0 = arith.constant 0 : i32
    %c0_i32_1 = arith.constant 0 : i32
    return %arg0, %c0_i32, %c0_i32_0 : i32, i32, i32
  }
  func.func @transform_7(%arg0: i32, %arg1: i32) -> (i32, i32, i32) {
    %c0_i32 = arith.constant 0 : i32
    %c0_i32_0 = arith.constant 0 : i32
    %c0_i32_1 = arith.constant 0 : i32
    return %arg0, %c0_i32, %c0_i32_0 : i32, i32, i32
  }
  func.func @transform_8(%arg0: i32, %arg1: i32) -> (i32, i32, i32) {
    %c0_i32 = arith.constant 0 : i32
    %c0_i32_0 = arith.constant 0 : i32
    %c0_i32_1 = arith.constant 0 : i32
    return %arg0, %c0_i32, %c0_i32_0 : i32, i32, i32
  }
  func.func @transform_9(%arg0: i32, %arg1: i32) -> (i32, i32, i32) {
    %c0_i32 = arith.constant 0 : i32
    %c0_i32_0 = arith.constant 0 : i32
    %c0_i32_1 = arith.constant 0 : i32
    return %arg0, %c0_i32, %c0_i32_0 : i32, i32, i32
  }
  func.func @transform_10(%arg0: i32, %arg1: i32) -> (i32, i32, i32) {
    %c0_i32 = arith.constant 0 : i32
    %c0_i32_0 = arith.constant 0 : i32
    %c0_i32_1 = arith.constant 0 : i32
    return %arg0, %c0_i32, %c0_i32_0 : i32, i32, i32
  }
  func.func @transform_11(%arg0: i32, %arg1: i32) -> (i32, i32, i32) {
    %c0_i32 = arith.constant 0 : i32
    %c0_i32_0 = arith.constant 0 : i32
    %c0_i32_1 = arith.constant 0 : i32
    return %arg0, %c0_i32, %c0_i32_0 : i32, i32, i32
  }
  func.func @transform_12(%arg0: i32, %arg1: i32) -> (i32, i32, i32, i32) {
    %c0_i32 = arith.constant 0 : i32
    %c0_i32_0 = arith.constant 0 : i32
    %c0_i32_1 = arith.constant 0 : i32
    return %arg0, %arg1, %c0_i32, %c0_i32_0 : i32, i32, i32, i32
  }
}

</mosaic_0001>

<bundles_post_ra>
// kernel: _lambda_.1
= control target key start
LH: loop header
LB: loop body
LE: loop exit
PB: predicated region body
PF: predicated region fallthrough
CT: control target
= control target key end

     0   :  { %s15790_s0 = inlined_call_operand.vmem [shape: f32[8,64,4], index: 0, kind: input, shape index: {}]   ;;  %s15791_s1 = inlined_call_operand.vmem [shape: bf16[2,4,32], index: 1, kind: input, shape index: {}]   ;;  %s15792_s2 = inlined_call_operand.hbm [shape: bf16[2,320,128], index: 2, kind: input, shape index: {}]   ;;  %s15793_s3 = inlined_call_operand.vmem [shape: f32[2,1,128], index: 3, kind: input, shape index: {}]   ;;  %s15794_s4 = inlined_call_operand.hbm [shape: bf16[2,128,32], index: 4, kind: input, shape index: {}]   ;;  %s15795_s5 = inlined_call_operand.hbm [shape: bf16[2,320,128], index: 5, kind: input, shape index: {}]   ;;  %s15796_s6 = inlined_call_operand.vmem [shape: f32[2,1,128], index: 6, kind: input, shape index: {}]   ;;  %s15797_s7 = inlined_call_operand.vmem [shape: bf16[2,128,32], index: 7, kind: input, shape index: {}]   ;;  %s15798_s8 = inlined_call_operand.vmem [shape: bf16[2,320,128], index: 8, kind: input, shape index: {}]   ;;  %s15799_s9 = inlined_call_operand.vmem [shape: f32[2,1,128], index: 9, kind: input, shape index: {}]   ;;  %s15800_s10 = inlined_call_operand.hbm [shape: f32[2,128,5], index: 10, kind: input, shape index: {}]   ;;  %s15801_s11 = inlined_call_operand.vmem [shape: f32[2,1,5], index: 11, kind: input, shape index: {}]   ;;  %s15802_s12 = inlined_call_operand.vmem [shape: f32[2,8,1,5], index: 12, kind: output, shape index: {}]  }
   0x1   :  { %15975 = sst [smem:[#allocation89_spill]] %s15790_s0 }
   0x2   :  { %15976 = sst [smem:[#allocation90_spill]] %s15792_s2 }
   0x3   :  { %15977 = sst [smem:[#allocation91_spill]] %s15793_s3 }
   0x4   :  { %15978 = sst [smem:[#allocation92_spill]] %s15794_s4 }
   0x5   :  { %15979 = sst [smem:[#allocation93_spill]] %s15796_s6 }
   0x6   :  { %15980 = sst [smem:[#allocation94_spill]] %s15797_s7 }
   0x7   :  { %15981 = sst [smem:[#allocation95_spill]] %s15798_s8 }
   0x8   :  { %15982 = sst [smem:[#allocation96_spill]] %s15799_s9 }
   0x9   :  { %15983 = sst [smem:[#allocation97_spill]] %s15801_s11 }
   0xa   :  { %15984 = sst [smem:[#allocation98_spill]] %s15802_s12 }
   0xb   :  { %17 = vsyncpa [#allocation4], 0 }
   0xc   :  { %19 = vsyncpa [#allocation4 + $0x1], 0 }
   0xd   :  { %20 = vsyncpa [#allocation6], 0 }
   0xe   :  { %22 = vsyncpa [#allocation6 + $0x1], 0 }
   0xf   :  { %23 = vsyncpa [#allocation9], 0 }
  0x10   :  { %25 = vsyncpa [#allocation9 + $0x1], 0  ;;  %s12490_s21 = smov 0   ;;  %s12492_s22 = smov 0  }
  0x11   :  { %s12494_s23 = smov 0   ;;  %s12496_s24 = smov 0  }
  0x12   :  { %s12498_s25 = smov 0   ;;  %s12500_s26 = smov 0  }
  0x13   :  { %s12502_s27 = smov 0   ;;  %s12504_s28 = smov 0  }
  0x14 LB: > { %15985 = sst [smem:[#allocation13_spill]] %s12397_s23  ;;  %s15803_s29 = sadd.s32 4294967295, %s12417_s28   ;;  %s12417_s28 = sphi %s12504_s28, %s31_s28   ;;  %s12413_s27 = sphi %s12502_s27, %s16348_s27   ;;  %s12409_s26 = sphi %s12500_s26, %s16343_s26   ;;  %s12405_s25 = sphi %s12498_s25, %s16347_s25   ;;  %s12401_s24 = sphi %s12496_s24, %s16342_s24   ;;  %s12397_s23 = sphi %s12494_s23, %s16341_s23   ;;  %s12393_s22 = sphi %s12492_s22, %s16346_s22   ;;  %s12389_s21 = sphi %s12490_s21, %s16345_s21  }
  0x15   : > { %15986 = sst [smem:[#allocation14_spill]] %s12409_s26  ;;  %s40_s30 = sadd.s32 1, %s12409_s26 }
  0x16   : > { %p41_p0 = scmp.ge.s32.totalorder %s40_s30, 2  ;;  %s43_s13 = sadd.s32 1, %s12413_s27 }
  0x17   : > { %s102_s14 = sadd.s32 1, %s12397_s23  ;;  %p109_p1 = scmp.ne.s32.totalorder %s12397_s23, %s12393_s22 }
  0x18   : > { %s16350_s30 = smov (%p41_p0, %s40_s30), 0  ;;  %s16352_s13 = smov (!%p41_p0, %s43_s13), %s12413_s27 }
  0x19   : > { %15987 = sst [smem:[#allocation15_spill]] %s16350_s30  ;;  %p110_p2 = scmp.eq.s32.totalorder %s12417_s28, 0 }
  0x1a   : > { %p115_p3 = scmp.ne.s32.totalorder %s12393_s22, %s12389_s21  ;;  %p45_p4 = scmp.ge.s32.totalorder %s16352_s13, 2 }
  0x1b   : > { %p116_p5 = scmp.eq.s32.totalorder %s15803_s29, 0  ;;  %p111_p6 = por %p110_p2, %p109_p1 }
  0x1c   : > { %s16354_s13 = smov (%p45_p4, %s16352_s13), 0  ;;  %p12065_p8 = scmp.lt.s32.totalorder %s12417_s28, 4 }
  0x1d   : > { %15988 = sst [smem:[#allocation16_spill]] %s16354_s13  ;;  %p12543_p7 = por %p116_p5, %p115_p3 }
  0x1e   : > { %s99_s16 = ssub.s32 %s12413_s27, %s16354_s13  ;;  %s12551_s17 = sand.u32 1, %s12397_s23  }
  0x1f   : > { %p100_p9 = scmp.eq.s32.totalorder %s99_s16, 0  ;;  %p12553_p10 = pnand %p12065_p8, %p111_p6 }
  0x20   : > { %s446_s20 = sand.u32 1, %s12417_s28   ;;  %s11134_s21 = sshll.u32 %s12551_s17, 6 }
  0x21   : > { %s12558_s19 = scalar_select %p100_p9, %s12397_s23, %s102_s14  }
  0x22   : > { %s11955_s29 = sshll.u32 %s12413_s27, 6  ;;  %s15992_s4 = sld [smem:[#allocation92_spill]] }
  0x23   : > { %15991 = sst [smem:[#allocation17_spill]] %s12558_s19  ;;  %s450_s12 = scalar_lea.vmem [#allocation5], %s11134_s21 }
  0x24   : > { %s458_s11 = sshll.u32 %s450_s12, 4  ;;  %p11141_p11 = scmp.ge.s32.totalorder %s12417_s28, 1  ;;  %s459_s11 = int_to_ptr.vmem [resolvable:$true] %s458_s11 }
  0x25   : > { %s447_s8 = scalar_lea.sflag [#allocation6], %s446_s20  ;;  %s12419_s14 = smov 64  }
  0x26   : > { %s12420_s19 = smov 4   ;;  %p544_p12 = scmp.lt.s32.totalorder %s12417_s28, 5 }
  0x27   : > { %s12038_s26 = smul.u32 160, %s12551_s17  ;;  %s15994_s2 = sld [smem:[#allocation90_spill]] }
  0x28   : > { %s455_s13 = scalar_lea.hbm %s15992_s4, %s11955_s29  ;;  %p12570_p13 = pnand %p11141_p11, %p544_p12 }
  0x29   : > { %s456_s16 = sshll.u32 %s455_s13, 4  ;;  %s12039_s29 = smul.u32 160, %s12413_s27  ;;  %s457_s16 = int_to_ptr.hbm [resolvable:$true] %s456_s16 }
  0x2a   : > { %12058 = dma.hbm_to_vmem [thread:$0]  (!%p12553_p10), %s457_s16, 1024, %s459_s11, %s447_s8, %s12419_s14, %s12419_s14, %s12420_s19  }
  0x2b   : > { %s422_s20 = scalar_lea.vmem [#allocation3], %s12038_s26  ;;  %s477_s7 = scalar_lea.hbm %s15795_s5, %s12039_s29 }
  0x2c   : > { %s430_s21 = sshll.u32 %s422_s20, 4  ;;  %s419_s0 = scalar_lea.sflag [#allocation4], %s12551_s17  ;;  %s431_s21 = int_to_ptr.vmem [resolvable:$true] %s430_s21 }
  0x2d   : > { %s427_s13 = scalar_lea.hbm %s15994_s2, %s12039_s29  ;;  %s478_s9 = sshll.u32 %s477_s7, 4  ;;  %s479_s9 = int_to_ptr.hbm [resolvable:$true] %s478_s9 }
  0x2e   : > { %s428_s4 = sshll.u32 %s427_s13, 4  ;;  %s472_s6 = scalar_lea.vmem [#allocation7], %s12038_s26  ;;  %s429_s4 = int_to_ptr.hbm [resolvable:$true] %s428_s4 }
  0x2f   : > { %12055 = dma.hbm_to_vmem [thread:$0]  (!%p12553_p10), %s429_s4, 2560, %s431_s21, %s419_s0, %s12419_s14, %s12419_s14, %s12420_s19  }
  0x30   : > { %s480_s12 = sshll.u32 %s472_s6, 4  ;;  %s11138_s30 = sshll.u32 %s12551_s17, 7  ;;  %s481_s12 = int_to_ptr.vmem [resolvable:$true] %s480_s12 }
  0x31   : > { %12061 = dma.hbm_to_vmem [thread:$0]  (!%p12553_p10), %s479_s9, 2560, %s481_s12, %s447_s8, %s12419_s14, %s12419_s14, %s12420_s19  }
  0x32   : > { %s11956_s13 = sshll.u32 %s12413_s27, 7  ;;  %s522_s29 = scalar_lea.vmem [#allocation8], %s11138_s30 }
  0x33   : > { %s527_s3 = scalar_lea.hbm %s15800_s10, %s11956_s13  ;;  %s530_s16 = sshll.u32 %s522_s29, 4  ;;  %s531_s16 = int_to_ptr.vmem [resolvable:$true] %s530_s16 }
  0x34   : > { %s528_s11 = sshll.u32 %s527_s3, 4  ;;  %s519_s0 = scalar_lea.sflag [#allocation9], %s12551_s17  ;;  %s529_s11 = int_to_ptr.hbm [resolvable:$true] %s528_s11 }
  0x35   : > { %s12421_s4 = smov 128   ;;  %s12422_s7 = smov 8  }
  0x36   : > { %12064 = dma.hbm_to_vmem [thread:$0]  (!%p12553_p10), %s529_s11, 2048, %s531_s16, %s519_s0, %s12421_s4, %s12421_s4, %s12422_s7  }
  0x37   : > { %548 = sbr.rel (%p12570_p13) target bundleno = 3181 (0xc6d), region = 68 }
  0x3c   : > { %s550_s6 = sand.u32 1, %s12393_s22  }
  0x3d   : > { %s12042_s8 = smul.u32 160, %s550_s6  ;;  %s551_s9 = scalar_lea.sflag [#allocation4], %s550_s6 }
  0x3f   : > { %s12598_s2 = scalar_lea.vmem [#allocation3], %s12042_s8 }
  0x40   : > { %12376 = dma.done.wait (%p12543_p7), %s551_s9, 2560  }
  0x41   : > { %12378 = vsyncadd (%p12543_p7), %s551_s9, 4294964736  ;;  %s15995_s3 = sadd.s32 4294967295, %s12417_s28   ;;  %s11142_s18 = sshll.u32 %s550_s6, 6 }
  0x42   : > { %s560_s17 = sand.u32 1, %s15995_s3   ;;  %s12606_s23 = scalar_lea.vmem [#allocation5], %s11142_s18 }
  0x43   : > { %s561_s19 = scalar_lea.sflag [#allocation6], %s560_s17 }
  0x44   : > { %12380 = dma.done.wait (%p12543_p7), %s561_s19, 3584  }
  0x45   : > { %12382 = vsyncadd (%p12543_p7), %s561_s19, 4294963712  ;;  %s11143_s14 = sshll.u32 %s550_s6, 7  ;;  %s12612_s26 = scalar_lea.vmem [#allocation7], %s12042_s8 }
  0x46   : > { %s581_s21 = scalar_lea.sflag [#allocation9], %s550_s6  ;;  %s12614_s12 = scalar_lea.vmem [#allocation8], %s11143_s14 }
  0x47   : > { %12384 = dma.done.wait (%p12543_p7), %s581_s21, 2048  }
  0x48   : > { %12386 = vsyncadd (%p12543_p7), %s581_s21, 4294965248  ;;  %p683_p0 = scmp.lt.s32.totalorder %s12405_s25, 1  ;;  %s11144_s30 = sshll.u32 %s12401_s24, 2  ;;  %vm1237_vm0 = vcmask 1041408   ;;  %vm1188_vm1 = vcmask 31744   ;;  %v11960_v23 = vld [vmem:[%s12598_s2 + $0x98] sm:$0xff]  ;;  %v722_v60 = vlaneseq }
  0x49   : > { %p677_p1 = scmp.lt.s32.totalorder %s11144_s30, 7  ;;  %s15996_s0 = sld [smem:[#allocation91_spill]]  ;;  %v11959_v36 = vld [vmem:[%s12598_s2 + $0x90] sm:$0xff]  ;;  %vm719_vm2 = vcmask 257024   ;;  %v12423_v37 = vmov 0.0   ;;  %v11962_v53 = vld [vmem:[%s12598_s2 + $0x8] sm:$0xff] }
  0x4a   : > { %s16356_s25 = smov (!%p683_p0, %s12405_s25), 1  ;;  %s15997_s6 = sld [smem:[#allocation93_spill]]  ;;  %720 = vst.msk [vmem:[#allocation2] sm:$0xf] %vm719_vm2, %v12423_v37  ;;  %v11964_v54 = vld [vmem:[%s12598_s2 + $0x18] sm:$0xff]  ;;  %v11966_v55 = vld [vmem:[%s12598_s2 + $0x28] sm:$0xff] }
  0x4b   : > { %s16358_s30 = smov (!%p677_p1, %s11144_s30), 7  ;;  %s11147_s13 = sshll.u32 %s16356_s25, 1  ;;  %721 = vst.msk [vmem:[#allocation2 + $0x104] sm:$0xf] %vm719_vm2, %v12423_v37  ;;  %v11961_v56 = vld [vmem:[%s12598_s2] sm:$0xff]  ;;  %v11963_v57 = vld [vmem:[%s12598_s2 + $0x10] sm:$0xff] }
  0x4c   : > { %s686_s15 = scalar_lea.vmem %s15791_s1, %s11147_s13  ;;  %s15998_s17 = sld [smem:[#allocation96_spill]]  ;;  %v11965_v58 = vld [vmem:[%s12598_s2 + $0x20] sm:$0xff]  ;;  %vm1330_vm3 = vcmask 261120   ;;  %v11970_v61 = vld [vmem:[%s12598_s2 + $0x48] sm:$0xff]  ;;  %v12707_v62 = vshrl.u32 %v722_v60, 7 }
  0x4d   : > { %v1187_v0 = vld [vmem:[%s686_s15] sm:$0x3]  ;;  %s11957_s19 = sshll.u32 %s16358_s30, 6  ;;  %s15999_s13 = sld [smem:[#allocation89_spill]] }
  0x4e   : > { %v1239_v1 = vsel %vm1237_vm0, %v1187_v0, 0  ;;  %v12710_v0 = vand.u32 63, %v12707_v62  ;;  %s11958_s11 = sshll.u32 %s16356_s25, 6  ;;  %s16073_s29 = sld [smem:[#allocation94_spill]] }
  0x4f   : > { %s689_s24 = scalar_lea.vmem %s15996_s0, %s16356_s25  ;;  %1248 = vmatpush.bf16.msra.mxu0 %v1239_v1  ;;  %12036 = vmatpush.bf16.msra.mxu2 %v1239_v1  ;;  %s16097_s9 = sld [smem:[#allocation95_spill]] }
  0x50   : > { %s692_s8 = scalar_lea.vmem %s15997_s6, %s16356_s25  ;;  %12035 = vmatpush.bf16.msra.mxu1 %v1239_v1  ;;  %12037 = vmatpush.bf16.msra.mxu3 %v1239_v1  ;;  %16000 = vst [vmem:[#allocation18_spill] sm:$0xff] %v12710_v0  ;;  %v11968_v1 = vld [vmem:[%s12598_s2 + $0x38] sm:$0xff]  ;;  %vm1799_vm4 = vcmp.ge.s32.totalorder %v12710_v0, 4  ;;  %vm2277_vm5 = vcmp.ge.s32.totalorder %v12710_v0, 3  ;;  %vm2638_vm6 = vcmp.ge.s32.totalorder %v12710_v0, 2  ;;  %vm1363_vm7 = vcmp.ge.s32.totalorder %v12710_v0, 1 }
  0x52   : > { %s705_s18 = scalar_lea.vmem %s15998_s17, %s16356_s25 }
  0x53   : > { %s12647_s20 = scalar_lea.vmem %s15999_s13, %s11957_s19  ;;  %2162 = vmatpush.bf16.msrb.mxu2 %v11960_v23  ;;  %2852 = vmatpush.bf16.msrb.mxu0 %v11966_v55 }
  0x54   : > { %v1139_v2 = vld [vmem:[%s12647_s20] sm:$0xff]  ;;  %v1140_v3 = vld [vmem:[%s12647_s20 + $0x8] sm:$0xff]  ;;  %v1141_v8 = vld [vmem:[%s12647_s20 + $0x10] sm:$0xff]  ;;  %2013 = vmatpush.bf16.msrb.mxu1 %v11962_v53  ;;  %2491 = vmatpush.bf16.msrb.mxu3 %v11964_v54  ;;  %s13973_s16 = scalar_lea.vmem %s16073_s29, %s11958_s11  ;;  %s11152_s11 = sshll.u32 %s16356_s25, 3 }
  0x55   : > { %v1171_v4 = vpack.c.bf16 %v1140_v3, %v1139_v2  ;;  %v1151_v5 = vld [vmem:[%s12647_s20 + $0x60] sm:$0xff]  ;;  %v1152_v6 = vld [vmem:[%s12647_s20 + $0x68] sm:$0xff]  ;;  %v1142_v9 = vld [vmem:[%s12647_s20 + $0x18] sm:$0xff] }
  0x56   : > { %v1177_v7 = vpack.c.bf16 %v1152_v6, %v1151_v5  ;;  %v1172_v10 = vpack.c.bf16 %v1142_v9, %v1141_v8  ;;  %v1153_v11 = vld [vmem:[%s12647_s20 + $0x70] sm:$0xff]  ;;  %v1154_v12 = vld [vmem:[%s12647_s20 + $0x78] sm:$0xff]  ;;  %v1143_v14 = vld [vmem:[%s12647_s20 + $0x20] sm:$0xff] }
  0x57   : > { %11153 = vmatmul.msk.bf16.vlgmr.msra.gmra.mxu0 %vm1188_vm1, %v1171_v4  ;;  %v1178_v13 = vpack.c.bf16 %v1154_v12, %v1153_v11  ;;  %v1144_v15 = vld [vmem:[%s12647_s20 + $0x28] sm:$0xff]  ;;  %v1149_v17 = vld [vmem:[%s12647_s20 + $0x50] sm:$0xff]  ;;  %v1150_v18 = vld [vmem:[%s12647_s20 + $0x58] sm:$0xff]  ;;  %2163 = vmatpush.bf16.msrb.mxu2 %v11959_v36 }
  0x58   : > { %11159 = vmatmul.msk.bf16.vlgmr.msra.gmra.mxu2 %vm1188_vm1, %v1177_v7  ;;  %v1173_v16 = vpack.c.bf16 %v1144_v15, %v1143_v14  ;;  %v1161_v19 = vld [vmem:[%s12647_s20 + $0xb0] sm:$0xff]  ;;  %v1176_v20 = vpack.c.bf16 %v1150_v18, %v1149_v17  ;;  %v1162_v21 = vld [vmem:[%s12647_s20 + $0xb8] sm:$0xff]  ;;  %v1155_v24 = vld [vmem:[%s12647_s20 + $0x80] sm:$0xff]  ;;  %2014 = vmatpush.bf16.msrb.mxu1 %v11961_v56 }
  0x59   : > { %v1182_v22 = vpack.c.bf16 %v1162_v21, %v1161_v19  ;;  %v1156_v25 = vld [vmem:[%s12647_s20 + $0x88] sm:$0xff]  ;;  %v1145_v27 = vld [vmem:[%s12647_s20 + $0x30] sm:$0xff]  ;;  %v1146_v28 = vld [vmem:[%s12647_s20 + $0x38] sm:$0xff]  ;;  %2492 = vmatpush.bf16.msrb.mxu3 %v11963_v57  ;;  %2853 = vmatpush.bf16.msrb.mxu0 %v11965_v58 }
  0x5a   : > { %11158 = vmatmul.msk.bf16.vlgmr.msra.gmra.mxu1 %vm1188_vm1, %v1176_v20  ;;  %v1179_v26 = vpack.c.bf16 %v1156_v25, %v1155_v24  ;;  %v1163_v29 = vld [vmem:[%s12647_s20 + $0xc0] sm:$0xff]  ;;  %v1164_v30 = vld [vmem:[%s12647_s20 + $0xc8] sm:$0xff]  ;;  %v1174_v31 = vpack.c.bf16 %v1146_v28, %v1145_v27  ;;  %v1157_v32 = vld [vmem:[%s12647_s20 + $0x90] sm:$0xff] }
  0x5b   : > { %11164 = vmatmul.msk.bf16.vlgmr.msra.gmra.mxu3 %vm1188_vm1, %v1182_v22  ;;  %v1158_v33 = vld [vmem:[%s12647_s20 + $0x98] sm:$0xff]  ;;  %v1183_v34 = vpack.c.bf16 %v1164_v30, %v1163_v29  ;;  %v1147_v38 = vld [vmem:[%s12647_s20 + $0x40] sm:$0xff]  ;;  %v1148_v39 = vld [vmem:[%s12647_s20 + $0x48] sm:$0xff]  ;;  %3318 = vmatpush.bf16.msra.mxu2 %v11970_v61 }
  0x5c   : > { %v1180_v35 = vpack.c.bf16 %v1158_v33, %v1157_v32  ;;  %v1165_v40 = vld [vmem:[%s12647_s20 + $0xd0] sm:$0xff]  ;;  %v1166_v41 = vld [vmem:[%s12647_s20 + $0xd8] sm:$0xff]  ;;  %v1175_v42 = vpack.c.bf16 %v1148_v39, %v1147_v38  ;;  %v1159_v43 = vld [vmem:[%s12647_s20 + $0xa0] sm:$0xff]  ;;  %3085 = vmatpush.bf16.msra.mxu1 %v11968_v1 }
  0x5d   : > { %v1160_v44 = vld [vmem:[%s12647_s20 + $0xa8] sm:$0xff]  ;;  %v1184_v45 = vpack.c.bf16 %v1166_v41, %v1165_v40  ;;  %v1167_v47 = vld [vmem:[%s12647_s20 + $0xe0] sm:$0xff]  ;;  %v1169_v50 = vld [vmem:[%s12647_s20 + $0xf0] sm:$0xff] }
  0x5e   : > { %v1181_v46 = vpack.c.bf16 %v1160_v44, %v1159_v43  ;;  %v1168_v48 = vld [vmem:[%s12647_s20 + $0xe8] sm:$0xff]  ;;  %v1170_v51 = vld [vmem:[%s12647_s20 + $0xf8] sm:$0xff]  ;;  %s16310_s20 = sld [smem:[#allocation97_spill]] }
  0x5f   : > { %v1185_v49 = vpack.c.bf16 %v1168_v48, %v1167_v47  ;;  %v1186_v52 = vpack.c.bf16 %v1170_v51, %v1169_v50 }
  0x67   : > { %11154 = vmatmul.msk.bf16.gmra.mxu0 %vm1188_vm1, %v1172_v10 }
  0x68   : > { %11160 = vmatmul.msk.bf16.gmra.mxu2 %vm1188_vm1, %v1178_v13 }
  0x6b   : > { %11165 = vmatmul.msk.bf16.gmra.mxu3 %vm1188_vm1, %v1183_v34 }
  0x77   : > { %11155 = vmatmul.msk.bf16.gmra.mxu0 %vm1188_vm1, %v1173_v16 }
  0x78   : > { %11161 = vmatmul.msk.bf16.gmra.mxu2 %vm1188_vm1, %v1179_v26 }
  0x7b   : > { %11166 = vmatmul.msk.bf16.gmra.mxu3 %vm1188_vm1, %v1184_v45 }
  0x87   : > { %11156 = vmatmul.msk.bf16.gmra.mxu0 %vm1188_vm1, %v1174_v31 }
  0x88   : > { %11162 = vmatmul.msk.bf16.gmra.mxu2 %vm1188_vm1, %v1180_v35 }
  0x8b   : > { %11167 = vmatmul.msk.bf16.gmra.mxu3 %vm1188_vm1, %v1185_v49 }
  0x97   : > { %11157 = vmatmul.msk.bf16.gmra.mxu0 %vm1188_vm1, %v1175_v42 }
  0x98   : > { %11163 = vmatmul.msk.bf16.gmra.mxu2 %vm1188_vm1, %v1181_v46 }
  0x9b   : > { %11168 = vmatmul.msk.bf16.gmra.mxu3 %vm1188_vm1, %v1186_v52 }
  0xd4   : > { %v1250_v59 = vpop.f32.mrf.mxu0 }
  0xd5   : > { %1331 = vst.msk [vmem:[#allocation2 + $0x4] sm:$0xff] %vm1330_vm3, %v1250_v59 }
  0xd7   : > { %v12744_v37 = vpop.f32.mrf.mxu1 }
  0xd8   : > { %1341 = vst.msk [vmem:[#allocation2 + $0x54] sm:$0xff] %vm1330_vm3, %v12744_v37 }
  0xdb   : > { %v12727_v16 = vpop.f32.mrf.mxu2 }
  0xdc   : > { %v1252_v63 = vpop.f32.mrf.mxu0  ;;  %v1767_v2 = vld [vmem:[#allocation2] sm:$0xff]  ;;  %1343 = vst.msk [vmem:[#allocation2 + $0x64] sm:$0xff] %vm1330_vm3, %v12727_v16 }
  0xdd   : > { %1332 = vst.msk [vmem:[#allocation2 + $0xc] sm:$0xff] %vm1330_vm3, %v1252_v63  ;;  %v2245_v3 = vld [vmem:[#allocation2 + $0x1] sm:$0xff]  ;;  %v1895_v7 = vsel %vm1799_vm4, %v1767_v2, 0.0 }
  0xde   : > { %v2606_v4 = vld [vmem:[#allocation2 + $0x2] sm:$0xff]  ;;  %v2373_v9 = vsel %vm2277_vm5, %v2245_v3, 0.0  ;;  %v12755_v45 = vpop.f32.mrf.mxu3 }
  0xdf   : > { %v1395_v10 = vld [vmem:[#allocation2 + $0x3] sm:$0xff]  ;;  %v2734_v14 = vsel %vm2638_vm6, %v2606_v4, 0.0  ;;  %1353 = vst.msk [vmem:[#allocation2 + $0xb4] sm:$0xff] %vm1330_vm3, %v12755_v45  ;;  %v12760_v50 = vpop.f32.mrf.mxu1 }
  0xe0   : > { %v1491_v17 = vsel %vm1363_vm7, %v1395_v10, %v1250_v59  ;;  %1342 = vst.msk [vmem:[#allocation2 + $0x5c] sm:$0xff] %vm1330_vm3, %v12760_v50 }
  0xe1   : > { %v1683_v20 = vmax.f32 %v1491_v17, %v1250_v59 }
  0xe3   : > { %v12735_v27 = vpop.f32.mrf.mxu2 }
  0xe4   : > { %v1255_v5 = vpop.f32.mrf.mxu0  ;;  %v1768_v6 = vld [vmem:[#allocation2 + $0x8] sm:$0xff]  ;;  %1344 = vst.msk [vmem:[#allocation2 + $0x6c] sm:$0xff] %vm1330_vm3, %v12735_v27 }
  0xe5   : > { %v2246_v8 = vld [vmem:[#allocation2 + $0x9] sm:$0xff]  ;;  %1333 = vst.msk [vmem:[#allocation2 + $0x14] sm:$0xff] %vm1330_vm3, %v1255_v5  ;;  %v1927_v11 = vpack.c.bf16 %v1768_v6, %v1895_v7 }
  0xe6   : > { %v2405_v12 = vpack.c.bf16 %v2246_v8, %v2373_v9  ;;  %v2607_v13 = vld [vmem:[#allocation2 + $0xa] sm:$0xff]  ;;  %v12769_v54 = vpop.f32.mrf.mxu3 }
  0xe7   : > { %v2766_v15 = vpack.c.bf16 %v2607_v13, %v2734_v14  ;;  %11177 = vmatmul.msk.bf16.vlgmr.msrb.gmra.mxu1 %vm1330_vm3, %v1927_v11  ;;  %v1396_v18 = vld [vmem:[#allocation2 + $0xb] sm:$0xff]  ;;  %1354 = vst.msk [vmem:[#allocation2 + $0xbc] sm:$0xff] %vm1330_vm3, %v12769_v54 }
  0xe8   : > { %11225 = vmatmul.msk.bf16.vlgmr.msrb.gmra.mxu3 %vm1330_vm3, %v2405_v12  ;;  %v1555_v19 = vld [vmem:[#allocation2 + $0x5] sm:$0xff]  ;;  %v1684_v21 = vmax.f32 %v1396_v18, %v1252_v63 }
  0xe9   : > { %11249 = vmatmul.msk.bf16.vlgmr.msrb.gmra.mxu0 %vm1330_vm3, %v2766_v15  ;;  %v1715_v24 = vmax.f32 %v1683_v20, %v1555_v19  ;;  %v730_v15 = vadd.s32 56, %v12707_v62 }
  0xeb   : > { %v12750_v39 = vpop.f32.mrf.mxu2 }
  0xec   : > { %v1257_v22 = vpop.f32.mrf.mxu0  ;;  %v1556_v23 = vld [vmem:[#allocation2 + $0xd] sm:$0xff]  ;;  %1345 = vst.msk [vmem:[#allocation2 + $0x74] sm:$0xff] %vm1330_vm3, %v12750_v39 }
  0xed   : > { %1334 = vst.msk [vmem:[#allocation2 + $0x1c] sm:$0xff] %vm1330_vm3, %v1257_v22  ;;  %v1716_v25 = vmax.f32 %v1684_v21, %v1556_v23  ;;  %v1769_v28 = vld [vmem:[#allocation2 + $0x10] sm:$0xff] }
  0xee   : > { %v2247_v31 = vld [vmem:[#allocation2 + $0x11] sm:$0xff]  ;;  %v12785_v8 = vpop.f32.mrf.mxu3 }
  0xef   : > { %v1747_v26 = vpack.c.bf16 %v1716_v25, %v1715_v24  ;;  %v2608_v35 = vld [vmem:[#allocation2 + $0x12] sm:$0xff]  ;;  %1355 = vst.msk [vmem:[#allocation2 + $0xc4] sm:$0xff] %vm1330_vm3, %v12785_v8 }
  0xf0   : > { %v1397_v40 = vld [vmem:[#allocation2 + $0x13] sm:$0xff] }
  0xf1   : > { %11201 = vmatmul.msk.bf16.vlgmr.msrb.gmra.mxu2 %vm1330_vm3, %v1747_v26  ;;  %v1685_v43 = vmax.f32 %v1397_v40, %v1255_v5 }
  0xf3   : > { %v12764_v52 = vpop.f32.mrf.mxu2 }
  0xf4   : > { %v12740_v29 = vpop.f32.mrf.mxu0  ;;  %v1770_v30 = vld [vmem:[#allocation2 + $0x18] sm:$0xff]  ;;  %1346 = vst.msk [vmem:[#allocation2 + $0x7c] sm:$0xff] %vm1330_vm3, %v12764_v52 }
  0xf5   : > { %v2248_v32 = vld [vmem:[#allocation2 + $0x19] sm:$0xff]  ;;  %1335 = vst.msk [vmem:[#allocation2 + $0x24] sm:$0xff] %vm1330_vm3, %v12740_v29  ;;  %v1928_v33 = vpack.c.bf16 %v1770_v30, %v1769_v28 }
  0xf6   : > { %v2406_v34 = vpack.c.bf16 %v2248_v32, %v2247_v31  ;;  %v2609_v36 = vld [vmem:[#allocation2 + $0x1a] sm:$0xff]  ;;  %v12796_v18 = vpop.f32.mrf.mxu3 }
  0xf7   : > { %v2767_v38 = vpack.c.bf16 %v2609_v36, %v2608_v35  ;;  %11178 = vmatmul.msk.bf16.gmra.mxu1 %vm1330_vm3, %v1928_v33  ;;  %v1398_v41 = vld [vmem:[#allocation2 + $0x1b] sm:$0xff]  ;;  %1356 = vst.msk [vmem:[#allocation2 + $0xcc] sm:$0xff] %vm1330_vm3, %v12796_v18  ;;  %v731_v33 = vadd.s32 64, %v12707_v62 }
  0xf8   : > { %11226 = vmatmul.msk.bf16.gmra.mxu3 %vm1330_vm3, %v2406_v34  ;;  %v1557_v42 = vld [vmem:[#allocation2 + $0x15] sm:$0xff]  ;;  %v1686_v44 = vmax.f32 %v1398_v41, %v1257_v22 }
  0xf9   : > { %11250 = vmatmul.msk.bf16.gmra.mxu0 %vm1330_vm3, %v2767_v38  ;;  %v1717_v48 = vmax.f32 %v1685_v43, %v1557_v42  ;;  %v12820_v42 = vand.u32 63, %v731_v33 }
  0xfb   : > { %v12779_v2 = vpop.f32.mrf.mxu2  ;;  %16002 = vst [vmem:[#allocation20_spill] sm:$0xff] %v12820_v42  ;;  %vm1807_vm9 = vcmp.ge.s32.totalorder %v12820_v42, 4  ;;  %vm2285_vm10 = vcmp.ge.s32.totalorder %v12820_v42, 3  ;;  %vm15813_vm11 = vcmp.ge.s32.totalorder %v12820_v42, 2  ;;  %vm1371_vm12 = vcmp.ge.s32.totalorder %v12820_v42, 1 }
  0xfc   : > { %v1262_v46 = vpop.f32.mrf.mxu0  ;;  %v1558_v47 = vld [vmem:[#allocation2 + $0x1d] sm:$0xff]  ;;  %1347 = vst.msk [vmem:[#allocation2 + $0x84] sm:$0xff] %vm1330_vm3, %v12779_v2 }
  0xfd   : > { %1336 = vst.msk [vmem:[#allocation2 + $0x2c] sm:$0xff] %vm1330_vm3, %v1262_v46  ;;  %v1718_v49 = vmax.f32 %v1686_v44, %v1558_v47  ;;  %v1771_v53 = vld [vmem:[#allocation2 + $0x20] sm:$0xff] }
  0xfe   : > { %v2249_v57 = vld [vmem:[#allocation2 + $0x21] sm:$0xff]  ;;  %v12815_v35 = vpop.f32.mrf.mxu3 }
  0xff   : > { %v1748_v51 = vpack.c.bf16 %v1718_v49, %v1717_v48  ;;  %v2610_v61 = vld [vmem:[#allocation2 + $0x22] sm:$0xff]  ;;  %1357 = vst.msk [vmem:[#allocation2 + $0xd4] sm:$0xff] %vm1330_vm3, %v12815_v35 }
 0x100   : > { %v1399_v3 = vld [vmem:[#allocation2 + $0x23] sm:$0xff] }
 0x101   : > { %11202 = vmatmul.msk.bf16.gmra.mxu2 %vm1330_vm3, %v1748_v51  ;;  %v1687_v6 = vmax.f32 %v1399_v3, %v12740_v29  ;;  %v12804_v29 = vand.u32 63, %v730_v15 }
 0x103   : > { %v12790_v14 = vpop.f32.mrf.mxu2  ;;  %16001 = vst [vmem:[#allocation19_spill] sm:$0xff] %v12804_v29  ;;  %vm1530_vm8 = vcmp.le.s32.totalorder %v12804_v29, 62 }
 0x104   : > { %v12771_v55 = vpop.f32.mrf.mxu0  ;;  %v1772_v56 = vld [vmem:[#allocation2 + $0x28] sm:$0xff]  ;;  %1348 = vst.msk [vmem:[#allocation2 + $0x8c] sm:$0xff] %vm1330_vm3, %v12790_v14 }
 0x105   : > { %v2250_v58 = vld [vmem:[#allocation2 + $0x29] sm:$0xff]  ;;  %1337 = vst.msk [vmem:[#allocation2 + $0x34] sm:$0xff] %vm1330_vm3, %v12771_v55  ;;  %v1929_v59 = vpack.c.bf16 %v1772_v56, %v1771_v53 }
 0x106   : > { %v2407_v60 = vpack.c.bf16 %v2250_v58, %v2249_v57  ;;  %v2611_v63 = vld [vmem:[#allocation2 + $0x2a] sm:$0xff] }
 0x107   : > { %v2768_v1 = vpack.c.bf16 %v2611_v63, %v2610_v61  ;;  %11179 = vmatmul.msk.bf16.gmra.mxu1 %vm1330_vm3, %v1929_v59  ;;  %v1400_v4 = vld [vmem:[#allocation2 + $0x2b] sm:$0xff] }
 0x108   : > { %11227 = vmatmul.msk.bf16.gmra.mxu3 %vm1330_vm3, %v2407_v60  ;;  %v1559_v5 = vld [vmem:[#allocation2 + $0x25] sm:$0xff]  ;;  %v1688_v7 = vmax.f32 %v1400_v4, %v1262_v46 }
 0x109   : > { %11251 = vmatmul.msk.bf16.gmra.mxu0 %vm1330_vm3, %v2768_v1  ;;  %v1719_v11 = vmax.f32 %v1687_v6, %v1559_v5 }
 0x10b   : > { %v12808_v30 = vpop.f32.mrf.mxu2 }
 0x10c   : > { %v1267_v9 = vpop.f32.mrf.mxu0  ;;  %v1560_v10 = vld [vmem:[#allocation2 + $0x2d] sm:$0xff]  ;;  %1349 = vst.msk [vmem:[#allocation2 + $0x94] sm:$0xff] %vm1330_vm3, %v12808_v30 }
 0x10d   : > { %1338 = vst.msk [vmem:[#allocation2 + $0x3c] sm:$0xff] %vm1330_vm3, %v1267_v9  ;;  %v1720_v12 = vmax.f32 %v1688_v7, %v1560_v10  ;;  %v1773_v17 = vld [vmem:[#allocation2 + $0x30] sm:$0xff] }
 0x10e   : > { %v2251_v21 = vld [vmem:[#allocation2 + $0x31] sm:$0xff] }
 0x10f   : > { %v1749_v13 = vpack.c.bf16 %v1720_v12, %v1719_v11  ;;  %v2612_v25 = vld [vmem:[#allocation2 + $0x32] sm:$0xff] }
 0x110   : > { %v1401_v31 = vld [vmem:[#allocation2 + $0x33] sm:$0xff] }
 0x111   : > { %11203 = vmatmul.msk.bf16.gmra.mxu2 %vm1330_vm3, %v1749_v13  ;;  %v1689_v36 = vmax.f32 %v1401_v31, %v12771_v55  ;;  %v12833_v55 = vpop.f32.mrf.mxu3 }
 0x112   : > { %1358 = vst.msk [vmem:[#allocation2 + $0xdc] sm:$0xff] %vm1330_vm3, %v12833_v55 }
 0x113   : > { %v12825_v47 = vpop.f32.mrf.mxu2 }
 0x114   : > { %v12798_v19 = vpop.f32.mrf.mxu0  ;;  %v1774_v20 = vld [vmem:[#allocation2 + $0x38] sm:$0xff]  ;;  %1350 = vst.msk [vmem:[#allocation2 + $0x9c] sm:$0xff] %vm1330_vm3, %v12825_v47 }
 0x115   : > { %v2252_v22 = vld [vmem:[#allocation2 + $0x39] sm:$0xff]  ;;  %1339 = vst.msk [vmem:[#allocation2 + $0x44] sm:$0xff] %vm1330_vm3, %v12798_v19  ;;  %v1930_v23 = vpack.c.bf16 %v1774_v20, %v1773_v17 }
 0x116   : > { %v2408_v24 = vpack.c.bf16 %v2252_v22, %v2251_v21  ;;  %v2613_v26 = vld [vmem:[#allocation2 + $0x3a] sm:$0xff] }
 0x117   : > { %v2769_v28 = vpack.c.bf16 %v2613_v26, %v2612_v25  ;;  %11180 = vmatmul.msk.bf16.gmra.mxu1 %vm1330_vm3, %v1930_v23  ;;  %v1402_v32 = vld [vmem:[#allocation2 + $0x3b] sm:$0xff] }
 0x118   : > { %11228 = vmatmul.msk.bf16.gmra.mxu3 %vm1330_vm3, %v2408_v24  ;;  %v1561_v34 = vld [vmem:[#allocation2 + $0x35] sm:$0xff]  ;;  %v1690_v38 = vmax.f32 %v1402_v32, %v1267_v9 }
 0x119   : > { %11252 = vmatmul.msk.bf16.gmra.mxu0 %vm1330_vm3, %v2769_v28  ;;  %v1721_v44 = vmax.f32 %v1689_v36, %v1561_v34  ;;  %v12854_v12 = vpop.f32.mrf.mxu3  ;;  %v1778_v22 = vld [vmem:[#allocation2 + $0x58] sm:$0xff] }
 0x11a   : > { %1359 = vst.msk [vmem:[#allocation2 + $0xe4] sm:$0xff] %vm1330_vm3, %v12854_v12  ;;  %v2256_v23 = vld [vmem:[#allocation2 + $0x59] sm:$0xff] }
 0x11b   : > { %v12845_v6 = vpop.f32.mrf.mxu2  ;;  %v2617_v28 = vld [vmem:[#allocation2 + $0x5a] sm:$0xff] }
 0x11c   : > { %v1272_v40 = vpop.f32.mrf.mxu0  ;;  %v1562_v41 = vld [vmem:[#allocation2 + $0x3d] sm:$0xff]  ;;  %1351 = vst.msk [vmem:[#allocation2 + $0xa4] sm:$0xff] %vm1330_vm3, %v12845_v6 }
 0x11d   : > { %1340 = vst.msk [vmem:[#allocation2 + $0x4c] sm:$0xff] %vm1330_vm3, %v1272_v40  ;;  %v1658_v43 = vsel %vm1530_vm8, %v1562_v41, %v1267_v9  ;;  %v1775_v49 = vld [vmem:[#allocation2 + $0x40] sm:$0xff] }
 0x11e   : > { %v1722_v46 = vmax.f32 %v1690_v38, %v1658_v43  ;;  %v2253_v51 = vld [vmem:[#allocation2 + $0x41] sm:$0xff]  ;;  %v1903_v57 = vsel %vm1807_vm9, %v1775_v49, 0.0  ;;  %v1565_v43 = vld [vmem:[#allocation2 + $0x55] sm:$0xff] }
 0x11f   : > { %v2614_v53 = vld [vmem:[#allocation2 + $0x42] sm:$0xff]  ;;  %v2381_v61 = vsel %vm2285_vm10, %v2253_v51, 0.0 }
 0x120   : > { %v1750_v48 = vpack.c.bf16 %v1722_v46, %v1721_v44  ;;  %v2742_v1 = vsel %vm15813_vm11, %v2614_v53, 0.0  ;;  %v1403_v3 = vld [vmem:[#allocation2 + $0x43] sm:$0xff] }
 0x121   : > { %v1499_v9 = vsel %vm1371_vm12, %v1403_v3, %v12798_v19  ;;  %v12862_v31 = vpop.f32.mrf.mxu3  ;;  %v1566_v41 = vld [vmem:[#allocation2 + $0x5d] sm:$0xff] }
 0x122   : > { %11204 = vmatmul.msk.bf16.gmra.mxu2 %vm1330_vm3, %v1750_v48  ;;  %v1691_v13 = vmax.f32 %v1499_v9, %v12798_v19  ;;  %1360 = vst.msk [vmem:[#allocation2 + $0xec] sm:$0xff] %vm1330_vm3, %v12862_v31  ;;  %v1406_v19 = vld [vmem:[#allocation2 + $0x5b] sm:$0xff] }
 0x123   : > { %v12860_v24 = vpop.f32.mrf.mxu2  ;;  %v1694_v38 = vmax.f32 %v1406_v19, %v12760_v50  ;;  %v1779_v51 = vld [vmem:[#allocation2 + $0x60] sm:$0xff]  ;;  %v1780_v50 = vld [vmem:[#allocation2 + $0x68] sm:$0xff] }
 0x124   : > { %v1776_v56 = vld [vmem:[#allocation2 + $0x48] sm:$0xff]  ;;  %v1777_v21 = vld [vmem:[#allocation2 + $0x50] sm:$0xff]  ;;  %1352 = vst.msk [vmem:[#allocation2 + $0xac] sm:$0xff] %vm1330_vm3, %v12860_v24 }
 0x125   : > { %v1404_v58 = vld [vmem:[#allocation2 + $0x4b] sm:$0xff]  ;;  %v1931_v59 = vpack.c.bf16 %v1776_v56, %v1903_v57  ;;  %v1932_v32 = vpack.c.bf16 %v1778_v22, %v1777_v21  ;;  %v1405_v33 = vld [vmem:[#allocation2 + $0x53] sm:$0xff]  ;;  %v1726_v46 = vmax.f32 %v1694_v38, %v1566_v41  ;;  %v2257_v53 = vld [vmem:[#allocation2 + $0x61] sm:$0xff] }
 0x126   : > { %v2254_v60 = vld [vmem:[#allocation2 + $0x49] sm:$0xff]  ;;  %v1692_v7 = vmax.f32 %v1404_v58, %v1272_v40  ;;  %v2255_v25 = vld [vmem:[#allocation2 + $0x51] sm:$0xff]  ;;  %v1693_v40 = vmax.f32 %v1405_v33, %v12744_v37  ;;  %v2260_v22 = vld [vmem:[#allocation2 + $0x79] sm:$0xff] }
 0x127   : > { %v2615_v63 = vld [vmem:[#allocation2 + $0x4a] sm:$0xff]  ;;  %v2409_v4 = vpack.c.bf16 %v2254_v60, %v2381_v61  ;;  %11181 = vmatmul.msk.bf16.gmra.mxu1 %vm1330_vm3, %v1931_v59  ;;  %v2616_v26 = vld [vmem:[#allocation2 + $0x52] sm:$0xff]  ;;  %v2410_v34 = vpack.c.bf16 %v2256_v23, %v2255_v25  ;;  %v2618_v57 = vld [vmem:[#allocation2 + $0x62] sm:$0xff]  ;;  %v1933_v60 = vpack.c.bf16 %v1780_v50, %v1779_v51 }
 0x128   : > { %v2770_v5 = vpack.c.bf16 %v2615_v63, %v2742_v1  ;;  %v1564_v10 = vld [vmem:[#allocation2 + $0x4d] sm:$0xff]  ;;  %v1563_v11 = vld [vmem:[#allocation2 + $0x45] sm:$0xff]  ;;  %v2771_v36 = vpack.c.bf16 %v2617_v28, %v2616_v26  ;;  %v1725_v48 = vmax.f32 %v1693_v40, %v1565_v43  ;;  %v2621_v25 = vld [vmem:[#allocation2 + $0x7a] sm:$0xff] }
 0x129   : > { %11229 = vmatmul.msk.bf16.gmra.mxu3 %vm1330_vm3, %v2409_v4  ;;  %v1724_v15 = vmax.f32 %v1692_v7, %v1564_v10  ;;  %v1723_v17 = vmax.f32 %v1691_v13, %v1563_v11  ;;  %v12873_v44 = vpop.f32.mrf.mxu3  ;;  %v2258_v56 = vld [vmem:[#allocation2 + $0x69] sm:$0xff]  ;;  %v738_v11 = vadd.s32 120, %v12707_v62  ;;  %v2620_v23 = vld [vmem:[#allocation2 + $0x72] sm:$0xff]  ;;  %v1410_v26 = vld [vmem:[#allocation2 + $0x7b] sm:$0xff] }
 0x12a   : > { %11253 = vmatmul.msk.bf16.gmra.mxu0 %vm1330_vm3, %v2770_v5  ;;  %1361 = vst.msk [vmem:[#allocation2 + $0xf4] sm:$0xff] %vm1330_vm3, %v12873_v44  ;;  %v1752_v49 = vpack.c.bf16 %v1726_v46, %v1725_v48  ;;  %v2619_v58 = vld [vmem:[#allocation2 + $0x6a] sm:$0xff]  ;;  %v2411_v63 = vpack.c.bf16 %v2258_v56, %v2257_v53  ;;  %v1570_v33 = vld [vmem:[#allocation2 + $0x7d] sm:$0xff]  ;;  %v1698_v40 = vmax.f32 %v1410_v26, %v12764_v52  ;;  %v1569_v41 = vld [vmem:[#allocation2 + $0x75] sm:$0xff] }
 0x12b   : > { %v1751_v20 = vpack.c.bf16 %v1724_v15, %v1723_v17  ;;  %v1408_v37 = vld [vmem:[#allocation2 + $0x6b] sm:$0xff]  ;;  %v1407_v61 = vld [vmem:[#allocation2 + $0x63] sm:$0xff]  ;;  %v2772_v1 = vpack.c.bf16 %v2619_v58, %v2618_v57  ;;  %v1782_v17 = vld [vmem:[#allocation2 + $0x78] sm:$0xff] }
 0x12c   : > { %v1696_v3 = vmax.f32 %v1408_v37, %v12735_v27  ;;  %v1695_v4 = vmax.f32 %v1407_v61, %v12727_v16  ;;  %v1567_v5 = vld [vmem:[#allocation2 + $0x65] sm:$0xff]  ;;  %v1568_v7 = vld [vmem:[#allocation2 + $0x6d] sm:$0xff]  ;;  %v12889_v27 = vand.u32 63, %v738_v11 }
 0x12d   : > { %v1781_v15 = vld [vmem:[#allocation2 + $0x70] sm:$0xff]  ;;  %v11969_v21 = vld [vmem:[%s12598_s2 + $0x40] sm:$0xff]  ;;  %v1783_v51 = vld [vmem:[#allocation2 + $0x80] sm:$0xff] }
 0x12e   : > { %v1727_v9 = vmax.f32 %v1695_v4, %v1567_v5  ;;  %v1728_v10 = vmax.f32 %v1696_v3, %v1568_v7  ;;  %16003 = vst [vmem:[#allocation21_spill] sm:$0xff] %v12889_v27  ;;  %3319 = vmatpush.bf16.msra.mxu2 %v11969_v21  ;;  %v1409_v16 = vld [vmem:[#allocation2 + $0x73] sm:$0xff]  ;;  %v1934_v28 = vpack.c.bf16 %v1782_v17, %v1781_v15  ;;  %vm15848_vm13 = vcmp.le.s32.totalorder %v12889_v27, 62  ;;  %v2261_v50 = vld [vmem:[#allocation2 + $0x81] sm:$0xff]  ;;  %v2262_v58 = vld [vmem:[#allocation2 + $0x89] sm:$0xff] }
 0x12f   : > { %v1697_v38 = vmax.f32 %v1409_v16, %v12750_v39  ;;  %v1666_v43 = vsel %vm15848_vm13, %v1570_v33, %v12764_v52  ;;  %v2622_v53 = vld [vmem:[#allocation2 + $0x82] sm:$0xff]  ;;  %v1412_v3 = vld [vmem:[#allocation2 + $0x8b] sm:$0xff]  ;;  %v2625_v33 = vld [vmem:[#allocation2 + $0x9a] sm:$0xff] }
 0x130   : > { %v1753_v13 = vpack.c.bf16 %v1728_v10, %v1727_v9  ;;  %v1411_v56 = vld [vmem:[#allocation2 + $0x83] sm:$0xff]  ;;  %v1572_v17 = vld [vmem:[#allocation2 + $0x8d] sm:$0xff] }
 0x131   : > { %v12878_v59 = vpop.f32.mrf.mxu3  ;;  %v1729_v48 = vmax.f32 %v1697_v38, %v1569_v41  ;;  %v1784_v52 = vld [vmem:[#allocation2 + $0x88] sm:$0xff]  ;;  %v11972_v10 = vld [vmem:[%s12598_s2 + $0x58] sm:$0xff]  ;;  %v1413_v38 = vld [vmem:[#allocation2 + $0x93] sm:$0xff] }
 0x132   : > { %11205 = vmatmul.msk.bf16.gmra.mxu2 %vm1330_vm3, %v1751_v20  ;;  %1362 = vst.msk [vmem:[#allocation2 + $0xfc] sm:$0xff] %vm1330_vm3, %v12878_v59  ;;  %v2259_v20 = vld [vmem:[#allocation2 + $0x71] sm:$0xff]  ;;  %v1571_v15 = vld [vmem:[#allocation2 + $0x85] sm:$0xff]  ;;  %3647 = vmatpush.bf16.msra.mxu3 %v11972_v10 }
 0x133   : > { %v2412_v19 = vpack.c.bf16 %v2260_v22, %v2259_v20  ;;  %v1788_v10 = vld [vmem:[#allocation2 + $0xa8] sm:$0xff] }
 0x137   : > { %11182 = vmatmul.msk.bf16.gmra.mxu1 %vm1330_vm3, %v1932_v32  ;;  %v2773_v32 = vpack.c.bf16 %v2621_v25, %v2620_v23 }
 0x139   : > { %11230 = vmatmul.msk.bf16.gmra.mxu3 %vm1330_vm3, %v2410_v34  ;;  %v739_v34 = vadd.s32 128, %v12707_v62 }
 0x13a   : > { %11254 = vmatmul.msk.bf16.gmra.mxu0 %vm1330_vm3, %v2771_v36  ;;  %v11967_v36 = vld [vmem:[%s12598_s2 + $0x30] sm:$0xff] }
 0x13b   : > { %3086 = vmatpush.bf16.msra.mxu1 %v11967_v36  ;;  %v12903_v46 = vand.u32 63, %v739_v34 }
 0x13d   : > { %16004 = vst [vmem:[#allocation22_spill] sm:$0xff] %v12903_v46  ;;  %vm1815_vm14 = vcmp.ge.s32.totalorder %v12903_v46, 4  ;;  %vm15814_vm15 = vcmp.ge.s32.totalorder %v12903_v46, 3  ;;  %vm15811_vm0 = vcmp.ge.s32.totalorder %v12903_v46, 2  ;;  %vm1379_vm1 = vcmp.ge.s32.totalorder %v12903_v46, 1 }
 0x13e   : > { %v1911_v57 = vsel %vm1815_vm14, %v1783_v51, 0.0  ;;  %v2389_v37 = vsel %vm15814_vm15, %v2261_v50, 0.0  ;;  %v2750_v61 = vsel %vm15811_vm0, %v2622_v53, 0.0  ;;  %v1701_v50 = vmax.f32 %v1413_v38, %v12808_v30 }
 0x13f   : > { %v1935_v5 = vpack.c.bf16 %v1784_v52, %v1911_v57  ;;  %v2413_v7 = vpack.c.bf16 %v2262_v58, %v2389_v37  ;;  %v1574_v52 = vld [vmem:[#allocation2 + $0x9d] sm:$0xff] }
 0x142   : > { %11206 = vmatmul.msk.bf16.gmra.mxu2 %vm1330_vm3, %v1752_v49  ;;  %v1730_v49 = vmax.f32 %v1698_v40, %v1666_v43  ;;  %v1414_v40 = vld [vmem:[#allocation2 + $0x9b] sm:$0xff] }
 0x143   : > { %v1702_v53 = vmax.f32 %v1414_v40, %v12825_v47 }
 0x144   : > { %v1754_v39 = vpack.c.bf16 %v1730_v49, %v1729_v48 }
 0x147   : > { %11183 = vmatmul.msk.bf16.gmra.mxu1 %vm1330_vm3, %v1933_v60  ;;  %v2623_v60 = vld [vmem:[#allocation2 + $0x8a] sm:$0xff] }
 0x148   : > { %v2774_v9 = vpack.c.bf16 %v2623_v60, %v2750_v61 }
 0x149   : > { %11231 = vmatmul.msk.bf16.gmra.mxu3 %vm1330_vm3, %v2411_v63 }
 0x14a   : > { %11255 = vmatmul.msk.bf16.gmra.mxu0 %vm1330_vm3, %v2772_v1  ;;  %v1507_v1 = vsel %vm1379_vm1, %v1411_v56, %v12779_v2  ;;  %v1573_v56 = vld [vmem:[#allocation2 + $0x95] sm:$0xff] }
 0x14b   : > { %v1699_v11 = vmax.f32 %v1507_v1, %v12779_v2  ;;  %v1786_v2 = vld [vmem:[#allocation2 + $0x98] sm:$0xff]  ;;  %v1733_v61 = vmax.f32 %v1701_v50, %v1573_v56 }
 0x14c   : > { %v1790_v56 = vld [vmem:[#allocation2 + $0xb8] sm:$0xff] }
 0x14d   : > { %v1731_v22 = vmax.f32 %v1699_v11, %v1571_v15  ;;  %v2265_v11 = vld [vmem:[#allocation2 + $0xa1] sm:$0xff]  ;;  %v2627_v15 = vld [vmem:[#allocation2 + $0xaa] sm:$0xff] }
 0x152   : > { %11207 = vmatmul.msk.bf16.gmra.mxu2 %vm1330_vm3, %v1753_v13  ;;  %v1700_v13 = vmax.f32 %v1412_v3, %v12790_v14  ;;  %v2264_v14 = vld [vmem:[#allocation2 + $0x99] sm:$0xff] }
 0x154   : > { %v1732_v23 = vmax.f32 %v1700_v13, %v1572_v17  ;;  %v2266_v13 = vld [vmem:[#allocation2 + $0xa9] sm:$0xff] }
 0x156   : > { %v1755_v16 = vpack.c.bf16 %v1732_v23, %v1731_v22  ;;  %v1415_v22 = vld [vmem:[#allocation2 + $0xa3] sm:$0xff]  ;;  %v1416_v23 = vld [vmem:[#allocation2 + $0xab] sm:$0xff] }
 0x157   : > { %11184 = vmatmul.msk.bf16.gmra.mxu1 %vm1330_vm3, %v1934_v28  ;;  %v1785_v28 = vld [vmem:[#allocation2 + $0x90] sm:$0xff] }
 0x158   : > { %v1936_v48 = vpack.c.bf16 %v1786_v2, %v1785_v28 }
 0x159   : > { %11232 = vmatmul.msk.bf16.gmra.mxu3 %vm1330_vm3, %v2412_v19  ;;  %v2263_v19 = vld [vmem:[#allocation2 + $0x91] sm:$0xff] }
 0x15a   : > { %11256 = vmatmul.msk.bf16.gmra.mxu0 %vm1330_vm3, %v2773_v32  ;;  %v2624_v32 = vld [vmem:[#allocation2 + $0x92] sm:$0xff]  ;;  %v2414_v49 = vpack.c.bf16 %v2264_v14, %v2263_v19  ;;  %v1703_v19 = vmax.f32 %v1415_v22, %v12845_v6  ;;  %v1704_v14 = vmax.f32 %v1416_v23, %v12860_v24  ;;  %v746_v24 = vadd.s32 184, %v12707_v62 }
 0x15b   : > { %v2775_v51 = vpack.c.bf16 %v2625_v33, %v2624_v32  ;;  %v12941_v32 = vld [vmem:[#allocation2 + $0xad] sm:$0xff]  ;;  %v12943_v33 = vld [vmem:[#allocation2 + $0xa5] sm:$0xff]  ;;  %v12964_v22 = vld [vmem:[#allocation2 + $0xb5] sm:$0xff] }
 0x15c   : > { %v1736_v38 = vmax.f32 %v1704_v14, %v12941_v32 }
 0x162   : > { %11208 = vmatmul.msk.bf16.gmra.mxu2 %vm1330_vm3, %v1754_v39 }
 0x164   : > { %v2016_v63 = vpop.f32.mrf.mxu1 }
 0x166   : > { %v2855_v4 = vpop.f32.mrf.mxu0 }
 0x167   : > { %11185 = vmatmul.msk.bf16.gmra.mxu1 %vm1330_vm3, %v1935_v5 }
 0x169   : > { %11233 = vmatmul.msk.bf16.gmra.mxu3 %vm1330_vm3, %v2413_v7 }
 0x16a   : > { %11257 = vmatmul.msk.bf16.gmra.mxu0 %vm1330_vm3, %v2774_v9  ;;  %v1787_v9 = vld [vmem:[#allocation2 + $0xa0] sm:$0xff] }
 0x16b   : > { %v2494_v20 = vpop.f32.mrf.mxu3  ;;  %v1937_v28 = vpack.c.bf16 %v1788_v10, %v1787_v9  ;;  %v1417_v10 = vld [vmem:[#allocation2 + $0xb3] sm:$0xff] }
 0x16c   : > { %v2018_v21 = vpop.f32.mrf.mxu1 }
 0x16e   : > { %v2857_v25 = vpop.f32.mrf.mxu0 }
 0x172   : > { %11209 = vmatmul.msk.bf16.gmra.mxu2 %vm1330_vm3, %v1755_v16 }
 0x173   : > { %v2496_v26 = vpop.f32.mrf.mxu3 }
 0x174   : > { %v2021_v34 = vpop.f32.mrf.mxu1  ;;  %v2165_v36 = vpop.f32.mrf.mxu2 }
 0x175   : > { %v2166_v41 = vadd.f32 %v2165_v36, %v2016_v63  ;;  %v1734_v63 = vmax.f32 %v1702_v53, %v1574_v52  ;;  %v2267_v52 = vld [vmem:[#allocation2 + $0xb1] sm:$0xff] }
 0x176   : > { %v2860_v43 = vpop.f32.mrf.mxu0 }
 0x177   : > { %v2574_v39 = vadd.f32 %v2494_v20, %v2166_v41  ;;  %11186 = vmatmul.msk.bf16.gmra.mxu1 %vm1330_vm3, %v1936_v48  ;;  %v1756_v7 = vpack.c.bf16 %v1734_v63, %v1733_v61  ;;  %v1735_v48 = vmax.f32 %v1703_v19, %v12943_v33  ;;  %v2628_v61 = vld [vmem:[#allocation2 + $0xb2] sm:$0xff]  ;;  %v2629_v63 = vld [vmem:[#allocation2 + $0xba] sm:$0xff] }
 0x179   : > { %11234 = vmatmul.msk.bf16.gmra.mxu3 %vm1330_vm3, %v2414_v49  ;;  %v12931_v57 = vadd.f32 %v2855_v4, %v2574_v39  ;;  %v2626_v4 = vld [vmem:[#allocation2 + $0xa2] sm:$0xff]  ;;  %v1757_v39 = vpack.c.bf16 %v1736_v38, %v1735_v48 }
 0x17a   : > { %11258 = vmatmul.msk.bf16.gmra.mxu0 %vm1330_vm3, %v2775_v51  ;;  %v2776_v2 = vpack.c.bf16 %v2627_v15, %v2626_v4  ;;  %v747_v4 = vadd.s32 192, %v12707_v62 }
 0x17b   : > { %v2499_v58 = vpop.f32.mrf.mxu3 }
 0x17c   : > { %v2023_v37 = vpop.f32.mrf.mxu1  ;;  %v2167_v60 = vpop.f32.mrf.mxu2 }
 0x17d   : > { %v2168_v1 = vadd.f32 %v2167_v60, %v2018_v21  ;;  %v2268_v60 = vld [vmem:[#allocation2 + $0xb9] sm:$0xff] }
 0x17e   : > { %v2862_v3 = vpop.f32.mrf.mxu0 }
 0x17f   : > { %v2575_v5 = vadd.f32 %v2496_v26, %v2168_v1  ;;  %v2415_v26 = vpack.c.bf16 %v2266_v13, %v2265_v11  ;;  %v2777_v11 = vpack.c.bf16 %v2629_v63, %v2628_v61  ;;  %v12956_v13 = vld [vmem:[#allocation2 + $0xbd] sm:$0xff]  ;;  %v12994_v61 = vld [vmem:[#allocation2 + $0xcb] sm:$0xff] }
 0x181   : > { %v12933_v30 = vadd.f32 %v2857_v25, %v2575_v5  ;;  %v1418_v5 = vld [vmem:[#allocation2 + $0xbb] sm:$0xff] }
 0x182   : > { %11210 = vmatmul.msk.bf16.gmra.mxu2 %vm1330_vm3, %v1756_v7 }
 0x183   : > { %v2501_v47 = vpop.f32.mrf.mxu3 }
 0x184   : > { %v2026_v17 = vpop.f32.mrf.mxu1  ;;  %v2170_v20 = vpop.f32.mrf.mxu2 }
 0x185   : > { %v2171_v16 = vadd.f32 %v2170_v20, %v2021_v34  ;;  %v1706_v20 = vmax.f32 %v1418_v5, %v12769_v54 }
 0x186   : > { %v2865_v21 = vpop.f32.mrf.mxu0 }
 0x187   : > { %v2576_v25 = vadd.f32 %v2499_v58, %v2171_v16  ;;  %11187 = vmatmul.msk.bf16.gmra.mxu1 %vm1330_vm3, %v1937_v28  ;;  %v12953_v58 = vand.u32 63, %v746_v24  ;;  %v12981_v24 = vld [vmem:[#allocation2 + $0xc3] sm:$0xff] }
 0x189   : > { %11235 = vmatmul.msk.bf16.gmra.mxu3 %vm1330_vm3, %v2415_v26  ;;  %v12945_v34 = vadd.f32 %v2860_v43, %v2576_v25  ;;  %v1789_v43 = vld [vmem:[#allocation2 + $0xb0] sm:$0xff]  ;;  %16005 = vst [vmem:[#allocation23_spill] sm:$0xff] %v12953_v58  ;;  %vm15812_vm2 = vcmp.le.s32.totalorder %v12953_v58, 62  ;;  %v12972_v26 = vand.u32 63, %v747_v4 }
 0x18a   : > { %11259 = vmatmul.msk.bf16.gmra.mxu0 %vm1330_vm3, %v2776_v2  ;;  %v1674_v23 = vsel %vm15812_vm2, %v12956_v13, %v12769_v54  ;;  %v2630_v54 = vld [vmem:[#allocation2 + $0xc2] sm:$0xff] }
 0x18b   : > { %v2504_v36 = vpop.f32.mrf.mxu3  ;;  %16006 = vst [vmem:[#allocation24_spill] sm:$0xff] %v12972_v26  ;;  %v1738_v14 = vmax.f32 %v1706_v20, %v1674_v23  ;;  %vm15863_vm0 = vcmp.ge.s32.totalorder %v12972_v26, 4  ;;  %vm15823_vm2 = vcmp.ge.s32.totalorder %v12972_v26, 3  ;;  %vm15815_vm11 = vcmp.ge.s32.totalorder %v12972_v26, 2  ;;  %v13004_v20 = vld [vmem:[#allocation2 + $0xcd] sm:$0xff] }
 0x18c   : > { %v2028_v40 = vpop.f32.mrf.mxu1  ;;  %v2172_v41 = vpop.f32.mrf.mxu2  ;;  %vm1387_vm15 = vcmp.ge.s32.totalorder %v12972_v26, 1 }
 0x18d   : > { %v2173_v6 = vadd.f32 %v2172_v41, %v2023_v37  ;;  %v1791_v41 = vld [vmem:[#allocation2 + $0xc0] sm:$0xff] }
 0x18e   : > { %v2867_v49 = vpop.f32.mrf.mxu0 }
 0x18f   : > { %v2577_v51 = vadd.f32 %v2501_v47, %v2173_v6  ;;  %v1938_v47 = vpack.c.bf16 %v1790_v56, %v1789_v43  ;;  %v2269_v6 = vld [vmem:[#allocation2 + $0xc1] sm:$0xff]  ;;  %v2631_v56 = vld [vmem:[#allocation2 + $0xca] sm:$0xff] }
 0x190   : > { %v2397_v43 = vsel %vm15823_vm2, %v2269_v6, 0.0  ;;  %vm15828_vm2 = vcmp.lt.s32.totalorder %v12804_v29, 62 }
 0x191   : > { %v12950_v50 = vadd.f32 %v2862_v3, %v2577_v51  ;;  %v2416_v3 = vpack.c.bf16 %v2268_v60, %v2267_v52  ;;  %v1792_v51 = vld [vmem:[#allocation2 + $0xc8] sm:$0xff]  ;;  %v1515_v60 = vsel %vm1387_vm15, %v12981_v24, %v12785_v8 }
 0x192   : > { %11211 = vmatmul.msk.bf16.gmra.mxu2 %vm1330_vm3, %v1757_v39  ;;  %v1919_v39 = vsel %vm15863_vm0, %v1791_v41, 0.0  ;;  %v1794_v41 = vld [vmem:[#allocation2 + $0xd8] sm:$0xff] }
 0x193   : > { %v2506_v53 = vpop.f32.mrf.mxu3  ;;  %v1939_v5 = vpack.c.bf16 %v1792_v51, %v1919_v39  ;;  %v2632_v51 = vld [vmem:[#allocation2 + $0xd2] sm:$0xff]  ;;  %v2633_v39 = vld [vmem:[#allocation2 + $0xda] sm:$0xff] }
 0x194   : > { %v2031_v1 = vpop.f32.mrf.mxu1  ;;  %v2175_v37 = vpop.f32.mrf.mxu2 }
 0x195   : > { %v2176_v7 = vadd.f32 %v2175_v37, %v2026_v17  ;;  %v1705_v17 = vmax.f32 %v1417_v10, %v12755_v45 }
 0x196   : > { %v2870_v9 = vpop.f32.mrf.mxu0 }
 0x197   : > { %v2578_v15 = vadd.f32 %v2504_v36, %v2176_v7  ;;  %11188 = vmatmul.msk.bf16.gmra.mxu1 %vm1330_vm3, %v1938_v47  ;;  %v1737_v19 = vmax.f32 %v1705_v17, %v12964_v22 }
 0x199   : > { %11236 = vmatmul.msk.bf16.gmra.mxu3 %vm1330_vm3, %v2416_v3  ;;  %v12970_v16 = vadd.f32 %v2865_v21, %v2578_v15  ;;  %v1758_v48 = vpack.c.bf16 %v1738_v14, %v1737_v19  ;;  %v1707_v3 = vmax.f32 %v1515_v60, %v12785_v8  ;;  %v13002_v15 = vld [vmem:[#allocation2 + $0xc5] sm:$0xff] }
 0x19a   : > { %11260 = vmatmul.msk.bf16.gmra.mxu0 %vm1330_vm3, %v2777_v11  ;;  %v1708_v11 = vmax.f32 %v12994_v61, %v12796_v18 }
 0x19b   : > { %v2509_v28 = vpop.f32.mrf.mxu3 }
 0x19c   : > { %v2033_v2 = vpop.f32.mrf.mxu1  ;;  %v2177_v25 = vpop.f32.mrf.mxu2  ;;  %v1740_v8 = vmax.f32 %v1708_v11, %v13004_v20 }
 0x19d   : > { %v2178_v36 = vadd.f32 %v2177_v25, %v2028_v40  ;;  %v1739_v25 = vmax.f32 %v1707_v3, %v13002_v15  ;;  %v13026_v3 = vld [vmem:[#allocation2 + $0xdd] sm:$0xff] }
 0x19e   : > { %v2872_v38 = vpop.f32.mrf.mxu0 }
 0x19f   : > { %v2579_v45 = vadd.f32 %v2506_v53, %v2178_v36  ;;  %v2270_v53 = vld [vmem:[#allocation2 + $0xc9] sm:$0xff]  ;;  %v1759_v36 = vpack.c.bf16 %v1740_v8, %v1739_v25 }
 0x1a0   : > { %v2417_v47 = vpack.c.bf16 %v2270_v53, %v2397_v43  ;;  %v13013_v43 = vld [vmem:[#allocation2 + $0xd3] sm:$0xff] }
 0x1a1   : > { %v12978_v21 = vadd.f32 %v2867_v49, %v2579_v45  ;;  %v2758_v49 = vsel %vm15815_vm11, %v2630_v54, 0.0  ;;  %v1793_v45 = vld [vmem:[#allocation2 + $0xd0] sm:$0xff]  ;;  %v2272_v54 = vld [vmem:[#allocation2 + $0xd9] sm:$0xff] }
 0x1a2   : > { %11212 = vmatmul.msk.bf16.gmra.mxu2 %vm1330_vm3, %v1758_v48  ;;  %v2778_v10 = vpack.c.bf16 %v2631_v56, %v2758_v49  ;;  %v2271_v48 = vld [vmem:[#allocation2 + $0xd1] sm:$0xff]  ;;  %v13015_v56 = vld [vmem:[#allocation2 + $0xdb] sm:$0xff] }
 0x1a3   : > { %v2511_v40 = vpop.f32.mrf.mxu3 }
 0x1a4   : > { %v2036_v52 = vpop.f32.mrf.mxu1 }
 0x1a5   : > { %v2180_v37 = vpop.f32.mrf.mxu2 }
 0x1a6   : > { %v2181_v7 = vadd.f32 %v2180_v37, %v2031_v1  ;;  %v2418_v37 = vpack.c.bf16 %v2272_v54, %v2271_v48  ;;  %v2274_v54 = vld [vmem:[#allocation2 + $0xe9] sm:$0xff] }
 0x1a7   : > { %v2875_v63 = vpop.f32.mrf.mxu0  ;;  %11189 = vmatmul.msk.bf16.gmra.mxu1 %vm1330_vm3, %v1939_v5  ;;  %v2779_v5 = vpack.c.bf16 %v2633_v39, %v2632_v51  ;;  %v2634_v51 = vld [vmem:[#allocation2 + $0xe2] sm:$0xff]  ;;  %v2635_v39 = vld [vmem:[#allocation2 + $0xea] sm:$0xff] }
 0x1a8   : > { %v2580_v4 = vadd.f32 %v2509_v28, %v2181_v7  ;;  %v1710_v7 = vmax.f32 %v13015_v56, %v12833_v55 }
 0x1a9   : > { %11237 = vmatmul.msk.bf16.gmra.mxu3 %vm1330_vm3, %v2417_v47 }
 0x1aa   : > { %11261 = vmatmul.msk.bf16.gmra.mxu0 %vm1330_vm3, %v2778_v10  ;;  %v13006_v17 = vadd.f32 %v2870_v9, %v2580_v4  ;;  %v13024_v10 = vld [vmem:[#allocation2 + $0xd5] sm:$0xff] }
 0x1ac   : > { %v2514_v1 = vpop.f32.mrf.mxu3  ;;  %v2038_v23 = vpop.f32.mrf.mxu1 }
 0x1ad   : > { %v2182_v14 = vpop.f32.mrf.mxu2 }
 0x1ae   : > { %v2183_v18 = vadd.f32 %v2182_v14, %v2033_v2 }
 0x1af   : > { %v2877_v19 = vpop.f32.mrf.mxu0 }
 0x1b0   : > { %v2581_v28 = vadd.f32 %v2511_v40, %v2183_v18  ;;  %v1940_v40 = vpack.c.bf16 %v1794_v41, %v1793_v45  ;;  %v1796_v45 = vld [vmem:[#allocation2 + $0xe8] sm:$0xff] }
 0x1b2   : > { %11213 = vmatmul.msk.bf16.gmra.mxu2 %vm1330_vm3, %v1759_v36  ;;  %v13011_v6 = vadd.f32 %v2872_v38, %v2581_v28  ;;  %v1709_v38 = vmax.f32 %v13013_v43, %v12815_v35  ;;  %v1742_v35 = vmax.f32 %v1710_v7, %v13026_v3  ;;  %v11974_v28 = vld [vmem:[%s12598_s2 + $0x68] sm:$0xff]  ;;  %v1795_v36 = vld [vmem:[#allocation2 + $0xe0] sm:$0xff] }
 0x1b3   : > { %4008 = vmatpush.bf16.msra.mxu0 %v11974_v28 }
 0x1b4   : > { %v2516_v9 = vpop.f32.mrf.mxu3  ;;  %v2041_v53 = vpop.f32.mrf.mxu1  ;;  %v1741_v25 = vmax.f32 %v1709_v38, %v13024_v10  ;;  %v11973_v38 = vld [vmem:[%s12598_s2 + $0x60] sm:$0xff] }
 0x1b5   : > { %v2185_v2 = vpop.f32.mrf.mxu2 }
 0x1b6   : > { %v2186_v60 = vadd.f32 %v2185_v2, %v2036_v52  ;;  %v1760_v18 = vpack.c.bf16 %v1742_v35, %v1741_v25  ;;  %v13036_v2 = vld [vmem:[#allocation2 + $0xe3] sm:$0xff]  ;;  %v2780_v25 = vpack.c.bf16 %v2635_v39, %v2634_v51  ;;  %v1797_v39 = vld [vmem:[#allocation2 + $0xf0] sm:$0xff] }
 0x1b7   : > { %v2880_v49 = vpop.f32.mrf.mxu0  ;;  %11190 = vmatmul.msk.bf16.gmra.mxu1 %vm1330_vm3, %v1940_v40  ;;  %4009 = vmatpush.bf16.msra.mxu0 %v11973_v38 }
 0x1b8   : > { %v2582_v47 = vadd.f32 %v2514_v1, %v2186_v60 }
 0x1b9   : > { %11238 = vmatmul.msk.bf16.gmra.mxu3 %vm1330_vm3, %v2418_v37  ;;  %v1941_v37 = vpack.c.bf16 %v1796_v45, %v1795_v36 }
 0x1ba   : > { %11262 = vmatmul.msk.bf16.gmra.mxu0 %vm1330_vm3, %v2779_v5  ;;  %v13028_v52 = vadd.f32 %v2875_v63, %v2582_v47  ;;  %v2273_v63 = vld [vmem:[#allocation2 + $0xe1] sm:$0xff]  ;;  %v11971_v5 = vld [vmem:[%s12598_s2 + $0x50] sm:$0xff] }
 0x1bb   : > { %v2419_v47 = vpack.c.bf16 %v2274_v54, %v2273_v63  ;;  %3648 = vmatpush.bf16.msra.mxu3 %v11971_v5  ;;  %v2276_v5 = vld [vmem:[#allocation2 + $0xf9] sm:$0xff] }
 0x1bc   : > { %v2519_v11 = vpop.f32.mrf.mxu3  ;;  %v2043_v4 = vpop.f32.mrf.mxu1 }
 0x1bd   : > { %v2187_v55 = vpop.f32.mrf.mxu2 }
 0x1be   : > { %v2188_v14 = vadd.f32 %v2187_v55, %v2038_v23 }
 0x1bf   : > { %v2882_v8 = vpop.f32.mrf.mxu0 }
 0x1c0   : > { %v2583_v1 = vadd.f32 %v2516_v9, %v2188_v14  ;;  %v13038_v9 = vld [vmem:[#allocation2 + $0xeb] sm:$0xff] }
 0x1c1   : > { %v1712_v35 = vmax.f32 %v13038_v9, %v12862_v31  ;;  %v13049_v14 = vld [vmem:[#allocation2 + $0xe5] sm:$0xff] }
 0x1c2   : > { %11214 = vmatmul.msk.bf16.gmra.mxu2 %vm1330_vm3, %v1760_v18  ;;  %v13034_v41 = vadd.f32 %v2877_v19, %v2583_v1  ;;  %v1711_v19 = vmax.f32 %v13036_v2, %v12854_v12  ;;  %v13051_v1 = vld [vmem:[#allocation2 + $0xed] sm:$0xff] }
 0x1c3   : > { %v1744_v12 = vmax.f32 %v1712_v35, %v13051_v1 }
 0x1c4   : > { %v2521_v48 = vpop.f32.mrf.mxu3  ;;  %v2046_v23 = vpop.f32.mrf.mxu1  ;;  %v1743_v36 = vmax.f32 %v1711_v19, %v13049_v14  ;;  %v11978_v19 = vld [vmem:[%s12598_s2 + $0x88] sm:$0xff] }
 0x1c5   : > { %v2190_v60 = vpop.f32.mrf.mxu2  ;;  %4730 = vmatpush.bf16.msrb.mxu2 %v11978_v19 }
 0x1c6   : > { %v2191_v7 = vadd.f32 %v2190_v60, %v2041_v53  ;;  %v1761_v51 = vpack.c.bf16 %v1744_v12, %v1743_v36  ;;  %v13069_v12 = vld [vmem:[#allocation2 + $0xfd] sm:$0xff] }
 0x1c7   : > { %v2885_v40 = vpop.f32.mrf.mxu0  ;;  %11191 = vmatmul.msk.bf16.gmra.mxu1 %vm1330_vm3, %v1941_v37  ;;  %v2275_v37 = vld [vmem:[#allocation2 + $0xf1] sm:$0xff]  ;;  %16010 = vst [vmem:[#allocation28_spill] sm:$0xff] %v13069_v12 }
 0x1c8   : > { %v2584_v55 = vadd.f32 %v2519_v11, %v2191_v7  ;;  %v754_v11 = vadd.s32 248, %v12707_v62  ;;  %v13066_v62 = vld [vmem:[#allocation2 + $0xfb] sm:$0xff] }
 0x1c9   : > { %11239 = vmatmul.msk.bf16.gmra.mxu3 %vm1330_vm3, %v2419_v47  ;;  %v2636_v47 = vld [vmem:[#allocation2 + $0xf2] sm:$0xff]  ;;  %16009 = vst [vmem:[#allocation27_spill] sm:$0xff] %v13066_v62 }
 0x1ca   : > { %11263 = vmatmul.msk.bf16.gmra.mxu0 %vm1330_vm3, %v2780_v25  ;;  %v13053_v53 = vadd.f32 %v2880_v49, %v2584_v55  ;;  %v13058_v60 = vand.u32 63, %v754_v11  ;;  %v1798_v49 = vld [vmem:[#allocation2 + $0xf8] sm:$0xff] }
 0x1cb   : > { %v2637_v25 = vld [vmem:[#allocation2 + $0xfa] sm:$0xff]  ;;  %v1942_v36 = vpack.c.bf16 %v1798_v49, %v1797_v39 }
 0x1cc   : > { %v2524_v18 = vpop.f32.mrf.mxu3  ;;  %v2048_v28 = vpop.f32.mrf.mxu1  ;;  %16007 = vst [vmem:[#allocation25_spill] sm:$0xff] %v13058_v60  ;;  %v13064_v55 = vld [vmem:[#allocation2 + $0xf3] sm:$0xff]  ;;  %vm15822_vm11 = vcmp.le.s32.totalorder %v13058_v60, 62  ;;  %v2781_v11 = vpack.c.bf16 %v2637_v25, %v2636_v47  ;;  %v11976_v39 = vld [vmem:[%s12598_s2 + $0x78] sm:$0xff] }
 0x1cd   : > { %v2192_v31 = vpop.f32.mrf.mxu2  ;;  %16008 = vst [vmem:[#allocation26_spill] sm:$0xff] %v13064_v55  ;;  %v13083_v49 = vld [vmem:[#allocation2 + $0xf5] sm:$0xff]  ;;  %4369 = vmatpush.bf16.msrb.mxu1 %v11976_v39 }
 0x1ce   : > { %v2193_v63 = vadd.f32 %v2192_v31, %v2043_v4  ;;  %v2420_v31 = vpack.c.bf16 %v2276_v5, %v2275_v37  ;;  %16011 = vst [vmem:[#allocation29_spill] sm:$0xff] %v13083_v49 }
 0x1cf   : > { %v2887_v45 = vpop.f32.mrf.mxu0 }
 0x1d0   : > { %v2585_v54 = vadd.f32 %v2521_v48, %v2193_v63  ;;  %v1713_v63 = vmax.f32 %v13064_v55, %v12873_v44 }
 0x1d2   : > { %11215 = vmatmul.msk.bf16.gmra.mxu2 %vm1330_vm3, %v1761_v51  ;;  %v13061_v38 = vadd.f32 %v2882_v8, %v2585_v54  ;;  %v1714_v54 = vmax.f32 %v13066_v62, %v12878_v59  ;;  %v12146_v62 = vld [vmem:[#allocation2 + $0x3] sm:$0xff] }
 0x1d4   : > { %v2526_v7 = vpop.f32.mrf.mxu3  ;;  %v2051_v35 = vpop.f32.mrf.mxu1 }
 0x1d5   : > { %v2195_v48 = vpop.f32.mrf.mxu2 }
 0x1d6   : > { %v2196_v8 = vadd.f32 %v2195_v48, %v2046_v23  ;;  %v1682_v23 = vsel %vm15822_vm11, %v13069_v12, %v12878_v59  ;;  %v12153_v12 = vld [vmem:[#allocation2 + $0x1d] sm:$0xff]  ;;  %vm15829_vm11 = vcmp.lt.s32.totalorder %v12804_v29, 63 }
 0x1d7   : > { %v2890_v4 = vpop.f32.mrf.mxu0  ;;  %11192 = vmatmul.msk.bf16.gmra.mxu1 %vm1330_vm3, %v1942_v36  ;;  %v1746_v5 = vmax.f32 %v1714_v54, %v1682_v23  ;;  %v12147_v23 = vld [vmem:[#allocation2 + $0xb] sm:$0xff] }
 0x1d8   : > { %v2586_v51 = vadd.f32 %v2524_v18, %v2196_v8  ;;  %v1745_v18 = vmax.f32 %v1713_v63, %v13083_v49  ;;  %v3762_v49 = vld [vmem:[#allocation2 + $0x6] sm:$0xff] }
 0x1d9   : > { %11240 = vmatmul.msk.bf16.gmra.mxu3 %vm1330_vm3, %v2420_v31 }
 0x1da   : > { %11264 = vmatmul.msk.bf16.gmra.mxu0 %vm1330_vm3, %v2781_v11  ;;  %v13085_v37 = vadd.f32 %v2885_v40, %v2586_v51  ;;  %v1762_v8 = vpack.c.bf16 %v1746_v5, %v1745_v18  ;;  %v3763_v11 = vld [vmem:[#allocation2 + $0xe] sm:$0xff]  ;;  %v2967_v40 = vsel %vm1363_vm7, %v12146_v62, 0.0 }
 0x1db   : > { %v2999_v63 = vpack.c.bf16 %v12147_v23, %v2967_v40  ;;  %v3922_v18 = vpack.c.bf16 %v3763_v11, %v3762_v49  ;;  %v3201_v40 = vld [vmem:[#allocation2 + $0xc] sm:$0xff] }
 0x1dc   : > { %v2529_v44 = vpop.f32.mrf.mxu3  ;;  %v2053_v47 = vpop.f32.mrf.mxu1 }
 0x1dd   : > { %v2197_v19 = vpop.f32.mrf.mxu2 }
 0x1de   : > { %v2198_v48 = vadd.f32 %v2197_v19, %v2048_v28  ;;  %v12148_v28 = vld [vmem:[#allocation2 + $0x5] sm:$0xff] }
 0x1df   : > { %v2892_v25 = vpop.f32.mrf.mxu0 }
 0x1e0   : > { %v2587_v36 = vadd.f32 %v2526_v7, %v2198_v48  ;;  %v12149_v7 = vld [vmem:[#allocation2 + $0xd] sm:$0xff] }
 0x1e1   : > { %v3561_v5 = vpack.c.bf16 %v12149_v7, %v12148_v28  ;;  %v12151_v7 = vld [vmem:[#allocation2 + $0x1b] sm:$0xff] }
 0x1e2   : > { %11216 = vmatmul.msk.bf16.gmra.mxu2 %vm1330_vm3, %v1762_v8  ;;  %v13089_v31 = vadd.f32 %v2887_v45, %v2587_v36 }
 0x1e4   : > { %v2531_v59 = vpop.f32.mrf.mxu3  ;;  %v2056_v51 = vpop.f32.mrf.mxu1 }
 0x1e5   : > { %v2200_v39 = vpop.f32.mrf.mxu2 }
 0x1e6   : > { %v2201_v55 = vadd.f32 %v2200_v39, %v2051_v35  ;;  %v3200_v35 = vld [vmem:[#allocation2 + $0x4] sm:$0xff] }
 0x1e7   : > { %v2895_v54 = vpop.f32.mrf.mxu0  ;;  %11273 = vmatmul.msk.bf16.vlgmr.msra.gmra.mxu1 %vm1330_vm3, %v2999_v63  ;;  %v3232_v0 = vpack.c.bf16 %v3201_v40, %v3200_v35 }
 0x1e8   : > { %v2588_v45 = vadd.f32 %v2529_v44, %v2201_v55  ;;  %v3765_v44 = vld [vmem:[#allocation2 + $0x1e] sm:$0xff] }
 0x1e9   : > { %11321 = vmatmul.msk.bf16.vlgmr.msra.gmra.mxu3 %vm1330_vm3, %v3561_v5 }
 0x1ea   : > { %11345 = vmatmul.msk.bf16.vlgmr.msra.gmra.mxu0 %vm1330_vm3, %v3922_v18  ;;  %v13096_v19 = vadd.f32 %v2890_v4, %v2588_v45  ;;  %v12150_v4 = vld [vmem:[#allocation2 + $0x13] sm:$0xff] }
 0x1eb   : > { %v3000_v5 = vpack.c.bf16 %v12151_v7, %v12150_v4  ;;  %v3764_v18 = vld [vmem:[#allocation2 + $0x16] sm:$0xff] }
 0x1ec   : > { %16012 = vst [vmem:[#allocation30_spill] sm:$0xff] %v13096_v19  ;;  %v2534_v62 = vpop.f32.mrf.mxu3  ;;  %v2058_v48 = vpop.f32.mrf.mxu1  ;;  %v12152_v19 = vld [vmem:[#allocation2 + $0x15] sm:$0xff] }
 0x1ed   : > { %v2202_v8 = vpop.f32.mrf.mxu2 }
 0x1ee   : > { %v2203_v23 = vadd.f32 %v2202_v8, %v2053_v47  ;;  %v3562_v47 = vpack.c.bf16 %v12153_v12, %v12152_v19  ;;  %v3923_v8 = vpack.c.bf16 %v3765_v44, %v3764_v18 }
 0x1ef   : > { %v2897_v36 = vpop.f32.mrf.mxu0 }
 0x1f0   : > { %v2589_v39 = vadd.f32 %v2531_v59, %v2203_v23 }
 0x1f2   : > { %11297 = vmatmul.msk.bf16.vlgmr.msra.gmra.mxu2 %vm1330_vm3, %v3232_v0  ;;  %v13099_v49 = vadd.f32 %v2892_v25, %v2589_v39  ;;  %v3203_v39 = vld [vmem:[#allocation2 + $0x1c] sm:$0xff] }
 0x1f4   : > { %16013 = vst [vmem:[#allocation31_spill] sm:$0xff] %v13099_v49  ;;  %v2536_v55 = vpop.f32.mrf.mxu3  ;;  %v2061_v11 = vpop.f32.mrf.mxu1  ;;  %v12157_v49 = vld [vmem:[#allocation2 + $0x2d] sm:$0xff] }
 0x1f5   : > { %v2205_v28 = vpop.f32.mrf.mxu2 }
 0x1f6   : > { %v2206_v45 = vadd.f32 %v2205_v28, %v2056_v51  ;;  %v3202_v51 = vld [vmem:[#allocation2 + $0x14] sm:$0xff] }
 0x1f7   : > { %v2900_v63 = vpop.f32.mrf.mxu0  ;;  %11274 = vmatmul.msk.bf16.gmra.mxu1 %vm1330_vm3, %v3000_v5  ;;  %v3233_v7 = vpack.c.bf16 %v3203_v39, %v3202_v51 }
 0x1f8   : > { %v2590_v59 = vadd.f32 %v2534_v62, %v2206_v45  ;;  %v3767_v62 = vld [vmem:[#allocation2 + $0x2e] sm:$0xff] }
 0x1f9   : > { %11322 = vmatmul.msk.bf16.gmra.mxu3 %vm1330_vm3, %v3562_v47  ;;  %v12155_v45 = vld [vmem:[#allocation2 + $0x2b] sm:$0xff] }
 0x1fa   : > { %11346 = vmatmul.msk.bf16.gmra.mxu0 %vm1330_vm3, %v3923_v8  ;;  %v13104_v0 = vadd.f32 %v2895_v54, %v2590_v59  ;;  %v12154_v54 = vld [vmem:[#allocation2 + $0x23] sm:$0xff] }
 0x1fb   : > { %v3001_v47 = vpack.c.bf16 %v12155_v45, %v12154_v54  ;;  %v3766_v8 = vld [vmem:[#allocation2 + $0x26] sm:$0xff] }
 0x1fc   : > { %16014 = vst [vmem:[#allocation32_spill] sm:$0xff] %v13104_v0  ;;  %v2539_v25 = vpop.f32.mrf.mxu3  ;;  %v2063_v40 = vpop.f32.mrf.mxu1  ;;  %v12156_v0 = vld [vmem:[#allocation2 + $0x25] sm:$0xff] }
 0x1fd   : > { %v2207_v35 = vpop.f32.mrf.mxu2 }
 0x1fe   : > { %v2208_v4 = vadd.f32 %v2207_v35, %v2058_v48  ;;  %v3563_v48 = vpack.c.bf16 %v12157_v49, %v12156_v0  ;;  %v3924_v35 = vpack.c.bf16 %v3767_v62, %v3766_v8  ;;  %v3769_v49 = vld [vmem:[#allocation2 + $0x3e] sm:$0xff] }
 0x1ff   : > { %v2902_v23 = vpop.f32.mrf.mxu0 }
 0x200   : > { %v2591_v28 = vadd.f32 %v2536_v55, %v2208_v4 }
 0x202   : > { %11298 = vmatmul.msk.bf16.gmra.mxu2 %vm1330_vm3, %v3233_v7  ;;  %v13107_v12 = vadd.f32 %v2897_v36, %v2591_v28  ;;  %v3205_v7 = vld [vmem:[#allocation2 + $0x2c] sm:$0xff] }
 0x204   : > { %v2541_v19 = vpop.f32.mrf.mxu3  ;;  %v2066_v44 = vpop.f32.mrf.mxu1 }
 0x205   : > { %v2210_v18 = vpop.f32.mrf.mxu2 }
 0x206   : > { %v2211_v59 = vadd.f32 %v2210_v18, %v2061_v11  ;;  %v3204_v11 = vld [vmem:[#allocation2 + $0x24] sm:$0xff] }
 0x207   : > { %v2905_v5 = vpop.f32.mrf.mxu0  ;;  %11275 = vmatmul.msk.bf16.gmra.mxu1 %vm1330_vm3, %v3001_v47  ;;  %v3234_v45 = vpack.c.bf16 %v3205_v7, %v3204_v11  ;;  %v12161_v7 = vld [vmem:[#allocation2 + $0x35] sm:$0xff] }
 0x208   : > { %v2592_v55 = vadd.f32 %v2539_v25, %v2211_v59  ;;  %v12158_v25 = vld [vmem:[#allocation2 + $0x3d] sm:$0xff]  ;;  %v12159_v59 = vld [vmem:[#allocation2 + $0x33] sm:$0xff] }
 0x209   : > { %11323 = vmatmul.msk.bf16.gmra.mxu3 %vm1330_vm3, %v3563_v48  ;;  %v3536_v62 = vsel %vm15829_vm11, %v12158_v25, 0.0  ;;  %v12160_v48 = vld [vmem:[#allocation2 + $0x3b] sm:$0xff]  ;;  %vm15832_vm11 = vcmp.lt.s32.totalorder %v12889_v27, 62 }
 0x20a   : > { %11347 = vmatmul.msk.bf16.gmra.mxu0 %vm1330_vm3, %v3924_v35  ;;  %v13112_v36 = vadd.f32 %v2900_v63, %v2592_v55  ;;  %v3002_v35 = vpack.c.bf16 %v12160_v48, %v12159_v59  ;;  %v3768_v55 = vld [vmem:[#allocation2 + $0x36] sm:$0xff] }
 0x20b   : > { %v3206_v48 = vld [vmem:[#allocation2 + $0x34] sm:$0xff] }
 0x20c   : > { %16015 = vst [vmem:[#allocation33_spill] sm:$0xff] %v13112_v36  ;;  %v2544_v39 = vpop.f32.mrf.mxu3  ;;  %v2068_v4 = vpop.f32.mrf.mxu1 }
 0x20d   : > { %v2212_v28 = vpop.f32.mrf.mxu2 }
 0x20e   : > { %v2213_v54 = vadd.f32 %v2212_v28, %v2063_v40  ;;  %v3897_v40 = vsel %vm15828_vm2, %v3769_v49, 0.0  ;;  %vm15833_vm2 = vcmp.lt.s32.totalorder %v12889_v27, 63 }
 0x20f   : > { %v2907_v51 = vpop.f32.mrf.mxu0 }
 0x210   : > { %v2593_v18 = vadd.f32 %v2541_v19, %v2213_v54  ;;  %v3564_v54 = vpack.c.bf16 %v3536_v62, %v12161_v7 }
 0x212   : > { %11299 = vmatmul.msk.bf16.gmra.mxu2 %vm1330_vm3, %v3234_v45  ;;  %v13117_v0 = vadd.f32 %v2902_v23, %v2593_v18  ;;  %v3925_v23 = vpack.c.bf16 %v3897_v40, %v3768_v55  ;;  %v3770_v40 = vld [vmem:[#allocation2 + $0x46] sm:$0xff] }
 0x214   : > { %16016 = vst [vmem:[#allocation34_spill] sm:$0xff] %v13117_v0  ;;  %v2546_v63 = vpop.f32.mrf.mxu3  ;;  %v2071_v47 = vpop.f32.mrf.mxu1  ;;  %v3207_v0 = vld [vmem:[#allocation2 + $0x3c] sm:$0xff] }
 0x215   : > { %v2215_v8 = vpop.f32.mrf.mxu2 }
 0x216   : > { %v2216_v28 = vadd.f32 %v2215_v8, %v2066_v44  ;;  %v3235_v8 = vpack.c.bf16 %v3207_v0, %v3206_v48 }
 0x217   : > { %v2910_v19 = vpop.f32.mrf.mxu0  ;;  %11276 = vmatmul.msk.bf16.gmra.mxu1 %vm1330_vm3, %v3002_v35  ;;  %v3771_v35 = vld [vmem:[#allocation2 + $0x4e] sm:$0xff] }
 0x218   : > { %v2594_v11 = vadd.f32 %v2544_v39, %v2216_v28  ;;  %v12162_v28 = vld [vmem:[#allocation2 + $0x43] sm:$0xff] }
 0x219   : > { %11324 = vmatmul.msk.bf16.gmra.mxu3 %vm1330_vm3, %v3564_v54 }
 0x21a   : > { %11348 = vmatmul.msk.bf16.gmra.mxu0 %vm1330_vm3, %v3925_v23  ;;  %v13126_v18 = vadd.f32 %v2905_v5, %v2594_v11  ;;  %v2975_v5 = vsel %vm1371_vm12, %v12162_v28, 0.0  ;;  %v12163_v23 = vld [vmem:[#allocation2 + $0x4b] sm:$0xff] }
 0x21b   : > { %v3003_v11 = vpack.c.bf16 %v12163_v23, %v2975_v5 }
 0x21c   : > { %16017 = vst [vmem:[#allocation35_spill] sm:$0xff] %v13126_v18  ;;  %v2549_v45 = vpop.f32.mrf.mxu3  ;;  %v2073_v49 = vpop.f32.mrf.mxu1  ;;  %v12169_v18 = vld [vmem:[#allocation2 + $0x55] sm:$0xff] }
 0x21d   : > { %v2217_v29 = vpop.f32.mrf.mxu2 }
 0x21e   : > { %v2218_v59 = vadd.f32 %v2217_v29, %v2068_v4  ;;  %v12164_v4 = vld [vmem:[#allocation2 + $0x4d] sm:$0xff] }
 0x21f   : > { %v2912_v25 = vpop.f32.mrf.mxu0 }
 0x220   : > { %v2595_v44 = vadd.f32 %v2546_v63, %v2218_v59  ;;  %v12165_v63 = vld [vmem:[#allocation2 + $0x45] sm:$0xff]  ;;  %v3926_v59 = vpack.c.bf16 %v3771_v35, %v3770_v40  ;;  %v3772_v35 = vld [vmem:[#allocation2 + $0x56] sm:$0xff] }
 0x221   : > { %v3565_v0 = vpack.c.bf16 %v12164_v4, %v12165_v63  ;;  %v12166_v63 = vld [vmem:[#allocation2 + $0x5b] sm:$0xff] }
 0x222   : > { %11300 = vmatmul.msk.bf16.gmra.mxu2 %vm1330_vm3, %v3235_v8  ;;  %v13129_v62 = vadd.f32 %v2907_v51, %v2595_v44 }
 0x224   : > { %16018 = vst [vmem:[#allocation36_spill] sm:$0xff] %v13129_v62  ;;  %v2551_v39 = vpop.f32.mrf.mxu3  ;;  %v2076_v55 = vpop.f32.mrf.mxu1  ;;  %v3209_v62 = vld [vmem:[#allocation2 + $0x4c] sm:$0xff] }
 0x225   : > { %v2220_v54 = vpop.f32.mrf.mxu2 }
 0x226   : > { %v2221_v29 = vadd.f32 %v2220_v54, %v2071_v47  ;;  %v3208_v47 = vld [vmem:[#allocation2 + $0x44] sm:$0xff] }
 0x227   : > { %v2915_v7 = vpop.f32.mrf.mxu0  ;;  %11277 = vmatmul.msk.bf16.gmra.mxu1 %vm1330_vm3, %v3003_v11  ;;  %v3236_v23 = vpack.c.bf16 %v3209_v62, %v3208_v47  ;;  %v3773_v11 = vld [vmem:[#allocation2 + $0x5e] sm:$0xff] }
 0x228   : > { %v2596_v51 = vadd.f32 %v2549_v45, %v2221_v29 }
 0x229   : > { %11325 = vmatmul.msk.bf16.gmra.mxu3 %vm1330_vm3, %v3565_v0  ;;  %v12167_v0 = vld [vmem:[#allocation2 + $0x53] sm:$0xff] }
 0x22a   : > { %11349 = vmatmul.msk.bf16.gmra.mxu0 %vm1330_vm3, %v3926_v59  ;;  %v13136_v48 = vadd.f32 %v2910_v19, %v2596_v51  ;;  %v3004_v59 = vpack.c.bf16 %v12166_v63, %v12167_v0  ;;  %v3211_v63 = vld [vmem:[#allocation2 + $0x5c] sm:$0xff] }
 0x22c   : > { %16019 = vst [vmem:[#allocation37_spill] sm:$0xff] %v13136_v48  ;;  %v2554_v44 = vpop.f32.mrf.mxu3  ;;  %v2078_v8 = vpop.f32.mrf.mxu1  ;;  %v12168_v48 = vld [vmem:[#allocation2 + $0x5d] sm:$0xff] }
 0x22d   : > { %v2222_v42 = vpop.f32.mrf.mxu2 }
 0x22e   : > { %v2223_v5 = vadd.f32 %v2222_v42, %v2073_v49  ;;  %v3566_v42 = vpack.c.bf16 %v12168_v48, %v12169_v18  ;;  %v3927_v49 = vpack.c.bf16 %v3773_v11, %v3772_v35  ;;  %v3775_v35 = vld [vmem:[#allocation2 + $0x6e] sm:$0xff] }
 0x22f   : > { %v2917_v28 = vpop.f32.mrf.mxu0 }
 0x230   : > { %v2597_v54 = vadd.f32 %v2551_v39, %v2223_v5 }
 0x232   : > { %11301 = vmatmul.msk.bf16.gmra.mxu2 %vm1330_vm3, %v3236_v23  ;;  %v13139_v40 = vadd.f32 %v2912_v25, %v2597_v54  ;;  %v3210_v23 = vld [vmem:[#allocation2 + $0x54] sm:$0xff] }
 0x233   : > { %v3237_v0 = vpack.c.bf16 %v3211_v63, %v3210_v23 }
 0x234   : > { %16020 = vst [vmem:[#allocation38_spill] sm:$0xff] %v13139_v40  ;;  %v2556_v45 = vpop.f32.mrf.mxu3  ;;  %v2081_v29 = vpop.f32.mrf.mxu1  ;;  %v12173_v40 = vld [vmem:[#allocation2 + $0x6d] sm:$0xff] }
 0x235   : > { %v2225_v19 = vpop.f32.mrf.mxu2 }
 0x236   : > { %v2226_v51 = vadd.f32 %v2225_v19, %v2076_v55 }
 0x237   : > { %v2920_v4 = vpop.f32.mrf.mxu0  ;;  %11278 = vmatmul.msk.bf16.gmra.mxu1 %vm1330_vm3, %v3004_v59 }
 0x238   : > { %v2598_v62 = vadd.f32 %v2554_v44, %v2226_v51  ;;  %v3774_v44 = vld [vmem:[#allocation2 + $0x66] sm:$0xff] }
 0x239   : > { %11326 = vmatmul.msk.bf16.gmra.mxu3 %vm1330_vm3, %v3566_v42  ;;  %v12170_v51 = vld [vmem:[#allocation2 + $0x6b] sm:$0xff]  ;;  %v12171_v42 = vld [vmem:[#allocation2 + $0x63] sm:$0xff] }
 0x23a   : > { %11350 = vmatmul.msk.bf16.gmra.mxu0 %vm1330_vm3, %v3927_v49  ;;  %v13144_v25 = vadd.f32 %v2915_v7, %v2598_v62  ;;  %v3005_v49 = vpack.c.bf16 %v12170_v51, %v12171_v42 }
 0x23c   : > { %16021 = vst [vmem:[#allocation39_spill] sm:$0xff] %v13144_v25  ;;  %v2559_v39 = vpop.f32.mrf.mxu3  ;;  %v2083_v5 = vpop.f32.mrf.mxu1  ;;  %v12172_v25 = vld [vmem:[#allocation2 + $0x65] sm:$0xff] }
 0x23d   : > { %v2227_v54 = vpop.f32.mrf.mxu2  ;;  %v3567_v36 = vpack.c.bf16 %v12173_v40, %v12172_v25  ;;  %v3777_v25 = vld [vmem:[#allocation2 + $0x7e] sm:$0xff] }
 0x23e   : > { %v2228_v55 = vadd.f32 %v2227_v54, %v2078_v8  ;;  %v3928_v8 = vpack.c.bf16 %v3775_v35, %v3774_v44  ;;  %v3776_v35 = vld [vmem:[#allocation2 + $0x76] sm:$0xff] }
 0x23f   : > { %v2922_v47 = vpop.f32.mrf.mxu0 }
 0x240   : > { %v2599_v19 = vadd.f32 %v2556_v45, %v2228_v55 }
 0x242   : > { %11302 = vmatmul.msk.bf16.gmra.mxu2 %vm1330_vm3, %v3237_v0  ;;  %v13147_v18 = vadd.f32 %v2917_v28, %v2599_v19  ;;  %v3212_v19 = vld [vmem:[#allocation2 + $0x64] sm:$0xff] }
 0x244   : > { %v2561_v48 = vpop.f32.mrf.mxu3  ;;  %v2086_v11 = vpop.f32.mrf.mxu1 }
 0x245   : > { %v2230_v7 = vpop.f32.mrf.mxu2 }
 0x246   : > { %v2231_v62 = vadd.f32 %v2230_v7, %v2081_v29  ;;  %v3213_v29 = vld [vmem:[#allocation2 + $0x6c] sm:$0xff] }
 0x247   : > { %v2925_v59 = vpop.f32.mrf.mxu0  ;;  %11279 = vmatmul.msk.bf16.gmra.mxu1 %vm1330_vm3, %v3005_v49  ;;  %v3238_v40 = vpack.c.bf16 %v3213_v29, %v3212_v19  ;;  %v12175_v49 = vld [vmem:[#allocation2 + $0x73] sm:$0xff] }
 0x248   : > { %v2600_v45 = vadd.f32 %v2559_v39, %v2231_v62  ;;  %v12174_v39 = vld [vmem:[#allocation2 + $0x7d] sm:$0xff] }
 0x249   : > { %11327 = vmatmul.msk.bf16.gmra.mxu3 %vm1330_vm3, %v3567_v36  ;;  %v3544_v44 = vsel %vm15833_vm2, %v12174_v39, 0.0  ;;  %v12176_v62 = vld [vmem:[#allocation2 + $0x7b] sm:$0xff]  ;;  %vm15834_vm2 = vcmp.lt.s32.totalorder %v12953_v58, 62 }
 0x24a   : > { %11351 = vmatmul.msk.bf16.gmra.mxu0 %vm1330_vm3, %v3928_v8  ;;  %v13152_v28 = vadd.f32 %v2920_v4, %v2600_v45  ;;  %v3006_v8 = vpack.c.bf16 %v12176_v62, %v12175_v49 }
 0x24c   : > { %v2564_v54 = vpop.f32.mrf.mxu3  ;;  %v2088_v23 = vpop.f32.mrf.mxu1 }
 0x24d   : > { %v2232_v55 = vpop.f32.mrf.mxu2 }
 0x24e   : > { %v2233_v0 = vadd.f32 %v2232_v55, %v2083_v5  ;;  %v3905_v5 = vsel %vm15832_vm11, %v3777_v25, 0.0  ;;  %vm15835_vm11 = vcmp.lt.s32.totalorder %v12953_v58, 63 }
 0x24f   : > { %v2927_v63 = vpop.f32.mrf.mxu0  ;;  %v3929_v19 = vpack.c.bf16 %v3905_v5, %v3776_v35 }
 0x250   : > { %v2601_v7 = vadd.f32 %v2561_v48, %v2233_v0  ;;  %v11977_v48 = vld [vmem:[%s12598_s2 + $0x80] sm:$0xff] }
 0x251   : > { %4731 = vmatpush.bf16.msrb.mxu2 %v11977_v48  ;;  %v3214_v48 = vld [vmem:[#allocation2 + $0x74] sm:$0xff] }
 0x252   : > { %11303 = vmatmul.msk.bf16.gmra.mxu2 %vm1330_vm3, %v3238_v40  ;;  %v13157_v36 = vadd.f32 %v2922_v47, %v2601_v7  ;;  %v12177_v47 = vld [vmem:[#allocation2 + $0x75] sm:$0xff] }
 0x253   : > { %v3568_v55 = vpack.c.bf16 %v3544_v44, %v12177_v47  ;;  %v11975_v7 = vld [vmem:[%s12598_s2 + $0x70] sm:$0xff]  ;;  %v3779_v47 = vld [vmem:[#allocation2 + $0x8e] sm:$0xff]  ;;  %s708_s2 = scalar_lea.vmem %s16310_s20, %s16356_s25 }
 0x254   : > { %v2566_v4 = vpop.f32.mrf.mxu3  ;;  %v2091_v51 = vpop.f32.mrf.mxu1  ;;  %4370 = vmatpush.bf16.msrb.mxu1 %v11975_v7 }
 0x255   : > { %v2235_v42 = vpop.f32.mrf.mxu2 }
 0x256   : > { %v2236_v45 = vadd.f32 %v2235_v42, %v2086_v11  ;;  %v3215_v11 = vld [vmem:[#allocation2 + $0x7c] sm:$0xff] }
 0x257   : > { %v2930_v29 = vpop.f32.mrf.mxu0  ;;  %11280 = vmatmul.msk.bf16.gmra.mxu1 %vm1330_vm3, %v3006_v8  ;;  %v3239_v35 = vpack.c.bf16 %v3215_v11, %v3214_v48  ;;  %v12181_v48 = vld [vmem:[#allocation2 + $0x8d] sm:$0xff] }
 0x258   : > { %v2602_v0 = vadd.f32 %v2564_v54, %v2236_v45  ;;  %v12178_v54 = vld [vmem:[#allocation2 + $0x83] sm:$0xff] }
 0x259   : > { %11328 = vmatmul.msk.bf16.gmra.mxu3 %vm1330_vm3, %v3568_v55  ;;  %v2983_v62 = vsel %vm1379_vm1, %v12178_v54, 0.0 }
 0x25a   : > { %11352 = vmatmul.msk.bf16.gmra.mxu0 %vm1330_vm3, %v3929_v19  ;;  %v13168_v40 = vadd.f32 %v2925_v59, %v2602_v0  ;;  %v3778_v59 = vld [vmem:[#allocation2 + $0x86] sm:$0xff] }
 0x25c   : > { %v2569_v25 = vpop.f32.mrf.mxu3  ;;  %v2093_v39 = vpop.f32.mrf.mxu1 }
 0x25d   : > { %v2237_v49 = vpop.f32.mrf.mxu2 }
 0x25e   : > { %v2238_v42 = vadd.f32 %v2237_v49, %v2088_v23  ;;  %v12179_v23 = vld [vmem:[#allocation2 + $0x8b] sm:$0xff] }
 0x25f   : > { %v2932_v5 = vpop.f32.mrf.mxu0  ;;  %v12180_v49 = vld [vmem:[#allocation2 + $0x85] sm:$0xff] }
 0x260   : > { %v2603_v44 = vadd.f32 %v2566_v4, %v2238_v42  ;;  %v3007_v4 = vpack.c.bf16 %v12179_v23, %v2983_v62  ;;  %v3569_v11 = vpack.c.bf16 %v12181_v48, %v12180_v49  ;;  %v3930_v42 = vpack.c.bf16 %v3779_v47, %v3778_v59  ;;  %v3217_v23 = vld [vmem:[#allocation2 + $0x8c] sm:$0xff]  ;;  %v3780_v49 = vld [vmem:[#allocation2 + $0x96] sm:$0xff]  ;;  %v3781_v48 = vld [vmem:[#allocation2 + $0x9e] sm:$0xff] }
 0x262   : > { %11304 = vmatmul.msk.bf16.gmra.mxu2 %vm1330_vm3, %v3239_v35  ;;  %v13173_v8 = vadd.f32 %v2927_v63, %v2603_v44  ;;  %v11986_v63 = vld [vmem:[%s12606_s23 + $0x38] sm:$0xff] }
 0x263   : > { %4993 = vmatpush.bf16.msrb.mxu3 %v11986_v63  ;;  %v12182_v63 = vld [vmem:[#allocation2 + $0x93] sm:$0xff] }
 0x264   : > { %v2571_v45 = vpop.f32.mrf.mxu3  ;;  %v3088_v55 = vpop.f32.mrf.mxu1 }
 0x265   : > { %v3168_v19 = vadd.f32 %v3088_v55, %v12931_v57  ;;  %v2240_v0 = vpop.f32.mrf.mxu2 }
 0x266   : > { %v2241_v7 = vadd.f32 %v2240_v0, %v2091_v51  ;;  %v3216_v0 = vld [vmem:[#allocation2 + $0x84] sm:$0xff] }
 0x267   : > { %11281 = vmatmul.msk.bf16.gmra.mxu1 %vm1330_vm3, %v3007_v4  ;;  %v4011_v57 = vpop.f32.mrf.mxu0  ;;  %v3240_v4 = vpack.c.bf16 %v3217_v23, %v3216_v0 }
 0x268   : > { %v2604_v35 = vadd.f32 %v2569_v25, %v2241_v7 }
 0x269   : > { %11329 = vmatmul.msk.bf16.gmra.mxu3 %vm1330_vm3, %v3569_v11 }
 0x26a   : > { %11353 = vmatmul.msk.bf16.gmra.mxu0 %vm1330_vm3, %v3930_v42  ;;  %v13180_v44 = vadd.f32 %v2930_v29, %v2604_v35 }
 0x26c   : > { %16022 = vst [vmem:[#allocation40_spill] sm:$0xff] %v13180_v44  ;;  %v3650_v54 = vpop.f32.mrf.mxu3  ;;  %v3090_v55 = vpop.f32.mrf.mxu1  ;;  %v12184_v44 = vld [vmem:[#allocation2 + $0x95] sm:$0xff] }
 0x26d   : > { %v3169_v51 = vadd.f32 %v3090_v55, %v12933_v30  ;;  %v2242_v62 = vpop.f32.mrf.mxu2  ;;  %v12183_v30 = vld [vmem:[#allocation2 + $0x9b] sm:$0xff] }
 0x26e   : > { %v2243_v59 = vadd.f32 %v2242_v62, %v2093_v39  ;;  %v3008_v55 = vpack.c.bf16 %v12183_v30, %v12182_v63  ;;  %v12185_v39 = vld [vmem:[#allocation2 + $0x9d] sm:$0xff]  ;;  %v3931_v62 = vpack.c.bf16 %v3781_v48, %v3780_v49  ;;  %v3782_v48 = vld [vmem:[#allocation2 + $0xa6] sm:$0xff] }
 0x26f   : > { %v4013_v11 = vpop.f32.mrf.mxu0 }
 0x270   : > { %v2605_v47 = vadd.f32 %v2571_v45, %v2243_v59  ;;  %v3570_v45 = vpack.c.bf16 %v12185_v39, %v12184_v44  ;;  %v12187_v39 = vld [vmem:[#allocation2 + $0xab] sm:$0xff] }
 0x272   : > { %11305 = vmatmul.msk.bf16.gmra.mxu2 %vm1330_vm3, %v3240_v4  ;;  %v13184_v25 = vadd.f32 %v2932_v5, %v2605_v47  ;;  %v3218_v4 = vld [vmem:[#allocation2 + $0x94] sm:$0xff] }
 0x274   : > { %v3652_v7 = vpop.f32.mrf.mxu3  ;;  %v3093_v29 = vpop.f32.mrf.mxu1 }
 0x275   : > { %v3170_v42 = vadd.f32 %v3093_v29, %v12945_v34  ;;  %v3321_v35 = vpop.f32.mrf.mxu2 }
 0x276   : > { %v3401_v46 = vadd.f32 %v3321_v35, %v3168_v19  ;;  %v3219_v19 = vld [vmem:[#allocation2 + $0x9c] sm:$0xff] }
 0x277   : > { %11282 = vmatmul.msk.bf16.gmra.mxu1 %vm1330_vm3, %v3008_v55  ;;  %v4016_v35 = vpop.f32.mrf.mxu0  ;;  %v3241_v49 = vpack.c.bf16 %v3219_v19, %v3218_v4 }
 0x278   : > { %v3730_v5 = vadd.f32 %v3650_v54, %v3401_v46 }
 0x279   : > { %11330 = vmatmul.msk.bf16.gmra.mxu3 %vm1330_vm3, %v3570_v45 }
 0x27a   : > { %11354 = vmatmul.msk.bf16.gmra.mxu0 %vm1330_vm3, %v3931_v62  ;;  %v13190_v0 = vadd.f32 %v4011_v57, %v3730_v5  ;;  %v3783_v57 = vld [vmem:[#allocation2 + $0xae] sm:$0xff]  ;;  %v11985_v5 = vld [vmem:[%s12606_s23 + $0x30] sm:$0xff] }
 0x27b   : > { %4994 = vmatpush.bf16.msrb.mxu3 %v11985_v5 }
 0x27c   : > { %v3655_v23 = vpop.f32.mrf.mxu3  ;;  %v3095_v34 = vpop.f32.mrf.mxu1 }
 0x27d   : > { %v3171_v59 = vadd.f32 %v3095_v34, %v12950_v50  ;;  %v3323_v47 = vpop.f32.mrf.mxu2  ;;  %v12186_v50 = vld [vmem:[#allocation2 + $0xa3] sm:$0xff] }
 0x27e   : > { %v3402_v29 = vadd.f32 %v3323_v47, %v3169_v51  ;;  %v3009_v45 = vpack.c.bf16 %v12187_v39, %v12186_v50  ;;  %v3571_v51 = vpack.c.bf16 %v12941_v32, %v12943_v33  ;;  %v3221_v32 = vld [vmem:[#allocation2 + $0xac] sm:$0xff]  ;;  %v12188_v39 = vld [vmem:[#allocation2 + $0xbb] sm:$0xff] }
 0x27f   : > { %v4018_v34 = vpop.f32.mrf.mxu0 }
 0x280   : > { %v3731_v44 = vadd.f32 %v3652_v7, %v3402_v29  ;;  %v3932_v7 = vpack.c.bf16 %v3783_v57, %v3782_v48  ;;  %v3220_v29 = vld [vmem:[#allocation2 + $0xa4] sm:$0xff] }
 0x282   : > { %11306 = vmatmul.msk.bf16.gmra.mxu2 %vm1330_vm3, %v3241_v49  ;;  %v13194_v46 = vadd.f32 %v4013_v11, %v3731_v44  ;;  %v3242_v49 = vpack.c.bf16 %v3221_v32, %v3220_v29  ;;  %v3222_v32 = vld [vmem:[#allocation2 + $0xb4] sm:$0xff] }
 0x284   : > { %v3657_v54 = vpop.f32.mrf.mxu3  ;;  %v3098_v63 = vpop.f32.mrf.mxu1 }
 0x285   : > { %v3172_v30 = vadd.f32 %v3098_v63, %v12970_v16  ;;  %v3326_v55 = vpop.f32.mrf.mxu2  ;;  %v3784_v63 = vld [vmem:[#allocation2 + $0xb6] sm:$0xff] }
 0x286   : > { %v3403_v62 = vadd.f32 %v3326_v55, %v3170_v42 }
 0x287   : > { %11283 = vmatmul.msk.bf16.gmra.mxu1 %vm1330_vm3, %v3009_v45  ;;  %v12189_v45 = vld [vmem:[#allocation2 + $0xb3] sm:$0xff] }
 0x288   : > { %v3732_v11 = vadd.f32 %v3655_v23, %v3403_v62  ;;  %v3785_v23 = vld [vmem:[#allocation2 + $0xbe] sm:$0xff]  ;;  %v3010_v62 = vpack.c.bf16 %v12188_v39, %v12189_v45  ;;  %v11984_v45 = vld [vmem:[%s12606_s23 + $0x28] sm:$0xff] }
 0x289   : > { %11331 = vmatmul.msk.bf16.gmra.mxu3 %vm1330_vm3, %v3571_v51 }
 0x28a   : > { %11355 = vmatmul.msk.bf16.gmra.mxu0 %vm1330_vm3, %v3932_v7  ;;  %v13203_v16 = vadd.f32 %v4016_v35, %v3732_v11  ;;  %v4021_v35 = vpop.f32.mrf.mxu0  ;;  %4995 = vmatpush.bf16.msrb.mxu3 %v11984_v45 }
 0x28c   : > { %v3660_v47 = vpop.f32.mrf.mxu3  ;;  %v3100_v4 = vpop.f32.mrf.mxu1 }
 0x28d   : > { %v3173_v42 = vadd.f32 %v3100_v4, %v12978_v21  ;;  %v3328_v19 = vpop.f32.mrf.mxu2  ;;  %v3552_v21 = vsel %vm15835_vm11, %v12956_v13, 0.0  ;;  %vm15836_vm11 = vcmp.lt.s32.totalorder %v13058_v60, 62 }
 0x28e   : > { %v3404_v33 = vadd.f32 %v3328_v19, %v3171_v59  ;;  %v3913_v59 = vsel %vm15834_vm2, %v3785_v23, 0.0  ;;  %v3572_v7 = vpack.c.bf16 %v3552_v21, %v12964_v22  ;;  %v3787_v21 = vld [vmem:[#allocation2 + $0xce] sm:$0xff]  ;;  %vm15837_vm2 = vcmp.lt.s32.totalorder %v13058_v60, 63 }
 0x28f   : > { %v3933_v11 = vpack.c.bf16 %v3913_v59, %v3784_v63 }
 0x290   : > { %v3733_v44 = vadd.f32 %v3657_v54, %v3404_v33 }
 0x292   : > { %11307 = vmatmul.msk.bf16.gmra.mxu2 %vm1330_vm3, %v3242_v49  ;;  %v13209_v48 = vadd.f32 %v4018_v34, %v3733_v44 }
 0x294   : > { %v3662_v57 = vpop.f32.mrf.mxu3  ;;  %v3103_v54 = vpop.f32.mrf.mxu1 }
 0x295   : > { %v3174_v55 = vadd.f32 %v3103_v54, %v13006_v17  ;;  %v3331_v50 = vpop.f32.mrf.mxu2  ;;  %v4023_v17 = vpop.f32.mrf.mxu0  ;;  %v3573_v54 = vpack.c.bf16 %v13004_v20, %v13002_v15  ;;  %v3225_v15 = vld [vmem:[#allocation2 + $0xcc] sm:$0xff] }
 0x296   : > { %v3405_v51 = vadd.f32 %v3331_v50, %v3172_v30  ;;  %v3223_v30 = vld [vmem:[#allocation2 + $0xbc] sm:$0xff] }
 0x297   : > { %11284 = vmatmul.msk.bf16.gmra.mxu1 %vm1330_vm3, %v3010_v62  ;;  %v3243_v44 = vpack.c.bf16 %v3223_v30, %v3222_v32  ;;  %v3789_v32 = vld [vmem:[#allocation2 + $0xde] sm:$0xff] }
 0x298   : > { %v3734_v5 = vadd.f32 %v3660_v47, %v3405_v51  ;;  %v2991_v47 = vsel %vm1387_vm15, %v12981_v24, 0.0 }
 0x299   : > { %11332 = vmatmul.msk.bf16.gmra.mxu3 %vm1330_vm3, %v3572_v7  ;;  %v3224_v7 = vld [vmem:[#allocation2 + $0xc4] sm:$0xff] }
 0x29a   : > { %11356 = vmatmul.msk.bf16.gmra.mxu0 %vm1330_vm3, %v3933_v11  ;;  %v13221_v13 = vadd.f32 %v4021_v35, %v3734_v5  ;;  %v3786_v35 = vld [vmem:[#allocation2 + $0xc6] sm:$0xff]  ;;  %v3244_v5 = vpack.c.bf16 %v3225_v15, %v3224_v7 }
 0x29b   : > { %v3934_v50 = vpack.c.bf16 %v3787_v21, %v3786_v35  ;;  %v3229_v7 = vld [vmem:[#allocation2 + $0xec] sm:$0xff] }
 0x29c   : > { %v3665_v34 = vpop.f32.mrf.mxu3  ;;  %v3105_v4 = vpop.f32.mrf.mxu1 }
 0x29d   : > { %v3175_v19 = vadd.f32 %v3105_v4, %v13011_v6  ;;  %v3333_v29 = vpop.f32.mrf.mxu2  ;;  %v4026_v39 = vpop.f32.mrf.mxu0 }
 0x29e   : > { %v3406_v33 = vadd.f32 %v3333_v29, %v3173_v42  ;;  %v3011_v42 = vpack.c.bf16 %v12994_v61, %v2991_v47  ;;  %v3788_v29 = vld [vmem:[#allocation2 + $0xd6] sm:$0xff] }
 0x29f   : > { %v3935_v47 = vpack.c.bf16 %v3789_v32, %v3788_v29  ;;  %v16024_v32 = vld [vmem:[#allocation30_spill] sm:$0xff] }
 0x2a0   : > { %v3735_v22 = vadd.f32 %v3662_v57, %v3406_v33 }
 0x2a2   : > { %11308 = vmatmul.msk.bf16.gmra.mxu2 %vm1330_vm3, %v3243_v44  ;;  %v13228_v49 = vadd.f32 %v4023_v17, %v3735_v22 }
 0x2a4   : > { %v3667_v23 = vpop.f32.mrf.mxu3  ;;  %v3108_v63 = vpop.f32.mrf.mxu1 }
 0x2a5   : > { %v3176_v6 = vadd.f32 %v3108_v63, %v13028_v52  ;;  %v3336_v59 = vpop.f32.mrf.mxu2  ;;  %v4028_v4 = vpop.f32.mrf.mxu0 }
 0x2a6   : > { %v3407_v57 = vadd.f32 %v3336_v59, %v3174_v55  ;;  %v3226_v59 = vld [vmem:[#allocation2 + $0xd4] sm:$0xff] }
 0x2a7   : > { %11285 = vmatmul.msk.bf16.gmra.mxu1 %vm1330_vm3, %v3011_v42  ;;  %v3791_v42 = vld [vmem:[#allocation2 + $0xee] sm:$0xff] }
 0x2a8   : > { %v3736_v24 = vadd.f32 %v3665_v34, %v3407_v57 }
 0x2a9   : > { %11333 = vmatmul.msk.bf16.gmra.mxu3 %vm1330_vm3, %v3573_v54 }
 0x2aa   : > { %11357 = vmatmul.msk.bf16.gmra.mxu0 %vm1330_vm3, %v3934_v50  ;;  %v13238_v62 = vadd.f32 %v4026_v39, %v3736_v24  ;;  %v3575_v24 = vpack.c.bf16 %v13051_v1, %v13049_v14  ;;  %v3793_v1 = vld [vmem:[#allocation2 + $0xfe] sm:$0xff] }
 0x2ac   : > { %v3670_v52 = vpop.f32.mrf.mxu3  ;;  %v3110_v51 = vpop.f32.mrf.mxu1 }
 0x2ad   : > { %v3177_v61 = vadd.f32 %v3110_v51, %v13034_v41  ;;  %v3338_v55 = vpop.f32.mrf.mxu2  ;;  %v3012_v41 = vpack.c.bf16 %v13015_v56, %v13013_v43  ;;  %v3227_v43 = vld [vmem:[#allocation2 + $0xdc] sm:$0xff]  ;;  %v11983_v51 = vld [vmem:[%s12606_s23 + $0x20] sm:$0xff] }
 0x2ae   : > { %v3408_v20 = vadd.f32 %v3338_v55, %v3175_v19  ;;  %v3574_v19 = vpack.c.bf16 %v13026_v3, %v13024_v10  ;;  %v3790_v3 = vld [vmem:[#allocation2 + $0xe6] sm:$0xff]  ;;  %4996 = vmatpush.bf16.msrb.mxu3 %v11983_v51  ;;  %v16029_v51 = vld [vmem:[#allocation32_spill] sm:$0xff] }
 0x2af   : > { %v3936_v45 = vpack.c.bf16 %v3791_v42, %v3790_v3  ;;  %v3230_v42 = vld [vmem:[#allocation2 + $0xf4] sm:$0xff] }
 0x2b0   : > { %v3737_v11 = vadd.f32 %v3667_v23, %v3408_v20 }
 0x2b2   : > { %11309 = vmatmul.msk.bf16.gmra.mxu2 %vm1330_vm3, %v3244_v5  ;;  %v13242_v34 = vadd.f32 %v4028_v4, %v3737_v11  ;;  %v16023_v11 = vld [vmem:[#allocation28_spill] sm:$0xff]  ;;  %v3921_v4 = vsel %vm15836_vm11, %v3793_v1, 0.0 }
 0x2b3   : > { %v3560_v5 = vsel %vm15837_vm2, %v16023_v11, 0.0 }
 0x2b4   : > { %v13244_v17 = vpop.f32.mrf.mxu3  ;;  %v3113_v30 = vpop.f32.mrf.mxu1 }
 0x2b5   : > { %v3178_v33 = vadd.f32 %v3113_v30, %v13053_v53  ;;  %v3341_v22 = vpop.f32.mrf.mxu2 }
 0x2b6   : > { %v3409_v44 = vadd.f32 %v3341_v22, %v3176_v6  ;;  %v3245_v6 = vpack.c.bf16 %v3227_v43, %v3226_v59  ;;  %v16025_v22 = vld [vmem:[#allocation26_spill] sm:$0xff]  ;;  %v16028_v43 = vld [vmem:[#allocation31_spill] sm:$0xff] }
 0x2b7   : > { %11286 = vmatmul.msk.bf16.gmra.mxu1 %vm1330_vm3, %v3012_v41  ;;  %v16026_v41 = vld [vmem:[#allocation27_spill] sm:$0xff] }
 0x2b8   : > { %v13252_v23 = vadd.f32 %v3670_v52, %v3409_v44  ;;  %v3014_v44 = vpack.c.bf16 %v16026_v41, %v16025_v22  ;;  %v4125_v41 = vld [vmem:[#allocation2 + $0x17] sm:$0xff] }
 0x2b9   : > { %11334 = vmatmul.msk.bf16.gmra.mxu3 %vm1330_vm3, %v3574_v19 }
 0x2ba   : > { %11358 = vmatmul.msk.bf16.gmra.mxu0 %vm1330_vm3, %v3935_v47  ;;  %v16027_v47 = vld [vmem:[#allocation29_spill] sm:$0xff] }
 0x2bc   : > { %v3675_v35 = vpop.f32.mrf.mxu3  ;;  %v3115_v21 = vpop.f32.mrf.mxu1 }
 0x2bd   : > { %v3179_v53 = vadd.f32 %v3115_v21, %v13061_v38  ;;  %v3343_v63 = vpop.f32.mrf.mxu2  ;;  %v3013_v38 = vpack.c.bf16 %v13038_v9, %v13036_v2  ;;  %v3228_v9 = vld [vmem:[#allocation2 + $0xe4] sm:$0xff] }
 0x2be   : > { %v13257_v56 = vadd.f32 %v3343_v63, %v3177_v61  ;;  %v3246_v14 = vpack.c.bf16 %v3229_v7, %v3228_v9 }
 0x2c2   : > { %11310 = vmatmul.msk.bf16.gmra.mxu2 %vm1330_vm3, %v3245_v6 }
 0x2c4   : > { %v13260_v10 = vpop.f32.mrf.mxu3  ;;  %v3118_v57 = vpop.f32.mrf.mxu1 }
 0x2c5   : > { %v3180_v54 = vadd.f32 %v3118_v57, %v13085_v37  ;;  %v3346_v50 = vpop.f32.mrf.mxu2  ;;  %v3231_v57 = vld [vmem:[#allocation2 + $0xfc] sm:$0xff] }
 0x2c6   : > { %v3411_v39 = vadd.f32 %v3346_v50, %v3178_v33  ;;  %v3247_v50 = vpack.c.bf16 %v3231_v57, %v3230_v42  ;;  %v4487_v42 = vld [vmem:[#allocation2 + $0x20] sm:$0xff] }
 0x2c7   : > { %11287 = vmatmul.msk.bf16.gmra.mxu1 %vm1330_vm3, %v3013_v38  ;;  %v4124_v38 = vld [vmem:[#allocation2 + $0xf] sm:$0xff] }
 0x2c8   : > { %v13268_v52 = vadd.f32 %v3675_v35, %v3411_v39  ;;  %v3576_v35 = vpack.c.bf16 %v3560_v5, %v16027_v47 }
 0x2c9   : > { %11335 = vmatmul.msk.bf16.gmra.mxu3 %vm1330_vm3, %v3575_v24 }
 0x2ca   : > { %11359 = vmatmul.msk.bf16.gmra.mxu0 %vm1330_vm3, %v3936_v45  ;;  %v4123_v45 = vld [vmem:[#allocation2 + $0x7] sm:$0xff] }
 0x2cc   : > { %v3680_v37 = vpop.f32.mrf.mxu3  ;;  %v3120_v61 = vpop.f32.mrf.mxu1 }
 0x2cd   : > { %v3181_v55 = vadd.f32 %v3120_v61, %v13089_v31  ;;  %v3348_v2 = vpop.f32.mrf.mxu2  ;;  %v3792_v31 = vld [vmem:[#allocation2 + $0xf6] sm:$0xff] }
 0x2ce   : > { %v13274_v15 = vadd.f32 %v3348_v2, %v3179_v53  ;;  %v3937_v21 = vpack.c.bf16 %v3921_v4, %v3792_v31  ;;  %v4283_v2 = vpack.c.bf16 %v4124_v38, %v4123_v45  ;;  %v4485_v31 = vld [vmem:[#allocation2 + $0x10] sm:$0xff] }
 0x2d2   : > { %11311 = vmatmul.msk.bf16.gmra.mxu2 %vm1330_vm3, %v3246_v14  ;;  %v11982_v14 = vld [vmem:[%s12606_s23 + $0x18] sm:$0xff] }
 0x2d3   : > { %4997 = vmatpush.bf16.msrb.mxu3 %v11982_v14 }
 0x2d4   : > { %v13279_v20 = vpop.f32.mrf.mxu3  ;;  %v3123_v29 = vpop.f32.mrf.mxu1 }
 0x2d5   : > { %v3182_v30 = vadd.f32 %v3123_v29, %v16024_v32  ;;  %v3351_v33 = vpop.f32.mrf.mxu2  ;;  %v4484_v29 = vld [vmem:[#allocation2 + $0x8] sm:$0xff] }
 0x2d6   : > { %v3413_v19 = vadd.f32 %v3351_v33, %v3180_v54  ;;  %v4644_v32 = vpack.c.bf16 %v4485_v31, %v4484_v29  ;;  %v4126_v33 = vld [vmem:[#allocation2 + $0x1f] sm:$0xff] }
 0x2d7   : > { %11288 = vmatmul.msk.bf16.gmra.mxu1 %vm1330_vm3, %v3014_v44  ;;  %v16030_v44 = vld [vmem:[#allocation33_spill] sm:$0xff] }
 0x2d8   : > { %v13291_v53 = vadd.f32 %v3680_v37, %v3413_v19  ;;  %v11988_v31 = vld [vmem:[%s12612_s26 + $0x98] sm:$0xff] }
 0x2d9   : > { %11336 = vmatmul.msk.bf16.gmra.mxu3 %vm1330_vm3, %v3576_v35  ;;  %v4284_v35 = vpack.c.bf16 %v4126_v33, %v4125_v41  ;;  %5625 = vmatpush.bf16.msra.mxu1 %v11988_v31  ;;  %v16033_v33 = vld [vmem:[#allocation36_spill] sm:$0xff] }
 0x2da   : > { %11360 = vmatmul.msk.bf16.gmra.mxu0 %vm1330_vm3, %v3937_v21 }
 0x2dc   : > { %v3685_v63 = vpop.f32.mrf.mxu3  ;;  %v3125_v59 = vpop.f32.mrf.mxu1 }
 0x2dd   : > { %v3183_v6 = vadd.f32 %v3125_v59, %v16028_v43  ;;  %v3353_v3 = vpop.f32.mrf.mxu2  ;;  %v16031_v43 = vld [vmem:[#allocation34_spill] sm:$0xff] }
 0x2de   : > { %v13296_v54 = vadd.f32 %v3353_v3, %v3181_v55 }
 0x2e2   : > { %11312 = vmatmul.msk.bf16.gmra.mxu2 %vm1330_vm3, %v3247_v50  ;;  %v4486_v50 = vld [vmem:[#allocation2 + $0x18] sm:$0xff] }
 0x2e3   : > { %v4645_v38 = vpack.c.bf16 %v4487_v42, %v4486_v50  ;;  %v4129_v42 = vld [vmem:[#allocation2 + $0x37] sm:$0xff]  ;;  %v16035_v50 = vld [vmem:[#allocation37_spill] sm:$0xff] }
 0x2e4   : > { %v13299_v39 = vpop.f32.mrf.mxu3  ;;  %v3128_v24 = vpop.f32.mrf.mxu1 }
 0x2e5   : > { %v3184_v37 = vadd.f32 %v3128_v24, %v16029_v51  ;;  %v3356_v61 = vpop.f32.mrf.mxu2  ;;  %v4128_v24 = vld [vmem:[#allocation2 + $0x2f] sm:$0xff] }
 0x2e6   : > { %v3415_v9 = vadd.f32 %v3356_v61, %v3182_v30  ;;  %v16032_v61 = vld [vmem:[#allocation35_spill] sm:$0xff] }
 0x2e7   : > { %11369 = vmatmul.msk.bf16.vlgmr.msrb.gmra.mxu1 %vm1330_vm3, %v4283_v2 }
 0x2e8   : > { %v13303_v7 = vadd.f32 %v3685_v63, %v3415_v9 }
 0x2ec   : > { %v3690_v55 = vpop.f32.mrf.mxu3  ;;  %v3130_v1 = vpop.f32.mrf.mxu1 }
 0x2ed   : > { %v3185_v11 = vadd.f32 %v3130_v1, %v13107_v12  ;;  %v3358_v5 = vpop.f32.mrf.mxu2 }
 0x2ee   : > { %v13307_v4 = vadd.f32 %v3358_v5, %v3183_v6  ;;  %v11981_v5 = vld [vmem:[%s12606_s23 + $0x10] sm:$0xff] }
 0x2ef   : > { %4998 = vmatpush.bf16.msrb.mxu3 %v11981_v5 }
 0x2f2   : > { %11393 = vmatmul.msk.bf16.vlgmr.msrb.gmra.mxu2 %vm1330_vm3, %v4644_v32 }
 0x2f4   : > { %v13310_v30 = vpop.f32.mrf.mxu3  ;;  %v3133_v22 = vpop.f32.mrf.mxu1 }
 0x2f5   : > { %v3186_v19 = vadd.f32 %v3133_v22, %v16030_v44  ;;  %v3361_v47 = vpop.f32.mrf.mxu2  ;;  %v4489_v44 = vld [vmem:[#allocation2 + $0x30] sm:$0xff] }
 0x2f6   : > { %v3417_v21 = vadd.f32 %v3361_v47, %v3184_v37  ;;  %v4127_v37 = vld [vmem:[#allocation2 + $0x27] sm:$0xff] }
 0x2f7   : > { %11370 = vmatmul.msk.bf16.gmra.mxu1 %vm1330_vm3, %v4284_v35  ;;  %v4285_v14 = vpack.c.bf16 %v4128_v24, %v4127_v37  ;;  %v4488_v35 = vld [vmem:[#allocation2 + $0x28] sm:$0xff] }
 0x2f8   : > { %v13314_v12 = vadd.f32 %v3690_v55, %v3417_v21  ;;  %v16034_v21 = vld [vmem:[#allocation19_spill] sm:$0xff] }
 0x2f9   : > { %vm15839_vm11 = vcmp.lt.s32.totalorder %v16034_v21, 61  ;;  %vm15838_vm2 = vcmp.lt.s32.totalorder %v16034_v21, 60 }
 0x2fc   : > { %v3695_v63 = vpop.f32.mrf.mxu3  ;;  %v3135_v59 = vpop.f32.mrf.mxu1 }
 0x2fd   : > { %v3187_v6 = vadd.f32 %v3135_v59, %v16031_v43  ;;  %v3363_v3 = vpop.f32.mrf.mxu2 }
 0x2fe   : > { %v13317_v57 = vadd.f32 %v3363_v3, %v3185_v11  ;;  %v11990_v11 = vld [vmem:[%s12612_s26 + $0x8] sm:$0xff] }
 0x2ff   : > { %5476 = vmatpush.bf16.msrb.mxu0 %v11990_v11 }
 0x302   : > { %11394 = vmatmul.msk.bf16.gmra.mxu2 %vm1330_vm3, %v4645_v38 }
 0x304   : > { %v13320_v45 = vpop.f32.mrf.mxu3  ;;  %v3138_v51 = vpop.f32.mrf.mxu1 }
 0x305   : > { %v3188_v2 = vadd.f32 %v3138_v51, %v16032_v61  ;;  %v3366_v9 = vpop.f32.mrf.mxu2  ;;  %v4491_v61 = vld [vmem:[#allocation2 + $0x40] sm:$0xff] }
 0x306   : > { %v3419_v55 = vadd.f32 %v3366_v9, %v3186_v19  ;;  %v4130_v19 = vld [vmem:[#allocation2 + $0x3f] sm:$0xff]  ;;  %v4619_v31 = vsel %vm15838_vm2, %v4491_v61, 0.0  ;;  %vm15845_vm2 = vcmp.lt.s32.totalorder %v12889_v27, 61 }
 0x307   : > { %11371 = vmatmul.msk.bf16.gmra.mxu1 %vm1330_vm3, %v4285_v14  ;;  %v4258_v59 = vsel %vm15839_vm11, %v4130_v19, 0.0  ;;  %v16037_v19 = vld [vmem:[#allocation39_spill] sm:$0xff]  ;;  %vm15844_vm11 = vcmp.lt.s32.totalorder %v12889_v27, 60 }
 0x308   : > { %v13324_v1 = vadd.f32 %v3695_v63, %v3419_v55  ;;  %v4646_v63 = vpack.c.bf16 %v4489_v44, %v4488_v35  ;;  %v4286_v51 = vpack.c.bf16 %v4258_v59, %v4129_v42  ;;  %v16036_v55 = vld [vmem:[#allocation38_spill] sm:$0xff] }
 0x30c   : > { %v3700_v29 = vpop.f32.mrf.mxu3  ;;  %v3140_v32 = vpop.f32.mrf.mxu1 }
 0x30d   : > { %v3189_v22 = vadd.f32 %v3140_v32, %v16033_v33  ;;  %v3368_v41 = vpop.f32.mrf.mxu2  ;;  %v4490_v33 = vld [vmem:[#allocation2 + $0x38] sm:$0xff] }
 0x30e   : > { %v13330_v47 = vadd.f32 %v3368_v41, %v3187_v6  ;;  %v4132_v41 = vld [vmem:[#allocation2 + $0x4f] sm:$0xff] }
 0x312   : > { %11395 = vmatmul.msk.bf16.gmra.mxu2 %vm1330_vm3, %v4646_v63 }
 0x314   : > { %v13336_v43 = vpop.f32.mrf.mxu3  ;;  %v3143_v3 = vpop.f32.mrf.mxu1 }
 0x315   : > { %v3190_v38 = vadd.f32 %v3143_v3, %v16035_v50  ;;  %v3371_v24 = vpop.f32.mrf.mxu2 }
 0x316   : > { %v3421_v6 = vadd.f32 %v3371_v24, %v3188_v2  ;;  %v4647_v2 = vpack.c.bf16 %v4619_v31, %v4490_v33  ;;  %v4133_v33 = vld [vmem:[#allocation2 + $0x57] sm:$0xff] }
 0x317   : > { %11372 = vmatmul.msk.bf16.gmra.mxu1 %vm1330_vm3, %v4286_v51 }
 0x318   : > { %v13340_v37 = vadd.f32 %v3700_v29, %v3421_v6  ;;  %v4131_v29 = vld [vmem:[#allocation2 + $0x47] sm:$0xff] }
 0x319   : > { %v4287_v3 = vpack.c.bf16 %v4132_v41, %v4131_v29 }
 0x31c   : > { %v3705_v9 = vpop.f32.mrf.mxu3  ;;  %v3145_v14 = vpop.f32.mrf.mxu1 }
 0x31d   : > { %v3191_v11 = vadd.f32 %v3145_v14, %v16036_v55  ;;  %v3373_v5 = vpop.f32.mrf.mxu2  ;;  %v4492_v14 = vld [vmem:[#allocation2 + $0x48] sm:$0xff]  ;;  %v4493_v55 = vld [vmem:[#allocation2 + $0x50] sm:$0xff] }
 0x31e   : > { %v13346_v32 = vadd.f32 %v3373_v5, %v3189_v22  ;;  %v11980_v22 = vld [vmem:[%s12606_s23 + $0x8] sm:$0xff]  ;;  %v4648_v31 = vpack.c.bf16 %v4493_v55, %v4492_v14 }
 0x31f   : > { %4999 = vmatpush.bf16.msrb.mxu3 %v11980_v22  ;;  %v4495_v22 = vld [vmem:[#allocation2 + $0x60] sm:$0xff]  ;;  %v4136_v55 = vld [vmem:[#allocation2 + $0x6f] sm:$0xff] }
 0x322   : > { %11396 = vmatmul.msk.bf16.gmra.mxu2 %vm1330_vm3, %v4647_v2 }
 0x324   : > { %v13349_v44 = vpop.f32.mrf.mxu3  ;;  %v3148_v35 = vpop.f32.mrf.mxu1 }
 0x325   : > { %v3192_v63 = vadd.f32 %v3148_v35, %v16037_v19  ;;  %v3376_v59 = vpop.f32.mrf.mxu2 }
 0x326   : > { %v3423_v42 = vadd.f32 %v3376_v59, %v3190_v38  ;;  %v4134_v38 = vld [vmem:[#allocation2 + $0x5f] sm:$0xff] }
 0x327   : > { %11373 = vmatmul.msk.bf16.gmra.mxu1 %vm1330_vm3, %v4287_v3  ;;  %v4288_v35 = vpack.c.bf16 %v4134_v38, %v4133_v33 }
 0x328   : > { %v13353_v50 = vadd.f32 %v3705_v9, %v3423_v42  ;;  %v4494_v42 = vld [vmem:[#allocation2 + $0x58] sm:$0xff] }
 0x329   : > { %v4649_v14 = vpack.c.bf16 %v4495_v22, %v4494_v42  ;;  %v4137_v22 = vld [vmem:[#allocation2 + $0x77] sm:$0xff] }
 0x32c   : > { %v3710_v24 = vpop.f32.mrf.mxu3  ;;  %v3150_v51 = vpop.f32.mrf.mxu1 }
 0x32d   : > { %v3193_v6 = vadd.f32 %v3150_v51, %v13147_v18  ;;  %v3378_v61 = vpop.f32.mrf.mxu2 }
 0x32e   : > { %v13357_v5 = vadd.f32 %v3378_v61, %v3191_v11 }
 0x332   : > { %11397 = vmatmul.msk.bf16.gmra.mxu2 %vm1330_vm3, %v4648_v31 }
 0x334   : > { %v3153_v2 = vpop.f32.mrf.mxu1  ;;  %v13360_v29 = vpop.f32.mrf.mxu3 }
 0x335   : > { %v3194_v9 = vadd.f32 %v3153_v2, %v13152_v28  ;;  %v3381_v41 = vpop.f32.mrf.mxu2  ;;  %v4135_v28 = vld [vmem:[#allocation2 + $0x67] sm:$0xff] }
 0x336   : > { %v3425_v19 = vadd.f32 %v3381_v41, %v3192_v63  ;;  %v4289_v33 = vpack.c.bf16 %v4136_v55, %v4135_v28  ;;  %v11979_v2 = vld [vmem:[%s12606_s23] sm:$0xff]  ;;  %v16038_v55 = vld [vmem:[#allocation40_spill] sm:$0xff] }
 0x337   : > { %11374 = vmatmul.msk.bf16.gmra.mxu1 %vm1330_vm3, %v4288_v35  ;;  %5000 = vmatpush.bf16.msrb.mxu3 %v11979_v2 }
 0x338   : > { %v13364_v18 = vadd.f32 %v3710_v24, %v3425_v19 }
 0x33c   : > { %v3155_v59 = vpop.f32.mrf.mxu1  ;;  %v3715_v61 = vpop.f32.mrf.mxu3 }
 0x33d   : > { %v3195_v11 = vadd.f32 %v3155_v59, %v13157_v36  ;;  %v3383_v3 = vpop.f32.mrf.mxu2  ;;  %v4496_v59 = vld [vmem:[#allocation2 + $0x68] sm:$0xff] }
 0x33e   : > { %v13367_v51 = vadd.f32 %v3383_v3, %v3193_v6  ;;  %v4497_v3 = vld [vmem:[#allocation2 + $0x70] sm:$0xff] }
 0x342   : > { %11398 = vmatmul.msk.bf16.gmra.mxu2 %vm1330_vm3, %v4649_v14 }
 0x344   : > { %v3158_v63 = vpop.f32.mrf.mxu1  ;;  %v13375_v41 = vpop.f32.mrf.mxu3 }
 0x345   : > { %v3196_v31 = vadd.f32 %v3158_v63, %v13168_v40  ;;  %v3386_v24 = vpop.f32.mrf.mxu2  ;;  %v4138_v40 = vld [vmem:[#allocation2 + $0x7f] sm:$0xff] }
 0x346   : > { %v3427_v38 = vadd.f32 %v3386_v24, %v3194_v9  ;;  %v4650_v9 = vpack.c.bf16 %v4497_v3, %v4496_v59  ;;  %v4498_v3 = vld [vmem:[#allocation2 + $0x78] sm:$0xff] }
 0x347   : > { %11375 = vmatmul.msk.bf16.gmra.mxu1 %vm1330_vm3, %v4289_v33 }
 0x348   : > { %v13372_v36 = vadd.f32 %v3715_v61, %v3427_v38  ;;  %v4266_v61 = vsel %vm15845_vm2, %v4138_v40, 0.0  ;;  %v4499_v38 = vld [vmem:[#allocation2 + $0x80] sm:$0xff]  ;;  %vm15846_vm2 = vcmp.lt.s32.totalorder %v12953_v58, 60 }
 0x349   : > { %v4290_v24 = vpack.c.bf16 %v4266_v61, %v4137_v22  ;;  %v4627_v40 = vsel %vm15844_vm11, %v4499_v38, 0.0  ;;  %v4139_v22 = vld [vmem:[#allocation2 + $0x87] sm:$0xff]  ;;  %v4140_v61 = vld [vmem:[#allocation2 + $0x8f] sm:$0xff]  ;;  %vm4178_vm11 = vcmp.lt.s32.totalorder %v12953_v58, 61 }
 0x34a   : > { %v4500_v38 = vld [vmem:[#allocation2 + $0x88] sm:$0xff] }
 0x34c   : > { %v3160_v6 = vpop.f32.mrf.mxu1  ;;  %v3720_v14 = vpop.f32.mrf.mxu3 }
 0x34d   : > { %v3197_v35 = vadd.f32 %v3160_v6, %v13173_v8  ;;  %v3388_v19 = vpop.f32.mrf.mxu2 }
 0x34e   : > { %v13378_v42 = vadd.f32 %v3388_v19, %v3195_v11 }
 0x352   : > { %11399 = vmatmul.msk.bf16.gmra.mxu2 %vm1330_vm3, %v4650_v9 }
 0x354   : > { %v3163_v28 = vpop.f32.mrf.mxu1  ;;  %v13389_v6 = vpop.f32.mrf.mxu3 }
 0x355   : > { %v3198_v63 = vadd.f32 %v3163_v28, %v16038_v55  ;;  %v3391_v8 = vpop.f32.mrf.mxu2  ;;  %v4291_v55 = vpack.c.bf16 %v4140_v61, %v4139_v22 }
 0x356   : > { %v3429_v33 = vadd.f32 %v3391_v8, %v3196_v31  ;;  %v4651_v31 = vpack.c.bf16 %v4627_v40, %v4498_v3  ;;  %v4141_v40 = vld [vmem:[#allocation2 + $0x97] sm:$0xff] }
 0x357   : > { %11376 = vmatmul.msk.bf16.gmra.mxu1 %vm1330_vm3, %v4290_v24 }
 0x358   : > { %v13386_v11 = vadd.f32 %v3720_v14, %v3429_v33 }
 0x35c   : > { %v3165_v2 = vpop.f32.mrf.mxu1  ;;  %v3725_v24 = vpop.f32.mrf.mxu3 }
 0x35d   : > { %v3199_v19 = vadd.f32 %v3165_v2, %v13184_v25  ;;  %v3393_v59 = vpop.f32.mrf.mxu2 }
 0x35e   : > { %v13394_v9 = vadd.f32 %v3393_v59, %v3197_v35  ;;  %v4501_v35 = vld [vmem:[#allocation2 + $0x90] sm:$0xff] }
 0x35f   : > { %v4652_v3 = vpack.c.bf16 %v4501_v35, %v4500_v38  ;;  %v4503_v38 = vld [vmem:[#allocation2 + $0xa0] sm:$0xff] }
 0x362   : > { %11400 = vmatmul.msk.bf16.gmra.mxu2 %vm1330_vm3, %v4651_v31  ;;  %v4142_v31 = vld [vmem:[#allocation2 + $0x9f] sm:$0xff] }
 0x364   : > { %v4372_v14 = vpop.f32.mrf.mxu1 }
 0x365   : > { %v3396_v28 = vpop.f32.mrf.mxu2  ;;  %v4452_v61 = vadd.f32 %v4372_v14, %v13190_v0  ;;  %v13415_v14 = vpop.f32.mrf.mxu0 }
 0x366   : > { %v3431_v8 = vadd.f32 %v3396_v28, %v3198_v63  ;;  %v4292_v63 = vpack.c.bf16 %v4142_v31, %v4141_v40  ;;  %v13410_v28 = vld [vmem:[%s689_s24] ss:$0 sm:$0xff]  ;;  %s12043_s24 = smul.u32 160, %s16356_s25 }
 0x367   : > { %11377 = vmatmul.msk.bf16.gmra.mxu1 %vm1330_vm3, %v4291_v55 }
 0x368   : > { %v13398_v25 = vadd.f32 %v3725_v24, %v3431_v8  ;;  %s14185_s3 = scalar_lea.vmem %s16097_s9, %s12043_s24 }
 0x36a   : > { %16039 = vst [vmem:[#allocation28_spill] sm:$0xff] %v13398_v25 }
 0x36c   : > { %v4374_v33 = vpop.f32.mrf.mxu1 }
 0x36d   : > { %v3398_v2 = vpop.f32.mrf.mxu2  ;;  %v4453_v55 = vadd.f32 %v4374_v33, %v13194_v46  ;;  %v4144_v46 = vld [vmem:[#allocation2 + $0xaf] sm:$0xff] }
 0x36e   : > { %v13400_v59 = vadd.f32 %v3398_v2, %v3199_v19  ;;  %v4502_v2 = vld [vmem:[#allocation2 + $0x98] sm:$0xff] }
 0x36f   : > { %v4653_v0 = vpack.c.bf16 %v4503_v38, %v4502_v2  ;;  %v11987_v2 = vld [vmem:[%s12612_s26 + $0x90] sm:$0xff]  ;;  %v13422_v38 = vpop.f32.mrf.mxu0 }
 0x370   : > { %5626 = vmatpush.bf16.msra.mxu1 %v11987_v2 }
 0x372   : > { %11401 = vmatmul.msk.bf16.gmra.mxu2 %vm1330_vm3, %v4652_v3 }
 0x374   : > { %v4377_v26 = vpop.f32.mrf.mxu1 }
 0x375   : > { %v4733_v22 = vpop.f32.mrf.mxu2 }
 0x376   : > { %v4813_v19 = vadd.f32 %v4733_v22, %v4452_v61  ;;  %v4143_v22 = vld [vmem:[#allocation2 + $0xa7] sm:$0xff] }
 0x377   : > { %11378 = vmatmul.msk.bf16.gmra.mxu1 %vm1330_vm3, %v4292_v63  ;;  %v4293_v25 = vpack.c.bf16 %v4144_v46, %v4143_v22  ;;  %v4146_v46 = vld [vmem:[#allocation2 + $0xbf] sm:$0xff]  ;;  %v13431_v2 = vpop.f32.mrf.mxu0 }
 0x378   : > { %v4849_v35 = vadd.f32 %v13410_v28, %v4813_v19  ;;  %v4454_v19 = vadd.f32 %v4377_v26, %v13203_v16 }
 0x37a   : > { %v4881_v31 = vmax.f32 %v4849_v35, 0.0 }
 0x37c   : > { %v4379_v8 = vpop.f32.mrf.mxu1 }
 0x37d   : > { %v4735_v24 = vpop.f32.mrf.mxu2  ;;  %v4455_v35 = vadd.f32 %v4379_v8, %v13209_v48  ;;  %v4145_v48 = vld [vmem:[#allocation2 + $0xb7] sm:$0xff]  ;;  %v4274_v8 = vsel %vm4178_vm11, %v4146_v46, 0.0 }
 0x37e   : > { %v4814_v3 = vadd.f32 %v4735_v24, %v4453_v55  ;;  %v11989_v24 = vld [vmem:[%s12612_s26] sm:$0xff] }
 0x37f   : > { %5477 = vmatpush.bf16.msrb.mxu0 %v11989_v24 }
 0x380   : > { %v4850_v40 = vadd.f32 %v13410_v28, %v4814_v3 }
 0x382   : > { %v4882_v63 = vmax.f32 %v4850_v40, 0.0  ;;  %11402 = vmatmul.msk.bf16.gmra.mxu2 %vm1330_vm3, %v4653_v0  ;;  %v4504_v0 = vld [vmem:[#allocation2 + $0xa8] sm:$0xff] }
 0x384   : > { %v4913_v33 = vpack.c.bf16 %v4882_v63, %v4881_v31  ;;  %v4382_v61 = vpop.f32.mrf.mxu1  ;;  %v4505_v31 = vld [vmem:[#allocation2 + $0xb0] sm:$0xff] }
 0x385   : > { %v4738_v27 = vpop.f32.mrf.mxu2  ;;  %v4654_v26 = vpack.c.bf16 %v4505_v31, %v4504_v0  ;;  %v4507_v0 = vld [vmem:[#allocation2 + $0xc0] sm:$0xff] }
 0x386   : > { %5001 = vmatmul.bf16.vlgmr.msrb.gmra.mxu3 %v4913_v33  ;;  %v4815_v55 = vadd.f32 %v4738_v27, %v4454_v19  ;;  %v11992_v31 = vld [vmem:[%s12612_s26 + $0x18] sm:$0xff] }
 0x387   : > { %11379 = vmatmul.msk.bf16.gmra.mxu1 %vm1330_vm3, %v4293_v25  ;;  %5858 = vmatpush.bf16.msra.mxu2 %v11992_v31 }
 0x388   : > { %v4851_v63 = vadd.f32 %v13410_v28, %v4815_v55  ;;  %v4294_v55 = vpack.c.bf16 %v4274_v8, %v4145_v48  ;;  %v13441_v48 = vpop.f32.mrf.mxu0 }
 0x38a   : > { %v4883_v16 = vmax.f32 %v4851_v63, 0.0 }
 0x38c   : > { %v4384_v3 = vpop.f32.mrf.mxu1 }
 0x38d   : > { %v4740_v40 = vpop.f32.mrf.mxu2  ;;  %v4457_v63 = vadd.f32 %v4384_v3, %v13228_v49  ;;  %v4147_v49 = vld [vmem:[#allocation2 + $0xc7] sm:$0xff]  ;;  %v4148_v3 = vld [vmem:[#allocation2 + $0xcf] sm:$0xff] }
 0x38e   : > { %v4816_v22 = vadd.f32 %v4740_v40, %v4455_v35  ;;  %v4456_v35 = vadd.f32 %v4382_v61, %v13221_v13  ;;  %v4295_v31 = vpack.c.bf16 %v4148_v3, %v4147_v49 }
 0x390   : > { %v4852_v27 = vadd.f32 %v13410_v28, %v4816_v22 }
 0x392   : > { %v4884_v25 = vmax.f32 %v4852_v27, 0.0  ;;  %11403 = vmatmul.msk.bf16.gmra.mxu2 %vm1330_vm3, %v4654_v26  ;;  %v4506_v27 = vld [vmem:[#allocation2 + $0xb8] sm:$0xff]  ;;  %v4635_v26 = vsel %vm15846_vm2, %v4507_v0, 0.0  ;;  %v13447_v0 = vpop.f32.mrf.mxu0  ;;  %vm15847_vm2 = vcmp.lt.s32.totalorder %v13058_v60, 61 }
 0x393   : > { %v4655_v61 = vpack.c.bf16 %v4635_v26, %v4506_v27 }
 0x394   : > { %v4387_v33 = vpop.f32.mrf.mxu1  ;;  %v4914_v19 = vpack.c.bf16 %v4884_v25, %v4883_v16 }
 0x395   : > { %v4743_v24 = vpop.f32.mrf.mxu2 }
 0x396   : > { %5006 = vmatmul.bf16.gmra.mxu3 %v4914_v19  ;;  %v4817_v40 = vadd.f32 %v4743_v24, %v4456_v35 }
 0x397   : > { %11380 = vmatmul.msk.bf16.gmra.mxu1 %vm1330_vm3, %v4294_v55 }
 0x398   : > { %v4853_v16 = vadd.f32 %v13410_v28, %v4817_v40  ;;  %v4458_v40 = vadd.f32 %v4387_v33, %v13238_v62  ;;  %v4149_v62 = vld [vmem:[#allocation2 + $0xd7] sm:$0xff]  ;;  %v4150_v33 = vld [vmem:[#allocation2 + $0xdf] sm:$0xff] }
 0x39a   : > { %v4885_v8 = vmax.f32 %v4853_v16, 0.0  ;;  %v4508_v16 = vld [vmem:[#allocation2 + $0xc8] sm:$0xff] }
 0x39c   : > { %v4389_v22 = vpop.f32.mrf.mxu1 }
 0x39d   : > { %v4745_v46 = vpop.f32.mrf.mxu2 }
 0x39e   : > { %v4818_v25 = vadd.f32 %v4745_v46, %v4457_v63  ;;  %v4459_v46 = vadd.f32 %v4389_v22, %v13242_v34 }
 0x3a0   : > { %v4854_v13 = vadd.f32 %v13410_v28, %v4818_v25  ;;  %v4509_v25 = vld [vmem:[#allocation2 + $0xd0] sm:$0xff] }
 0x3a2   : > { %v4886_v19 = vmax.f32 %v4854_v13, 0.0  ;;  %11404 = vmatmul.msk.bf16.gmra.mxu2 %vm1330_vm3, %v4655_v61 }
 0x3a4   : > { %v4392_v24 = vpop.f32.mrf.mxu1  ;;  %v4915_v55 = vpack.c.bf16 %v4886_v19, %v4885_v8  ;;  %v4656_v19 = vpack.c.bf16 %v4509_v25, %v4508_v16 }
 0x3a5   : > { %v4748_v35 = vpop.f32.mrf.mxu2 }
 0x3a6   : > { %5011 = vmatmul.bf16.gmra.mxu3 %v4915_v55  ;;  %v4819_v63 = vadd.f32 %v4748_v35, %v4458_v40  ;;  %v13453_v55 = vpop.f32.mrf.mxu0  ;;  %v3739_v40 = vadd.f32 %v13244_v17, %v13257_v56 }
 0x3a7   : > { %11381 = vmatmul.msk.bf16.gmra.mxu1 %vm1330_vm3, %v4295_v31  ;;  %v4296_v31 = vpack.c.bf16 %v4150_v33, %v4149_v62 }
 0x3a8   : > { %v4855_v13 = vadd.f32 %v13410_v28, %v4819_v63  ;;  %v4099_v63 = vadd.f32 %v13415_v14, %v13252_v23 }
 0x3aa   : > { %v4887_v49 = vmax.f32 %v4855_v13, 0.0 }
 0x3ac   : > { %v4394_v27 = vpop.f32.mrf.mxu1 }
 0x3ad   : > { %v4750_v26 = vpop.f32.mrf.mxu2 }
 0x3ae   : > { %v4820_v61 = vadd.f32 %v4750_v26, %v4459_v46  ;;  %v4460_v46 = vadd.f32 %v4392_v24, %v4099_v63  ;;  %v4100_v26 = vadd.f32 %v13422_v38, %v3739_v40  ;;  %v4151_v24 = vld [vmem:[#allocation2 + $0xe7] sm:$0xff]  ;;  %v4152_v38 = vld [vmem:[#allocation2 + $0xef] sm:$0xff]  ;;  %v4101_v40 = vadd.f32 %v13431_v2, %v13268_v52 }
 0x3b0   : > { %v4856_v8 = vadd.f32 %v13410_v28, %v4820_v61  ;;  %v4461_v25 = vadd.f32 %v4394_v27, %v4100_v26 }
 0x3b2   : > { %v4888_v3 = vmax.f32 %v4856_v8, 0.0  ;;  %11405 = vmatmul.msk.bf16.gmra.mxu2 %vm1330_vm3, %v4656_v19  ;;  %v4510_v8 = vld [vmem:[#allocation2 + $0xd8] sm:$0xff]  ;;  %v4511_v19 = vld [vmem:[#allocation2 + $0xe0] sm:$0xff] }
 0x3b3   : > { %v4657_v23 = vpack.c.bf16 %v4511_v19, %v4510_v8  ;;  %v4512_v19 = vld [vmem:[#allocation2 + $0xe8] sm:$0xff] }
 0x3b4   : > { %v4397_v35 = vpop.f32.mrf.mxu1  ;;  %v4916_v34 = vpack.c.bf16 %v4888_v3, %v4887_v49  ;;  %v13461_v49 = vpop.f32.mrf.mxu0 }
 0x3b5   : > { %v4753_v22 = vpop.f32.mrf.mxu2 }
 0x3b6   : > { %5016 = vmatmul.bf16.gmra.mxu3 %v4916_v34  ;;  %v4821_v16 = vadd.f32 %v4753_v22, %v4460_v46  ;;  %v4297_v22 = vpack.c.bf16 %v4152_v38, %v4151_v24  ;;  %v4462_v46 = vadd.f32 %v4397_v35, %v4101_v40 }
 0x3b7   : > { %11382 = vmatmul.msk.bf16.gmra.mxu1 %vm1330_vm3, %v4296_v31  ;;  %v3741_v31 = vadd.f32 %v13260_v10, %v13274_v15  ;;  %v4154_v10 = vld [vmem:[#allocation2 + $0xff] sm:$0xff] }
 0x3b8   : > { %v4857_v3 = vadd.f32 %v13410_v28, %v4821_v16 }
 0x3b9   : > { %v4102_v26 = vadd.f32 %v13441_v48, %v3741_v31  ;;  %v4153_v48 = vld [vmem:[#allocation2 + $0xf7] sm:$0xff] }
 0x3ba   : > { %v4889_v14 = vmax.f32 %v4857_v3, 0.0  ;;  %v4513_v3 = vld [vmem:[#allocation2 + $0xf0] sm:$0xff] }
 0x3bb   : > { %v4658_v15 = vpack.c.bf16 %v4513_v3, %v4512_v19  ;;  %v4514_v19 = vld [vmem:[#allocation2 + $0xf8] sm:$0xff] }
 0x3bc   : > { %v4399_v13 = vpop.f32.mrf.mxu1  ;;  %v4048_v63 = vpop.f32.mrf.mxu0 }
 0x3bd   : > { %v4755_v61 = vpop.f32.mrf.mxu2 }
 0x3be   : > { %v4822_v17 = vadd.f32 %v4755_v61, %v4461_v25  ;;  %v4463_v25 = vadd.f32 %v4399_v13, %v4102_v26  ;;  %v4282_v13 = vsel %vm15847_vm2, %v4154_v10, 0.0  ;;  %vm4547_vm2 = vcmp.lt.s32.totalorder %v13058_v60, 60 }
 0x3bf   : > { %v4298_v38 = vpack.c.bf16 %v4282_v13, %v4153_v48 }
 0x3c0   : > { %v4858_v56 = vadd.f32 %v13410_v28, %v4822_v17 }
 0x3c2   : > { %v4890_v62 = vmax.f32 %v4858_v56, 0.0  ;;  %11406 = vmatmul.msk.bf16.gmra.mxu2 %vm1330_vm3, %v4657_v23 }
 0x3c4   : > { %v4402_v33 = vpop.f32.mrf.mxu1  ;;  %v4917_v27 = vpack.c.bf16 %v4890_v62, %v4889_v14  ;;  %v4051_v2 = vpop.f32.mrf.mxu0 }
 0x3c5   : > { %v4758_v34 = vpop.f32.mrf.mxu2 }
 0x3c6   : > { %5021 = vmatmul.bf16.gmra.mxu3 %v4917_v27  ;;  %v4823_v16 = vadd.f32 %v4758_v34, %v4462_v46  ;;  %v3743_v27 = vadd.f32 %v13279_v20, %v13296_v54  ;;  %v4103_v34 = vadd.f32 %v13447_v0, %v13291_v53  ;;  %v4515_v46 = vld [vmem:[#allocation2 + $0x100] sm:$0xff] }
 0x3c7   : > { %11383 = vmatmul.msk.bf16.gmra.mxu1 %vm1330_vm3, %v4297_v22  ;;  %v4643_v20 = vsel %vm4547_vm2, %v4515_v46, 0.0 }
 0x3c8   : > { %v4859_v17 = vadd.f32 %v13410_v28, %v4823_v16  ;;  %v4464_v22 = vadd.f32 %v4402_v33, %v4103_v34  ;;  %v4104_v31 = vadd.f32 %v13453_v55, %v3743_v27  ;;  %v4659_v33 = vpack.c.bf16 %v4643_v20, %v4514_v19 }
 0x3ca   : > { %v4891_v23 = vmax.f32 %v4859_v17, 0.0 }
 0x3cc   : > { %v4404_v61 = vpop.f32.mrf.mxu1  ;;  %v4053_v26 = vpop.f32.mrf.mxu0 }
 0x3cd   : > { %v4760_v8 = vpop.f32.mrf.mxu2  ;;  %v4465_v16 = vadd.f32 %v4404_v61, %v4104_v31  ;;  %v3745_v61 = vadd.f32 %v13299_v39, %v13307_v4 }
 0x3ce   : > { %v4824_v56 = vadd.f32 %v4760_v8, %v4463_v25 }
 0x3d0   : > { %v4860_v52 = vadd.f32 %v13410_v28, %v4824_v56 }
 0x3d2   : > { %v4892_v35 = vmax.f32 %v4860_v52, 0.0  ;;  %11407 = vmatmul.msk.bf16.gmra.mxu2 %vm1330_vm3, %v4658_v15  ;;  %v4105_v15 = vadd.f32 %v13461_v49, %v13303_v7  ;;  %v3747_v7 = vadd.f32 %v13310_v30, %v13317_v57  ;;  %v4107_v49 = vadd.f32 %v4051_v2, %v13314_v12  ;;  %v11994_v12 = vld [vmem:[%s12612_s26 + $0x28] sm:$0xff] }
 0x3d3   : > { %6123 = vmatpush.bf16.msra.mxu3 %v11994_v12 }
 0x3d4   : > { %v4407_v14 = vpop.f32.mrf.mxu1  ;;  %v4918_v62 = vpack.c.bf16 %v4892_v35, %v4891_v23  ;;  %v4056_v52 = vpop.f32.mrf.mxu0  ;;  %v4106_v35 = vadd.f32 %v4048_v63, %v3745_v61 }
 0x3d5   : > { %v4763_v24 = vpop.f32.mrf.mxu2  ;;  %v4466_v23 = vadd.f32 %v4407_v14, %v4105_v15 }
 0x3d6   : > { %5026 = vmatmul.bf16.gmra.mxu3 %v4918_v62  ;;  %v4825_v40 = vadd.f32 %v4763_v24, %v4464_v22 }
 0x3d7   : > { %11384 = vmatmul.msk.bf16.gmra.mxu1 %vm1330_vm3, %v4298_v38 }
 0x3d8   : > { %v4861_v53 = vadd.f32 %v13410_v28, %v4825_v40 }
 0x3da   : > { %v4893_v3 = vmax.f32 %v4861_v53, 0.0 }
 0x3dc   : > { %v4409_v25 = vpop.f32.mrf.mxu1  ;;  %v4058_v34 = vpop.f32.mrf.mxu0 }
 0x3dd   : > { %v4765_v8 = vpop.f32.mrf.mxu2  ;;  %v4467_v13 = vadd.f32 %v4409_v25, %v4106_v35 }
 0x3de   : > { %v4826_v54 = vadd.f32 %v4765_v8, %v4465_v16  ;;  %v4108_v16 = vadd.f32 %v4053_v26, %v3747_v7 }
 0x3e0   : > { %v4862_v0 = vadd.f32 %v13410_v28, %v4826_v54 }
 0x3e2   : > { %v4894_v55 = vmax.f32 %v4862_v0, 0.0  ;;  %11408 = vmatmul.msk.bf16.gmra.mxu2 %vm1330_vm3, %v4659_v33  ;;  %v13501_v33 = vpop.f32.mrf.mxu3 }
 0x3e4   : > { %v4412_v17 = vpop.f32.mrf.mxu1  ;;  %v4919_v56 = vpack.c.bf16 %v4894_v55, %v4893_v3  ;;  %v4061_v14 = vpop.f32.mrf.mxu0  ;;  %v11991_v3 = vld [vmem:[%s12612_s26 + $0x10] sm:$0xff] }
 0x3e5   : > { %v4768_v10 = vpop.f32.mrf.mxu2  ;;  %v4468_v63 = vadd.f32 %v4412_v17, %v4107_v49  ;;  %5859 = vmatpush.bf16.msra.mxu2 %v11991_v3 }
 0x3e6   : > { %5031 = vmatmul.bf16.gmra.mxu3 %v4919_v56  ;;  %v4827_v48 = vadd.f32 %v4768_v10, %v4466_v23  ;;  %v3749_v56 = vadd.f32 %v13320_v45, %v13330_v47  ;;  %v4109_v10 = vadd.f32 %v4056_v52, %v13324_v1 }
 0x3e8   : > { %v4863_v38 = vadd.f32 %v13410_v28, %v4827_v48  ;;  %v4110_v23 = vadd.f32 %v4058_v34, %v3749_v56  ;;  %v11996_v48 = vld [vmem:[%s12612_s26 + $0x38] sm:$0xff] }
 0x3e9   : > { %6356 = vmatpush.bf16.msra.mxu0 %v11996_v48 }
 0x3ea   : > { %v4895_v31 = vmax.f32 %v4863_v38, 0.0 }
 0x3ec   : > { %v4414_v62 = vpop.f32.mrf.mxu1  ;;  %v4063_v2 = vpop.f32.mrf.mxu0 }
 0x3ed   : > { %v4770_v24 = vpop.f32.mrf.mxu2  ;;  %v4469_v8 = vadd.f32 %v4414_v62, %v4108_v16 }
 0x3ee   : > { %v4828_v27 = vadd.f32 %v4770_v24, %v4467_v13  ;;  %v11998_v13 = vld [vmem:[%s12612_s26 + $0x48] sm:$0xff] }
 0x3ef   : > { %6589 = vmatpush.bf16.msrb.mxu1 %v11998_v13 }
 0x3f0   : > { %v4864_v22 = vadd.f32 %v13410_v28, %v4828_v27 }
 0x3f2   : > { %v4896_v40 = vmax.f32 %v4864_v22, 0.0 }
 0x3f4   : > { %v4417_v39 = vpop.f32.mrf.mxu1  ;;  %v4920_v4 = vpack.c.bf16 %v4896_v40, %v4895_v31  ;;  %v4066_v27 = vpop.f32.mrf.mxu0 }
 0x3f5   : > { %v4773_v46 = vpop.f32.mrf.mxu2  ;;  %v4470_v61 = vadd.f32 %v4417_v39, %v4109_v10 }
 0x3f6   : > { %5036 = vmatmul.bf16.gmra.mxu3 %v4920_v4  ;;  %v4829_v25 = vadd.f32 %v4773_v46, %v4468_v63  ;;  %v3751_v4 = vadd.f32 %v13336_v43, %v13346_v32  ;;  %v4111_v46 = vadd.f32 %v4061_v14, %v13340_v37 }
 0x3f8   : > { %v4865_v53 = vadd.f32 %v13410_v28, %v4829_v25 }
 0x3fa   : > { %v4897_v30 = vmax.f32 %v4865_v53, 0.0 }
 0x3fc   : > { %v4419_v19 = vpop.f32.mrf.mxu1  ;;  %v4068_v63 = vpop.f32.mrf.mxu0 }
 0x3fd   : > { %v4775_v20 = vpop.f32.mrf.mxu2  ;;  %v4471_v62 = vadd.f32 %v4419_v19, %v4110_v23 }
 0x3fe   : > { %v4830_v54 = vadd.f32 %v4775_v20, %v4469_v8 }
 0x400   : > { %v4866_v0 = vadd.f32 %v13410_v28, %v4830_v54 }
 0x402   : > { %v4898_v57 = vmax.f32 %v4866_v0, 0.0  ;;  %v4112_v0 = vadd.f32 %v4063_v2, %v3751_v4 }
 0x404   : > { %v4422_v55 = vpop.f32.mrf.mxu1  ;;  %v4921_v26 = vpack.c.bf16 %v4898_v57, %v4897_v30  ;;  %v4071_v48 = vpop.f32.mrf.mxu0 }
 0x405   : > { %v4778_v17 = vpop.f32.mrf.mxu2  ;;  %v4472_v16 = vadd.f32 %v4422_v55, %v4111_v46 }
 0x406   : > { %5041 = vmatmul.bf16.gmra.mxu3 %v4921_v26  ;;  %v4831_v35 = vadd.f32 %v4778_v17, %v4470_v61 }
 0x408   : > { %v4867_v22 = vadd.f32 %v13410_v28, %v4831_v35 }
 0x409   : > { %v5002_v15 = vpop.f32.mrf.mxu3 }
 0x40a   : > { %5082 = vst.msk [vmem:[#allocation2 + $0x4] sm:$0xff] %vm1330_vm3, %v5002_v15  ;;  %v4899_v52 = vmax.f32 %v4867_v22, 0.0 }
 0x40c   : > { %v4424_v24 = vpop.f32.mrf.mxu1 }
 0x40d   : > { %v4780_v38 = vpop.f32.mrf.mxu2  ;;  %v4473_v14 = vadd.f32 %v4424_v24, %v4112_v0 }
 0x40e   : > { %v4832_v45 = vadd.f32 %v4780_v38, %v4471_v62 }
 0x410   : > { %v4868_v1 = vadd.f32 %v13410_v28, %v4832_v45 }
 0x411   : > { %v5004_v47 = vpop.f32.mrf.mxu3  ;;  %v5326_v7 = vld [vmem:[#allocation2] sm:$0xff] }
 0x412   : > { %v4900_v31 = vmax.f32 %v4868_v1, 0.0  ;;  %5083 = vst.msk [vmem:[#allocation2 + $0xc] sm:$0xff] %vm1330_vm3, %v5004_v47  ;;  %v5708_v49 = vld [vmem:[#allocation2 + $0x1] sm:$0xff]  ;;  %v5358_v20 = vsel %vm1799_vm4, %v5326_v7, 0.0 }
 0x413   : > { %v5114_v54 = vld [vmem:[#allocation2 + $0x3] sm:$0xff]  ;;  %v5740_v37 = vsel %vm2277_vm5, %v5708_v49, 0.0 }
 0x414   : > { %v4427_v34 = vpop.f32.mrf.mxu1  ;;  %v4922_v40 = vpack.c.bf16 %v4900_v31, %v4899_v52  ;;  %v5146_v3 = vsel %vm1363_vm7, %v5114_v54, %v5002_v15  ;;  %v3753_v31 = vadd.f32 %v13349_v44, %v13357_v5  ;;  %v4073_v44 = vpop.f32.mrf.mxu0 }
 0x415   : > { %v4783_v39 = vpop.f32.mrf.mxu2  ;;  %v5242_v56 = vmax.f32 %v5146_v3, %v5002_v15  ;;  %v4113_v15 = vadd.f32 %v4066_v27, %v13353_v50 }
 0x416   : > { %5046 = vmatmul.bf16.gmra.mxu3 %v4922_v40  ;;  %v4833_v30 = vadd.f32 %v4783_v39, %v4472_v16  ;;  %v4114_v49 = vadd.f32 %v4068_v63, %v3753_v31 }
 0x418   : > { %v4869_v55 = vadd.f32 %v13410_v28, %v4833_v30 }
 0x419   : > { %v13517_v25 = vpop.f32.mrf.mxu3  ;;  %v5327_v8 = vld [vmem:[#allocation2 + $0x8] sm:$0xff] }
 0x41a   : > { %v5709_v53 = vld [vmem:[#allocation2 + $0x9] sm:$0xff]  ;;  %5084 = vst.msk [vmem:[#allocation2 + $0x14] sm:$0xff] %vm1330_vm3, %v13517_v25  ;;  %v5390_v43 = vpack.c.bf16 %v5327_v8, %v5358_v20  ;;  %v4901_v13 = vmax.f32 %v4869_v55, 0.0 }
 0x41b   : > { %v5772_v32 = vpack.c.bf16 %v5709_v53, %v5740_v37  ;;  %v5115_v12 = vld [vmem:[#allocation2 + $0xb] sm:$0xff] }
 0x41c   : > { %v4429_v57 = vpop.f32.mrf.mxu1  ;;  %11449 = vmatmul.msk.bf16.vlgmr.msrb.gmra.mxu0 %vm1330_vm3, %v5390_v43  ;;  %v5178_v17 = vld [vmem:[#allocation2 + $0x5] sm:$0xff]  ;;  %v5243_v10 = vmax.f32 %v5115_v12, %v5004_v47  ;;  %v4474_v47 = vadd.f32 %v4427_v34, %v4113_v15 }
 0x41d   : > { %11497 = vmatmul.msk.bf16.vlgmr.msra.gmra.mxu2 %vm1330_vm3, %v5772_v32  ;;  %v4785_v2 = vpop.f32.mrf.mxu2  ;;  %v5274_v24 = vmax.f32 %v5242_v56, %v5178_v17  ;;  %v4475_v5 = vadd.f32 %v4429_v57, %v4114_v49  ;;  %v4076_v56 = vpop.f32.mrf.mxu0 }
 0x41e   : > { %v4834_v26 = vadd.f32 %v4785_v2, %v4473_v14 }
 0x420   : > { %v4870_v61 = vadd.f32 %v13410_v28, %v4834_v26 }
 0x421   : > { %v5009_v23 = vpop.f32.mrf.mxu3  ;;  %v5179_v35 = vld [vmem:[#allocation2 + $0xd] sm:$0xff] }
 0x422   : > { %v4902_v62 = vmax.f32 %v4870_v61, 0.0  ;;  %5085 = vst.msk [vmem:[#allocation2 + $0x1c] sm:$0xff] %vm1330_vm3, %v5009_v23  ;;  %v5275_v38 = vmax.f32 %v5243_v10, %v5179_v35  ;;  %v5328_v40 = vld [vmem:[#allocation2 + $0x10] sm:$0xff]  ;;  %v3755_v10 = vadd.f32 %v13360_v29, %v13367_v51 }
 0x423   : > { %v5710_v46 = vld [vmem:[#allocation2 + $0x11] sm:$0xff] }
 0x424   : > { %v4432_v22 = vpop.f32.mrf.mxu1  ;;  %v4923_v45 = vpack.c.bf16 %v4902_v62, %v4901_v13  ;;  %v5306_v1 = vpack.c.bf16 %v5275_v38, %v5274_v24  ;;  %v5116_v50 = vld [vmem:[#allocation2 + $0x13] sm:$0xff] }
 0x425   : > { %v4788_v52 = vpop.f32.mrf.mxu2  ;;  %v5244_v30 = vmax.f32 %v5116_v50, %v13517_v25  ;;  %v4115_v25 = vadd.f32 %v4071_v48, %v13364_v18 }
 0x426   : > { %5051 = vmatmul.bf16.gmra.mxu3 %v4923_v45  ;;  %11473 = vmatmul.msk.bf16.vlgmr.msra.gmra.mxu1 %vm1330_vm3, %v5306_v1  ;;  %v4835_v16 = vadd.f32 %v4788_v52, %v4474_v47  ;;  %v4116_v45 = vadd.f32 %v4073_v44, %v3755_v10 }
 0x428   : > { %v4871_v54 = vadd.f32 %v13410_v28, %v4835_v16 }
 0x429   : > { %v13536_v39 = vpop.f32.mrf.mxu3  ;;  %v5329_v4 = vld [vmem:[#allocation2 + $0x18] sm:$0xff] }
 0x42a   : > { %v5711_v7 = vld [vmem:[#allocation2 + $0x19] sm:$0xff]  ;;  %5086 = vst.msk [vmem:[#allocation2 + $0x24] sm:$0xff] %vm1330_vm3, %v13536_v39  ;;  %v5391_v8 = vpack.c.bf16 %v5329_v4, %v5328_v40  ;;  %v4903_v57 = vmax.f32 %v4871_v54, 0.0  ;;  %v4078_v40 = vpop.f32.mrf.mxu0  ;;  %v3757_v54 = vadd.f32 %v13375_v41, %v13378_v42 }
 0x42b   : > { %v5773_v20 = vpack.c.bf16 %v5711_v7, %v5710_v46  ;;  %v5117_v27 = vld [vmem:[#allocation2 + $0x1b] sm:$0xff] }
 0x42c   : > { %11450 = vmatmul.msk.bf16.gmra.mxu0 %vm1330_vm3, %v5391_v8  ;;  %v4434_v34 = vpop.f32.mrf.mxu1  ;;  %v5180_v63 = vld [vmem:[#allocation2 + $0x15] sm:$0xff]  ;;  %v5245_v43 = vmax.f32 %v5117_v27, %v5009_v23  ;;  %v4476_v23 = vadd.f32 %v4432_v22, %v4115_v25 }
 0x42d   : > { %11498 = vmatmul.msk.bf16.gmra.mxu2 %vm1330_vm3, %v5773_v20  ;;  %v4790_v53 = vpop.f32.mrf.mxu2  ;;  %v5276_v12 = vmax.f32 %v5244_v30, %v5180_v63  ;;  %v4477_v51 = vadd.f32 %v4434_v34, %v4116_v45 }
 0x42e   : > { %v4836_v0 = vadd.f32 %v4790_v53, %v4475_v5 }
 0x430   : > { %v4872_v37 = vadd.f32 %v13410_v28, %v4836_v0 }
 0x431   : > { %v5014_v32 = vpop.f32.mrf.mxu3  ;;  %v5181_v14 = vld [vmem:[#allocation2 + $0x1d] sm:$0xff] }
 0x432   : > { %v4904_v3 = vmax.f32 %v4872_v37, 0.0  ;;  %5087 = vst.msk [vmem:[#allocation2 + $0x2c] sm:$0xff] %vm1330_vm3, %v5014_v32  ;;  %v5277_v2 = vmax.f32 %v5245_v43, %v5181_v14  ;;  %v5330_v35 = vld [vmem:[#allocation2 + $0x20] sm:$0xff]  ;;  %v4081_v14 = vpop.f32.mrf.mxu0 }
 0x433   : > { %v5712_v24 = vld [vmem:[#allocation2 + $0x21] sm:$0xff] }
 0x434   : > { %v4924_v55 = vpack.c.bf16 %v4904_v3, %v4903_v57  ;;  %v5307_v26 = vpack.c.bf16 %v5277_v2, %v5276_v12  ;;  %v4437_v61 = vpop.f32.mrf.mxu1  ;;  %v5118_v18 = vld [vmem:[#allocation2 + $0x23] sm:$0xff]  ;;  %v4118_v57 = vadd.f32 %v4078_v40, %v3757_v54 }
 0x435   : > { %v4793_v17 = vpop.f32.mrf.mxu2  ;;  %v5246_v4 = vmax.f32 %v5118_v18, %v13536_v39  ;;  %v4117_v39 = vadd.f32 %v4076_v56, %v13372_v36 }
 0x436   : > { %5056 = vmatmul.bf16.gmra.mxu3 %v4924_v55  ;;  %11474 = vmatmul.msk.bf16.gmra.mxu1 %vm1330_vm3, %v5307_v26  ;;  %v4837_v1 = vadd.f32 %v4793_v17, %v4476_v23 }
 0x437   : > { %v4478_v0 = vadd.f32 %v4437_v61, %v4117_v39 }
 0x438   : > { %v4873_v31 = vadd.f32 %v13410_v28, %v4837_v1 }
 0x439   : > { %v13550_v13 = vpop.f32.mrf.mxu3  ;;  %v5331_v62 = vld [vmem:[#allocation2 + $0x28] sm:$0xff] }
 0x43a   : > { %v5713_v38 = vld [vmem:[#allocation2 + $0x29] sm:$0xff]  ;;  %5088 = vst.msk [vmem:[#allocation2 + $0x34] sm:$0xff] %vm1330_vm3, %v13550_v13  ;;  %v5392_v52 = vpack.c.bf16 %v5331_v62, %v5330_v35  ;;  %v4905_v20 = vmax.f32 %v4873_v31, 0.0  ;;  %v4119_v31 = vadd.f32 %v4081_v14, %v13386_v11 }
 0x43b   : > { %v5774_v29 = vpack.c.bf16 %v5713_v38, %v5712_v24  ;;  %v5119_v48 = vld [vmem:[#allocation2 + $0x2b] sm:$0xff] }
 0x43c   : > { %11451 = vmatmul.msk.bf16.gmra.mxu0 %vm1330_vm3, %v5392_v52  ;;  %v5182_v47 = vld [vmem:[#allocation2 + $0x25] sm:$0xff]  ;;  %v5247_v46 = vmax.f32 %v5119_v48, %v5014_v32  ;;  %v4439_v49 = vpop.f32.mrf.mxu1 }
 0x43d   : > { %11499 = vmatmul.msk.bf16.gmra.mxu2 %vm1330_vm3, %v5774_v29  ;;  %v4795_v22 = vpop.f32.mrf.mxu2  ;;  %v5278_v5 = vmax.f32 %v5246_v4, %v5182_v47  ;;  %v4479_v36 = vadd.f32 %v4439_v49, %v4118_v57  ;;  %v4083_v29 = vpop.f32.mrf.mxu0 }
 0x43e   : > { %v4838_v15 = vadd.f32 %v4795_v22, %v4477_v51 }
 0x440   : > { %v4874_v7 = vadd.f32 %v13410_v28, %v4838_v15 }
 0x441   : > { %v5019_v16 = vpop.f32.mrf.mxu3  ;;  %v5183_v8 = vld [vmem:[#allocation2 + $0x2d] sm:$0xff] }
 0x442   : > { %v4906_v44 = vmax.f32 %v4874_v7, 0.0  ;;  %5089 = vst.msk [vmem:[#allocation2 + $0x3c] sm:$0xff] %vm1330_vm3, %v5019_v16  ;;  %v5279_v50 = vmax.f32 %v5247_v46, %v5183_v8  ;;  %v5332_v63 = vld [vmem:[#allocation2 + $0x30] sm:$0xff]  ;;  %v16041_v7 = vld [vmem:[#allocation20_spill] sm:$0xff] }
 0x443   : > { %v5714_v37 = vld [vmem:[#allocation2 + $0x31] sm:$0xff] }
 0x444   : > { %v4925_v27 = vpack.c.bf16 %v4906_v44, %v4905_v20  ;;  %v5308_v34 = vpack.c.bf16 %v5279_v50, %v5278_v5  ;;  %v4442_v42 = vpop.f32.mrf.mxu1  ;;  %v5120_v55 = vld [vmem:[#allocation2 + $0x33] sm:$0xff] }
 0x445   : > { %v4798_v53 = vpop.f32.mrf.mxu2  ;;  %v5248_v61 = vmax.f32 %v5120_v55, %v13550_v13  ;;  %v3759_v13 = vadd.f32 %v13389_v6, %v13394_v9  ;;  %v4480_v40 = vadd.f32 %v4442_v42, %v4119_v31 }
 0x446   : > { %5061 = vmatmul.bf16.gmra.mxu3 %v4925_v27  ;;  %11475 = vmatmul.msk.bf16.gmra.mxu1 %vm1330_vm3, %v5308_v34  ;;  %v4839_v3 = vadd.f32 %v4798_v53, %v4478_v0  ;;  %v4086_v53 = vpop.f32.mrf.mxu0 }
 0x447   : > { %v4120_v6 = vadd.f32 %v4083_v29, %v3759_v13 }
 0x448   : > { %v4875_v17 = vadd.f32 %v13410_v28, %v4839_v3 }
 0x449   : > { %v13564_v30 = vpop.f32.mrf.mxu3  ;;  %v5333_v43 = vld [vmem:[#allocation2 + $0x38] sm:$0xff] }
 0x44a   : > { %v5715_v32 = vld [vmem:[#allocation2 + $0x39] sm:$0xff]  ;;  %5090 = vst.msk [vmem:[#allocation2 + $0x44] sm:$0xff] %vm1330_vm3, %v13564_v30  ;;  %v5393_v12 = vpack.c.bf16 %v5333_v43, %v5332_v63  ;;  %v4907_v24 = vmax.f32 %v4875_v17, 0.0 }
 0x44b   : > { %v5775_v41 = vpack.c.bf16 %v5715_v32, %v5714_v37  ;;  %v5121_v26 = vld [vmem:[#allocation2 + $0x3b] sm:$0xff] }
 0x44c   : > { %11452 = vmatmul.msk.bf16.gmra.mxu0 %vm1330_vm3, %v5393_v12  ;;  %v5184_v25 = vld [vmem:[#allocation2 + $0x35] sm:$0xff]  ;;  %v5249_v23 = vmax.f32 %v5121_v26, %v5019_v16  ;;  %v4444_v18 = vpop.f32.mrf.mxu1  ;;  %v3761_v26 = vadd.f32 %v13501_v33, %v13400_v59  ;;  %v11993_v33 = vld [vmem:[%s12612_s26 + $0x20] sm:$0xff] }
 0x44d   : > { %11500 = vmatmul.msk.bf16.gmra.mxu2 %vm1330_vm3, %v5775_v41  ;;  %v4800_v2 = vpop.f32.mrf.mxu2  ;;  %v5280_v1 = vmax.f32 %v5248_v61, %v5184_v25  ;;  %v4481_v5 = vadd.f32 %v4444_v18, %v4120_v6  ;;  %v16042_v17 = vld [vmem:[#allocation28_spill] sm:$0xff]  ;;  %6124 = vmatpush.bf16.msra.mxu3 %v11993_v33 }
 0x44e   : > { %v4840_v56 = vadd.f32 %v4800_v2, %v4479_v36  ;;  %v5975_v33 = vld [vmem:[#allocation2 + $0x12] sm:$0xff] }
 0x450   : > { %v4876_v10 = vadd.f32 %v13410_v28, %v4840_v56  ;;  %v4121_v56 = vadd.f32 %v4086_v53, %v16042_v17 }
 0x451   : > { %v5024_v35 = vpop.f32.mrf.mxu3  ;;  %v5185_v62 = vld [vmem:[#allocation2 + $0x3d] sm:$0xff] }
 0x452   : > { %v4908_v38 = vmax.f32 %v4876_v10, 0.0  ;;  %5091 = vst.msk [vmem:[#allocation2 + $0x4c] sm:$0xff] %vm1330_vm3, %v5024_v35  ;;  %v5217_v45 = vsel %vm1530_vm8, %v5185_v62, %v5019_v16  ;;  %v5334_v15 = vld [vmem:[#allocation2 + $0x40] sm:$0xff] }
 0x453   : > { %v5281_v52 = vmax.f32 %v5249_v23, %v5217_v45  ;;  %v5716_v47 = vld [vmem:[#allocation2 + $0x41] sm:$0xff]  ;;  %v5366_v49 = vsel %vm1807_vm9, %v5334_v15, 0.0 }
 0x454   : > { %v4926_v51 = vpack.c.bf16 %v4908_v38, %v4907_v24  ;;  %v5748_v8 = vsel %vm2285_vm10, %v5716_v47, 0.0  ;;  %v5122_v20 = vld [vmem:[#allocation2 + $0x43] sm:$0xff]  ;;  %v4447_v0 = vpop.f32.mrf.mxu1 }
 0x455   : > { %v4803_v48 = vpop.f32.mrf.mxu2  ;;  %v5309_v22 = vpack.c.bf16 %v5281_v52, %v5280_v1  ;;  %v5154_v50 = vsel %vm1371_vm12, %v5122_v20, %v13564_v30  ;;  %v4482_v10 = vadd.f32 %v4447_v0, %v4121_v56 }
 0x456   : > { %5066 = vmatmul.bf16.gmra.mxu3 %v4926_v51  ;;  %v4841_v9 = vadd.f32 %v4803_v48, %v4480_v40  ;;  %v5250_v43 = vmax.f32 %v5154_v50, %v13564_v30  ;;  %v4088_v30 = vpop.f32.mrf.mxu0 }
 0x457   : > { %11476 = vmatmul.msk.bf16.gmra.mxu1 %vm1330_vm3, %v5309_v22  ;;  %v4122_v38 = vadd.f32 %v4088_v30, %v3761_v26  ;;  %v11995_v30 = vld [vmem:[%s12612_s26 + $0x30] sm:$0xff] }
 0x458   : > { %v4877_v54 = vadd.f32 %v13410_v28, %v4841_v9  ;;  %6357 = vmatpush.bf16.msra.mxu0 %v11995_v30 }
 0x459   : > { %v13580_v4 = vpop.f32.mrf.mxu3  ;;  %v5335_v46 = vld [vmem:[#allocation2 + $0x48] sm:$0xff] }
 0x45a   : > { %v5717_v16 = vld [vmem:[#allocation2 + $0x49] sm:$0xff]  ;;  %5092 = vst.msk [vmem:[#allocation2 + $0x54] sm:$0xff] %vm1330_vm3, %v13580_v4  ;;  %v5394_v11 = vpack.c.bf16 %v5335_v46, %v5366_v49  ;;  %v4909_v3 = vmax.f32 %v4877_v54, 0.0 }
 0x45b   : > { %v5776_v44 = vpack.c.bf16 %v5717_v16, %v5748_v8  ;;  %v5123_v27 = vld [vmem:[#allocation2 + $0x4b] sm:$0xff] }
 0x45c   : > { %11453 = vmatmul.msk.bf16.gmra.mxu0 %vm1330_vm3, %v5394_v11  ;;  %v5186_v63 = vld [vmem:[#allocation2 + $0x45] sm:$0xff]  ;;  %v5251_v37 = vmax.f32 %v5123_v27, %v5024_v35  ;;  %v4449_v61 = vpop.f32.mrf.mxu1 }
 0x45d   : > { %11501 = vmatmul.msk.bf16.gmra.mxu2 %vm1330_vm3, %v5776_v44  ;;  %v4805_v34 = vpop.f32.mrf.mxu2  ;;  %v5282_v41 = vmax.f32 %v5250_v43, %v5186_v63  ;;  %v4483_v52 = vadd.f32 %v4449_v61, %v4122_v38  ;;  %v5973_v63 = vld [vmem:[#allocation2 + $0x2] sm:$0xff]  ;;  %v5976_v38 = vld [vmem:[#allocation2 + $0x1a] sm:$0xff] }
 0x45e   : > { %v4842_v39 = vadd.f32 %v4805_v34, %v4481_v5 }
 0x460   : > { %v4878_v32 = vadd.f32 %v13410_v28, %v4842_v39 }
 0x461   : > { %v5029_v14 = vpop.f32.mrf.mxu3  ;;  %v5187_v57 = vld [vmem:[#allocation2 + $0x4d] sm:$0xff] }
 0x462   : > { %v4910_v12 = vmax.f32 %v4878_v32, 0.0  ;;  %5093 = vst.msk [vmem:[#allocation2 + $0x5c] sm:$0xff] %vm1330_vm3, %v5029_v14  ;;  %v5283_v42 = vmax.f32 %v5251_v37, %v5187_v57  ;;  %v5336_v25 = vld [vmem:[#allocation2 + $0x50] sm:$0xff] }
 0x463   : > { %v5718_v62 = vld [vmem:[#allocation2 + $0x51] sm:$0xff] }
 0x464   : > { %v4927_v36 = vpack.c.bf16 %v4910_v12, %v4909_v3  ;;  %v5310_v2 = vpack.c.bf16 %v5283_v42, %v5282_v41  ;;  %v5124_v29 = vld [vmem:[#allocation2 + $0x53] sm:$0xff]  ;;  %v5974_v37 = vld [vmem:[#allocation2 + $0xa] sm:$0xff]  ;;  %v6005_v3 = vsel %vm2638_vm6, %v5973_v63, 0.0  ;;  %v5977_v63 = vld [vmem:[#allocation2 + $0x22] sm:$0xff] }
 0x465   : > { %v4808_v55 = vpop.f32.mrf.mxu2  ;;  %v5252_v31 = vmax.f32 %v5124_v29, %v13580_v4  ;;  %v6037_v12 = vpack.c.bf16 %v5974_v37, %v6005_v3 }
 0x466   : > { %5071 = vmatmul.bf16.gmra.mxu3 %v4927_v36  ;;  %v4843_v45 = vadd.f32 %v4808_v55, %v4482_v10  ;;  %v11997_v10 = vld [vmem:[%s12612_s26 + $0x40] sm:$0xff] }
 0x467   : > { %11477 = vmatmul.msk.bf16.gmra.mxu1 %vm1330_vm3, %v5310_v2 }
 0x468   : > { %v4879_v48 = vadd.f32 %v13410_v28, %v4843_v45  ;;  %6590 = vmatpush.bf16.msrb.mxu1 %v11997_v10 }
 0x469   : > { %v5032_v23 = vpop.f32.mrf.mxu3  ;;  %v5337_v35 = vld [vmem:[#allocation2 + $0x58] sm:$0xff] }
 0x46a   : > { %v5719_v24 = vld [vmem:[#allocation2 + $0x59] sm:$0xff]  ;;  %5094 = vst.msk [vmem:[#allocation2 + $0x64] sm:$0xff] %vm1330_vm3, %v5032_v23  ;;  %v5395_v1 = vpack.c.bf16 %v5337_v35, %v5336_v25  ;;  %v4911_v49 = vmax.f32 %v4879_v48, 0.0 }
 0x46b   : > { %v5777_v59 = vpack.c.bf16 %v5719_v24, %v5718_v62  ;;  %v5125_v51 = vld [vmem:[#allocation2 + $0x5b] sm:$0xff] }
 0x46c   : > { %11454 = vmatmul.msk.bf16.gmra.mxu0 %vm1330_vm3, %v5395_v1  ;;  %v5188_v13 = vld [vmem:[#allocation2 + $0x55] sm:$0xff]  ;;  %v5253_v15 = vmax.f32 %v5125_v51, %v5029_v14  ;;  %v16043_v1 = vld [vmem:[#allocation21_spill] sm:$0xff]  ;;  %v6038_v51 = vpack.c.bf16 %v5976_v38, %v5975_v33 }
 0x46d   : > { %11502 = vmatmul.msk.bf16.gmra.mxu2 %vm1330_vm3, %v5777_v59  ;;  %v4810_v18 = vpop.f32.mrf.mxu2  ;;  %v5284_v8 = vmax.f32 %v5252_v31, %v5188_v13  ;;  %v5980_v33 = vld [vmem:[#allocation2 + $0x3a] sm:$0xff] }
 0x46e   : > { %v4844_v22 = vadd.f32 %v4810_v18, %v4483_v52 }
 0x470   : > { %v4880_v47 = vadd.f32 %v13410_v28, %v4844_v22 }
 0x471   : > { %v5034_v40 = vpop.f32.mrf.mxu3  ;;  %v5189_v46 = vld [vmem:[#allocation2 + $0x5d] sm:$0xff] }
 0x472   : > { %v4912_v16 = vmax.f32 %v4880_v47, 0.0  ;;  %5095 = vst.msk [vmem:[#allocation2 + $0x6c] sm:$0xff] %vm1330_vm3, %v5034_v40  ;;  %v5285_v20 = vmax.f32 %v5253_v15, %v5189_v46  ;;  %v5338_v11 = vld [vmem:[#allocation2 + $0x60] sm:$0xff]  ;;  %v16044_v47 = vld [vmem:[#allocation22_spill] sm:$0xff] }
 0x473   : > { %v5720_v4 = vld [vmem:[#allocation2 + $0x61] sm:$0xff] }
 0x474   : > { %v4928_v6 = vpack.c.bf16 %v4912_v16, %v4911_v49  ;;  %v5311_v9 = vpack.c.bf16 %v5285_v20, %v5284_v8  ;;  %v5126_v34 = vld [vmem:[#allocation2 + $0x63] sm:$0xff] }
 0x475   : > { %v5254_v39 = vmax.f32 %v5126_v34, %v5032_v23  ;;  %v5978_v34 = vld [vmem:[#allocation2 + $0x2a] sm:$0xff] }
 0x476   : > { %5076 = vmatmul.bf16.gmra.mxu3 %v4928_v6  ;;  %v12000_v6 = vld [vmem:[%s12612_s26 + $0x58] sm:$0xff]  ;;  %v6039_v37 = vpack.c.bf16 %v5978_v34, %v5977_v63 }
 0x477   : > { %11478 = vmatmul.msk.bf16.gmra.mxu1 %vm1330_vm3, %v5311_v9  ;;  %6822 = vmatpush.bf16.msrb.mxu2 %v12000_v6 }
 0x479   : > { %v5037_v44 = vpop.f32.mrf.mxu3  ;;  %v5339_v5 = vld [vmem:[#allocation2 + $0x68] sm:$0xff] }
 0x47a   : > { %v5721_v50 = vld [vmem:[#allocation2 + $0x69] sm:$0xff]  ;;  %5096 = vst.msk [vmem:[#allocation2 + $0x74] sm:$0xff] %vm1330_vm3, %v5037_v44  ;;  %v5396_v28 = vpack.c.bf16 %v5339_v5, %v5338_v11 }
 0x47b   : > { %v5778_v27 = vpack.c.bf16 %v5721_v50, %v5720_v4  ;;  %v5127_v53 = vld [vmem:[#allocation2 + $0x6b] sm:$0xff] }
 0x47c   : > { %11455 = vmatmul.msk.bf16.gmra.mxu0 %vm1330_vm3, %v5396_v28  ;;  %v5190_v54 = vld [vmem:[#allocation2 + $0x65] sm:$0xff]  ;;  %v5255_v0 = vmax.f32 %v5127_v53, %v5034_v40 }
 0x47d   : > { %11503 = vmatmul.msk.bf16.gmra.mxu2 %vm1330_vm3, %v5778_v27  ;;  %v5286_v14 = vmax.f32 %v5254_v39, %v5190_v54 }
 0x481   : > { %v5039_v43 = vpop.f32.mrf.mxu3  ;;  %v13613_v32 = vld [vmem:[#allocation2 + $0x6d] sm:$0xff] }
 0x482   : > { %5097 = vst.msk [vmem:[#allocation2 + $0x7c] sm:$0xff] %vm1330_vm3, %v5039_v43  ;;  %v5287_v57 = vmax.f32 %v5255_v0, %v13613_v32  ;;  %v5340_v42 = vld [vmem:[#allocation2 + $0x70] sm:$0xff] }
 0x483   : > { %v5722_v55 = vld [vmem:[#allocation2 + $0x71] sm:$0xff] }
 0x484   : > { %v5312_v41 = vpack.c.bf16 %v5287_v57, %v5286_v14  ;;  %v5128_v25 = vld [vmem:[#allocation2 + $0x73] sm:$0xff] }
 0x485   : > { %v5256_v35 = vmax.f32 %v5128_v25, %v5037_v44 }
 0x486   : > { %11521 = vmatmul.msk.bf16.vlgmr.msra.gmra.mxu3 %vm1330_vm3, %v6037_v12 }
 0x487   : > { %11479 = vmatmul.msk.bf16.gmra.mxu1 %vm1330_vm3, %v5312_v41 }
 0x489   : > { %v5042_v36 = vpop.f32.mrf.mxu3  ;;  %v5341_v2 = vld [vmem:[#allocation2 + $0x78] sm:$0xff] }
 0x48a   : > { %v5723_v26 = vld [vmem:[#allocation2 + $0x79] sm:$0xff]  ;;  %5098 = vst.msk [vmem:[#allocation2 + $0x84] sm:$0xff] %vm1330_vm3, %v5042_v36  ;;  %v5397_v17 = vpack.c.bf16 %v5341_v2, %v5340_v42 }
 0x48b   : > { %v5779_v56 = vpack.c.bf16 %v5723_v26, %v5722_v55  ;;  %v5129_v61 = vld [vmem:[#allocation2 + $0x7b] sm:$0xff] }
 0x48c   : > { %11456 = vmatmul.msk.bf16.gmra.mxu0 %vm1330_vm3, %v5397_v17  ;;  %v5192_v23 = vld [vmem:[#allocation2 + $0x75] sm:$0xff]  ;;  %v5257_v62 = vmax.f32 %v5129_v61, %v5039_v43 }
 0x48d   : > { %11504 = vmatmul.msk.bf16.gmra.mxu2 %vm1330_vm3, %v5779_v56  ;;  %v5288_v52 = vmax.f32 %v5256_v35, %v5192_v23 }
 0x491   : > { %v5044_v24 = vpop.f32.mrf.mxu3  ;;  %v13626_v45 = vld [vmem:[#allocation2 + $0x7d] sm:$0xff] }
 0x492   : > { %5099 = vst.msk [vmem:[#allocation2 + $0x8c] sm:$0xff] %vm1330_vm3, %v5044_v24  ;;  %v5225_v59 = vsel %vm15848_vm13, %v13626_v45, %v5039_v43  ;;  %v5342_v48 = vld [vmem:[#allocation2 + $0x80] sm:$0xff]  ;;  %vm16045_vm13 = vcmp.ge.s32.totalorder %v16044_v47, 3 }
 0x493   : > { %v5289_v29 = vmax.f32 %v5257_v62, %v5225_v59  ;;  %v5724_v22 = vld [vmem:[#allocation2 + $0x81] sm:$0xff]  ;;  %v5374_v40 = vsel %vm1815_vm14, %v5342_v48, 0.0  ;;  %v5979_v48 = vld [vmem:[#allocation2 + $0x32] sm:$0xff] }
 0x494   : > { %v5756_v49 = vsel %vm16045_vm13, %v5724_v22, 0.0  ;;  %v5130_v16 = vld [vmem:[#allocation2 + $0x83] sm:$0xff]  ;;  %vm16046_vm13 = vcmp.ge.s32.totalorder %v16041_v7, 2 }
 0x495   : > { %v5313_v18 = vpack.c.bf16 %v5289_v29, %v5288_v52  ;;  %v5162_v9 = vsel %vm1379_vm1, %v5130_v16, %v5042_v36 }
 0x496   : > { %11522 = vmatmul.msk.bf16.gmra.mxu3 %vm1330_vm3, %v6038_v51  ;;  %v5258_v5 = vmax.f32 %v5162_v9, %v5042_v36 }
 0x497   : > { %11480 = vmatmul.msk.bf16.gmra.mxu1 %vm1330_vm3, %v5313_v18 }
 0x499   : > { %v5047_v13 = vpop.f32.mrf.mxu3  ;;  %v5479_v31 = vpop.f32.mrf.mxu0  ;;  %v5343_v15 = vld [vmem:[#allocation2 + $0x88] sm:$0xff] }
 0x49a   : > { %v5725_v46 = vld [vmem:[#allocation2 + $0x89] sm:$0xff]  ;;  %5100 = vst.msk [vmem:[#allocation2 + $0x94] sm:$0xff] %vm1330_vm3, %v5047_v13  ;;  %v5398_v8 = vpack.c.bf16 %v5343_v15, %v5374_v40 }
 0x49b   : > { %v5780_v20 = vpack.c.bf16 %v5725_v46, %v5756_v49  ;;  %v5131_v11 = vld [vmem:[#allocation2 + $0x8b] sm:$0xff] }
 0x49c   : > { %11457 = vmatmul.msk.bf16.gmra.mxu0 %vm1330_vm3, %v5398_v8  ;;  %v5194_v44 = vld [vmem:[#allocation2 + $0x85] sm:$0xff]  ;;  %v5259_v4 = vmax.f32 %v5131_v11, %v5044_v24 }
 0x49d   : > { %11505 = vmatmul.msk.bf16.gmra.mxu2 %vm1330_vm3, %v5780_v20  ;;  %v5290_v54 = vmax.f32 %v5258_v5, %v5194_v44 }
 0x4a0   : > { %v5861_v50 = vpop.f32.mrf.mxu2 }
 0x4a1   : > { %v5049_v28 = vpop.f32.mrf.mxu3  ;;  %v5481_v27 = vpop.f32.mrf.mxu0  ;;  %v13644_v53 = vld [vmem:[#allocation2 + $0x8d] sm:$0xff] }
 0x4a2   : > { %5101 = vst.msk [vmem:[#allocation2 + $0x9c] sm:$0xff] %vm1330_vm3, %v5049_v28  ;;  %v5291_v39 = vmax.f32 %v5259_v4, %v13644_v53  ;;  %v5344_v12 = vld [vmem:[#allocation2 + $0x90] sm:$0xff] }
 0x4a3   : > { %v5628_v0 = vpop.f32.mrf.mxu1  ;;  %v5726_v2 = vld [vmem:[#allocation2 + $0x91] sm:$0xff] }
 0x4a4   : > { %v5629_v43 = vadd.f32 %v5628_v0, %v5479_v31  ;;  %v5314_v14 = vpack.c.bf16 %v5291_v39, %v5290_v54  ;;  %v13654_v10 = vld [vmem:[#allocation2 + $0x93] sm:$0xff]  ;;  %v6040_v31 = vpack.c.bf16 %v5980_v33, %v5979_v48  ;;  %v5981_v0 = vld [vmem:[#allocation2 + $0x42] sm:$0xff] }
 0x4a5   : > { %v5260_v35 = vmax.f32 %v13654_v10, %v5047_v13 }
 0x4a6   : > { %11523 = vmatmul.msk.bf16.gmra.mxu3 %vm1330_vm3, %v6039_v37  ;;  %v13649_v57 = vadd.f32 %v5861_v50, %v5629_v43  ;;  %v5982_v37 = vld [vmem:[#allocation2 + $0x4a] sm:$0xff] }
 0x4a7   : > { %11481 = vmatmul.msk.bf16.gmra.mxu1 %vm1330_vm3, %v5314_v14 }
 0x4a8   : > { %v5863_v3 = vpop.f32.mrf.mxu2 }
 0x4a9   : > { %v5052_v41 = vpop.f32.mrf.mxu3  ;;  %v5484_v42 = vpop.f32.mrf.mxu0  ;;  %v5345_v36 = vld [vmem:[#allocation2 + $0x98] sm:$0xff] }
 0x4aa   : > { %v5727_v55 = vld [vmem:[#allocation2 + $0x99] sm:$0xff]  ;;  %5102 = vst.msk [vmem:[#allocation2 + $0xa4] sm:$0xff] %vm1330_vm3, %v5052_v41  ;;  %v5399_v26 = vpack.c.bf16 %v5345_v36, %v5344_v12  ;;  %v6013_v36 = vsel %vm16046_vm13, %v5981_v0, 0.0  ;;  %vm16047_vm13 = vcmp.le.s32.totalorder %v12953_v58, 62 }
 0x4ab   : > { %v5781_v17 = vpack.c.bf16 %v5727_v55, %v5726_v2  ;;  %v5630_v56 = vpop.f32.mrf.mxu1  ;;  %v13656_v25 = vld [vmem:[#allocation2 + $0x9b] sm:$0xff]  ;;  %v6041_v2 = vpack.c.bf16 %v5982_v37, %v6013_v36 }
 0x4ac   : > { %v5631_v30 = vadd.f32 %v5630_v56, %v5481_v27  ;;  %11458 = vmatmul.msk.bf16.gmra.mxu0 %vm1330_vm3, %v5399_v26  ;;  %v13661_v23 = vld [vmem:[#allocation2 + $0x95] sm:$0xff]  ;;  %v5261_v62 = vmax.f32 %v13656_v25, %v5049_v28 }
 0x4ad   : > { %11506 = vmatmul.msk.bf16.gmra.mxu2 %vm1330_vm3, %v5781_v17  ;;  %v5292_v29 = vmax.f32 %v5260_v35, %v13661_v23  ;;  %v16048_v36 = vld [vmem:[#allocation24_spill] sm:$0xff] }
 0x4ae   : > { %v13659_v61 = vadd.f32 %v5863_v3, %v5631_v30 }
 0x4b0   : > { %v5866_v24 = vpop.f32.mrf.mxu2 }
 0x4b1   : > { %v5054_v38 = vpop.f32.mrf.mxu3  ;;  %v5486_v59 = vpop.f32.mrf.mxu0  ;;  %v13665_v52 = vld [vmem:[#allocation2 + $0x9d] sm:$0xff] }
 0x4b2   : > { %5103 = vst.msk [vmem:[#allocation2 + $0xac] sm:$0xff] %vm1330_vm3, %v5054_v38  ;;  %v5293_v51 = vmax.f32 %v5261_v62, %v13665_v52  ;;  %v5346_v46 = vld [vmem:[#allocation2 + $0xa0] sm:$0xff] }
 0x4b3   : > { %v5633_v18 = vpop.f32.mrf.mxu1  ;;  %v5728_v20 = vld [vmem:[#allocation2 + $0xa1] sm:$0xff] }
 0x4b4   : > { %v5634_v22 = vadd.f32 %v5633_v18, %v5484_v42  ;;  %v5315_v15 = vpack.c.bf16 %v5293_v51, %v5292_v29  ;;  %v13679_v4 = vld [vmem:[#allocation2 + $0xa3] sm:$0xff] }
 0x4b5   : > { %v5262_v34 = vmax.f32 %v13679_v4, %v5052_v41 }
 0x4b6   : > { %11524 = vmatmul.msk.bf16.gmra.mxu3 %vm1330_vm3, %v6040_v31  ;;  %v13671_v13 = vadd.f32 %v5866_v24, %v5634_v22 }
 0x4b7   : > { %11482 = vmatmul.msk.bf16.gmra.mxu1 %vm1330_vm3, %v5315_v15 }
 0x4b8   : > { %v5868_v40 = vpop.f32.mrf.mxu2 }
 0x4b9   : > { %v13674_v49 = vpop.f32.mrf.mxu3  ;;  %v5489_v16 = vpop.f32.mrf.mxu0  ;;  %v5347_v8 = vld [vmem:[#allocation2 + $0xa8] sm:$0xff] }
 0x4ba   : > { %v5729_v6 = vld [vmem:[#allocation2 + $0xa9] sm:$0xff]  ;;  %5104 = vst.msk [vmem:[#allocation2 + $0xb4] sm:$0xff] %vm1330_vm3, %v13674_v49  ;;  %v5400_v9 = vpack.c.bf16 %v5347_v8, %v5346_v46 }
 0x4bb   : > { %v5782_v11 = vpack.c.bf16 %v5729_v6, %v5728_v20  ;;  %v5635_v44 = vpop.f32.mrf.mxu1  ;;  %v13681_v50 = vld [vmem:[#allocation2 + $0xab] sm:$0xff]  ;;  %v5984_v20 = vld [vmem:[#allocation2 + $0x5a] sm:$0xff] }
 0x4bc   : > { %v5636_v5 = vadd.f32 %v5635_v44, %v5486_v59  ;;  %11459 = vmatmul.msk.bf16.gmra.mxu0 %vm1330_vm3, %v5400_v9  ;;  %v13686_v27 = vld [vmem:[#allocation2 + $0xa5] sm:$0xff]  ;;  %v5263_v54 = vmax.f32 %v13681_v50, %v5054_v38 }
 0x4bd   : > { %11507 = vmatmul.msk.bf16.gmra.mxu2 %vm1330_vm3, %v5782_v11  ;;  %v5294_v3 = vmax.f32 %v5262_v34, %v13686_v27  ;;  %v5983_v11 = vld [vmem:[#allocation2 + $0x52] sm:$0xff] }
 0x4be   : > { %v13684_v28 = vadd.f32 %v5868_v40, %v5636_v5 }
 0x4c0   : > { %v5871_v39 = vpop.f32.mrf.mxu2 }
 0x4c1   : > { %v5059_v63 = vpop.f32.mrf.mxu3  ;;  %v5491_v43 = vpop.f32.mrf.mxu0  ;;  %v13690_v14 = vld [vmem:[#allocation2 + $0xad] sm:$0xff] }
 0x4c2   : > { %5105 = vst.msk [vmem:[#allocation2 + $0xbc] sm:$0xff] %vm1330_vm3, %v5059_v63  ;;  %v5295_v12 = vmax.f32 %v5263_v54, %v13690_v14  ;;  %v5348_v56 = vld [vmem:[#allocation2 + $0xb0] sm:$0xff]  ;;  %v6042_v54 = vpack.c.bf16 %v5984_v20, %v5983_v11 }
 0x4c3   : > { %v5638_v42 = vpop.f32.mrf.mxu1  ;;  %v5730_v24 = vld [vmem:[#allocation2 + $0xb1] sm:$0xff] }
 0x4c4   : > { %v5639_v41 = vadd.f32 %v5638_v42, %v5489_v16  ;;  %v5316_v55 = vpack.c.bf16 %v5295_v12, %v5294_v3  ;;  %v13707_v18 = vld [vmem:[#allocation2 + $0xb3] sm:$0xff] }
 0x4c5   : > { %v5264_v40 = vmax.f32 %v13707_v18, %v13674_v49 }
 0x4c6   : > { %11525 = vmatmul.msk.bf16.gmra.mxu3 %vm1330_vm3, %v6041_v2  ;;  %v13698_v26 = vadd.f32 %v5871_v39, %v5639_v41 }
 0x4c7   : > { %11483 = vmatmul.msk.bf16.gmra.mxu1 %vm1330_vm3, %v5316_v55 }
 0x4c8   : > { %v5873_v17 = vpop.f32.mrf.mxu2 }
 0x4c9   : > { %v13701_v30 = vpop.f32.mrf.mxu3  ;;  %v5494_v35 = vpop.f32.mrf.mxu0  ;;  %v5349_v62 = vld [vmem:[#allocation2 + $0xb8] sm:$0xff] }
 0x4ca   : > { %v5731_v38 = vld [vmem:[#allocation2 + $0xb9] sm:$0xff]  ;;  %5106 = vst.msk [vmem:[#allocation2 + $0xc4] sm:$0xff] %vm1330_vm3, %v13701_v30  ;;  %v5401_v59 = vpack.c.bf16 %v5349_v62, %v5348_v56 }
 0x4cb   : > { %v5783_v33 = vpack.c.bf16 %v5731_v38, %v5730_v24  ;;  %v5640_v29 = vpop.f32.mrf.mxu1  ;;  %v13709_v48 = vld [vmem:[#allocation2 + $0xbb] sm:$0xff] }
 0x4cc   : > { %v5641_v51 = vadd.f32 %v5640_v29, %v5491_v43  ;;  %11460 = vmatmul.msk.bf16.gmra.mxu0 %vm1330_vm3, %v5401_v59  ;;  %v13713_v15 = vld [vmem:[#allocation2 + $0xb5] sm:$0xff]  ;;  %v5265_v46 = vmax.f32 %v13709_v48, %v5059_v63 }
 0x4cd   : > { %11508 = vmatmul.msk.bf16.gmra.mxu2 %vm1330_vm3, %v5783_v33  ;;  %v5296_v44 = vmax.f32 %v5264_v40, %v13713_v15 }
 0x4ce   : > { %v13711_v22 = vadd.f32 %v5873_v17, %v5641_v51 }
 0x4d0   : > { %v5876_v31 = vpop.f32.mrf.mxu2 }
 0x4d1   : > { %v5064_v16 = vpop.f32.mrf.mxu3  ;;  %v5496_v8 = vpop.f32.mrf.mxu0  ;;  %v13718_v6 = vld [vmem:[#allocation2 + $0xbd] sm:$0xff] }
 0x4d2   : > { %5107 = vst.msk [vmem:[#allocation2 + $0xcc] sm:$0xff] %vm1330_vm3, %v5064_v16  ;;  %v5233_v9 = vsel %vm16047_vm13, %v13718_v6, %v5059_v63  ;;  %v5350_v0 = vld [vmem:[#allocation2 + $0xc0] sm:$0xff]  ;;  %vm16049_vm13 = vcmp.ge.s32.totalorder %v16048_v36, 3 }
 0x4d3   : > { %v5297_v5 = vmax.f32 %v5265_v46, %v5233_v9  ;;  %v5732_v43 = vld [vmem:[#allocation2 + $0xc1] sm:$0xff]  ;;  %v5382_v41 = vsel %vm15863_vm0, %v5350_v0, 0.0  ;;  %v5986_v9 = vld [vmem:[#allocation2 + $0x6a] sm:$0xff]  ;;  %vm16067_vm0 = vcmp.lt.s32.totalorder %v16034_v21, 63 }
 0x4d4   : > { %v5643_v34 = vpop.f32.mrf.mxu1  ;;  %v5764_v55 = vsel %vm16049_vm13, %v5732_v43, 0.0  ;;  %v13735_v17 = vld [vmem:[#allocation2 + $0xc3] sm:$0xff]  ;;  %vm16060_vm13 = vcmp.ge.s32.totalorder %v16044_v47, 2 }
 0x4d5   : > { %v5644_v49 = vadd.f32 %v5643_v34, %v5494_v35  ;;  %v5317_v39 = vpack.c.bf16 %v5297_v5, %v5296_v44  ;;  %v5170_v24 = vsel %vm1387_vm15, %v13735_v17, %v13701_v30  ;;  %v5985_v5 = vld [vmem:[#allocation2 + $0x62] sm:$0xff] }
 0x4d6   : > { %11526 = vmatmul.msk.bf16.gmra.mxu3 %vm1330_vm3, %v6042_v54  ;;  %v5266_v51 = vmax.f32 %v5170_v24, %v13701_v30  ;;  %v6043_v54 = vpack.c.bf16 %v5986_v9, %v5985_v5  ;;  %v5988_v5 = vld [vmem:[#allocation2 + $0x7a] sm:$0xff]  ;;  %v7222_v47 = vld [vmem:[#allocation2 + $0xa7] sm:$0xff] }
 0x4d7   : > { %11484 = vmatmul.msk.bf16.gmra.mxu1 %vm1330_vm3, %v5317_v39  ;;  %v13727_v37 = vadd.f32 %v5876_v31, %v5644_v49 }
 0x4d8   : > { %v5878_v3 = vpop.f32.mrf.mxu2 }
 0x4d9   : > { %v13729_v12 = vpop.f32.mrf.mxu3  ;;  %v5499_v63 = vpop.f32.mrf.mxu0  ;;  %v5351_v42 = vld [vmem:[#allocation2 + $0xc8] sm:$0xff] }
 0x4da   : > { %v5733_v2 = vld [vmem:[#allocation2 + $0xc9] sm:$0xff]  ;;  %5108 = vst.msk [vmem:[#allocation2 + $0xd4] sm:$0xff] %vm1330_vm3, %v13729_v12  ;;  %v5402_v56 = vpack.c.bf16 %v5351_v42, %v5382_v41 }
 0x4db   : > { %v5784_v35 = vpack.c.bf16 %v5733_v2, %v5764_v55  ;;  %v13744_v38 = vld [vmem:[#allocation2 + $0xcb] sm:$0xff] }
 0x4dc   : > { %11461 = vmatmul.msk.bf16.gmra.mxu0 %vm1330_vm3, %v5402_v56  ;;  %v5645_v62 = vpop.f32.mrf.mxu1  ;;  %v13747_v33 = vld [vmem:[#allocation2 + $0xc5] sm:$0xff]  ;;  %v5267_v31 = vmax.f32 %v13744_v38, %v5064_v16 }
 0x4dd   : > { %v5646_v59 = vadd.f32 %v5645_v62, %v5496_v8  ;;  %11509 = vmatmul.msk.bf16.gmra.mxu2 %vm1330_vm3, %v5784_v35  ;;  %16050 = vst [vmem:[#allocation30_spill] sm:$0xff] %v13747_v33  ;;  %v5298_v8 = vmax.f32 %v5266_v51, %v13747_v33 }
 0x4df   : > { %v13749_v29 = vadd.f32 %v5878_v3, %v5646_v59 }
 0x4e0   : > { %v5881_v40 = vpop.f32.mrf.mxu2 }
 0x4e1   : > { %v5069_v46 = vpop.f32.mrf.mxu3  ;;  %v5501_v20 = vpop.f32.mrf.mxu0  ;;  %v13753_v11 = vld [vmem:[#allocation2 + $0xcd] sm:$0xff] }
 0x4e2   : > { %16051 = vst [vmem:[#allocation26_spill] sm:$0xff] %v13753_v11  ;;  %v5299_v44 = vmax.f32 %v5267_v31, %v13753_v11  ;;  %v5352_v0 = vld [vmem:[#allocation2 + $0xd0] sm:$0xff] }
 0x4e3   : > { %5109 = vst.msk [vmem:[#allocation2 + $0xdc] sm:$0xff] %vm1330_vm3, %v5069_v46  ;;  %v5734_v41 = vld [vmem:[#allocation2 + $0xd1] sm:$0xff] }
 0x4e4   : > { %v5648_v34 = vpop.f32.mrf.mxu1  ;;  %v5318_v49 = vpack.c.bf16 %v5299_v44, %v5298_v8  ;;  %v13767_v35 = vld [vmem:[#allocation2 + $0xd3] sm:$0xff] }
 0x4e5   : > { %v5649_v39 = vadd.f32 %v5648_v34, %v5499_v63  ;;  %16052 = vst [vmem:[#allocation27_spill] sm:$0xff] %v13767_v35  ;;  %v5268_v31 = vmax.f32 %v13767_v35, %v13729_v12  ;;  %v5999_v11 = vld [vmem:[#allocation2 + $0xd2] sm:$0xff] }
 0x4e6   : > { %11527 = vmatmul.msk.bf16.gmra.mxu3 %vm1330_vm3, %v6043_v54 }
 0x4e7   : > { %11485 = vmatmul.msk.bf16.gmra.mxu1 %vm1330_vm3, %v5318_v49  ;;  %v13760_v30 = vadd.f32 %v5881_v40, %v5649_v39  ;;  %v5987_v49 = vld [vmem:[#allocation2 + $0x72] sm:$0xff] }
 0x4e8   : > { %v5883_v16 = vpop.f32.mrf.mxu2 }
 0x4e9   : > { %v13762_v43 = vpop.f32.mrf.mxu3  ;;  %v5504_v3 = vpop.f32.mrf.mxu0 }
 0x4ea   : > { %v5353_v42 = vld [vmem:[#allocation2 + $0xd8] sm:$0xff]  ;;  %5110 = vst.msk [vmem:[#allocation2 + $0xe4] sm:$0xff] %vm1330_vm3, %v13762_v43 }
 0x4eb   : > { %v5735_v2 = vld [vmem:[#allocation2 + $0xd9] sm:$0xff]  ;;  %v5403_v55 = vpack.c.bf16 %v5353_v42, %v5352_v0 }
 0x4ec   : > { %v5785_v56 = vpack.c.bf16 %v5735_v2, %v5734_v41  ;;  %v5650_v63 = vpop.f32.mrf.mxu1  ;;  %v13769_v62 = vld [vmem:[#allocation2 + $0xdb] sm:$0xff] }
 0x4ed   : > { %11462 = vmatmul.msk.bf16.gmra.mxu0 %vm1330_vm3, %v5403_v55  ;;  %16053 = vst [vmem:[#allocation29_spill] sm:$0xff] %v13769_v62  ;;  %v5651_v24 = vadd.f32 %v5650_v63, %v5501_v20  ;;  %v13772_v59 = vld [vmem:[#allocation2 + $0xd5] sm:$0xff]  ;;  %v5269_v40 = vmax.f32 %v13769_v62, %v5069_v46  ;;  %v12200_v62 = vld [vmem:[#allocation2 + $0x25] sm:$0xff] }
 0x4ee   : > { %11510 = vmatmul.msk.bf16.gmra.mxu2 %vm1330_vm3, %v5785_v56  ;;  %16054 = vst [vmem:[#allocation31_spill] sm:$0xff] %v13772_v59  ;;  %v5300_v20 = vmax.f32 %v5268_v31, %v13772_v59  ;;  %v6000_v35 = vld [vmem:[#allocation2 + $0xda] sm:$0xff] }
 0x4ef   : > { %v13774_v51 = vadd.f32 %v5883_v16, %v5651_v24  ;;  %v6044_v16 = vpack.c.bf16 %v5988_v5, %v5987_v49  ;;  %v12002_v49 = vld [vmem:[%s12612_s26 + $0x68] sm:$0xff] }
 0x4f0   : > { %v5886_v9 = vpop.f32.mrf.mxu2  ;;  %7087 = vmatpush.bf16.msrb.mxu3 %v12002_v49  ;;  %v12004_v49 = vld [vmem:[%s12612_s26 + $0x78] sm:$0xff] }
 0x4f1   : > { %v5074_v8 = vpop.f32.mrf.mxu3  ;;  %v5506_v44 = vpop.f32.mrf.mxu0  ;;  %v13779_v34 = vld [vmem:[#allocation2 + $0xdd] sm:$0xff]  ;;  %7352 = vmatpush.bf16.msrb.mxu0 %v12004_v49 }
 0x4f2   : > { %16055 = vst [vmem:[#allocation32_spill] sm:$0xff] %v13779_v34  ;;  %v5301_v54 = vmax.f32 %v5269_v40, %v13779_v34  ;;  %v5354_v41 = vld [vmem:[#allocation2 + $0xe0] sm:$0xff]  ;;  %v11999_v40 = vld [vmem:[%s12612_s26 + $0x50] sm:$0xff]  ;;  %v12006_v34 = vld [vmem:[%s12612_s26 + $0x88] sm:$0xff] }
 0x4f3   : > { %5111 = vst.msk [vmem:[#allocation2 + $0xec] sm:$0xff] %vm1330_vm3, %v5074_v8  ;;  %v5736_v63 = vld [vmem:[#allocation2 + $0xe1] sm:$0xff]  ;;  %6823 = vmatpush.bf16.msrb.mxu2 %v11999_v40  ;;  %7617 = vmatpush.bf16.msra.mxu1 %v12006_v34 }
 0x4f4   : > { %v5653_v39 = vpop.f32.mrf.mxu1  ;;  %v5319_v0 = vpack.c.bf16 %v5301_v54, %v5300_v20 }
 0x4f5   : > { %v5654_v12 = vadd.f32 %v5653_v39, %v5504_v3 }
 0x4f6   : > { %11528 = vmatmul.msk.bf16.gmra.mxu3 %vm1330_vm3, %v6044_v16 }
 0x4f7   : > { %11486 = vmatmul.msk.bf16.gmra.mxu1 %vm1330_vm3, %v5319_v0  ;;  %v13786_v46 = vadd.f32 %v5886_v9, %v5654_v12  ;;  %v13794_v9 = vld [vmem:[#allocation2 + $0xe3] sm:$0xff] }
 0x4f8   : > { %v5888_v42 = vpop.f32.mrf.mxu2  ;;  %16056 = vst [vmem:[#allocation33_spill] sm:$0xff] %v13794_v9  ;;  %v5270_v0 = vmax.f32 %v13794_v9, %v13762_v43 }
 0x4f9   : > { %v13788_v2 = vpop.f32.mrf.mxu3  ;;  %v5509_v55 = vpop.f32.mrf.mxu0 }
 0x4fa   : > { %v5355_v56 = vld [vmem:[#allocation2 + $0xe8] sm:$0xff]  ;;  %5112 = vst.msk [vmem:[#allocation2 + $0xf4] sm:$0xff] %vm1330_vm3, %v13788_v2 }
 0x4fb   : > { %v5737_v24 = vld [vmem:[#allocation2 + $0xe9] sm:$0xff]  ;;  %v5404_v31 = vpack.c.bf16 %v5355_v56, %v5354_v41 }
 0x4fc   : > { %v5786_v3 = vpack.c.bf16 %v5737_v24, %v5736_v63  ;;  %v5655_v5 = vpop.f32.mrf.mxu1  ;;  %v13796_v20 = vld [vmem:[#allocation2 + $0xeb] sm:$0xff]  ;;  %v5989_v56 = vld [vmem:[#allocation2 + $0x82] sm:$0xff] }
 0x4fd   : > { %11463 = vmatmul.msk.bf16.gmra.mxu0 %vm1330_vm3, %v5404_v31  ;;  %16057 = vst [vmem:[#allocation34_spill] sm:$0xff] %v13796_v20  ;;  %v5656_v54 = vadd.f32 %v5655_v5, %v5506_v44  ;;  %v13800_v39 = vld [vmem:[#allocation2 + $0xe5] sm:$0xff]  ;;  %v5271_v12 = vmax.f32 %v13796_v20, %v5074_v8  ;;  %v6021_v43 = vsel %vm16060_vm13, %v5989_v56, 0.0  ;;  %vm16064_vm13 = vcmp.le.s32.totalorder %v13058_v60, 62 }
 0x4fe   : > { %11511 = vmatmul.msk.bf16.gmra.mxu2 %vm1330_vm3, %v5786_v3  ;;  %16058 = vst [vmem:[#allocation35_spill] sm:$0xff] %v13800_v39  ;;  %v5990_v31 = vld [vmem:[#allocation2 + $0x8a] sm:$0xff]  ;;  %v5302_v3 = vmax.f32 %v5270_v0, %v13800_v39 }
 0x4ff   : > { %v13802_v16 = vadd.f32 %v5888_v42, %v5656_v54  ;;  %v6045_v5 = vpack.c.bf16 %v5990_v31, %v6021_v43 }
 0x500   : > { %v5891_v41 = vpop.f32.mrf.mxu2 }
 0x501   : > { %v5079_v63 = vpop.f32.mrf.mxu3  ;;  %v5511_v24 = vpop.f32.mrf.mxu0  ;;  %v13807_v44 = vld [vmem:[#allocation2 + $0xed] sm:$0xff] }
 0x502   : > { %16059 = vst [vmem:[#allocation36_spill] sm:$0xff] %v13807_v44  ;;  %v5303_v42 = vmax.f32 %v5271_v12, %v13807_v44  ;;  %v5356_v12 = vld [vmem:[#allocation2 + $0xf0] sm:$0xff] }
 0x503   : > { %5113 = vst.msk [vmem:[#allocation2 + $0xfc] sm:$0xff] %vm1330_vm3, %v5079_v63  ;;  %v5738_v31 = vld [vmem:[#allocation2 + $0xf1] sm:$0xff] }
 0x504   : > { %v5658_v40 = vpop.f32.mrf.mxu1  ;;  %v5320_v8 = vpack.c.bf16 %v5303_v42, %v5302_v3 }
 0x505   : > { %v5659_v54 = vadd.f32 %v5658_v40, %v5509_v55 }
 0x506   : > { %11529 = vmatmul.msk.bf16.gmra.mxu3 %vm1330_vm3, %v6045_v5 }
 0x507   : > { %11487 = vmatmul.msk.bf16.gmra.mxu1 %vm1330_vm3, %v5320_v8  ;;  %v13817_v20 = vadd.f32 %v5891_v41, %v5659_v54  ;;  %v13830_v8 = vld [vmem:[#allocation2 + $0xf3] sm:$0xff] }
 0x508   : > { %v5893_v9 = vpop.f32.mrf.mxu2  ;;  %16063 = vst [vmem:[#allocation39_spill] sm:$0xff] %v13830_v8  ;;  %v5272_v54 = vmax.f32 %v13830_v8, %v13788_v2  ;;  %v12191_v8 = vld [vmem:[#allocation2 + $0xb] sm:$0xff] }
 0x509   : > { %v5514_v0 = vpop.f32.mrf.mxu0  ;;  %v6126_v39 = vpop.f32.mrf.mxu3 }
 0x50a   : > { %v5357_v44 = vld [vmem:[#allocation2 + $0xf8] sm:$0xff]  ;;  %v13823_v56 = vadd.f32 %v6126_v39, %v13649_v57 }
 0x50b   : > { %v13820_v59 = vld [vmem:[#allocation2 + $0xfb] sm:$0xff]  ;;  %v5405_v55 = vpack.c.bf16 %v5357_v44, %v5356_v12 }
 0x50c   : > { %16061 = vst [vmem:[#allocation37_spill] sm:$0xff] %v13820_v59  ;;  %v5739_v3 = vld [vmem:[#allocation2 + $0xf9] sm:$0xff]  ;;  %v5660_v41 = vpop.f32.mrf.mxu1  ;;  %v5273_v40 = vmax.f32 %v13820_v59, %v5079_v63 }
 0x50d   : > { %v13825_v42 = vld [vmem:[#allocation2 + $0xfd] sm:$0xff]  ;;  %v5787_v43 = vpack.c.bf16 %v5739_v3, %v5738_v31  ;;  %11464 = vmatmul.msk.bf16.gmra.mxu0 %vm1330_vm3, %v5405_v55  ;;  %v5661_v5 = vadd.f32 %v5660_v41, %v5511_v24  ;;  %v13837_v44 = vld [vmem:[#allocation2 + $0xf5] sm:$0xff] }
 0x50e   : > { %16062 = vst [vmem:[#allocation38_spill] sm:$0xff] %v13825_v42  ;;  %v5241_v57 = vsel %vm16064_vm13, %v13825_v42, %v5079_v63  ;;  %v5992_v24 = vld [vmem:[#allocation2 + $0x9a] sm:$0xff]  ;;  %v5991_v3 = vld [vmem:[#allocation2 + $0x92] sm:$0xff]  ;;  %vm16066_vm13 = vcmp.ge.s32.totalorder %v16048_v36, 2 }
 0x50f   : > { %11512 = vmatmul.msk.bf16.gmra.mxu2 %vm1330_vm3, %v5787_v43  ;;  %v13835_v39 = vadd.f32 %v5893_v9, %v5661_v5  ;;  %16065 = vst [vmem:[#allocation40_spill] sm:$0xff] %v13837_v44  ;;  %v5305_v49 = vmax.f32 %v5273_v40, %v5241_v57  ;;  %v5304_v43 = vmax.f32 %v5272_v54, %v13837_v44  ;;  %v12190_v40 = vld [vmem:[#allocation2 + $0x3] sm:$0xff]  ;;  %v12196_v44 = vld [vmem:[#allocation2 + $0x15] sm:$0xff] }
 0x510   : > { %v5896_v34 = vpop.f32.mrf.mxu2  ;;  %v6046_v63 = vpack.c.bf16 %v5992_v24, %v5991_v3  ;;  %v6238_v57 = vsel %vm1363_vm7, %v12190_v40, 0.0  ;;  %v5993_v40 = vld [vmem:[#allocation2 + $0xa2] sm:$0xff] }
 0x511   : > { %v5516_v12 = vpop.f32.mrf.mxu0  ;;  %v6128_v55 = vpop.f32.mrf.mxu3  ;;  %v5321_v5 = vpack.c.bf16 %v5305_v49, %v5304_v43  ;;  %v6270_v60 = vpack.c.bf16 %v12191_v8, %v6238_v57  ;;  %v12193_v49 = vld [vmem:[#allocation2 + $0xd] sm:$0xff] }
 0x512   : > { %v13842_v31 = vadd.f32 %v6128_v55, %v13659_v61 }
 0x514   : > { %v5663_v41 = vpop.f32.mrf.mxu1 }
 0x515   : > { %v5664_v9 = vadd.f32 %v5663_v41, %v5514_v0  ;;  %v12192_v0 = vld [vmem:[#allocation2 + $0x5] sm:$0xff] }
 0x516   : > { %11530 = vmatmul.msk.bf16.gmra.mxu3 %vm1330_vm3, %v6046_v63  ;;  %v6736_v24 = vpack.c.bf16 %v12193_v49, %v12192_v0  ;;  %v6471_v0 = vld [vmem:[#allocation2 + $0x4] sm:$0xff] }
 0x517   : > { %11488 = vmatmul.msk.bf16.gmra.mxu1 %vm1330_vm3, %v5321_v5  ;;  %v13847_v59 = vadd.f32 %v5896_v34, %v5664_v9  ;;  %v5994_v5 = vld [vmem:[#allocation2 + $0xaa] sm:$0xff] }
 0x518   : > { %v5898_v2 = vpop.f32.mrf.mxu2 }
 0x519   : > { %v5519_v61 = vpop.f32.mrf.mxu0  ;;  %v6131_v55 = vpop.f32.mrf.mxu3 }
 0x51a   : > { %v13852_v54 = vadd.f32 %v6131_v55, %v13671_v13  ;;  %v6472_v13 = vld [vmem:[#allocation2 + $0xc] sm:$0xff]  ;;  %v6047_v55 = vpack.c.bf16 %v5994_v5, %v5993_v40  ;;  %v12197_v5 = vld [vmem:[#allocation2 + $0x1d] sm:$0xff] }
 0x51b   : > { %v6503_v19 = vpack.c.bf16 %v6472_v13, %v6471_v0  ;;  %v6737_v40 = vpack.c.bf16 %v12197_v5, %v12196_v44  ;;  %v5996_v0 = vld [vmem:[#allocation2 + $0xba] sm:$0xff] }
 0x51c   : > { %v5665_v3 = vpop.f32.mrf.mxu1  ;;  %v6473_v44 = vld [vmem:[#allocation2 + $0x14] sm:$0xff] }
 0x51d   : > { %11545 = vmatmul.msk.bf16.vlgmr.msra.gmra.mxu0 %vm1330_vm3, %v6270_v60  ;;  %v5666_v34 = vadd.f32 %v5665_v3, %v5516_v12 }
 0x51f   : > { %11593 = vmatmul.msk.bf16.vlgmr.msrb.gmra.mxu2 %vm1330_vm3, %v6736_v24  ;;  %v13856_v43 = vadd.f32 %v5898_v2, %v5666_v34  ;;  %v12195_v34 = vld [vmem:[#allocation2 + $0x1b] sm:$0xff] }
 0x520   : > { %v5901_v41 = vpop.f32.mrf.mxu2 }
 0x521   : > { %v5521_v63 = vpop.f32.mrf.mxu0  ;;  %v6133_v9 = vpop.f32.mrf.mxu3 }
 0x522   : > { %v13859_v8 = vadd.f32 %v6133_v9, %v13684_v28  ;;  %v12194_v28 = vld [vmem:[#allocation2 + $0x13] sm:$0xff] }
 0x523   : > { %v6271_v9 = vpack.c.bf16 %v12195_v34, %v12194_v28 }
 0x524   : > { %v5668_v57 = vpop.f32.mrf.mxu1 }
 0x525   : > { %v5669_v49 = vadd.f32 %v5668_v57, %v5519_v61 }
 0x526   : > { %11531 = vmatmul.msk.bf16.gmra.mxu3 %vm1330_vm3, %v6047_v55 }
 0x527   : > { %11569 = vmatmul.msk.bf16.vlgmr.msrb.gmra.mxu1 %vm1330_vm3, %v6503_v19  ;;  %v13863_v60 = vadd.f32 %v5901_v41, %v5669_v49  ;;  %v6474_v49 = vld [vmem:[#allocation2 + $0x1c] sm:$0xff] }
 0x528   : > { %v5903_v12 = vpop.f32.mrf.mxu2  ;;  %v6504_v42 = vpack.c.bf16 %v6474_v49, %v6473_v44 }
 0x529   : > { %v5524_v2 = vpop.f32.mrf.mxu0  ;;  %v6136_v24 = vpop.f32.mrf.mxu3 }
 0x52a   : > { %v13866_v3 = vadd.f32 %v6136_v24, %v13698_v26  ;;  %v5995_v24 = vld [vmem:[#allocation2 + $0xb2] sm:$0xff] }
 0x52b   : > { %v6048_v34 = vpack.c.bf16 %v5996_v0, %v5995_v24  ;;  %v12201_v0 = vld [vmem:[#allocation2 + $0x2d] sm:$0xff] }
 0x52c   : > { %v5670_v61 = vpop.f32.mrf.mxu1  ;;  %v6738_v24 = vpack.c.bf16 %v12201_v0, %v12200_v62 }
 0x52d   : > { %11546 = vmatmul.msk.bf16.gmra.mxu0 %vm1330_vm3, %v6271_v9  ;;  %v5671_v13 = vadd.f32 %v5670_v61, %v5521_v63 }
 0x52f   : > { %11594 = vmatmul.msk.bf16.gmra.mxu2 %vm1330_vm3, %v6737_v40  ;;  %v13870_v19 = vadd.f32 %v5903_v12, %v5671_v13  ;;  %v12199_v13 = vld [vmem:[#allocation2 + $0x2b] sm:$0xff] }
 0x530   : > { %v5906_v41 = vpop.f32.mrf.mxu2 }
 0x531   : > { %v5526_v57 = vpop.f32.mrf.mxu0  ;;  %v6138_v55 = vpop.f32.mrf.mxu3 }
 0x532   : > { %v13873_v26 = vadd.f32 %v6138_v55, %v13711_v22  ;;  %v12198_v22 = vld [vmem:[#allocation2 + $0x23] sm:$0xff] }
 0x533   : > { %v6272_v55 = vpack.c.bf16 %v12199_v13, %v12198_v22 }
 0x534   : > { %v5673_v28 = vpop.f32.mrf.mxu1 }
 0x535   : > { %v5674_v5 = vadd.f32 %v5673_v28, %v5524_v2  ;;  %v5997_v28 = vld [vmem:[#allocation2 + $0xc2] sm:$0xff] }
 0x536   : > { %11532 = vmatmul.msk.bf16.gmra.mxu3 %vm1330_vm3, %v6048_v34  ;;  %v6029_v62 = vsel %vm16066_vm13, %v5997_v28, 0.0  ;;  %vm16074_vm13 = vcmp.lt.s32.totalorder %v16034_v21, 62 }
 0x537   : > { %11570 = vmatmul.msk.bf16.gmra.mxu1 %vm1330_vm3, %v6504_v42  ;;  %v13877_v63 = vadd.f32 %v5906_v41, %v5674_v5 }
 0x538   : > { %v5908_v12 = vpop.f32.mrf.mxu2 }
 0x539   : > { %v5529_v9 = vpop.f32.mrf.mxu0  ;;  %v6141_v40 = vpop.f32.mrf.mxu3 }
 0x53a   : > { %v13880_v61 = vadd.f32 %v6141_v40, %v13727_v37  ;;  %v5998_v37 = vld [vmem:[#allocation2 + $0xca] sm:$0xff] }
 0x53b   : > { %v6476_v40 = vld [vmem:[#allocation2 + $0x2c] sm:$0xff]  ;;  %v6049_v13 = vpack.c.bf16 %v5998_v37, %v6029_v62  ;;  %v12204_v62 = vld [vmem:[#allocation2 + $0x3b] sm:$0xff] }
 0x53c   : > { %v5675_v2 = vpop.f32.mrf.mxu1  ;;  %v12203_v37 = vld [vmem:[#allocation2 + $0x33] sm:$0xff] }
 0x53d   : > { %11547 = vmatmul.msk.bf16.gmra.mxu0 %vm1330_vm3, %v6272_v55  ;;  %v5676_v49 = vadd.f32 %v5675_v2, %v5526_v57  ;;  %v6475_v55 = vld [vmem:[#allocation2 + $0x24] sm:$0xff] }
 0x53e   : > { %v6505_v0 = vpack.c.bf16 %v6476_v40, %v6475_v55  ;;  %v12202_v2 = vld [vmem:[#allocation2 + $0x3d] sm:$0xff]  ;;  %v12205_v40 = vld [vmem:[#allocation2 + $0x35] sm:$0xff] }
 0x53f   : > { %11595 = vmatmul.msk.bf16.gmra.mxu2 %vm1330_vm3, %v6738_v24  ;;  %v13884_v42 = vadd.f32 %v5908_v12, %v5676_v49 }
 0x540   : > { %v5911_v41 = vpop.f32.mrf.mxu2 }
 0x541   : > { %v5531_v34 = vpop.f32.mrf.mxu0  ;;  %v6143_v44 = vpop.f32.mrf.mxu3 }
 0x542   : > { %v13887_v5 = vadd.f32 %v6143_v44, %v13749_v29  ;;  %v6711_v29 = vsel %vm16067_vm0, %v12202_v2, 0.0  ;;  %vm16072_vm0 = vcmp.lt.s32.totalorder %v16043_v1, 63 }
 0x544   : > { %v5678_v22 = vpop.f32.mrf.mxu1 }
 0x545   : > { %v5679_v57 = vadd.f32 %v5678_v22, %v5529_v9  ;;  %v6273_v9 = vpack.c.bf16 %v12204_v62, %v12203_v37  ;;  %v6739_v22 = vpack.c.bf16 %v6711_v29, %v12205_v40  ;;  %v6050_v62 = vpack.c.bf16 %v6000_v35, %v5999_v11  ;;  %v6477_v29 = vld [vmem:[#allocation2 + $0x34] sm:$0xff]  ;;  %v12207_v11 = vld [vmem:[#allocation2 + $0x4b] sm:$0xff] }
 0x546   : > { %11533 = vmatmul.msk.bf16.gmra.mxu3 %vm1330_vm3, %v6049_v13 }
 0x547   : > { %11571 = vmatmul.msk.bf16.gmra.mxu1 %vm1330_vm3, %v6505_v0  ;;  %v13893_v12 = vadd.f32 %v5911_v41, %v5679_v57 }
 0x548   : > { %v5913_v24 = vpop.f32.mrf.mxu2 }
 0x549   : > { %v5534_v49 = vpop.f32.mrf.mxu0  ;;  %v6146_v44 = vpop.f32.mrf.mxu3 }
 0x54a   : > { %v13898_v28 = vadd.f32 %v6146_v44, %v13760_v30  ;;  %v6478_v44 = vld [vmem:[#allocation2 + $0x3c] sm:$0xff] }
 0x54b   : > { %v6506_v33 = vpack.c.bf16 %v6478_v44, %v6477_v29 }
 0x54c   : > { %v5680_v13 = vpop.f32.mrf.mxu1 }
 0x54d   : > { %11548 = vmatmul.msk.bf16.gmra.mxu0 %vm1330_vm3, %v6273_v9  ;;  %v5681_v41 = vadd.f32 %v5680_v13, %v5531_v34  ;;  %v12206_v13 = vld [vmem:[#allocation2 + $0x43] sm:$0xff] }
 0x54f   : > { %11596 = vmatmul.msk.bf16.gmra.mxu2 %vm1330_vm3, %v6739_v22  ;;  %v13902_v55 = vadd.f32 %v5913_v24, %v5681_v41 }
 0x550   : > { %v5916_v57 = vpop.f32.mrf.mxu2 }
 0x551   : > { %v5536_v0 = vpop.f32.mrf.mxu0  ;;  %v6148_v2 = vpop.f32.mrf.mxu3 }
 0x552   : > { %v13905_v30 = vadd.f32 %v6148_v2, %v13774_v51  ;;  %v6246_v51 = vsel %vm1371_vm12, %v12206_v13, 0.0  ;;  %v12209_v2 = vld [vmem:[#allocation2 + $0x4d] sm:$0xff] }
 0x553   : > { %v6274_v35 = vpack.c.bf16 %v12207_v11, %v6246_v51  ;;  %v6002_v13 = vld [vmem:[#allocation2 + $0xea] sm:$0xff]  ;;  %v6001_v11 = vld [vmem:[#allocation2 + $0xe2] sm:$0xff] }
 0x554   : > { %v5683_v37 = vpop.f32.mrf.mxu1  ;;  %v12001_v51 = vld [vmem:[%s12612_s26 + $0x60] sm:$0xff] }
 0x555   : > { %v5684_v40 = vadd.f32 %v5683_v37, %v5534_v49  ;;  %v12208_v49 = vld [vmem:[#allocation2 + $0x45] sm:$0xff]  ;;  %7088 = vmatpush.bf16.msrb.mxu3 %v12001_v51 }
 0x556   : > { %11534 = vmatmul.msk.bf16.gmra.mxu3 %vm1330_vm3, %v6050_v62  ;;  %v6740_v44 = vpack.c.bf16 %v12209_v2, %v12208_v49  ;;  %v6051_v49 = vpack.c.bf16 %v6002_v13, %v6001_v11  ;;  %v6479_v2 = vld [vmem:[#allocation2 + $0x44] sm:$0xff]  ;;  %v12212_v13 = vld [vmem:[#allocation2 + $0x55] sm:$0xff] }
 0x557   : > { %11572 = vmatmul.msk.bf16.gmra.mxu1 %vm1330_vm3, %v6506_v33  ;;  %v13909_v34 = vadd.f32 %v5916_v57, %v5684_v40  ;;  %v12213_v11 = vld [vmem:[#allocation2 + $0x5d] sm:$0xff] }
 0x558   : > { %v5918_v24 = vpop.f32.mrf.mxu2  ;;  %v6741_v51 = vpack.c.bf16 %v12213_v11, %v12212_v13  ;;  %v6481_v13 = vld [vmem:[#allocation2 + $0x54] sm:$0xff] }
 0x559   : > { %v5539_v9 = vpop.f32.mrf.mxu0  ;;  %v6151_v22 = vpop.f32.mrf.mxu3 }
 0x55a   : > { %v13914_v41 = vadd.f32 %v6151_v22, %v13786_v46  ;;  %v6480_v22 = vld [vmem:[#allocation2 + $0x4c] sm:$0xff] }
 0x55c   : > { %16068 = vst [vmem:[#allocation28_spill] sm:$0xff] %v13914_v41  ;;  %v5685_v37 = vpop.f32.mrf.mxu1 }
 0x55d   : > { %11549 = vmatmul.msk.bf16.gmra.mxu0 %vm1330_vm3, %v6274_v35  ;;  %v5686_v33 = vadd.f32 %v5685_v37, %v5536_v0  ;;  %v6507_v0 = vpack.c.bf16 %v6480_v22, %v6479_v2 }
 0x55f   : > { %11597 = vmatmul.msk.bf16.gmra.mxu2 %vm1330_vm3, %v6740_v44  ;;  %v13918_v57 = vadd.f32 %v5918_v24, %v5686_v33 }
 0x560   : > { %v5921_v62 = vpop.f32.mrf.mxu2 }
 0x561   : > { %v5541_v29 = vpop.f32.mrf.mxu0  ;;  %v6153_v40 = vpop.f32.mrf.mxu3 }
 0x562   : > { %v13921_v46 = vadd.f32 %v6153_v40, %v13802_v16  ;;  %v12210_v40 = vld [vmem:[#allocation2 + $0x53] sm:$0xff] }
 0x564   : > { %16069 = vst [vmem:[#allocation41_spill] sm:$0xff] %v13921_v46  ;;  %v5688_v7 = vpop.f32.mrf.mxu1  ;;  %v12211_v46 = vld [vmem:[#allocation2 + $0x5b] sm:$0xff] }
 0x565   : > { %v5689_v35 = vadd.f32 %v5688_v7, %v5539_v9  ;;  %v6275_v41 = vpack.c.bf16 %v12211_v46, %v12210_v40  ;;  %v6003_v46 = vld [vmem:[#allocation2 + $0xf2] sm:$0xff] }
 0x566   : > { %11535 = vmatmul.msk.bf16.gmra.mxu3 %vm1330_vm3, %v6051_v49 }
 0x567   : > { %11573 = vmatmul.msk.bf16.gmra.mxu1 %vm1330_vm3, %v6507_v0  ;;  %v13926_v24 = vadd.f32 %v5921_v62, %v5689_v35  ;;  %v6004_v35 = vld [vmem:[#allocation2 + $0xfa] sm:$0xff] }
 0x568   : > { %v5923_v44 = vpop.f32.mrf.mxu2  ;;  %v6482_v0 = vld [vmem:[#allocation2 + $0x5c] sm:$0xff]  ;;  %v6052_v40 = vpack.c.bf16 %v6004_v35, %v6003_v46 }
 0x569   : > { %v6156_v33 = vpop.f32.mrf.mxu3 }
 0x56a   : > { %v5544_v37 = vpop.f32.mrf.mxu0  ;;  %v13929_v16 = vadd.f32 %v6156_v33, %v13817_v20 }
 0x56c   : > { %16070 = vst [vmem:[#allocation42_spill] sm:$0xff] %v13929_v16  ;;  %v5690_v7 = vpop.f32.mrf.mxu1  ;;  %v6508_v16 = vpack.c.bf16 %v6482_v0, %v6481_v13  ;;  %v6484_v13 = vld [vmem:[#allocation2 + $0x6c] sm:$0xff] }
 0x56d   : > { %11550 = vmatmul.msk.bf16.gmra.mxu0 %vm1330_vm3, %v6275_v41  ;;  %v5691_v9 = vadd.f32 %v5690_v7, %v5541_v29 }
 0x56f   : > { %11598 = vmatmul.msk.bf16.gmra.mxu2 %vm1330_vm3, %v6741_v51  ;;  %v13933_v62 = vadd.f32 %v5923_v44, %v5691_v9  ;;  %v12215_v9 = vld [vmem:[#allocation2 + $0x6b] sm:$0xff] }
 0x571   : > { %v5926_v22 = vpop.f32.mrf.mxu2  ;;  %v6158_v2 = vpop.f32.mrf.mxu3 }
 0x572   : > { %v5546_v49 = vpop.f32.mrf.mxu0  ;;  %v13936_v20 = vadd.f32 %v6158_v2, %v13835_v39  ;;  %v12214_v39 = vld [vmem:[#allocation2 + $0x63] sm:$0xff] }
 0x573   : > { %v6276_v2 = vpack.c.bf16 %v12215_v9, %v12214_v39 }
 0x574   : > { %16071 = vst [vmem:[#allocation43_spill] sm:$0xff] %v13936_v20  ;;  %v5693_v33 = vpop.f32.mrf.mxu1  ;;  %v12216_v20 = vld [vmem:[#allocation2 + $0x65] sm:$0xff] }
 0x575   : > { %v5694_v11 = vadd.f32 %v5693_v33, %v5544_v37  ;;  %v6742_v35 = vpack.c.bf16 %v13613_v32, %v12216_v20 }
 0x576   : > { %11536 = vmatmul.msk.bf16.gmra.mxu3 %vm1330_vm3, %v6052_v40 }
 0x577   : > { %11574 = vmatmul.msk.bf16.gmra.mxu1 %vm1330_vm3, %v6508_v16  ;;  %v13940_v41 = vadd.f32 %v5926_v22, %v5694_v11  ;;  %v6937_v11 = vld [vmem:[#allocation2 + $0x6] sm:$0xff] }
 0x579   : > { %v5928_v29 = vpop.f32.mrf.mxu2  ;;  %v6161_v51 = vpop.f32.mrf.mxu3 }
 0x57a   : > { %v5549_v44 = vpop.f32.mrf.mxu0  ;;  %v13943_v7 = vadd.f32 %v6161_v51, %v13847_v59  ;;  %v6938_v59 = vld [vmem:[#allocation2 + $0xe] sm:$0xff]  ;;  %v6483_v51 = vld [vmem:[#allocation2 + $0x64] sm:$0xff] }
 0x57b   : > { %v7001_v20 = vpack.c.bf16 %v6938_v59, %v6937_v11  ;;  %v6509_v9 = vpack.c.bf16 %v6484_v13, %v6483_v51  ;;  %v12218_v59 = vld [vmem:[#allocation2 + $0x7b] sm:$0xff] }
 0x57c   : > { %v5695_v37 = vpop.f32.mrf.mxu1  ;;  %v12219_v11 = vld [vmem:[#allocation2 + $0x75] sm:$0xff] }
 0x57d   : > { %11551 = vmatmul.msk.bf16.gmra.mxu0 %vm1330_vm3, %v6276_v2  ;;  %v5696_v0 = vadd.f32 %v5695_v37, %v5546_v49  ;;  %v12003_v49 = vld [vmem:[%s12612_s26 + $0x70] sm:$0xff] }
 0x57e   : > { %7353 = vmatpush.bf16.msrb.mxu0 %v12003_v49 }
 0x57f   : > { %11599 = vmatmul.msk.bf16.gmra.mxu2 %vm1330_vm3, %v6742_v35  ;;  %v13948_v16 = vadd.f32 %v5928_v29, %v5696_v0  ;;  %v12005_v35 = vld [vmem:[%s12612_s26 + $0x80] sm:$0xff]  ;;  %s715_s26 = sadd.s32 %s11152_s11, %s16358_s30 }
 0x580   : > { %7618 = vmatpush.bf16.msra.mxu1 %v12005_v35 }
 0x581   : > { %v5931_v22 = vpop.f32.mrf.mxu2  ;;  %v6163_v33 = vpop.f32.mrf.mxu3 }
 0x582   : > { %v5551_v46 = vpop.f32.mrf.mxu0  ;;  %v13951_v40 = vadd.f32 %v6163_v33, %v13856_v43  ;;  %v6719_v43 = vsel %vm16072_vm0, %v13626_v45, 0.0  ;;  %v12217_v33 = vld [vmem:[#allocation2 + $0x73] sm:$0xff]  ;;  %vm16075_vm0 = vcmp.lt.s32.totalorder %v12953_v58, 63 }
 0x583   : > { %v6277_v13 = vpack.c.bf16 %v12218_v59, %v12217_v33  ;;  %v6485_v33 = vld [vmem:[#allocation2 + $0x74] sm:$0xff] }
 0x584   : > { %v5698_v32 = vpop.f32.mrf.mxu1 }
 0x585   : > { %v5699_v39 = vadd.f32 %v5698_v32, %v5549_v44  ;;  %v6743_v32 = vpack.c.bf16 %v6719_v43, %v12219_v11  ;;  %v6486_v43 = vld [vmem:[#allocation2 + $0x7c] sm:$0xff] }
 0x586   : > { %11617 = vmatmul.msk.bf16.vlgmr.msrb.gmra.mxu3 %vm1330_vm3, %v7001_v20  ;;  %v6510_v59 = vpack.c.bf16 %v6486_v43, %v6485_v33  ;;  %v12221_v43 = vld [vmem:[#allocation2 + $0x8b] sm:$0xff] }
 0x587   : > { %11575 = vmatmul.msk.bf16.gmra.mxu1 %vm1330_vm3, %v6509_v9  ;;  %v13956_v29 = vadd.f32 %v5931_v22, %v5699_v39 }
 0x589   : > { %v5933_v2 = vpop.f32.mrf.mxu2  ;;  %v6166_v0 = vpop.f32.mrf.mxu3 }
 0x58a   : > { %v5554_v37 = vpop.f32.mrf.mxu0  ;;  %v13963_v44 = vadd.f32 %v6166_v0, %v13863_v60  ;;  %v6940_v60 = vld [vmem:[#allocation2 + $0x1e] sm:$0xff] }
 0x58c   : > { %v5700_v22 = vpop.f32.mrf.mxu1 }
 0x58d   : > { %11552 = vmatmul.msk.bf16.gmra.mxu0 %vm1330_vm3, %v6277_v13  ;;  %v5701_v20 = vadd.f32 %v5700_v22, %v5551_v46  ;;  %v6939_v46 = vld [vmem:[#allocation2 + $0x16] sm:$0xff] }
 0x58e   : > { %v7002_v0 = vpack.c.bf16 %v6940_v60, %v6939_v46  ;;  %v12014_v13 = vld [vmem:[%s13973_s16 + $0x38] sm:$0xff] }
 0x58f   : > { %11600 = vmatmul.msk.bf16.gmra.mxu2 %vm1330_vm3, %v6743_v32  ;;  %v13968_v45 = vadd.f32 %v5933_v2, %v5701_v20 }
 0x590   : > { %7880 = vmatpush.bf16.msra.mxu2 %v12014_v13 }
 0x591   : > { %v6168_v9 = vpop.f32.mrf.mxu3 }
 0x592   : > { %v5936_v51 = vpop.f32.mrf.mxu2  ;;  %v5556_v39 = vpop.f32.mrf.mxu0  ;;  %v13976_v49 = vadd.f32 %v6168_v9, %v13870_v19  ;;  %v12220_v19 = vld [vmem:[#allocation2 + $0x83] sm:$0xff] }
 0x593   : > { %v6254_v9 = vsel %vm1379_vm1, %v12220_v19, 0.0 }
 0x594   : > { %v5703_v35 = vpop.f32.mrf.mxu1  ;;  %v6278_v46 = vpack.c.bf16 %v12221_v43, %v6254_v9  ;;  %v6941_v9 = vld [vmem:[#allocation2 + $0x26] sm:$0xff] }
 0x595   : > { %v5704_v2 = vadd.f32 %v5703_v35, %v5554_v37  ;;  %v12222_v35 = vld [vmem:[#allocation2 + $0x85] sm:$0xff] }
 0x596   : > { %11618 = vmatmul.msk.bf16.gmra.mxu3 %vm1330_vm3, %v7002_v0  ;;  %v6744_v0 = vpack.c.bf16 %v13644_v53, %v12222_v35  ;;  %v6487_v35 = vld [vmem:[#allocation2 + $0x84] sm:$0xff] }
 0x597   : > { %11576 = vmatmul.msk.bf16.gmra.mxu1 %vm1330_vm3, %v6510_v59  ;;  %v13981_v11 = vadd.f32 %v5936_v51, %v5704_v2 }
 0x599   : > { %v6171_v22 = vpop.f32.mrf.mxu3 }
 0x59a   : > { %v5938_v32 = vpop.f32.mrf.mxu2  ;;  %v6359_v20 = vpop.f32.mrf.mxu0  ;;  %v13986_v60 = vadd.f32 %v6171_v22, %v13877_v63  ;;  %v6942_v63 = vld [vmem:[#allocation2 + $0x2e] sm:$0xff] }
 0x59b   : > { %v6439_v37 = vadd.f32 %v6359_v20, %v13823_v56  ;;  %v6488_v20 = vld [vmem:[#allocation2 + $0x8c] sm:$0xff]  ;;  %v7003_v43 = vpack.c.bf16 %v6942_v63, %v6941_v9 }
 0x59c   : > { %v5705_v33 = vpop.f32.mrf.mxu1 }
 0x59d   : > { %11553 = vmatmul.msk.bf16.gmra.mxu0 %vm1330_vm3, %v6278_v46  ;;  %v5706_v51 = vadd.f32 %v5705_v33, %v5556_v39  ;;  %v6511_v39 = vpack.c.bf16 %v6488_v20, %v6487_v35  ;;  %v6489_v35 = vld [vmem:[#allocation2 + $0x94] sm:$0xff] }
 0x59f   : > { %11601 = vmatmul.msk.bf16.gmra.mxu2 %vm1330_vm3, %v6744_v0  ;;  %v13992_v2 = vadd.f32 %v5938_v32, %v5706_v51 }
 0x5a1   : > { %v6173_v13 = vpop.f32.mrf.mxu3 }
 0x5a2   : > { %v6825_v59 = vpop.f32.mrf.mxu2  ;;  %v6361_v19 = vpop.f32.mrf.mxu0  ;;  %v13995_v22 = vadd.f32 %v6173_v13, %v13884_v42  ;;  %v6279_v13 = vpack.c.bf16 %v13656_v25, %v13654_v10 }
 0x5a3   : > { %v6440_v56 = vadd.f32 %v6361_v19, %v13842_v31 }
 0x5a4   : > { %v6592_v53 = vpop.f32.mrf.mxu1 }
 0x5a5   : > { %v6672_v46 = vadd.f32 %v6592_v53, %v6439_v37  ;;  %v6745_v37 = vpack.c.bf16 %v13665_v52, %v13661_v23  ;;  %v6490_v23 = vld [vmem:[#allocation2 + $0x9c] sm:$0xff] }
 0x5a6   : > { %11619 = vmatmul.msk.bf16.gmra.mxu3 %vm1330_vm3, %v7003_v43  ;;  %v6943_v52 = vld [vmem:[#allocation2 + $0x36] sm:$0xff] }
 0x5a7   : > { %11577 = vmatmul.msk.bf16.gmra.mxu1 %vm1330_vm3, %v6511_v39  ;;  %v14000_v32 = vadd.f32 %v6825_v59, %v6672_v46  ;;  %v6944_v59 = vld [vmem:[#allocation2 + $0x3e] sm:$0xff]  ;;  %v6512_v39 = vpack.c.bf16 %v6490_v23, %v6489_v35  ;;  %v6945_v23 = vld [vmem:[#allocation2 + $0x46] sm:$0xff] }
 0x5a9   : > { %v6176_v33 = vpop.f32.mrf.mxu3 }
 0x5aa   : > { %v6827_v0 = vpop.f32.mrf.mxu2  ;;  %v6364_v51 = vpop.f32.mrf.mxu0  ;;  %v14003_v42 = vadd.f32 %v6176_v33, %v13893_v12 }
 0x5ab   : > { %v6441_v31 = vadd.f32 %v6364_v51, %v13852_v54  ;;  %v6976_v54 = vsel %vm16074_vm13, %v6944_v59, 0.0  ;;  %vm16083_vm13 = vcmp.lt.s32.totalorder %v16043_v1, 62 }
 0x5ac   : > { %v6594_v19 = vpop.f32.mrf.mxu1  ;;  %v7004_v43 = vpack.c.bf16 %v6976_v54, %v6943_v52  ;;  %v6946_v54 = vld [vmem:[#allocation2 + $0x4e] sm:$0xff]  ;;  %v6491_v52 = vld [vmem:[#allocation2 + $0xa4] sm:$0xff] }
 0x5ad   : > { %11554 = vmatmul.msk.bf16.gmra.mxu0 %vm1330_vm3, %v6279_v13  ;;  %v6673_v63 = vadd.f32 %v6594_v19, %v6440_v56  ;;  %v6746_v19 = vpack.c.bf16 %v13690_v14, %v13686_v27  ;;  %v7005_v14 = vpack.c.bf16 %v6946_v54, %v6945_v23 }
 0x5af   : > { %11602 = vmatmul.msk.bf16.gmra.mxu2 %vm1330_vm3, %v6745_v37  ;;  %v14012_v20 = vadd.f32 %v6827_v0, %v6673_v63  ;;  %v12013_v0 = vld [vmem:[%s13973_s16 + $0x30] sm:$0xff] }
 0x5b0   : > { %7881 = vmatpush.bf16.msra.mxu2 %v12013_v0 }
 0x5b1   : > { %v6178_v9 = vpop.f32.mrf.mxu3 }
 0x5b2   : > { %v6830_v12 = vpop.f32.mrf.mxu2  ;;  %v6366_v53 = vpop.f32.mrf.mxu0  ;;  %v14017_v10 = vadd.f32 %v6178_v9, %v13902_v55 }
 0x5b3   : > { %v6442_v25 = vadd.f32 %v6366_v53, %v13859_v8 }
 0x5b4   : > { %v6597_v56 = vpop.f32.mrf.mxu1 }
 0x5b5   : > { %v6674_v46 = vadd.f32 %v6597_v56, %v6441_v31  ;;  %v6280_v31 = vpack.c.bf16 %v13681_v50, %v13679_v4  ;;  %v6492_v50 = vld [vmem:[#allocation2 + $0xac] sm:$0xff] }
 0x5b6   : > { %11620 = vmatmul.msk.bf16.gmra.mxu3 %vm1330_vm3, %v7004_v43 }
 0x5b7   : > { %11578 = vmatmul.msk.bf16.gmra.mxu1 %vm1330_vm3, %v6512_v39  ;;  %v14023_v33 = vadd.f32 %v6830_v12, %v6674_v46 }
 0x5b9   : > { %v6181_v55 = vpop.f32.mrf.mxu3 }
 0x5ba   : > { %v6832_v51 = vpop.f32.mrf.mxu2  ;;  %v6369_v13 = vpop.f32.mrf.mxu0  ;;  %v14026_v8 = vadd.f32 %v6181_v55, %v13909_v34 }
 0x5bb   : > { %v6443_v37 = vadd.f32 %v6369_v13, %v13866_v3 }
 0x5bc   : > { %v6599_v63 = vpop.f32.mrf.mxu1 }
 0x5bd   : > { %11555 = vmatmul.msk.bf16.gmra.mxu0 %vm1330_vm3, %v6280_v31  ;;  %v6675_v59 = vadd.f32 %v6599_v63, %v6442_v25  ;;  %v6513_v25 = vpack.c.bf16 %v6492_v50, %v6491_v52  ;;  %v6948_v63 = vld [vmem:[#allocation2 + $0x5e] sm:$0xff] }
 0x5bf   : > { %11603 = vmatmul.msk.bf16.gmra.mxu2 %vm1330_vm3, %v6746_v19  ;;  %v14035_v12 = vadd.f32 %v6832_v51, %v6675_v59  ;;  %v6281_v51 = vpack.c.bf16 %v13709_v48, %v13707_v18  ;;  %v6494_v48 = vld [vmem:[#allocation2 + $0xbc] sm:$0xff] }
 0x5c1   : > { %v6183_v53 = vpop.f32.mrf.mxu3 }
 0x5c2   : > { %v6835_v9 = vpop.f32.mrf.mxu2  ;;  %v6371_v34 = vpop.f32.mrf.mxu0  ;;  %v14038_v3 = vadd.f32 %v6183_v53, %v13918_v57  ;;  %v6727_v57 = vsel %vm16075_vm0, %v13718_v6, 0.0  ;;  %v6493_v53 = vld [vmem:[#allocation2 + $0xb4] sm:$0xff] }
 0x5c3   : > { %v6444_v4 = vadd.f32 %v6371_v34, %v13873_v26  ;;  %v6747_v55 = vpack.c.bf16 %v6727_v57, %v13713_v15  ;;  %v6947_v15 = vld [vmem:[#allocation2 + $0x56] sm:$0xff]  ;;  %v6514_v54 = vpack.c.bf16 %v6494_v48, %v6493_v53 }
 0x5c4   : > { %v6602_v27 = vpop.f32.mrf.mxu1 }
 0x5c5   : > { %v6676_v56 = vadd.f32 %v6602_v27, %v6443_v37 }
 0x5c6   : > { %11621 = vmatmul.msk.bf16.gmra.mxu3 %vm1330_vm3, %v7005_v14 }
 0x5c7   : > { %11579 = vmatmul.msk.bf16.gmra.mxu1 %vm1330_vm3, %v6513_v25  ;;  %v14043_v43 = vadd.f32 %v6835_v9, %v6676_v56  ;;  %v7006_v9 = vpack.c.bf16 %v6948_v63, %v6947_v15  ;;  %v16076_v25 = vld [vmem:[#allocation30_spill] sm:$0xff] }
 0x5c9   : > { %v6186_v46 = vpop.f32.mrf.mxu3 }
 0x5ca   : > { %v6837_v35 = vpop.f32.mrf.mxu2  ;;  %v6374_v26 = vpop.f32.mrf.mxu0  ;;  %v14049_v39 = vadd.f32 %v6186_v46, %v13926_v24 }
 0x5cb   : > { %v6445_v0 = vadd.f32 %v6374_v26, %v13880_v61 }
 0x5cc   : > { %v6604_v13 = vpop.f32.mrf.mxu1 }
 0x5cd   : > { %11556 = vmatmul.msk.bf16.gmra.mxu0 %vm1330_vm3, %v6281_v51  ;;  %v6677_v37 = vadd.f32 %v6604_v13, %v6444_v4  ;;  %v12012_v4 = vld [vmem:[%s13973_s16 + $0x28] sm:$0xff] }
 0x5ce   : > { %7882 = vmatpush.bf16.msra.mxu2 %v12012_v4 }
 0x5cf   : > { %11604 = vmatmul.msk.bf16.gmra.mxu2 %vm1330_vm3, %v6747_v55  ;;  %v14057_v6 = vadd.f32 %v6837_v35, %v6677_v37  ;;  %v16077_v35 = vld [vmem:[#allocation26_spill] sm:$0xff] }
 0x5d0   : > { %v6748_v57 = vpack.c.bf16 %v16077_v35, %v16076_v25  ;;  %v6949_v37 = vld [vmem:[#allocation2 + $0x66] sm:$0xff] }
 0x5d1   : > { %v6188_v19 = vpop.f32.mrf.mxu3 }
 0x5d2   : > { %v6840_v31 = vpop.f32.mrf.mxu2  ;;  %v6376_v24 = vpop.f32.mrf.mxu0  ;;  %v14060_v61 = vadd.f32 %v6188_v19, %v13933_v62 }
 0x5d3   : > { %v6446_v18 = vadd.f32 %v6376_v24, %v13887_v5  ;;  %v6262_v5 = vsel %vm1387_vm15, %v13735_v17, 0.0  ;;  %v6495_v24 = vld [vmem:[#allocation2 + $0xc4] sm:$0xff] }
 0x5d4   : > { %v6607_v59 = vpop.f32.mrf.mxu1  ;;  %v6282_v56 = vpack.c.bf16 %v13744_v38, %v6262_v5 }
 0x5d5   : > { %v6678_v34 = vadd.f32 %v6607_v59, %v6445_v0 }
 0x5d6   : > { %11622 = vmatmul.msk.bf16.gmra.mxu3 %vm1330_vm3, %v7006_v9 }
 0x5d7   : > { %11580 = vmatmul.msk.bf16.gmra.mxu1 %vm1330_vm3, %v6514_v54  ;;  %v14066_v50 = vadd.f32 %v6840_v31, %v6678_v34  ;;  %v16079_v34 = vld [vmem:[#allocation27_spill] sm:$0xff]  ;;  %v16080_v54 = vld [vmem:[#allocation29_spill] sm:$0xff] }
 0x5d8   : > { %v6283_v4 = vpack.c.bf16 %v16080_v54, %v16079_v34  ;;  %v16086_v34 = vld [vmem:[#allocation33_spill] sm:$0xff] }
 0x5d9   : > { %v6191_v62 = vpop.f32.mrf.mxu3 }
 0x5da   : > { %v6842_v23 = vpop.f32.mrf.mxu2  ;;  %v6379_v27 = vpop.f32.mrf.mxu0  ;;  %v14072_v14 = vadd.f32 %v6191_v62, %v13940_v41  ;;  %v6950_v41 = vld [vmem:[#allocation2 + $0x6e] sm:$0xff]  ;;  %v16082_v62 = vld [vmem:[#allocation32_spill] sm:$0xff] }
 0x5db   : > { %v6447_v52 = vadd.f32 %v6379_v27, %v13898_v28  ;;  %v6496_v28 = vld [vmem:[#allocation2 + $0xcc] sm:$0xff]  ;;  %v7007_v19 = vpack.c.bf16 %v6950_v41, %v6949_v37 }
 0x5dc   : > { %v6609_v46 = vpop.f32.mrf.mxu1 }
 0x5dd   : > { %11557 = vmatmul.msk.bf16.gmra.mxu0 %vm1330_vm3, %v6282_v56  ;;  %v6679_v26 = vadd.f32 %v6609_v46, %v6446_v18  ;;  %v6515_v18 = vpack.c.bf16 %v6496_v28, %v6495_v24  ;;  %v6952_v56 = vld [vmem:[#allocation2 + $0x7e] sm:$0xff]  ;;  %v6497_v28 = vld [vmem:[#allocation2 + $0xd4] sm:$0xff] }
 0x5df   : > { %11605 = vmatmul.msk.bf16.gmra.mxu2 %vm1330_vm3, %v6748_v57  ;;  %v14080_v0 = vadd.f32 %v6842_v23, %v6679_v26  ;;  %v16081_v23 = vld [vmem:[#allocation31_spill] sm:$0xff]  ;;  %v6984_v57 = vsel %vm16083_vm13, %v6952_v56, 0.0  ;;  %v16084_v26 = vld [vmem:[#allocation41_spill] sm:$0xff]  ;;  %vm16098_vm13 = vcmp.lt.s32.totalorder %v12953_v58, 62 }
 0x5e0   : > { %v6749_v27 = vpack.c.bf16 %v16082_v62, %v16081_v23  ;;  %v16089_v23 = vld [vmem:[#allocation36_spill] sm:$0xff] }
 0x5e1   : > { %v6193_v17 = vpop.f32.mrf.mxu3 }
 0x5e2   : > { %v6845_v51 = vpop.f32.mrf.mxu2  ;;  %v6381_v55 = vpop.f32.mrf.mxu0  ;;  %v14083_v13 = vadd.f32 %v6193_v17, %v13948_v16  ;;  %v6498_v17 = vld [vmem:[#allocation2 + $0xdc] sm:$0xff] }
 0x5e3   : > { %v6448_v38 = vadd.f32 %v6381_v55, %v13905_v30  ;;  %v16078_v30 = vld [vmem:[#allocation28_spill] sm:$0xff] }
 0x5e4   : > { %v6612_v31 = vpop.f32.mrf.mxu1  ;;  %v6951_v55 = vld [vmem:[#allocation2 + $0x76] sm:$0xff] }
 0x5e5   : > { %v6680_v63 = vadd.f32 %v6612_v31, %v6447_v52  ;;  %v6516_v31 = vpack.c.bf16 %v6498_v17, %v6497_v28  ;;  %v6500_v17 = vld [vmem:[#allocation2 + $0xec] sm:$0xff]  ;;  %v6499_v28 = vld [vmem:[#allocation2 + $0xe4] sm:$0xff] }
 0x5e6   : > { %11623 = vmatmul.msk.bf16.gmra.mxu3 %vm1330_vm3, %v7007_v19  ;;  %v12011_v19 = vld [vmem:[%s13973_s16 + $0x20] sm:$0xff] }
 0x5e7   : > { %11581 = vmatmul.msk.bf16.gmra.mxu1 %vm1330_vm3, %v6515_v18  ;;  %v14088_v48 = vadd.f32 %v6845_v51, %v6680_v63  ;;  %7883 = vmatpush.bf16.msra.mxu2 %v12011_v19 }
 0x5e9   : > { %v6196_v59 = vpop.f32.mrf.mxu3 }
 0x5ea   : > { %v14090_v15 = vpop.f32.mrf.mxu2  ;;  %v6384_v16 = vpop.f32.mrf.mxu0  ;;  %v14093_v9 = vadd.f32 %v6196_v59, %v13956_v29 }
 0x5eb   : > { %v6449_v53 = vadd.f32 %v6384_v16, %v16078_v30  ;;  %v16085_v16 = vld [vmem:[#allocation42_spill] sm:$0xff] }
 0x5ec   : > { %v6614_v5 = vpop.f32.mrf.mxu1 }
 0x5ed   : > { %11558 = vmatmul.msk.bf16.gmra.mxu0 %vm1330_vm3, %v6283_v4  ;;  %v14101_v52 = vadd.f32 %v6614_v5, %v6448_v38  ;;  %v7008_v38 = vpack.c.bf16 %v6984_v57, %v6951_v55  ;;  %v16088_v4 = vld [vmem:[#allocation35_spill] sm:$0xff]  ;;  %v6953_v55 = vld [vmem:[#allocation2 + $0x86] sm:$0xff] }
 0x5ee   : > { %v6750_v62 = vpack.c.bf16 %v16089_v23, %v16088_v4  ;;  %v16090_v57 = vld [vmem:[#allocation43_spill] sm:$0xff]  ;;  %v16095_v4 = vld [vmem:[#allocation37_spill] sm:$0xff] }
 0x5ef   : > { %11606 = vmatmul.msk.bf16.gmra.mxu2 %vm1330_vm3, %v6749_v27 }
 0x5f1   : > { %v6198_v29 = vpop.f32.mrf.mxu3 }
 0x5f2   : > { %v6850_v25 = vpop.f32.mrf.mxu2  ;;  %v6386_v35 = vpop.f32.mrf.mxu0  ;;  %v14107_v46 = vadd.f32 %v6198_v29, %v13968_v45 }
 0x5f3   : > { %v6450_v51 = vadd.f32 %v6386_v35, %v16084_v26 }
 0x5f4   : > { %v6617_v41 = vpop.f32.mrf.mxu1 }
 0x5f5   : > { %v6682_v37 = vadd.f32 %v6617_v41, %v6449_v53  ;;  %v16087_v53 = vld [vmem:[#allocation34_spill] sm:$0xff] }
 0x5f6   : > { %11624 = vmatmul.msk.bf16.gmra.mxu3 %vm1330_vm3, %v7008_v38  ;;  %v6284_v54 = vpack.c.bf16 %v16087_v53, %v16086_v34 }
 0x5f7   : > { %11582 = vmatmul.msk.bf16.gmra.mxu1 %vm1330_vm3, %v6516_v31  ;;  %v14113_v24 = vadd.f32 %v6850_v25, %v6682_v37  ;;  %v6517_v31 = vpack.c.bf16 %v6500_v17, %v6499_v28 }
 0x5f9   : > { %v6201_v45 = vpop.f32.mrf.mxu3 }
 0x5fa   : > { %v14115_v63 = vpop.f32.mrf.mxu2  ;;  %v6389_v18 = vpop.f32.mrf.mxu0  ;;  %v14118_v59 = vadd.f32 %v6201_v45, %v13981_v11  ;;  %v6954_v11 = vld [vmem:[#allocation2 + $0x8e] sm:$0xff] }
 0x5fb   : > { %v6451_v30 = vadd.f32 %v6389_v18, %v16085_v16  ;;  %v7009_v38 = vpack.c.bf16 %v6954_v11, %v6953_v55  ;;  %v16091_v45 = vld [vmem:[#allocation38_spill] sm:$0xff]  ;;  %v6502_v55 = vld [vmem:[#allocation2 + $0xfc] sm:$0xff] }
 0x5fc   : > { %v6619_v27 = vpop.f32.mrf.mxu1 }
 0x5fd   : > { %11559 = vmatmul.msk.bf16.gmra.mxu0 %vm1330_vm3, %v6284_v54  ;;  %v14126_v5 = vadd.f32 %v6619_v27, %v6450_v51 }
 0x5ff   : > { %11607 = vmatmul.msk.bf16.gmra.mxu2 %vm1330_vm3, %v6750_v62  ;;  %v16096_v62 = vld [vmem:[#allocation40_spill] sm:$0xff] }
 0x601   : > { %v6203_v25 = vpop.f32.mrf.mxu3 }
 0x602   : > { %v6855_v56 = vpop.f32.mrf.mxu2  ;;  %v6391_v29 = vpop.f32.mrf.mxu0  ;;  %v14130_v35 = vadd.f32 %v6203_v25, %v13992_v2  ;;  %v16092_v2 = vld [vmem:[#allocation25_spill] sm:$0xff] }
 0x603   : > { %v6452_v26 = vadd.f32 %v6391_v29, %v16090_v57  ;;  %vm16093_vm0 = vcmp.lt.s32.totalorder %v16092_v2, 63 }
 0x604   : > { %v6622_v41 = vpop.f32.mrf.mxu1  ;;  %v6735_v18 = vsel %vm16093_vm0, %v16091_v45, 0.0  ;;  %vm16099_vm0 = vcmp.lt.s32.totalorder %v16034_v21, 61 }
 0x605   : > { %v6684_v37 = vadd.f32 %v6622_v41, %v6451_v30  ;;  %v16094_v30 = vld [vmem:[#allocation39_spill] sm:$0xff]  ;;  %v6751_v27 = vpack.c.bf16 %v6735_v18, %v16096_v62 }
 0x606   : > { %11625 = vmatmul.msk.bf16.gmra.mxu3 %vm1330_vm3, %v7009_v38  ;;  %v6285_v23 = vpack.c.bf16 %v16095_v4, %v16094_v30  ;;  %v6955_v41 = vld [vmem:[#allocation2 + $0x96] sm:$0xff]  ;;  %v7202_v30 = vld [vmem:[#allocation2 + $0x7] sm:$0xff] }
 0x607   : > { %11583 = vmatmul.msk.bf16.gmra.mxu1 %vm1330_vm3, %v6517_v31  ;;  %v14135_v51 = vadd.f32 %v6855_v56, %v6684_v37  ;;  %v6501_v37 = vld [vmem:[#allocation2 + $0xf4] sm:$0xff] }
 0x608   : > { %v6518_v45 = vpack.c.bf16 %v6502_v55, %v6501_v37  ;;  %v7203_v18 = vld [vmem:[#allocation2 + $0xf] sm:$0xff] }
 0x609   : > { %v7090_v34 = vpop.f32.mrf.mxu3 }
 0x60a   : > { %v14137_v19 = vpop.f32.mrf.mxu2  ;;  %v6394_v16 = vpop.f32.mrf.mxu0  ;;  %v14144_v54 = vadd.f32 %v7090_v34, %v14000_v32 }
 0x60b   : > { %v6453_v53 = vadd.f32 %v6394_v16, %v13943_v7  ;;  %v6956_v7 = vld [vmem:[#allocation2 + $0x9e] sm:$0xff] }
 0x60c   : > { %v6624_v56 = vpop.f32.mrf.mxu1  ;;  %v7010_v28 = vpack.c.bf16 %v6956_v7, %v6955_v41  ;;  %v6957_v41 = vld [vmem:[#allocation2 + $0xa6] sm:$0xff] }
 0x60d   : > { %11560 = vmatmul.msk.bf16.gmra.mxu0 %vm1330_vm3, %v6285_v23  ;;  %v14150_v25 = vadd.f32 %v6624_v56, %v6452_v26  ;;  %v12010_v26 = vld [vmem:[%s13973_s16 + $0x18] sm:$0xff] }
 0x60e   : > { %7884 = vmatpush.bf16.msra.mxu2 %v12010_v26 }
 0x60f   : > { %11608 = vmatmul.msk.bf16.gmra.mxu2 %vm1330_vm3, %v6751_v27 }
 0x611   : > { %v7092_v57 = vpop.f32.mrf.mxu3 }
 0x612   : > { %v6860_v29 = vpop.f32.mrf.mxu2  ;;  %v6396_v11 = vpop.f32.mrf.mxu0  ;;  %v14155_v17 = vadd.f32 %v7092_v57, %v14012_v20  ;;  %v6958_v57 = vld [vmem:[#allocation2 + $0xae] sm:$0xff] }
 0x613   : > { %v6454_v32 = vadd.f32 %v6396_v11, %v13951_v40 }
 0x614   : > { %v6627_v38 = vpop.f32.mrf.mxu1 }
 0x615   : > { %v6686_v31 = vadd.f32 %v6627_v38, %v6453_v53  ;;  %v7266_v53 = vpack.c.bf16 %v7203_v18, %v7202_v30  ;;  %v7011_v38 = vpack.c.bf16 %v6958_v57, %v6957_v41  ;;  %v7204_v18 = vld [vmem:[#allocation2 + $0x17] sm:$0xff]  ;;  %v7470_v41 = vld [vmem:[#allocation2 + $0x20] sm:$0xff] }
 0x616   : > { %11626 = vmatmul.msk.bf16.gmra.mxu3 %vm1330_vm3, %v7010_v28  ;;  %v7467_v28 = vld [vmem:[#allocation2 + $0x8] sm:$0xff] }
 0x617   : > { %11584 = vmatmul.msk.bf16.gmra.mxu1 %vm1330_vm3, %v6518_v45  ;;  %v14160_v16 = vadd.f32 %v6860_v29, %v6686_v31 }
 0x619   : > { %v7095_v34 = vpop.f32.mrf.mxu3 }
 0x61a   : > { %v14162_v40 = vpop.f32.mrf.mxu2  ;;  %v6399_v20 = vpop.f32.mrf.mxu0  ;;  %v14166_v23 = vadd.f32 %v7095_v34, %v14023_v33 }
 0x61b   : > { %v6455_v4 = vadd.f32 %v6399_v20, %v13963_v44  ;;  %v7468_v44 = vld [vmem:[#allocation2 + $0x10] sm:$0xff] }
 0x61c   : > { %v6629_v62 = vpop.f32.mrf.mxu1  ;;  %v7531_v31 = vpack.c.bf16 %v7468_v44, %v7467_v28  ;;  %v7469_v28 = vld [vmem:[#allocation2 + $0x18] sm:$0xff] }
 0x61d   : > { %11641 = vmatmul.msk.bf16.vlgmr.msrb.gmra.mxu0 %vm1330_vm3, %v7266_v53  ;;  %v14169_v27 = vadd.f32 %v6629_v62, %v6454_v32  ;;  %v7205_v32 = vld [vmem:[#allocation2 + $0x1f] sm:$0xff]  ;;  %v12018_v62 = vld [vmem:[%s14185_s3 + $0x8] sm:$0xff] }
 0x61e   : > { %v7267_v30 = vpack.c.bf16 %v7205_v32, %v7204_v18  ;;  %8363 = vmatpush.bf16.msra.mxu3 %v12018_v62  ;;  %v12009_v32 = vld [vmem:[%s13973_s16 + $0x10] sm:$0xff] }
 0x61f   : > { %7885 = vmatpush.bf16.msra.mxu2 %v12009_v32  ;;  %v7209_v32 = vld [vmem:[#allocation2 + $0x3f] sm:$0xff] }
 0x621   : > { %v7097_v11 = vpop.f32.mrf.mxu3 }
 0x622   : > { %v6865_v56 = vpop.f32.mrf.mxu2  ;;  %v6401_v29 = vpop.f32.mrf.mxu0  ;;  %v14173_v55 = vadd.f32 %v7097_v11, %v14035_v12 }
 0x623   : > { %v6456_v7 = vadd.f32 %v6401_v29, %v13976_v49 }
 0x624   : > { %v6632_v33 = vpop.f32.mrf.mxu1 }
 0x625   : > { %v6688_v37 = vadd.f32 %v6632_v33, %v6455_v4  ;;  %v6959_v33 = vld [vmem:[#allocation2 + $0xb6] sm:$0xff] }
 0x626   : > { %11627 = vmatmul.msk.bf16.gmra.mxu3 %vm1330_vm3, %v7011_v38 }
 0x627   : > { %11665 = vmatmul.msk.bf16.vlgmr.msra.gmra.mxu1 %vm1330_vm3, %v7531_v31  ;;  %v14178_v45 = vadd.f32 %v6865_v56, %v6688_v37  ;;  %v6960_v56 = vld [vmem:[#allocation2 + $0xbe] sm:$0xff]  ;;  %v7532_v31 = vpack.c.bf16 %v7470_v41, %v7469_v28  ;;  %v7472_v28 = vld [vmem:[#allocation2 + $0x30] sm:$0xff] }
 0x629   : > { %v7100_v12 = vpop.f32.mrf.mxu3 }
 0x62a   : > { %v14180_v26 = vpop.f32.mrf.mxu2  ;;  %v6404_v49 = vpop.f32.mrf.mxu0  ;;  %v14189_v34 = vadd.f32 %v7100_v12, %v14043_v43  ;;  %v7207_v12 = vld [vmem:[#allocation2 + $0x2f] sm:$0xff] }
 0x62b   : > { %v6457_v20 = vadd.f32 %v6404_v49, %v13986_v60  ;;  %v6992_v60 = vsel %vm16098_vm13, %v6960_v56, 0.0  ;;  %v12016_v49 = vld [vmem:[%s14185_s3 + $0x98] sm:$0xff]  ;;  %vm16100_vm13 = vcmp.lt.s32.totalorder %v16034_v21, 60 }
 0x62c   : > { %v6634_v4 = vpop.f32.mrf.mxu1  ;;  %v7012_v38 = vpack.c.bf16 %v6992_v60, %v6959_v33  ;;  %8512 = vmatpush.bf16.msra.mxu0 %v12016_v49  ;;  %v6962_v33 = vld [vmem:[#allocation2 + $0xce] sm:$0xff] }
 0x62d   : > { %11642 = vmatmul.msk.bf16.gmra.mxu0 %vm1330_vm3, %v7267_v30  ;;  %v14192_v53 = vadd.f32 %v6634_v4, %v6456_v7  ;;  %v7206_v4 = vld [vmem:[#allocation2 + $0x27] sm:$0xff] }
 0x62e   : > { %v7268_v56 = vpack.c.bf16 %v7207_v12, %v7206_v4 }
 0x631   : > { %v7102_v57 = vpop.f32.mrf.mxu3 }
 0x632   : > { %v6870_v29 = vpop.f32.mrf.mxu2  ;;  %v6406_v11 = vpop.f32.mrf.mxu0  ;;  %v14199_v44 = vadd.f32 %v7102_v57, %v14057_v6 }
 0x633   : > { %v6458_v43 = vadd.f32 %v6406_v11, %v13995_v22 }
 0x634   : > { %v6637_v7 = vpop.f32.mrf.mxu1 }
 0x635   : > { %v6690_v37 = vadd.f32 %v6637_v7, %v6457_v20 }
 0x636   : > { %11628 = vmatmul.msk.bf16.gmra.mxu3 %vm1330_vm3, %v7012_v38 }
 0x637   : > { %11666 = vmatmul.msk.bf16.gmra.mxu1 %vm1330_vm3, %v7532_v31  ;;  %v14205_v18 = vadd.f32 %v6870_v29, %v6690_v37  ;;  %v7471_v31 = vld [vmem:[#allocation2 + $0x28] sm:$0xff] }
 0x638   : > { %v7533_v12 = vpack.c.bf16 %v7472_v28, %v7471_v31  ;;  %v6964_v28 = vld [vmem:[#allocation2 + $0xde] sm:$0xff] }
 0x639   : > { %v7105_v30 = vpop.f32.mrf.mxu3 }
 0x63a   : > { %v14207_v22 = vpop.f32.mrf.mxu2  ;;  %v6409_v6 = vpop.f32.mrf.mxu0  ;;  %v14211_v20 = vadd.f32 %v7105_v30, %v14066_v50  ;;  %v7208_v30 = vld [vmem:[#allocation2 + $0x37] sm:$0xff] }
 0x63b   : > { %v6459_v62 = vadd.f32 %v6409_v6, %v14003_v42  ;;  %v6961_v42 = vld [vmem:[#allocation2 + $0xc6] sm:$0xff] }
 0x63c   : > { %v6639_v11 = vpop.f32.mrf.mxu1  ;;  %v7013_v50 = vpack.c.bf16 %v6962_v33, %v6961_v42 }
 0x63d   : > { %11643 = vmatmul.msk.bf16.gmra.mxu0 %vm1330_vm3, %v7268_v56  ;;  %v14214_v57 = vadd.f32 %v6639_v11, %v6458_v43  ;;  %v7241_v43 = vsel %vm16099_vm0, %v7209_v32, 0.0  ;;  %vm16101_vm0 = vcmp.lt.s32.totalorder %v16092_v2, 62 }
 0x63e   : > { %v7269_v56 = vpack.c.bf16 %v7241_v43, %v7208_v30  ;;  %v7210_v30 = vld [vmem:[#allocation2 + $0x47] sm:$0xff] }
 0x641   : > { %v7107_v41 = vpop.f32.mrf.mxu3 }
 0x642   : > { %v6875_v60 = vpop.f32.mrf.mxu2  ;;  %v6411_v29 = vpop.f32.mrf.mxu0  ;;  %v14218_v38 = vadd.f32 %v7107_v41, %v14080_v0 }
 0x643   : > { %v6460_v7 = vadd.f32 %v6411_v29, %v14017_v10  ;;  %v7474_v29 = vld [vmem:[#allocation2 + $0x40] sm:$0xff] }
 0x644   : > { %v6642_v37 = vpop.f32.mrf.mxu1  ;;  %v7506_v42 = vsel %vm16100_vm13, %v7474_v29, 0.0  ;;  %vm16102_vm13 = vcmp.lt.s32.totalorder %v16043_v1, 61 }
 0x645   : > { %v6692_v49 = vadd.f32 %v6642_v37, %v6459_v62  ;;  %v6963_v37 = vld [vmem:[#allocation2 + $0xd6] sm:$0xff] }
 0x646   : > { %11629 = vmatmul.msk.bf16.gmra.mxu3 %vm1330_vm3, %v7013_v50  ;;  %v7014_v31 = vpack.c.bf16 %v6964_v28, %v6963_v37 }
 0x647   : > { %11667 = vmatmul.msk.bf16.gmra.mxu1 %vm1330_vm3, %v7533_v12  ;;  %v14224_v6 = vadd.f32 %v6875_v60, %v6692_v49  ;;  %v12008_v12 = vld [vmem:[%s13973_s16 + $0x8] sm:$0xff] }
 0x648   : > { %7886 = vmatpush.bf16.msra.mxu2 %v12008_v12 }
 0x64a   : > { %v14226_v10 = vpop.f32.mrf.mxu2  ;;  %v6414_v0 = vpop.f32.mrf.mxu0 }
 0x64b   : > { %v6461_v4 = vadd.f32 %v6414_v0, %v14026_v8  ;;  %v7473_v8 = vld [vmem:[#allocation2 + $0x38] sm:$0xff] }
 0x64c   : > { %v6644_v11 = vpop.f32.mrf.mxu1  ;;  %v7534_v49 = vpack.c.bf16 %v7506_v42, %v7473_v8  ;;  %v6966_v42 = vld [vmem:[#allocation2 + $0xee] sm:$0xff] }
 0x64d   : > { %11644 = vmatmul.msk.bf16.gmra.mxu0 %vm1330_vm3, %v7269_v56  ;;  %v14230_v62 = vadd.f32 %v6644_v11, %v6460_v7  ;;  %v7211_v7 = vld [vmem:[#allocation2 + $0x4f] sm:$0xff] }
 0x64e   : > { %v7270_v11 = vpack.c.bf16 %v7211_v7, %v7210_v30  ;;  %v7212_v30 = vld [vmem:[#allocation2 + $0x57] sm:$0xff] }
 0x652   : > { %v6880_v41 = vpop.f32.mrf.mxu2  ;;  %v6416_v33 = vpop.f32.mrf.mxu0 }
 0x653   : > { %v6462_v60 = vadd.f32 %v6416_v33, %v14038_v3 }
 0x654   : > { %v6647_v50 = vpop.f32.mrf.mxu1 }
 0x655   : > { %v6694_v32 = vadd.f32 %v6647_v50, %v6461_v4  ;;  %v7476_v50 = vld [vmem:[#allocation2 + $0x50] sm:$0xff] }
 0x656   : > { %11630 = vmatmul.msk.bf16.gmra.mxu3 %vm1330_vm3, %v7014_v31 }
 0x657   : > { %11668 = vmatmul.msk.bf16.gmra.mxu1 %vm1330_vm3, %v7534_v49  ;;  %v14238_v43 = vadd.f32 %v6880_v41, %v6694_v32  ;;  %v6965_v41 = vld [vmem:[#allocation2 + $0xe6] sm:$0xff] }
 0x658   : > { %v7015_v8 = vpack.c.bf16 %v6966_v42, %v6965_v41  ;;  %v7475_v32 = vld [vmem:[#allocation2 + $0x48] sm:$0xff]  ;;  %v6967_v41 = vld [vmem:[#allocation2 + $0xf6] sm:$0xff] }
 0x659   : > { %v7535_v12 = vpack.c.bf16 %v7476_v50, %v7475_v32 }
 0x65a   : > { %v14240_v0 = vpop.f32.mrf.mxu2  ;;  %v6419_v3 = vpop.f32.mrf.mxu0 }
 0x65b   : > { %v6463_v56 = vadd.f32 %v6419_v3, %v14049_v39  ;;  %v7213_v39 = vld [vmem:[#allocation2 + $0x5f] sm:$0xff] }
 0x65c   : > { %v6649_v29 = vpop.f32.mrf.mxu1 }
 0x65d   : > { %11645 = vmatmul.msk.bf16.gmra.mxu0 %vm1330_vm3, %v7270_v11  ;;  %v14244_v4 = vadd.f32 %v6649_v29, %v6462_v60  ;;  %v7271_v11 = vpack.c.bf16 %v7213_v39, %v7212_v30 }
 0x662   : > { %v6885_v33 = vpop.f32.mrf.mxu2  ;;  %v6421_v28 = vpop.f32.mrf.mxu0 }
 0x663   : > { %v6464_v37 = vadd.f32 %v6421_v28, %v14060_v61  ;;  %v6968_v28 = vld [vmem:[#allocation2 + $0xfe] sm:$0xff] }
 0x664   : > { %v6652_v31 = vpop.f32.mrf.mxu1 }
 0x665   : > { %v6696_v49 = vadd.f32 %v6652_v31, %v6463_v56 }
 0x666   : > { %11631 = vmatmul.msk.bf16.gmra.mxu3 %vm1330_vm3, %v7015_v8  ;;  %v7478_v8 = vld [vmem:[#allocation2 + $0x60] sm:$0xff] }
 0x667   : > { %11669 = vmatmul.msk.bf16.gmra.mxu1 %vm1330_vm3, %v7535_v12  ;;  %v14249_v7 = vadd.f32 %v6885_v33, %v6696_v49  ;;  %v7000_v33 = vsel %vm16101_vm0, %v6968_v28, 0.0  ;;  %v7214_v28 = vld [vmem:[#allocation2 + $0x67] sm:$0xff]  ;;  %vm16103_vm0 = vcmp.lt.s32.totalorder %v16043_v1, 60  ;;  %v12015_v1 = vld [vmem:[%s14185_s3 + $0x90] sm:$0xff] }
 0x668   : > { %v7016_v49 = vpack.c.bf16 %v7000_v33, %v6967_v41  ;;  %8513 = vmatpush.bf16.msra.mxu0 %v12015_v1 }
 0x66a   : > { %v14251_v60 = vpop.f32.mrf.mxu2  ;;  %v6424_v3 = vpop.f32.mrf.mxu0 }
 0x66b   : > { %v6465_v61 = vadd.f32 %v6424_v3, %v14072_v14  ;;  %v7477_v14 = vld [vmem:[#allocation2 + $0x58] sm:$0xff]  ;;  %v12007_v3 = vld [vmem:[%s13973_s16] sm:$0xff]  ;;  %s16339_s16 = sld [smem:[#allocation98_spill]] }
 0x66c   : > { %v6654_v29 = vpop.f32.mrf.mxu1  ;;  %v7536_v39 = vpack.c.bf16 %v7478_v8, %v7477_v14  ;;  %7887 = vmatpush.bf16.msra.mxu2 %v12007_v3 }
 0x66d   : > { %11646 = vmatmul.msk.bf16.gmra.mxu0 %vm1330_vm3, %v7271_v11  ;;  %v14255_v56 = vadd.f32 %v6654_v29, %v6464_v37  ;;  %v7215_v37 = vld [vmem:[#allocation2 + $0x6f] sm:$0xff] }
 0x671   : > { %s716_s24 = scalar_lea.vmem %s16339_s16, %s715_s26 }
 0x672   : > { %v6890_v42 = vpop.f32.mrf.mxu2  ;;  %v6426_v50 = vpop.f32.mrf.mxu0 }
 0x673   : > { %v6466_v31 = vadd.f32 %v6426_v50, %v14083_v13  ;;  %v7272_v50 = vpack.c.bf16 %v7215_v37, %v7214_v28 }
 0x674   : > { %v6657_v32 = vpop.f32.mrf.mxu1 }
 0x675   : > { %v6698_v12 = vadd.f32 %v6657_v32, %v6465_v61 }
 0x676   : > { %11632 = vmatmul.msk.bf16.gmra.mxu3 %vm1330_vm3, %v7016_v49  ;;  %v7480_v49 = vld [vmem:[#allocation2 + $0x70] sm:$0xff] }
 0x677   : > { %11670 = vmatmul.msk.bf16.gmra.mxu1 %vm1330_vm3, %v7536_v39  ;;  %v14263_v30 = vadd.f32 %v6890_v42, %v6698_v12  ;;  %v7479_v42 = vld [vmem:[#allocation2 + $0x68] sm:$0xff]  ;;  %v7217_v12 = vld [vmem:[#allocation2 + $0x7f] sm:$0xff] }
 0x678   : > { %v7537_v3 = vpack.c.bf16 %v7480_v49, %v7479_v42 }
 0x67a   : > { %v14265_v11 = vpop.f32.mrf.mxu2  ;;  %v6429_v29 = vpop.f32.mrf.mxu0 }
 0x67b   : > { %v6467_v13 = vadd.f32 %v6429_v29, %v14093_v9  ;;  %v7249_v9 = vsel %vm16102_vm13, %v7217_v12, 0.0  ;;  %v7481_v12 = vld [vmem:[#allocation2 + $0x78] sm:$0xff]  ;;  %vm16111_vm13 = vcmp.lt.s32.totalorder %v12953_v58, 60 }
 0x67c   : > { %v6659_v41 = vpop.f32.mrf.mxu1 }
 0x67d   : > { %11647 = vmatmul.msk.bf16.gmra.mxu0 %vm1330_vm3, %v7272_v50  ;;  %v14269_v61 = vadd.f32 %v6659_v41, %v6466_v31  ;;  %v7216_v31 = vld [vmem:[#allocation2 + $0x77] sm:$0xff] }
 0x67e   : > { %v7273_v50 = vpack.c.bf16 %v7249_v9, %v7216_v31  ;;  %v7219_v9 = vld [vmem:[#allocation2 + $0x8f] sm:$0xff]  ;;  %v7218_v31 = vld [vmem:[#allocation2 + $0x87] sm:$0xff] }
 0x682   : > { %v6431_v33 = vpop.f32.mrf.mxu0  ;;  %v6895_v8 = vpop.f32.mrf.mxu2 }
 0x683   : > { %v6468_v32 = vadd.f32 %v6431_v33, %v14107_v46 }
 0x684   : > { %v6662_v14 = vpop.f32.mrf.mxu1 }
 0x685   : > { %v6700_v39 = vadd.f32 %v6662_v14, %v6467_v13  ;;  %v7482_v13 = vld [vmem:[#allocation2 + $0x80] sm:$0xff] }
 0x687   : > { %11671 = vmatmul.msk.bf16.gmra.mxu1 %vm1330_vm3, %v7537_v3  ;;  %v14275_v37 = vadd.f32 %v6895_v8, %v6700_v39  ;;  %v7514_v8 = vsel %vm16103_vm0, %v7482_v13, 0.0  ;;  %vm16118_vm0 = vcmp.lt.s32.totalorder %v16092_v2, 61 }
 0x688   : > { %v7538_v3 = vpack.c.bf16 %v7514_v8, %v7481_v12  ;;  %v7221_v12 = vld [vmem:[#allocation2 + $0x9f] sm:$0xff] }
 0x68a   : > { %v6434_v29 = vpop.f32.mrf.mxu0  ;;  %v14278_v41 = vpop.f32.mrf.mxu2 }
 0x68b   : > { %v6469_v28 = vadd.f32 %v6434_v29, %v14118_v59 }
 0x68c   : > { %v6664_v46 = vpop.f32.mrf.mxu1 }
 0x68d   : > { %11648 = vmatmul.msk.bf16.gmra.mxu0 %vm1330_vm3, %v7273_v50  ;;  %v14281_v33 = vadd.f32 %v6664_v46, %v6468_v32  ;;  %v7274_v50 = vpack.c.bf16 %v7219_v9, %v7218_v31 }
 0x692   : > { %v6436_v49 = vpop.f32.mrf.mxu0  ;;  %v6900_v59 = vpop.f32.mrf.mxu2 }
 0x693   : > { %v6470_v14 = vadd.f32 %v6436_v49, %v14130_v35  ;;  %v7484_v49 = vld [vmem:[#allocation2 + $0x90] sm:$0xff] }
 0x694   : > { %v6667_v42 = vpop.f32.mrf.mxu1 }
 0x695   : > { %v6702_v39 = vadd.f32 %v6667_v42, %v6469_v28  ;;  %v7483_v28 = vld [vmem:[#allocation2 + $0x88] sm:$0xff] }
 0x696   : > { %v7539_v8 = vpack.c.bf16 %v7484_v49, %v7483_v28  ;;  %v14309_v49 = vpop.f32.mrf.mxu3 }
 0x697   : > { %11672 = vmatmul.msk.bf16.gmra.mxu1 %vm1330_vm3, %v7538_v3  ;;  %v14287_v29 = vadd.f32 %v6900_v59, %v6702_v39  ;;  %v14299_v39 = vld [vmem:[%s692_s8] ss:$0 sm:$0xff]  ;;  %v7220_v59 = vld [vmem:[#allocation2 + $0x97] sm:$0xff] }
 0x698   : > { %v7275_v9 = vpack.c.bf16 %v7221_v12, %v7220_v59 }
 0x69a   : > { %v7355_v32 = vpop.f32.mrf.mxu0 }
 0x69b   : > { %v7435_v42 = vadd.f32 %v7355_v32, %v14144_v54 }
 0x69c   : > { %v6669_v46 = vpop.f32.mrf.mxu1 }
 0x69d   : > { %11649 = vmatmul.msk.bf16.gmra.mxu0 %vm1330_vm3, %v7274_v50  ;;  %v14290_v35 = vadd.f32 %v6669_v46, %v6470_v14 }
 0x69f   : > { %16104 = vst [vmem:[#allocation30_spill] sm:$0xff] %v14290_v35  ;;  %v14321_v35 = vpop.f32.mrf.mxu3 }
 0x6a2   : > { %v7357_v13 = vpop.f32.mrf.mxu0 }
 0x6a3   : > { %v7436_v31 = vadd.f32 %v7357_v13, %v14155_v17  ;;  %v7486_v17 = vld [vmem:[#allocation2 + $0xa0] sm:$0xff] }
 0x6a4   : > { %v7620_v36 = vpop.f32.mrf.mxu1 }
 0x6a5   : > { %v7700_v3 = vadd.f32 %v7620_v36, %v7435_v42  ;;  %v12017_v42 = vld [vmem:[%s14185_s3] sm:$0xff] }
 0x6a6   : > { %8364 = vmatpush.bf16.msra.mxu3 %v12017_v42 }
 0x6a7   : > { %11673 = vmatmul.msk.bf16.gmra.mxu1 %vm1330_vm3, %v7539_v8  ;;  %v14304_v54 = vadd.f32 %v14299_v39, %v7700_v3  ;;  %v7485_v3 = vld [vmem:[#allocation2 + $0x98] sm:$0xff] }
 0x6a8   : > { %v7540_v59 = vpack.c.bf16 %v7486_v17, %v7485_v3 }
 0x6a9   : > { %16105 = vst [vmem:[#allocation26_spill] sm:$0xff] %v14304_v54  ;;  %v15876_v28 = vmax.f32 %v14304_v54, 0.0 }
 0x6aa   : > { %v7360_v14 = vpop.f32.mrf.mxu0 }
 0x6ac   : > { %v7622_v50 = vpop.f32.mrf.mxu1 }
 0x6ad   : > { %11650 = vmatmul.msk.bf16.gmra.mxu0 %vm1330_vm3, %v7275_v9  ;;  %v7701_v32 = vadd.f32 %v7622_v50, %v7436_v31  ;;  %v7437_v9 = vadd.f32 %v7360_v14, %v14166_v23  ;;  %v7223_v31 = vld [vmem:[#allocation2 + $0xaf] sm:$0xff] }
 0x6ae   : > { %v7276_v54 = vpack.c.bf16 %v7223_v31, %v7222_v47  ;;  %v14337_v47 = vpop.f32.mrf.mxu3 }
 0x6af   : > { %v14307_v46 = vadd.f32 %v14299_v39, %v7701_v32 }
 0x6b1   : > { %16106 = vst [vmem:[#allocation28_spill] sm:$0xff] %v14307_v46  ;;  %v15873_v36 = vmax.f32 %v14307_v46, 0.0 }
 0x6b2   : > { %v7362_v8 = vpop.f32.mrf.mxu0 }
 0x6b3   : > { %v7800_v13 = vpack.c.bf16 %v15873_v36, %v15876_v28  ;;  %v7438_v46 = vadd.f32 %v7362_v8, %v14173_v55  ;;  %v7225_v8 = vld [vmem:[#allocation2 + $0xbf] sm:$0xff] }
 0x6b4   : > { %v7625_v12 = vpop.f32.mrf.mxu1  ;;  %v7257_v31 = vsel %vm4178_vm11, %v7225_v8, 0.0 }
 0x6b5   : > { %7888 = vmatmul.bf16.vlgmr.msra.gmra.mxu2 %v7800_v13  ;;  %v7702_v50 = vadd.f32 %v7625_v12, %v7437_v9 }
 0x6b7   : > { %11674 = vmatmul.msk.bf16.gmra.mxu1 %vm1330_vm3, %v7540_v59  ;;  %v14326_v17 = vadd.f32 %v14299_v39, %v7702_v50  ;;  %v7488_v59 = vld [vmem:[#allocation2 + $0xb0] sm:$0xff] }
 0x6b9   : > { %16107 = vst [vmem:[#allocation27_spill] sm:$0xff] %v14326_v17  ;;  %v15875_v13 = vmax.f32 %v14326_v17, 0.0 }
 0x6ba   : > { %v7365_v32 = vpop.f32.mrf.mxu0 }
 0x6bb   : > { %v7439_v9 = vadd.f32 %v7365_v32, %v14189_v34  ;;  %v7490_v32 = vld [vmem:[#allocation2 + $0xc0] sm:$0xff] }
 0x6bc   : > { %v7627_v42 = vpop.f32.mrf.mxu1 }
 0x6bd   : > { %11651 = vmatmul.msk.bf16.gmra.mxu0 %vm1330_vm3, %v7276_v54  ;;  %v7703_v23 = vadd.f32 %v7627_v42, %v7438_v46  ;;  %v7487_v54 = vld [vmem:[#allocation2 + $0xa8] sm:$0xff] }
 0x6be   : > { %v7541_v46 = vpack.c.bf16 %v7488_v59, %v7487_v54 }
 0x6bf   : > { %v14329_v14 = vadd.f32 %v14299_v39, %v7703_v23  ;;  %v7224_v23 = vld [vmem:[#allocation2 + $0xb7] sm:$0xff] }
 0x6c0   : > { %v7277_v36 = vpack.c.bf16 %v7257_v31, %v7224_v23 }
 0x6c1   : > { %16108 = vst [vmem:[#allocation29_spill] sm:$0xff] %v14329_v14  ;;  %v15874_v12 = vmax.f32 %v14329_v14, 0.0 }
 0x6c2   : > { %v7367_v3 = vpop.f32.mrf.mxu0 }
 0x6c3   : > { %v7801_v1 = vpack.c.bf16 %v15874_v12, %v15875_v13  ;;  %v7440_v12 = vadd.f32 %v7367_v3, %v14199_v44  ;;  %v7522_v44 = vsel %vm16111_vm13, %v7490_v32, 0.0  ;;  %vm16191_vm13 = vcmp.le.s32.totalorder %v16092_v2, 62 }
 0x6c4   : > { %v7630_v55 = vpop.f32.mrf.mxu1 }
 0x6c5   : > { %7893 = vmatmul.bf16.gmra.mxu2 %v7801_v1  ;;  %v7704_v50 = vadd.f32 %v7630_v55, %v7439_v9  ;;  %v14348_v1 = vpop.f32.mrf.mxu3  ;;  %v7227_v9 = vld [vmem:[#allocation2 + $0xcf] sm:$0xff] }
 0x6c7   : > { %11675 = vmatmul.msk.bf16.gmra.mxu1 %vm1330_vm3, %v7541_v46  ;;  %v14346_v28 = vadd.f32 %v14299_v39, %v7704_v50 }
 0x6c9   : > { %16109 = vst [vmem:[#allocation31_spill] sm:$0xff] %v14346_v28  ;;  %v15879_v55 = vmax.f32 %v14346_v28, 0.0 }
 0x6ca   : > { %v7370_v42 = vpop.f32.mrf.mxu0 }
 0x6cb   : > { %v7441_v46 = vadd.f32 %v7370_v42, %v14211_v20 }
 0x6cc   : > { %v7632_v13 = vpop.f32.mrf.mxu1 }
 0x6cd   : > { %11652 = vmatmul.msk.bf16.gmra.mxu0 %vm1330_vm3, %v7277_v36  ;;  %v7705_v59 = vadd.f32 %v7632_v13, %v7440_v12  ;;  %v7489_v12 = vld [vmem:[#allocation2 + $0xb8] sm:$0xff]  ;;  %v14363_v31 = vpop.f32.mrf.mxu3 }
 0x6ce   : > { %v7542_v3 = vpack.c.bf16 %v7522_v44, %v7489_v12 }
 0x6cf   : > { %v14351_v34 = vadd.f32 %v14299_v39, %v7705_v59  ;;  %v7226_v59 = vld [vmem:[#allocation2 + $0xc7] sm:$0xff] }
 0x6d0   : > { %v7278_v32 = vpack.c.bf16 %v7227_v9, %v7226_v59  ;;  %v6914_v9 = vadd.f32 %v14090_v15, %v14101_v52  ;;  %v7229_v59 = vld [vmem:[#allocation2 + $0xdf] sm:$0xff] }
 0x6d1   : > { %16110 = vst [vmem:[#allocation32_spill] sm:$0xff] %v14351_v34  ;;  %v15878_v54 = vmax.f32 %v14351_v34, 0.0 }
 0x6d2   : > { %v7372_v8 = vpop.f32.mrf.mxu0 }
 0x6d3   : > { %v7802_v36 = vpack.c.bf16 %v15878_v54, %v15879_v55  ;;  %v7442_v28 = vadd.f32 %v7372_v8, %v14218_v38 }
 0x6d4   : > { %v7635_v13 = vpop.f32.mrf.mxu1 }
 0x6d5   : > { %7898 = vmatmul.bf16.gmra.mxu2 %v7802_v36  ;;  %v7706_v50 = vadd.f32 %v7635_v13, %v7441_v46  ;;  %v14375_v12 = vpop.f32.mrf.mxu3  ;;  %v7491_v46 = vld [vmem:[#allocation2 + $0xc8] sm:$0xff] }
 0x6d7   : > { %11676 = vmatmul.msk.bf16.gmra.mxu1 %vm1330_vm3, %v7542_v3  ;;  %v14368_v55 = vadd.f32 %v14299_v39, %v7706_v50  ;;  %v7492_v3 = vld [vmem:[#allocation2 + $0xd0] sm:$0xff] }
 0x6d9   : > { %16112 = vst [vmem:[#allocation41_spill] sm:$0xff] %v14368_v55  ;;  %v15883_v42 = vmax.f32 %v14368_v55, 0.0 }
 0x6da   : > { %v7375_v23 = vpop.f32.mrf.mxu0 }
 0x6dc   : > { %v7637_v54 = vpop.f32.mrf.mxu1 }
 0x6dd   : > { %11653 = vmatmul.msk.bf16.gmra.mxu0 %vm1330_vm3, %v7278_v32  ;;  %v7707_v44 = vadd.f32 %v7637_v54, %v7442_v28  ;;  %v7178_v28 = vadd.f32 %v14309_v49, %v14088_v48  ;;  %v7543_v54 = vpack.c.bf16 %v7492_v3, %v7491_v46  ;;  %v7179_v32 = vadd.f32 %v14321_v35, %v6914_v9  ;;  %v14387_v34 = vpop.f32.mrf.mxu3  ;;  %v7231_v9 = vld [vmem:[#allocation2 + $0xef] sm:$0xff] }
 0x6df   : > { %v14371_v20 = vadd.f32 %v14299_v39, %v7707_v44  ;;  %v7443_v50 = vadd.f32 %v7375_v23, %v7178_v28  ;;  %v6916_v28 = vadd.f32 %v14115_v63, %v14126_v5 }
 0x6e1   : > { %16113 = vst [vmem:[#allocation42_spill] sm:$0xff] %v14371_v20  ;;  %v15882_v36 = vmax.f32 %v14371_v20, 0.0  ;;  %v7228_v20 = vld [vmem:[#allocation2 + $0xd7] sm:$0xff] }
 0x6e2   : > { %v7377_v13 = vpop.f32.mrf.mxu0 }
 0x6e3   : > { %v7803_v38 = vpack.c.bf16 %v15882_v36, %v15883_v42  ;;  %v7279_v36 = vpack.c.bf16 %v7229_v59, %v7228_v20  ;;  %v7444_v42 = vadd.f32 %v7377_v13, %v7179_v32  ;;  %v7493_v13 = vld [vmem:[#allocation2 + $0xd8] sm:$0xff] }
 0x6e4   : > { %v7640_v8 = vpop.f32.mrf.mxu1 }
 0x6e5   : > { %7903 = vmatmul.bf16.gmra.mxu2 %v7803_v38  ;;  %v7708_v44 = vadd.f32 %v7640_v8, %v7443_v50  ;;  %v7494_v38 = vld [vmem:[#allocation2 + $0xe0] sm:$0xff]  ;;  %v7180_v8 = vadd.f32 %v14337_v47, %v14113_v24  ;;  %v7127_v46 = vpop.f32.mrf.mxu3  ;;  %v7181_v50 = vadd.f32 %v14348_v1, %v6916_v28  ;;  %v7182_v28 = vadd.f32 %v14363_v31, %v14135_v51 }
 0x6e7   : > { %11677 = vmatmul.msk.bf16.gmra.mxu1 %vm1330_vm3, %v7543_v54  ;;  %v14391_v49 = vadd.f32 %v14299_v39, %v7708_v44  ;;  %v7230_v44 = vld [vmem:[#allocation2 + $0xe7] sm:$0xff] }
 0x6e9   : > { %16114 = vst [vmem:[#allocation33_spill] sm:$0xff] %v14391_v49  ;;  %v15898_v23 = vmax.f32 %v14391_v49, 0.0 }
 0x6ea   : > { %v7380_v55 = vpop.f32.mrf.mxu0 }
 0x6eb   : > { %v7445_v54 = vadd.f32 %v7380_v55, %v7180_v8  ;;  %v7495_v8 = vld [vmem:[#allocation2 + $0xe8] sm:$0xff] }
 0x6ec   : > { %v7642_v48 = vpop.f32.mrf.mxu1 }
 0x6ed   : > { %11654 = vmatmul.msk.bf16.gmra.mxu0 %vm1330_vm3, %v7279_v36  ;;  %v7709_v15 = vadd.f32 %v7642_v48, %v7444_v42  ;;  %v7544_v42 = vpack.c.bf16 %v7494_v38, %v7493_v13  ;;  %v7280_v48 = vpack.c.bf16 %v7231_v9, %v7230_v44  ;;  %v7130_v5 = vpop.f32.mrf.mxu3  ;;  %v6918_v9 = vadd.f32 %v14137_v19, %v14150_v25 }
 0x6ef   : > { %v14394_v52 = vadd.f32 %v14299_v39, %v7709_v15 }
 0x6f1   : > { %16115 = vst [vmem:[#allocation34_spill] sm:$0xff] %v14394_v52  ;;  %v15895_v35 = vmax.f32 %v14394_v52, 0.0 }
 0x6f2   : > { %v7382_v3 = vpop.f32.mrf.mxu0 }
 0x6f3   : > { %v7804_v20 = vpack.c.bf16 %v15895_v35, %v15898_v23  ;;  %v7446_v15 = vadd.f32 %v7382_v3, %v7181_v50 }
 0x6f4   : > { %v7645_v36 = vpop.f32.mrf.mxu1 }
 0x6f5   : > { %7908 = vmatmul.bf16.gmra.mxu2 %v7804_v20  ;;  %v7710_v59 = vadd.f32 %v7645_v36, %v7445_v54  ;;  %v7496_v36 = vld [vmem:[#allocation2 + $0xf0] sm:$0xff] }
 0x6f6   : > { %v7545_v54 = vpack.c.bf16 %v7496_v36, %v7495_v8 }
 0x6f7   : > { %11678 = vmatmul.msk.bf16.gmra.mxu1 %vm1330_vm3, %v7544_v42  ;;  %v14410_v47 = vadd.f32 %v14299_v39, %v7710_v59  ;;  %v7233_v42 = vld [vmem:[#allocation2 + $0xff] sm:$0xff]  ;;  %v7232_v59 = vld [vmem:[#allocation2 + $0xf7] sm:$0xff] }
 0x6f8   : > { %v7265_v44 = vsel %vm16118_vm0, %v7233_v42, 0.0  ;;  %v7184_v42 = vadd.f32 %v14387_v34, %v14160_v16 }
 0x6f9   : > { %16116 = vst [vmem:[#allocation35_spill] sm:$0xff] %v14410_v47  ;;  %v15886_v55 = vmax.f32 %v14410_v47, 0.0 }
 0x6fa   : > { %v7385_v32 = vpop.f32.mrf.mxu0 }
 0x6fb   : > { %v7447_v50 = vadd.f32 %v7385_v32, %v7182_v28  ;;  %v7498_v32 = vld [vmem:[#allocation2 + $0x100] sm:$0xff] }
 0x6fc   : > { %v7647_v24 = vpop.f32.mrf.mxu1 }
 0x6fd   : > { %11655 = vmatmul.msk.bf16.gmra.mxu0 %vm1330_vm3, %v7280_v48  ;;  %v7711_v38 = vadd.f32 %v7647_v24, %v7446_v15  ;;  %v7183_v48 = vadd.f32 %v14375_v12, %v6918_v9 }
 0x6ff   : > { %v14413_v63 = vadd.f32 %v14299_v39, %v7711_v38  ;;  %v7132_v38 = vpop.f32.mrf.mxu3 }
 0x701   : > { %16117 = vst [vmem:[#allocation36_spill] sm:$0xff] %v14413_v63  ;;  %v15885_v1 = vmax.f32 %v14413_v63, 0.0 }
 0x702   : > { %v7387_v20 = vpop.f32.mrf.mxu0 }
 0x703   : > { %v7805_v3 = vpack.c.bf16 %v15885_v1, %v15886_v55  ;;  %v7281_v1 = vpack.c.bf16 %v7265_v44, %v7232_v59  ;;  %v7448_v55 = vadd.f32 %v7387_v20, %v7183_v48  ;;  %v7530_v20 = vsel %vm4547_vm2, %v7498_v32, 0.0 }
 0x704   : > { %v7650_v13 = vpop.f32.mrf.mxu1 }
 0x705   : > { %7913 = vmatmul.bf16.gmra.mxu2 %v7805_v3  ;;  %v7712_v15 = vadd.f32 %v7650_v13, %v7447_v50  ;;  %v7497_v13 = vld [vmem:[#allocation2 + $0xf8] sm:$0xff] }
 0x706   : > { %v7546_v28 = vpack.c.bf16 %v7530_v20, %v7497_v13  ;;  %v6922_v13 = vadd.f32 %v14180_v26, %v14192_v53  ;;  %v14471_v26 = vpop.f32.mrf.mxu2 }
 0x707   : > { %11679 = vmatmul.msk.bf16.gmra.mxu1 %vm1330_vm3, %v7545_v54  ;;  %v14431_v31 = vadd.f32 %v14299_v39, %v7712_v15  ;;  %v7135_v8 = vpop.f32.mrf.mxu3  ;;  %v6920_v54 = vadd.f32 %v14162_v40, %v14169_v27 }
 0x709   : > { %16119 = vst [vmem:[#allocation43_spill] sm:$0xff] %v14431_v31  ;;  %v15894_v36 = vmax.f32 %v14431_v31, 0.0  ;;  %v7185_v50 = vadd.f32 %v7127_v46, %v6920_v54  ;;  %v12020_v54 = vld [vmem:[%s14185_s3 + $0x18] sm:$0xff] }
 0x70a   : > { %v7390_v24 = vpop.f32.mrf.mxu0  ;;  %8745 = vmatpush.bf16.msrb.mxu1 %v12020_v54 }
 0x70b   : > { %v7449_v9 = vadd.f32 %v7390_v24, %v7184_v42 }
 0x70c   : > { %v7652_v51 = vpop.f32.mrf.mxu1 }
 0x70d   : > { %11656 = vmatmul.msk.bf16.gmra.mxu0 %vm1330_vm3, %v7281_v1  ;;  %v7713_v19 = vadd.f32 %v7652_v51, %v7448_v55 }
 0x70f   : > { %v14434_v25 = vadd.f32 %v14299_v39, %v7713_v19  ;;  %v7137_v32 = vpop.f32.mrf.mxu3 }
 0x711   : > { %16120 = vst [vmem:[#allocation38_spill] sm:$0xff] %v14434_v25  ;;  %v15893_v12 = vmax.f32 %v14434_v25, 0.0 }
 0x712   : > { %v7392_v3 = vpop.f32.mrf.mxu0 }
 0x713   : > { %v7806_v1 = vpack.c.bf16 %v15893_v12, %v15894_v36  ;;  %v7450_v48 = vadd.f32 %v7392_v3, %v7185_v50  ;;  %v7186_v3 = vadd.f32 %v7130_v5, %v14178_v45 }
 0x714   : > { %v7655_v55 = vpop.f32.mrf.mxu1 }
 0x715   : > { %7918 = vmatmul.bf16.gmra.mxu2 %v7806_v1  ;;  %v7714_v59 = vadd.f32 %v7655_v55, %v7449_v9  ;;  %v7187_v55 = vadd.f32 %v7132_v38, %v6922_v13  ;;  %v6924_v13 = vadd.f32 %v14207_v22, %v14214_v57 }
 0x717   : > { %11680 = vmatmul.msk.bf16.gmra.mxu1 %vm1330_vm3, %v7546_v28  ;;  %v14450_v51 = vadd.f32 %v14299_v39, %v7714_v59  ;;  %v7140_v1 = vpop.f32.mrf.mxu3 }
 0x719   : > { %16121 = vst [vmem:[#allocation39_spill] sm:$0xff] %v14450_v51  ;;  %v15892_v34 = vmax.f32 %v14450_v51, 0.0 }
 0x71a   : > { %v7395_v44 = vpop.f32.mrf.mxu0 }
 0x71b   : > { %v7451_v20 = vadd.f32 %v7395_v44, %v7186_v3  ;;  %v7188_v3 = vadd.f32 %v7135_v8, %v14205_v18 }
 0x71c   : > { %v7657_v15 = vpop.f32.mrf.mxu1 }
 0x71d   : > { %v7715_v19 = vadd.f32 %v7657_v15, %v7450_v48  ;;  %v12019_v48 = vld [vmem:[%s14185_s3 + $0x10] sm:$0xff]  ;;  %v12022_v15 = vld [vmem:[%s14185_s3 + $0x28] sm:$0xff] }
 0x71e   : > { %8746 = vmatpush.bf16.msrb.mxu1 %v12019_v48  ;;  %9010 = vmatpush.bf16.msrb.mxu2 %v12022_v15 }
 0x71f   : > { %v14453_v16 = vadd.f32 %v14299_v39, %v7715_v19  ;;  %v12024_v19 = vld [vmem:[%s14185_s3 + $0x38] sm:$0xff] }
 0x720   : > { %9243 = vmatpush.bf16.msrb.mxu3 %v12024_v19 }
 0x721   : > { %16122 = vst [vmem:[#allocation37_spill] sm:$0xff] %v14453_v16  ;;  %v15891_v40 = vmax.f32 %v14453_v16, 0.0 }
 0x722   : > { %v7397_v27 = vpop.f32.mrf.mxu0 }
 0x723   : > { %v7807_v46 = vpack.c.bf16 %v15891_v40, %v15892_v34  ;;  %v7452_v9 = vadd.f32 %v7397_v27, %v7187_v55  ;;  %v7142_v27 = vpop.f32.mrf.mxu3 }
 0x724   : > { %v7660_v24 = vpop.f32.mrf.mxu1 }
 0x725   : > { %7923 = vmatmul.bf16.gmra.mxu2 %v7807_v46  ;;  %v7716_v42 = vadd.f32 %v7660_v24, %v7451_v20 }
 0x727   : > { %v14466_v59 = vadd.f32 %v14299_v39, %v7716_v42  ;;  %v7189_v42 = vadd.f32 %v7137_v32, %v6924_v13 }
 0x729   : > { %16123 = vst [vmem:[#allocation40_spill] sm:$0xff] %v14466_v59  ;;  %v15890_v53 = vmax.f32 %v14466_v59, 0.0 }
 0x72a   : > { %v7400_v28 = vpop.f32.mrf.mxu0 }
 0x72b   : > { %v7453_v20 = vadd.f32 %v7400_v28, %v7188_v3  ;;  %v7145_v48 = vpop.f32.mrf.mxu3 }
 0x72c   : > { %v7662_v50 = vpop.f32.mrf.mxu1 }
 0x72d   : > { %v7717_v45 = vadd.f32 %v7662_v50, %v7452_v9  ;;  %v12026_v50 = vld [vmem:[%s14185_s3 + $0x48] sm:$0xff] }
 0x72e   : > { %9476 = vmatpush.bf16.msrb.mxu0 %v12026_v50  ;;  %v6926_v50 = vadd.f32 %v14226_v10, %v14230_v62 }
 0x72f   : > { %v14469_v5 = vadd.f32 %v14299_v39, %v7717_v45 }
 0x731   : > { %16124 = vst [vmem:[#allocation44_spill] sm:$0xff] %v14469_v5  ;;  %v15887_v38 = vmax.f32 %v14469_v5, 0.0 }
 0x732   : > { %v7402_v44 = vpop.f32.mrf.mxu0 }
 0x733   : > { %v7808_v46 = vpack.c.bf16 %v15887_v38, %v15890_v53  ;;  %v7454_v45 = vadd.f32 %v7402_v44, %v7189_v42 }
 0x734   : > { %v7665_v24 = vpop.f32.mrf.mxu1 }
 0x735   : > { %7928 = vmatmul.bf16.gmra.mxu2 %v7808_v46  ;;  %v7718_v54 = vadd.f32 %v7665_v24, %v7453_v20  ;;  %v7190_v46 = vadd.f32 %v7140_v1, %v14224_v6  ;;  %v7147_v20 = vpop.f32.mrf.mxu3 }
 0x737   : > { %v14488_v19 = vadd.f32 %v14299_v39, %v7718_v54 }
 0x738   : > { %v7889_v55 = vpop.f32.mrf.mxu2 }
 0x739   : > { %7969 = vst.msk [vmem:[#allocation2 + $0x4] sm:$0xff] %vm1330_vm3, %v7889_v55  ;;  %v15889_v57 = vmax.f32 %v14488_v19, 0.0 }
 0x73a   : > { %v7405_v9 = vpop.f32.mrf.mxu0  ;;  %16125 = vst [vmem:[#allocation45_spill] sm:$0xff] %v14488_v19 }
 0x73b   : > { %v7455_v42 = vadd.f32 %v7405_v9, %v7190_v46 }
 0x73c   : > { %v7667_v15 = vpop.f32.mrf.mxu1 }
 0x73d   : > { %v7719_v18 = vadd.f32 %v7667_v15, %v7454_v45 }
 0x73f   : > { %v14491_v8 = vadd.f32 %v14299_v39, %v7719_v18 }
 0x740   : > { %v7891_v22 = vpop.f32.mrf.mxu2  ;;  %v8001_v3 = vld [vmem:[#allocation2 + $0x3] sm:$0xff] }
 0x741   : > { %16126 = vst [vmem:[#allocation46_spill] sm:$0xff] %v14491_v8  ;;  %v15888_v32 = vmax.f32 %v14491_v8, 0.0  ;;  %v8213_v13 = vld [vmem:[#allocation2] sm:$0xff]  ;;  %v14507_v18 = vsel %vm1363_vm7, %v8001_v3, 0.0 }
 0x742   : > { %7970 = vst.msk [vmem:[#allocation2 + $0xc] sm:$0xff] %vm1330_vm3, %v7891_v22  ;;  %v7407_v28 = vpop.f32.mrf.mxu0  ;;  %v8595_v54 = vld [vmem:[#allocation2 + $0x1] sm:$0xff]  ;;  %v8245_v1 = vsel %vm1799_vm4, %v8213_v13, 0.0  ;;  %v8033_v13 = vsel %vm1363_vm7, %v8001_v3, %v7889_v55  ;;  %vm16136_vm4 = vcmp.lt.s32.totalorder %v16034_v21, 63 }
 0x743   : > { %v7809_v44 = vpack.c.bf16 %v15888_v32, %v15889_v57  ;;  %v7191_v57 = vadd.f32 %v7142_v27, %v6926_v50  ;;  %v8627_v46 = vsel %vm2277_vm5, %v8595_v54, 0.0 }
 0x744   : > { %v7670_v24 = vpop.f32.mrf.mxu1 }
 0x745   : > { %7933 = vmatmul.bf16.gmra.mxu2 %v7809_v44  ;;  %v7720_v38 = vadd.f32 %v7670_v24, %v7455_v42  ;;  %v7456_v42 = vadd.f32 %v7407_v28, %v7191_v57  ;;  %v7150_v57 = vpop.f32.mrf.mxu3 }
 0x747   : > { %v14523_v27 = vadd.f32 %v14299_v39, %v7720_v38 }
 0x748   : > { %v14509_v32 = vpop.f32.mrf.mxu2 }
 0x749   : > { %v14503_v45 = vld [vmem:[#allocation2 + $0xb] sm:$0xff]  ;;  %7971 = vst.msk [vmem:[#allocation2 + $0x14] sm:$0xff] %vm1330_vm3, %v14509_v32  ;;  %v15897_v28 = vmax.f32 %v14523_v27, 0.0 }
 0x74a   : > { %v8214_v6 = vld [vmem:[#allocation2 + $0x8] sm:$0xff]  ;;  %v7410_v10 = vpop.f32.mrf.mxu0  ;;  %16128 = vst [vmem:[#allocation18_spill] sm:$0xff] %v14523_v27 }
 0x74b   : > { %v8596_v44 = vld [vmem:[#allocation2 + $0x9] sm:$0xff]  ;;  %v8277_v62 = vpack.c.bf16 %v8214_v6, %v8245_v1  ;;  %v8129_v6 = vmax.f32 %v8033_v13, %v7889_v55  ;;  %v8130_v1 = vmax.f32 %v14503_v45, %v7891_v22 }
 0x74c   : > { %v8659_v24 = vpack.c.bf16 %v8596_v44, %v8627_v46  ;;  %v7672_v50 = vpop.f32.mrf.mxu1  ;;  %v14526_v40 = vld [vmem:[#allocation2 + $0x5] sm:$0xff] }
 0x74d   : > { %11721 = vmatmul.msk.bf16.vlgmr.msra.gmra.mxu3 %vm1330_vm3, %v8277_v62  ;;  %v7721_v53 = vadd.f32 %v7672_v50, %v7456_v42  ;;  %v8161_v46 = vmax.f32 %v8129_v6, %v14526_v40  ;;  %v7192_v42 = vadd.f32 %v7145_v48, %v14238_v43  ;;  %v6928_v6 = vadd.f32 %v14240_v0, %v14244_v4  ;;  %v7152_v4 = vpop.f32.mrf.mxu3 }
 0x74e   : > { %11769 = vmatmul.msk.bf16.vlgmr.msrb.gmra.mxu1 %vm1330_vm3, %v8659_v24 }
 0x74f   : > { %v14530_v54 = vadd.f32 %v14299_v39, %v7721_v53  ;;  %v7457_v50 = vadd.f32 %v7410_v10, %v7192_v42 }
 0x750   : > { %v7896_v44 = vpop.f32.mrf.mxu2  ;;  %v14533_v3 = vld [vmem:[#allocation2 + $0xd] sm:$0xff] }
 0x751   : > { %16129 = vst [vmem:[#allocation47_spill] sm:$0xff] %v14530_v54  ;;  %v15896_v38 = vmax.f32 %v14530_v54, 0.0  ;;  %v8162_v55 = vmax.f32 %v8130_v1, %v14533_v3  ;;  %v14549_v1 = vld [vmem:[#allocation2 + $0x13] sm:$0xff] }
 0x752   : > { %7972 = vst.msk [vmem:[#allocation2 + $0x1c] sm:$0xff] %vm1330_vm3, %v7896_v44  ;;  %v7412_v62 = vpop.f32.mrf.mxu0  ;;  %v8215_v34 = vld [vmem:[#allocation2 + $0x10] sm:$0xff] }
 0x753   : > { %v7810_v53 = vpack.c.bf16 %v15896_v38, %v15897_v28  ;;  %v8193_v24 = vpack.c.bf16 %v8162_v55, %v8161_v46  ;;  %v7193_v55 = vadd.f32 %v7147_v20, %v6928_v6  ;;  %v8597_v0 = vld [vmem:[#allocation2 + $0x11] sm:$0xff]  ;;  %v8131_v6 = vmax.f32 %v14549_v1, %v14509_v32 }
 0x754   : > { %v7675_v13 = vpop.f32.mrf.mxu1 }
 0x755   : > { %7938 = vmatmul.bf16.gmra.mxu2 %v7810_v53  ;;  %11745 = vmatmul.msk.bf16.vlgmr.msra.gmra.mxu0 %vm1330_vm3, %v8193_v24  ;;  %v7722_v36 = vadd.f32 %v7675_v13, %v7457_v50  ;;  %v7458_v24 = vadd.f32 %v7412_v62, %v7193_v55 }
 0x757   : > { %v14561_v42 = vadd.f32 %v14299_v39, %v7722_v36 }
 0x758   : > { %v14553_v35 = vpop.f32.mrf.mxu2 }
 0x759   : > { %v14551_v12 = vld [vmem:[#allocation2 + $0x1b] sm:$0xff]  ;;  %7973 = vst.msk [vmem:[#allocation2 + $0x24] sm:$0xff] %vm1330_vm3, %v14553_v35  ;;  %v15900_v62 = vmax.f32 %v14561_v42, 0.0 }
 0x75a   : > { %v8216_v38 = vld [vmem:[#allocation2 + $0x18] sm:$0xff]  ;;  %v7415_v48 = vpop.f32.mrf.mxu0  ;;  %16130 = vst [vmem:[#allocation48_spill] sm:$0xff] %v14561_v42 }
 0x75b   : > { %v8598_v46 = vld [vmem:[#allocation2 + $0x19] sm:$0xff]  ;;  %v8278_v10 = vpack.c.bf16 %v8216_v38, %v8215_v34  ;;  %v8132_v34 = vmax.f32 %v14551_v12, %v7896_v44 }
 0x75c   : > { %v8660_v53 = vpack.c.bf16 %v8598_v46, %v8597_v0  ;;  %v7677_v20 = vpop.f32.mrf.mxu1  ;;  %v14564_v50 = vld [vmem:[#allocation2 + $0x15] sm:$0xff] }
 0x75d   : > { %11722 = vmatmul.msk.bf16.gmra.mxu3 %vm1330_vm3, %v8278_v10  ;;  %v7723_v13 = vadd.f32 %v7677_v20, %v7458_v24  ;;  %v8163_v0 = vmax.f32 %v8131_v6, %v14564_v50  ;;  %v7194_v20 = vadd.f32 %v7150_v57, %v14249_v7  ;;  %v6930_v6 = vadd.f32 %v14251_v60, %v14255_v56 }
 0x75e   : > { %11770 = vmatmul.msk.bf16.gmra.mxu1 %vm1330_vm3, %v8660_v53 }
 0x75f   : > { %v14570_v38 = vadd.f32 %v14299_v39, %v7723_v13  ;;  %v7155_v13 = vpop.f32.mrf.mxu3  ;;  %v7459_v23 = vadd.f32 %v7415_v48, %v7194_v20  ;;  %v7195_v7 = vadd.f32 %v7152_v4, %v6930_v6 }
 0x760   : > { %v7901_v46 = vpop.f32.mrf.mxu2  ;;  %v14573_v55 = vld [vmem:[#allocation2 + $0x1d] sm:$0xff] }
 0x761   : > { %16131 = vst [vmem:[#allocation49_spill] sm:$0xff] %v14570_v38  ;;  %v15899_v36 = vmax.f32 %v14570_v38, 0.0  ;;  %v8164_v53 = vmax.f32 %v8132_v34, %v14573_v55  ;;  %v14589_v34 = vld [vmem:[#allocation2 + $0x23] sm:$0xff] }
 0x762   : > { %7974 = vst.msk [vmem:[#allocation2 + $0x2c] sm:$0xff] %vm1330_vm3, %v7901_v46  ;;  %v7417_v10 = vpop.f32.mrf.mxu0  ;;  %v8217_v32 = vld [vmem:[#allocation2 + $0x20] sm:$0xff] }
 0x763   : > { %v7811_v44 = vpack.c.bf16 %v15899_v36, %v15900_v62  ;;  %v8194_v24 = vpack.c.bf16 %v8164_v53, %v8163_v0  ;;  %v8599_v60 = vld [vmem:[#allocation2 + $0x21] sm:$0xff]  ;;  %v8133_v36 = vmax.f32 %v14589_v34, %v14553_v35 }
 0x764   : > { %v7680_v28 = vpop.f32.mrf.mxu1 }
 0x765   : > { %7943 = vmatmul.bf16.gmra.mxu2 %v7811_v44  ;;  %11746 = vmatmul.msk.bf16.gmra.mxu0 %vm1330_vm3, %v8194_v24  ;;  %v7724_v22 = vadd.f32 %v7680_v28, %v7459_v23  ;;  %v7460_v24 = vadd.f32 %v7417_v10, %v7195_v7 }
 0x767   : > { %v14601_v23 = vadd.f32 %v14299_v39, %v7724_v22  ;;  %v7157_v20 = vpop.f32.mrf.mxu3 }
 0x768   : > { %v14593_v9 = vpop.f32.mrf.mxu2 }
 0x769   : > { %v14591_v43 = vld [vmem:[#allocation2 + $0x2b] sm:$0xff]  ;;  %7975 = vst.msk [vmem:[#allocation2 + $0x34] sm:$0xff] %vm1330_vm3, %v14593_v9  ;;  %v15905_v10 = vmax.f32 %v14601_v23, 0.0 }
 0x76a   : > { %v8218_v0 = vld [vmem:[#allocation2 + $0x28] sm:$0xff]  ;;  %v7420_v48 = vpop.f32.mrf.mxu0  ;;  %16132 = vst [vmem:[#allocation50_spill] sm:$0xff] %v14601_v23 }
 0x76b   : > { %v8600_v53 = vld [vmem:[#allocation2 + $0x29] sm:$0xff]  ;;  %v8279_v44 = vpack.c.bf16 %v8218_v0, %v8217_v32  ;;  %v8134_v32 = vmax.f32 %v14591_v43, %v7901_v46 }
 0x76c   : > { %v8661_v56 = vpack.c.bf16 %v8600_v53, %v8599_v60  ;;  %v7682_v28 = vpop.f32.mrf.mxu1  ;;  %v14604_v6 = vld [vmem:[#allocation2 + $0x25] sm:$0xff] }
 0x76d   : > { %11723 = vmatmul.msk.bf16.gmra.mxu3 %vm1330_vm3, %v8279_v44  ;;  %v7725_v4 = vadd.f32 %v7682_v28, %v7460_v24  ;;  %v8165_v60 = vmax.f32 %v8133_v36, %v14604_v6  ;;  %v6932_v36 = vadd.f32 %v14265_v11, %v14269_v61 }
 0x76e   : > { %11771 = vmatmul.msk.bf16.gmra.mxu1 %vm1330_vm3, %v8661_v56 }
 0x76f   : > { %v14610_v0 = vadd.f32 %v14299_v39, %v7725_v4  ;;  %v7196_v4 = vadd.f32 %v7155_v13, %v14263_v30  ;;  %v7160_v38 = vpop.f32.mrf.mxu3 }
 0x770   : > { %v7906_v53 = vpop.f32.mrf.mxu2  ;;  %v14613_v22 = vld [vmem:[#allocation2 + $0x2d] sm:$0xff] }
 0x771   : > { %16133 = vst [vmem:[#allocation51_spill] sm:$0xff] %v14610_v0  ;;  %v15904_v7 = vmax.f32 %v14610_v0, 0.0  ;;  %v8166_v56 = vmax.f32 %v8134_v32, %v14613_v22  ;;  %v7461_v62 = vadd.f32 %v7420_v48, %v7196_v4  ;;  %v8219_v32 = vld [vmem:[#allocation2 + $0x30] sm:$0xff] }
 0x772   : > { %7976 = vst.msk [vmem:[#allocation2 + $0x3c] sm:$0xff] %vm1330_vm3, %v7906_v53  ;;  %v7422_v44 = vpop.f32.mrf.mxu0  ;;  %v8601_v57 = vld [vmem:[#allocation2 + $0x31] sm:$0xff] }
 0x773   : > { %v7812_v46 = vpack.c.bf16 %v15904_v7, %v15905_v10  ;;  %v8195_v24 = vpack.c.bf16 %v8166_v56, %v8165_v60  ;;  %v7197_v60 = vadd.f32 %v7157_v20, %v6932_v36  ;;  %v14633_v56 = vld [vmem:[#allocation2 + $0x33] sm:$0xff] }
 0x774   : > { %v7685_v28 = vpop.f32.mrf.mxu1 }
 0x775   : > { %7948 = vmatmul.bf16.gmra.mxu2 %v7812_v46  ;;  %11747 = vmatmul.msk.bf16.gmra.mxu0 %vm1330_vm3, %v8195_v24  ;;  %v7726_v30 = vadd.f32 %v7685_v28, %v7461_v62  ;;  %v7462_v48 = vadd.f32 %v7422_v44, %v7197_v60 }
 0x777   : > { %v14642_v20 = vadd.f32 %v14299_v39, %v7726_v30  ;;  %v7162_v30 = vpop.f32.mrf.mxu3 }
 0x778   : > { %v14631_v23 = vpop.f32.mrf.mxu2 }
 0x779   : > { %v14629_v35 = vld [vmem:[#allocation2 + $0x3b] sm:$0xff]  ;;  %7977 = vst.msk [vmem:[#allocation2 + $0x44] sm:$0xff] %vm1330_vm3, %v14631_v23  ;;  %v15908_v36 = vmax.f32 %v14642_v20, 0.0 }
 0x77a   : > { %v8220_v0 = vld [vmem:[#allocation2 + $0x38] sm:$0xff]  ;;  %v7425_v11 = vpop.f32.mrf.mxu0  ;;  %16134 = vst [vmem:[#allocation52_spill] sm:$0xff] %v14642_v20 }
 0x77b   : > { %v8602_v7 = vld [vmem:[#allocation2 + $0x39] sm:$0xff]  ;;  %v8280_v13 = vpack.c.bf16 %v8220_v0, %v8219_v32  ;;  %v8136_v0 = vmax.f32 %v14629_v35, %v7906_v53 }
 0x77c   : > { %v8662_v46 = vpack.c.bf16 %v8602_v7, %v8601_v57  ;;  %v7687_v24 = vpop.f32.mrf.mxu1  ;;  %v14647_v28 = vld [vmem:[#allocation2 + $0x35] sm:$0xff]  ;;  %v8135_v57 = vmax.f32 %v14633_v56, %v14593_v9 }
 0x77d   : > { %11724 = vmatmul.msk.bf16.gmra.mxu3 %vm1330_vm3, %v8280_v13  ;;  %v7727_v4 = vadd.f32 %v7687_v24, %v7462_v48  ;;  %v7198_v24 = vadd.f32 %v7160_v38, %v14275_v37  ;;  %v8867_v21 = vld [vmem:[#allocation2 + $0x3a] sm:$0xff] }
 0x77e   : > { %11772 = vmatmul.msk.bf16.gmra.mxu1 %vm1330_vm3, %v8662_v46  ;;  %v8167_v13 = vmax.f32 %v8135_v57, %v14647_v28 }
 0x77f   : > { %v14645_v62 = vadd.f32 %v14299_v39, %v7727_v4 }
 0x780   : > { %v7911_v7 = vpop.f32.mrf.mxu2  ;;  %v8072_v44 = vld [vmem:[#allocation2 + $0x3d] sm:$0xff] }
 0x781   : > { %16135 = vst [vmem:[#allocation53_spill] sm:$0xff] %v14645_v62  ;;  %v15907_v32 = vmax.f32 %v14645_v62, 0.0  ;;  %v8104_v60 = vsel %vm1530_vm8, %v8072_v44, %v7906_v53  ;;  %v14664_v48 = vsel %vm16136_vm4, %v8072_v44, 0.0  ;;  %v8009_v42 = vld [vmem:[#allocation2 + $0x43] sm:$0xff] }
 0x782   : > { %7978 = vst.msk [vmem:[#allocation2 + $0x4c] sm:$0xff] %vm1330_vm3, %v7911_v7  ;;  %v8168_v46 = vmax.f32 %v8136_v0, %v8104_v60  ;;  %v7427_v4 = vpop.f32.mrf.mxu0  ;;  %v8221_v57 = vld [vmem:[#allocation2 + $0x40] sm:$0xff]  ;;  %v7463_v0 = vadd.f32 %v7425_v11, %v7198_v24  ;;  %v14676_v37 = vsel %vm1371_vm12, %v8009_v42, 0.0 }
 0x783   : > { %v7813_v9 = vpack.c.bf16 %v15907_v32, %v15908_v36  ;;  %v8603_v60 = vld [vmem:[#allocation2 + $0x41] sm:$0xff]  ;;  %v6934_v32 = vadd.f32 %v14278_v41, %v14281_v33  ;;  %v16137_v36 = vld [vmem:[#allocation20_spill] sm:$0xff] }
 0x784   : > { %v7690_v10 = vpop.f32.mrf.mxu1  ;;  %v8196_v61 = vpack.c.bf16 %v8168_v46, %v8167_v13  ;;  %v8635_v33 = vsel %vm2285_vm10, %v8603_v60, 0.0  ;;  %vm16166_vm8 = vcmp.ge.s32.totalorder %v16137_v36, 2  ;;  %vm16171_vm10 = vcmp.lt.s32.totalorder %v12953_v58, 63 }
 0x785   : > { %7953 = vmatmul.bf16.gmra.mxu2 %v7813_v9  ;;  %v7728_v38 = vadd.f32 %v7690_v10, %v7463_v0  ;;  %v8253_v9 = vsel %vm1807_vm9, %v8221_v57, 0.0  ;;  %v7199_v24 = vadd.f32 %v7162_v30, %v6934_v32  ;;  %v7165_v0 = vpop.f32.mrf.mxu3  ;;  %v8041_v57 = vsel %vm1371_vm12, %v8009_v42, %v14631_v23 }
 0x786   : > { %11748 = vmatmul.msk.bf16.gmra.mxu0 %vm1330_vm3, %v8196_v61  ;;  %v8137_v60 = vmax.f32 %v8041_v57, %v14631_v23  ;;  %vm16170_vm9 = vcmp.le.s32.totalorder %v12953_v58, 62 }
 0x787   : > { %v7464_v10 = vadd.f32 %v7427_v4, %v7199_v24  ;;  %v14693_v32 = vadd.f32 %v14299_v39, %v7728_v38 }
 0x788   : > { %v14678_v13 = vpop.f32.mrf.mxu2 }
 0x789   : > { %v14672_v44 = vld [vmem:[#allocation2 + $0x4b] sm:$0xff]  ;;  %7979 = vst.msk [vmem:[#allocation2 + $0x54] sm:$0xff] %vm1330_vm3, %v14678_v13  ;;  %v15914_v24 = vmax.f32 %v14693_v32, 0.0 }
 0x78a   : > { %v8222_v46 = vld [vmem:[#allocation2 + $0x48] sm:$0xff]  ;;  %16138 = vst [vmem:[#allocation20_spill] sm:$0xff] %v14693_v32  ;;  %v8138_v4 = vmax.f32 %v14672_v44, %v7911_v7 }
 0x78b   : > { %v8604_v11 = vld [vmem:[#allocation2 + $0x49] sm:$0xff]  ;;  %v8281_v41 = vpack.c.bf16 %v8222_v46, %v8253_v9  ;;  %v7430_v46 = vpop.f32.mrf.mxu0 }
 0x78c   : > { %v8663_v53 = vpack.c.bf16 %v8604_v11, %v8635_v33  ;;  %v7692_v30 = vpop.f32.mrf.mxu1  ;;  %v14696_v9 = vld [vmem:[#allocation2 + $0x45] sm:$0xff] }
 0x78d   : > { %11725 = vmatmul.msk.bf16.gmra.mxu3 %vm1330_vm3, %v8281_v41  ;;  %v7729_v61 = vadd.f32 %v7692_v30, %v7464_v10  ;;  %v7200_v10 = vadd.f32 %v7165_v0, %v14287_v29  ;;  %v7167_v30 = vpop.f32.mrf.mxu3 }
 0x78e   : > { %11773 = vmatmul.msk.bf16.gmra.mxu1 %vm1330_vm3, %v8663_v53  ;;  %v8169_v53 = vmax.f32 %v8137_v60, %v14696_v9  ;;  %v16140_v60 = vld [vmem:[#allocation30_spill] sm:$0xff] }
 0x78f   : > { %v14701_v11 = vadd.f32 %v14299_v39, %v7729_v61  ;;  %v7465_v62 = vadd.f32 %v7430_v46, %v7200_v10  ;;  %v12021_v10 = vld [vmem:[%s14185_s3 + $0x20] sm:$0xff] }
 0x790   : > { %v7916_v42 = vpop.f32.mrf.mxu2  ;;  %v14704_v41 = vld [vmem:[#allocation2 + $0x4d] sm:$0xff]  ;;  %9011 = vmatpush.bf16.msrb.mxu2 %v12021_v10 }
 0x791   : > { %16139 = vst [vmem:[#allocation54_spill] sm:$0xff] %v14701_v11  ;;  %v15913_v38 = vmax.f32 %v14701_v11, 0.0  ;;  %v8170_v33 = vmax.f32 %v8138_v4, %v14704_v41  ;;  %v6936_v4 = vadd.f32 %v14471_v26, %v16140_v60  ;;  %v14720_v20 = vld [vmem:[#allocation2 + $0x53] sm:$0xff] }
 0x792   : > { %7980 = vst.msk [vmem:[#allocation2 + $0x5c] sm:$0xff] %vm1330_vm3, %v7916_v42  ;;  %v8223_v23 = vld [vmem:[#allocation2 + $0x50] sm:$0xff] }
 0x793   : > { %v7814_v7 = vpack.c.bf16 %v15913_v38, %v15914_v24  ;;  %v8197_v61 = vpack.c.bf16 %v8170_v33, %v8169_v53  ;;  %v7432_v11 = vpop.f32.mrf.mxu0  ;;  %v7201_v0 = vadd.f32 %v7167_v30, %v6936_v4  ;;  %v8139_v4 = vmax.f32 %v14720_v20, %v14678_v13 }
 0x794   : > { %v7695_v57 = vpop.f32.mrf.mxu1 }
 0x795   : > { %7958 = vmatmul.bf16.gmra.mxu2 %v7814_v7  ;;  %v7730_v38 = vadd.f32 %v7695_v57, %v7465_v62  ;;  %v7466_v60 = vadd.f32 %v7432_v11, %v7201_v0 }
 0x796   : > { %11749 = vmatmul.msk.bf16.gmra.mxu0 %vm1330_vm3, %v8197_v61  ;;  %v8605_v61 = vld [vmem:[#allocation2 + $0x51] sm:$0xff] }
 0x797   : > { %v14730_v24 = vadd.f32 %v14299_v39, %v7730_v38 }
 0x798   : > { %v7919_v53 = vpop.f32.mrf.mxu2 }
 0x799   : > { %v14722_v32 = vld [vmem:[#allocation2 + $0x5b] sm:$0xff]  ;;  %7981 = vst.msk [vmem:[#allocation2 + $0x64] sm:$0xff] %vm1330_vm3, %v7919_v53  ;;  %v15916_v11 = vmax.f32 %v14730_v24, 0.0 }
 0x79a   : > { %v8224_v33 = vld [vmem:[#allocation2 + $0x58] sm:$0xff]  ;;  %16141 = vst [vmem:[#allocation30_spill] sm:$0xff] %v14730_v24 }
 0x79b   : > { %v8606_v29 = vld [vmem:[#allocation2 + $0x59] sm:$0xff]  ;;  %v8282_v7 = vpack.c.bf16 %v8224_v33, %v8223_v23  ;;  %v8140_v23 = vmax.f32 %v14722_v32, %v7916_v42 }
 0x79c   : > { %v8664_v26 = vpack.c.bf16 %v8606_v29, %v8605_v61  ;;  %v7697_v62 = vpop.f32.mrf.mxu1  ;;  %v14733_v30 = vld [vmem:[#allocation2 + $0x55] sm:$0xff] }
 0x79d   : > { %11726 = vmatmul.msk.bf16.gmra.mxu3 %vm1330_vm3, %v8282_v7  ;;  %v7731_v57 = vadd.f32 %v7697_v62, %v7466_v60  ;;  %v8171_v7 = vmax.f32 %v8139_v4, %v14733_v30 }
 0x79e   : > { %11774 = vmatmul.msk.bf16.gmra.mxu1 %vm1330_vm3, %v8664_v26 }
 0x79f   : > { %v14739_v33 = vadd.f32 %v14299_v39, %v7731_v57 }
 0x7a0   : > { %v7921_v29 = vpop.f32.mrf.mxu2  ;;  %v14742_v0 = vld [vmem:[#allocation2 + $0x5d] sm:$0xff] }
 0x7a1   : > { %16142 = vst [vmem:[#allocation55_spill] sm:$0xff] %v14739_v33  ;;  %v15915_v38 = vmax.f32 %v14739_v33, 0.0  ;;  %v8172_v61 = vmax.f32 %v8140_v23, %v14742_v0  ;;  %v14755_v10 = vld [vmem:[#allocation2 + $0x63] sm:$0xff] }
 0x7a2   : > { %7982 = vst.msk [vmem:[#allocation2 + $0x6c] sm:$0xff] %vm1330_vm3, %v7921_v29  ;;  %v8225_v26 = vld [vmem:[#allocation2 + $0x60] sm:$0xff]  ;;  %v8861_v33 = vld [vmem:[#allocation2 + $0xa] sm:$0xff] }
 0x7a3   : > { %v7815_v39 = vpack.c.bf16 %v15915_v38, %v15916_v11  ;;  %v8198_v42 = vpack.c.bf16 %v8172_v61, %v8171_v7  ;;  %v8607_v60 = vld [vmem:[#allocation2 + $0x61] sm:$0xff] }
 0x7a4   : > { %v8860_v11 = vld [vmem:[#allocation2 + $0x2] sm:$0xff] }
 0x7a5   : > { %7963 = vmatmul.bf16.gmra.mxu2 %v7815_v39  ;;  %v8141_v39 = vmax.f32 %v14755_v10, %v7919_v53  ;;  %v8892_v53 = vsel %vm2638_vm6, %v8860_v11, 0.0 }
 0x7a6   : > { %11750 = vmatmul.msk.bf16.gmra.mxu0 %vm1330_vm3, %v8198_v42 }
 0x7a8   : > { %v7924_v57 = vpop.f32.mrf.mxu2 }
 0x7a9   : > { %v14757_v62 = vld [vmem:[#allocation2 + $0x6b] sm:$0xff]  ;;  %7983 = vst.msk [vmem:[#allocation2 + $0x74] sm:$0xff] %vm1330_vm3, %v7924_v57 }
 0x7aa   : > { %v8226_v4 = vld [vmem:[#allocation2 + $0x68] sm:$0xff]  ;;  %v8142_v42 = vmax.f32 %v14757_v62, %v7921_v29  ;;  %v8924_v29 = vpack.c.bf16 %v8861_v33, %v8892_v53  ;;  %v12025_v33 = vld [vmem:[%s14185_s3 + $0x40] sm:$0xff] }
 0x7ab   : > { %v8608_v23 = vld [vmem:[#allocation2 + $0x69] sm:$0xff]  ;;  %v8283_v38 = vpack.c.bf16 %v8226_v4, %v8225_v26  ;;  %9477 = vmatpush.bf16.msrb.mxu0 %v12025_v33 }
 0x7ac   : > { %v8665_v7 = vpack.c.bf16 %v8608_v23, %v8607_v60  ;;  %v14764_v61 = vld [vmem:[#allocation2 + $0x65] sm:$0xff] }
 0x7ad   : > { %11727 = vmatmul.msk.bf16.gmra.mxu3 %vm1330_vm3, %v8283_v38  ;;  %16143 = vst [vmem:[#allocation56_spill] sm:$0xff] %v14764_v61  ;;  %v8173_v26 = vmax.f32 %v8141_v39, %v14764_v61  ;;  %v12023_v38 = vld [vmem:[%s14185_s3 + $0x30] sm:$0xff] }
 0x7ae   : > { %11775 = vmatmul.msk.bf16.gmra.mxu1 %vm1330_vm3, %v8665_v7  ;;  %9244 = vmatpush.bf16.msrb.mxu3 %v12023_v38 }
 0x7b0   : > { %v7926_v46 = vpop.f32.mrf.mxu2  ;;  %v14768_v24 = vld [vmem:[#allocation2 + $0x6d] sm:$0xff] }
 0x7b1   : > { %16144 = vst [vmem:[#allocation57_spill] sm:$0xff] %v14768_v24  ;;  %v8174_v60 = vmax.f32 %v8142_v42, %v14768_v24  ;;  %v14780_v7 = vld [vmem:[#allocation2 + $0x73] sm:$0xff] }
 0x7b2   : > { %7984 = vst.msk [vmem:[#allocation2 + $0x7c] sm:$0xff] %vm1330_vm3, %v7926_v46  ;;  %v8227_v39 = vld [vmem:[#allocation2 + $0x70] sm:$0xff]  ;;  %v8143_v38 = vmax.f32 %v14780_v7, %v7924_v57 }
 0x7b3   : > { %v8199_v23 = vpack.c.bf16 %v8174_v60, %v8173_v26  ;;  %16145 = vst [vmem:[#allocation58_spill] sm:$0xff] %v14780_v7  ;;  %v8609_v13 = vld [vmem:[#allocation2 + $0x71] sm:$0xff] }
 0x7b5   : > { %11793 = vmatmul.msk.bf16.vlgmr.msrb.gmra.mxu2 %vm1330_vm3, %v8924_v29 }
 0x7b6   : > { %11751 = vmatmul.msk.bf16.gmra.mxu0 %vm1330_vm3, %v8199_v23  ;;  %v8863_v23 = vld [vmem:[#allocation2 + $0x1a] sm:$0xff] }
 0x7b8   : > { %v7929_v54 = vpop.f32.mrf.mxu2 }
 0x7b9   : > { %v14782_v42 = vld [vmem:[#allocation2 + $0x7b] sm:$0xff]  ;;  %7985 = vst.msk [vmem:[#allocation2 + $0x84] sm:$0xff] %vm1330_vm3, %v7929_v54 }
 0x7ba   : > { %16146 = vst [vmem:[#allocation59_spill] sm:$0xff] %v14782_v42  ;;  %v8228_v27 = vld [vmem:[#allocation2 + $0x78] sm:$0xff]  ;;  %v8144_v53 = vmax.f32 %v14782_v42, %v7926_v46 }
 0x7bb   : > { %v8610_v4 = vld [vmem:[#allocation2 + $0x79] sm:$0xff]  ;;  %v8284_v15 = vpack.c.bf16 %v8228_v27, %v8227_v39 }
 0x7bc   : > { %v8666_v11 = vpack.c.bf16 %v8610_v4, %v8609_v13  ;;  %v14790_v60 = vld [vmem:[#allocation2 + $0x75] sm:$0xff]  ;;  %v16148_v27 = vld [vmem:[#allocation21_spill] sm:$0xff] }
 0x7bd   : > { %11728 = vmatmul.msk.bf16.gmra.mxu3 %vm1330_vm3, %v8284_v15  ;;  %16147 = vst [vmem:[#allocation60_spill] sm:$0xff] %v14790_v60  ;;  %vm16149_vm5 = vcmp.le.s32.totalorder %v16148_v27, 62  ;;  %v8862_v4 = vld [vmem:[#allocation2 + $0x12] sm:$0xff]  ;;  %v8175_v39 = vmax.f32 %v8143_v38, %v14790_v60  ;;  %vm16150_vm6 = vcmp.lt.s32.totalorder %v16148_v27, 63  ;;  %v16153_v38 = vld [vmem:[#allocation22_spill] sm:$0xff] }
 0x7be   : > { %11776 = vmatmul.msk.bf16.gmra.mxu1 %vm1330_vm3, %v8666_v11  ;;  %v8925_v33 = vpack.c.bf16 %v8863_v23, %v8862_v4  ;;  %vm16155_vm7 = vcmp.ge.s32.totalorder %v16153_v38, 3 }
 0x7c0   : > { %v7931_v29 = vpop.f32.mrf.mxu2  ;;  %v8080_v8 = vld [vmem:[#allocation2 + $0x7d] sm:$0xff] }
 0x7c1   : > { %7986 = vst.msk [vmem:[#allocation2 + $0x8c] sm:$0xff] %vm1330_vm3, %v7931_v29  ;;  %v8112_v13 = vsel %vm16149_vm5, %v8080_v8, %v7926_v46  ;;  %v14800_v11 = vsel %vm16150_vm6, %v8080_v8, 0.0  ;;  %v8017_v19 = vld [vmem:[#allocation2 + $0x83] sm:$0xff] }
 0x7c2   : > { %v8176_v15 = vmax.f32 %v8144_v53, %v8112_v13  ;;  %16151 = vst [vmem:[#allocation61_spill] sm:$0xff] %v14800_v11  ;;  %v8229_v5 = vld [vmem:[#allocation2 + $0x80] sm:$0xff]  ;;  %v14810_v53 = vsel %vm1379_vm1, %v8017_v19, 0.0  ;;  %v8049_v16 = vsel %vm1379_vm1, %v8017_v19, %v7929_v54  ;;  %vm16189_vm1 = vcmp.lt.s32.totalorder %v16092_v2, 63 }
 0x7c3   : > { %v8611_v59 = vld [vmem:[#allocation2 + $0x81] sm:$0xff]  ;;  %16154 = vst [vmem:[#allocation22_spill] sm:$0xff] %v14810_v53  ;;  %v8261_v13 = vsel %vm1815_vm14, %v8229_v5, 0.0  ;;  %v8145_v25 = vmax.f32 %v8049_v16, %v7929_v54  ;;  %v8869_v53 = vld [vmem:[#allocation2 + $0x4a] sm:$0xff] }
 0x7c4   : > { %v8200_v57 = vpack.c.bf16 %v8176_v15, %v8175_v39  ;;  %v8643_v39 = vsel %vm16155_vm7, %v8611_v59, 0.0  ;;  %v8865_v15 = vld [vmem:[#allocation2 + $0x2a] sm:$0xff] }
 0x7c5   : > { %11794 = vmatmul.msk.bf16.gmra.mxu2 %vm1330_vm3, %v8925_v33 }
 0x7c6   : > { %11752 = vmatmul.msk.bf16.gmra.mxu0 %vm1330_vm3, %v8200_v57 }
 0x7c8   : > { %v14806_v46 = vld [vmem:[#allocation2 + $0x8b] sm:$0xff]  ;;  %v7934_v23 = vpop.f32.mrf.mxu2 }
 0x7c9   : > { %16152 = vst [vmem:[#allocation62_spill] sm:$0xff] %v14806_v46  ;;  %v8230_v8 = vld [vmem:[#allocation2 + $0x88] sm:$0xff]  ;;  %v8146_v59 = vmax.f32 %v14806_v46, %v7931_v29 }
 0x7ca   : > { %v8612_v4 = vld [vmem:[#allocation2 + $0x89] sm:$0xff]  ;;  %7987 = vst.msk [vmem:[#allocation2 + $0x94] sm:$0xff] %vm1330_vm3, %v7934_v23  ;;  %v8285_v57 = vpack.c.bf16 %v8230_v8, %v8261_v13 }
 0x7cb   : > { %v8748_v33 = vpop.f32.mrf.mxu1  ;;  %v8667_v26 = vpack.c.bf16 %v8612_v4, %v8643_v39  ;;  %v14823_v51 = vld [vmem:[#allocation2 + $0x85] sm:$0xff] }
 0x7cc   : > { %16156 = vst [vmem:[#allocation63_spill] sm:$0xff] %v14823_v51  ;;  %v8177_v13 = vmax.f32 %v8145_v25, %v14823_v51  ;;  %v8864_v39 = vld [vmem:[#allocation2 + $0x22] sm:$0xff] }
 0x7cd   : > { %11729 = vmatmul.msk.bf16.gmra.mxu3 %vm1330_vm3, %v8285_v57  ;;  %v8926_v16 = vpack.c.bf16 %v8865_v15, %v8864_v39 }
 0x7ce   : > { %11777 = vmatmul.msk.bf16.gmra.mxu1 %vm1330_vm3, %v8667_v26 }
 0x7d0   : > { %v8366_v5 = vpop.f32.mrf.mxu3  ;;  %v7936_v31 = vpop.f32.mrf.mxu2 }
 0x7d1   : > { %v14826_v63 = vld [vmem:[#allocation2 + $0x8d] sm:$0xff]  ;;  %7988 = vst.msk [vmem:[#allocation2 + $0x9c] sm:$0xff] %vm1330_vm3, %v7936_v31 }
 0x7d2   : > { %16157 = vst [vmem:[#allocation64_spill] sm:$0xff] %v14826_v63  ;;  %v8178_v4 = vmax.f32 %v8146_v59, %v14826_v63  ;;  %v8515_v26 = vpop.f32.mrf.mxu0  ;;  %v14837_v52 = vld [vmem:[#allocation2 + $0x93] sm:$0xff] }
 0x7d3   : > { %v8750_v8 = vpop.f32.mrf.mxu1  ;;  %v8516_v57 = vadd.f32 %v8515_v26, %v8366_v5  ;;  %16158 = vst [vmem:[#allocation65_spill] sm:$0xff] %v14837_v52  ;;  %v8231_v25 = vld [vmem:[#allocation2 + $0x90] sm:$0xff] }
 0x7d4   : > { %v8201_v54 = vpack.c.bf16 %v8178_v4, %v8177_v13  ;;  %v8613_v49 = vld [vmem:[#allocation2 + $0x91] sm:$0xff] }
 0x7d5   : > { %11795 = vmatmul.msk.bf16.gmra.mxu2 %vm1330_vm3, %v8926_v16  ;;  %v14834_v29 = vadd.f32 %v8748_v33, %v8516_v57 }
 0x7d6   : > { %11753 = vmatmul.msk.bf16.gmra.mxu0 %vm1330_vm3, %v8201_v54  ;;  %v8147_v54 = vmax.f32 %v14837_v52, %v7934_v23 }
 0x7d8   : > { %v8368_v47 = vpop.f32.mrf.mxu3  ;;  %v14839_v59 = vld [vmem:[#allocation2 + $0x9b] sm:$0xff]  ;;  %v7939_v14 = vpop.f32.mrf.mxu2 }
 0x7d9   : > { %16159 = vst [vmem:[#allocation66_spill] sm:$0xff] %v14839_v59  ;;  %v8232_v19 = vld [vmem:[#allocation2 + $0x98] sm:$0xff]  ;;  %v8148_v15 = vmax.f32 %v14839_v59, %v7936_v31 }
 0x7da   : > { %v8614_v17 = vld [vmem:[#allocation2 + $0x99] sm:$0xff]  ;;  %7989 = vst.msk [vmem:[#allocation2 + $0xa4] sm:$0xff] %vm1330_vm3, %v7939_v14  ;;  %v8286_v33 = vpack.c.bf16 %v8232_v19, %v8231_v25  ;;  %v8517_v4 = vpop.f32.mrf.mxu0 }
 0x7db   : > { %v8753_v5 = vpop.f32.mrf.mxu1  ;;  %v8668_v13 = vpack.c.bf16 %v8614_v17, %v8613_v49  ;;  %v8518_v26 = vadd.f32 %v8517_v4, %v8368_v47  ;;  %v14848_v16 = vld [vmem:[#allocation2 + $0x95] sm:$0xff] }
 0x7dc   : > { %16160 = vst [vmem:[#allocation67_spill] sm:$0xff] %v14848_v16  ;;  %v8179_v49 = vmax.f32 %v8147_v54, %v14848_v16  ;;  %v8866_v25 = vld [vmem:[#allocation2 + $0x32] sm:$0xff] }
 0x7dd   : > { %11730 = vmatmul.msk.bf16.gmra.mxu3 %vm1330_vm3, %v8286_v33  ;;  %v14846_v39 = vadd.f32 %v8750_v8, %v8518_v26  ;;  %v8927_v23 = vpack.c.bf16 %v8867_v21, %v8866_v25 }
 0x7de   : > { %11778 = vmatmul.msk.bf16.gmra.mxu1 %vm1330_vm3, %v8668_v13 }
 0x7e0   : > { %v8371_v57 = vpop.f32.mrf.mxu3  ;;  %v7941_v27 = vpop.f32.mrf.mxu2 }
 0x7e1   : > { %v14852_v51 = vld [vmem:[#allocation2 + $0x9d] sm:$0xff]  ;;  %7990 = vst.msk [vmem:[#allocation2 + $0xac] sm:$0xff] %vm1330_vm3, %v7941_v27 }
 0x7e2   : > { %16161 = vst [vmem:[#allocation68_spill] sm:$0xff] %v14852_v51  ;;  %v8180_v47 = vmax.f32 %v8148_v15, %v14852_v51  ;;  %v8520_v19 = vpop.f32.mrf.mxu0  ;;  %v14863_v26 = vld [vmem:[#allocation2 + $0xa3] sm:$0xff] }
 0x7e3   : > { %v8755_v17 = vpop.f32.mrf.mxu1  ;;  %v8521_v33 = vadd.f32 %v8520_v19, %v8371_v57  ;;  %16162 = vst [vmem:[#allocation69_spill] sm:$0xff] %v14863_v26  ;;  %v8233_v54 = vld [vmem:[#allocation2 + $0xa0] sm:$0xff] }
 0x7e4   : > { %v8202_v13 = vpack.c.bf16 %v8180_v47, %v8179_v49  ;;  %v8615_v52 = vld [vmem:[#allocation2 + $0xa1] sm:$0xff] }
 0x7e5   : > { %11796 = vmatmul.msk.bf16.gmra.mxu2 %vm1330_vm3, %v8927_v23  ;;  %v14860_v31 = vadd.f32 %v8753_v5, %v8521_v33  ;;  %v8868_v51 = vld [vmem:[#allocation2 + $0x42] sm:$0xff] }
 0x7e6   : > { %11754 = vmatmul.msk.bf16.gmra.mxu0 %vm1330_vm3, %v8202_v13  ;;  %v8149_v13 = vmax.f32 %v14863_v26, %v7939_v14  ;;  %v8900_v14 = vsel %vm16166_vm8, %v8868_v51, 0.0 }
 0x7e8   : > { %v8373_v4 = vpop.f32.mrf.mxu3  ;;  %v14865_v15 = vld [vmem:[#allocation2 + $0xab] sm:$0xff]  ;;  %v14867_v59 = vpop.f32.mrf.mxu2 }
 0x7e9   : > { %16163 = vst [vmem:[#allocation70_spill] sm:$0xff] %v14865_v15  ;;  %v8234_v8 = vld [vmem:[#allocation2 + $0xa8] sm:$0xff]  ;;  %v8150_v21 = vmax.f32 %v14865_v15, %v7941_v27 }
 0x7ea   : > { %v8616_v16 = vld [vmem:[#allocation2 + $0xa9] sm:$0xff]  ;;  %7991 = vst.msk [vmem:[#allocation2 + $0xb4] sm:$0xff] %vm1330_vm3, %v14867_v59  ;;  %v8287_v57 = vpack.c.bf16 %v8234_v8, %v8233_v54  ;;  %v8522_v47 = vpop.f32.mrf.mxu0 }
 0x7eb   : > { %v8758_v5 = vpop.f32.mrf.mxu1  ;;  %v8669_v49 = vpack.c.bf16 %v8616_v16, %v8615_v52  ;;  %v8523_v19 = vadd.f32 %v8522_v47, %v8373_v4  ;;  %v14877_v23 = vld [vmem:[#allocation2 + $0xa5] sm:$0xff] }
 0x7ec   : > { %16164 = vst [vmem:[#allocation71_spill] sm:$0xff] %v14877_v23  ;;  %v8181_v16 = vmax.f32 %v8149_v13, %v14877_v23 }
 0x7ed   : > { %11731 = vmatmul.msk.bf16.gmra.mxu3 %vm1330_vm3, %v8287_v57  ;;  %v14875_v25 = vadd.f32 %v8755_v17, %v8523_v19  ;;  %v8928_v57 = vpack.c.bf16 %v8869_v53, %v8900_v14 }
 0x7ee   : > { %11779 = vmatmul.msk.bf16.gmra.mxu1 %vm1330_vm3, %v8669_v49 }
 0x7f0   : > { %v8376_v33 = vpop.f32.mrf.mxu3  ;;  %v7946_v63 = vpop.f32.mrf.mxu2 }
 0x7f1   : > { %v14881_v8 = vld [vmem:[#allocation2 + $0xad] sm:$0xff]  ;;  %7992 = vst.msk [vmem:[#allocation2 + $0xbc] sm:$0xff] %vm1330_vm3, %v7946_v63 }
 0x7f2   : > { %16165 = vst [vmem:[#allocation72_spill] sm:$0xff] %v14881_v8  ;;  %v8182_v17 = vmax.f32 %v8150_v21, %v14881_v8  ;;  %v8525_v54 = vpop.f32.mrf.mxu0  ;;  %v14894_v13 = vld [vmem:[#allocation2 + $0xb3] sm:$0xff] }
 0x7f3   : > { %v8760_v52 = vpop.f32.mrf.mxu1  ;;  %v8526_v27 = vadd.f32 %v8525_v54, %v8376_v33  ;;  %16167 = vst [vmem:[#allocation73_spill] sm:$0xff] %v14894_v13  ;;  %v8235_v21 = vld [vmem:[#allocation2 + $0xb0] sm:$0xff] }
 0x7f4   : > { %v8203_v49 = vpack.c.bf16 %v8182_v17, %v8181_v16  ;;  %v8617_v26 = vld [vmem:[#allocation2 + $0xb1] sm:$0xff] }
 0x7f5   : > { %11797 = vmatmul.msk.bf16.gmra.mxu2 %vm1330_vm3, %v8928_v57  ;;  %v14891_v47 = vadd.f32 %v8758_v5, %v8526_v27 }
 0x7f6   : > { %11755 = vmatmul.msk.bf16.gmra.mxu0 %vm1330_vm3, %v8203_v49  ;;  %v8151_v49 = vmax.f32 %v14894_v13, %v14867_v59 }
 0x7f8   : > { %v8378_v19 = vpop.f32.mrf.mxu3  ;;  %v14896_v15 = vld [vmem:[#allocation2 + $0xbb] sm:$0xff]  ;;  %v14898_v4 = vpop.f32.mrf.mxu2 }
 0x7f9   : > { %16168 = vst [vmem:[#allocation74_spill] sm:$0xff] %v14896_v15  ;;  %v8236_v36 = vld [vmem:[#allocation2 + $0xb8] sm:$0xff] }
 0x7fa   : > { %v8618_v51 = vld [vmem:[#allocation2 + $0xb9] sm:$0xff]  ;;  %7993 = vst.msk [vmem:[#allocation2 + $0xc4] sm:$0xff] %vm1330_vm3, %v14898_v4  ;;  %v8288_v33 = vpack.c.bf16 %v8236_v36, %v8235_v21  ;;  %v8527_v17 = vpop.f32.mrf.mxu0  ;;  %v8152_v21 = vmax.f32 %v14896_v15, %v7946_v63 }
 0x7fb   : > { %v8763_v53 = vpop.f32.mrf.mxu1  ;;  %v8670_v5 = vpack.c.bf16 %v8618_v51, %v8617_v26  ;;  %v8528_v54 = vadd.f32 %v8527_v17, %v8378_v19  ;;  %v14908_v57 = vld [vmem:[#allocation2 + $0xb5] sm:$0xff] }
 0x7fc   : > { %16169 = vst [vmem:[#allocation75_spill] sm:$0xff] %v14908_v57  ;;  %v8871_v36 = vld [vmem:[#allocation2 + $0x5a] sm:$0xff] }
 0x7fd   : > { %11732 = vmatmul.msk.bf16.gmra.mxu3 %vm1330_vm3, %v8288_v33  ;;  %v14906_v14 = vadd.f32 %v8760_v52, %v8528_v54  ;;  %v8183_v52 = vmax.f32 %v8151_v49, %v14908_v57 }
 0x7fe   : > { %11780 = vmatmul.msk.bf16.gmra.mxu1 %vm1330_vm3, %v8670_v5  ;;  %v8870_v5 = vld [vmem:[#allocation2 + $0x52] sm:$0xff] }
 0x7ff   : > { %v8929_v16 = vpack.c.bf16 %v8871_v36, %v8870_v5  ;;  %v16174_v36 = vld [vmem:[#allocation24_spill] sm:$0xff] }
 0x800   : > { %v8381_v27 = vpop.f32.mrf.mxu3  ;;  %v7951_v26 = vpop.f32.mrf.mxu2  ;;  %vm16176_vm12 = vcmp.ge.s32.totalorder %v16174_v36, 4  ;;  %vm16177_vm14 = vcmp.ge.s32.totalorder %v16174_v36, 3  ;;  %vm16198_vm0 = vcmp.ge.s32.totalorder %v16174_v36, 2  ;;  %v16199_v36 = vpack.c.bf16 %v14629_v35, %v14633_v56 }
 0x801   : > { %v8088_v51 = vld [vmem:[#allocation2 + $0xbd] sm:$0xff]  ;;  %7994 = vst.msk [vmem:[#allocation2 + $0xcc] sm:$0xff] %vm1330_vm3, %v7951_v26 }
 0x802   : > { %v8120_v33 = vsel %vm16170_vm9, %v8088_v51, %v7946_v63  ;;  %v14919_v59 = vsel %vm16171_vm10, %v8088_v51, 0.0  ;;  %v8025_v8 = vld [vmem:[#allocation2 + $0xc3] sm:$0xff] }
 0x803   : > { %v8765_v19 = vpop.f32.mrf.mxu1  ;;  %v8184_v17 = vmax.f32 %v8152_v21, %v8120_v33  ;;  %v8530_v54 = vpop.f32.mrf.mxu0  ;;  %16172 = vst [vmem:[#allocation76_spill] sm:$0xff] %v14919_v59  ;;  %v8237_v46 = vld [vmem:[#allocation2 + $0xc0] sm:$0xff]  ;;  %v14931_v51 = vsel %vm1387_vm15, %v8025_v8, 0.0 }
 0x804   : > { %v8531_v13 = vadd.f32 %v8530_v54, %v8381_v27  ;;  %v8619_v63 = vld [vmem:[#allocation2 + $0xc1] sm:$0xff]  ;;  %16175 = vst [vmem:[#allocation24_spill] sm:$0xff] %v14931_v51  ;;  %v8269_v5 = vsel %vm16176_vm12, %v8237_v46, 0.0  ;;  %v8057_v46 = vsel %vm1387_vm15, %v8025_v8, %v14898_v4  ;;  %vm16188_vm15 = vcmp.ge.s32.totalorder %v16153_v38, 2 }
 0x805   : > { %v8204_v15 = vpack.c.bf16 %v8184_v17, %v8183_v52  ;;  %11798 = vmatmul.msk.bf16.gmra.mxu2 %vm1330_vm3, %v8929_v16  ;;  %v8651_v52 = vsel %vm16177_vm14, %v8619_v63, 0.0  ;;  %v8153_v51 = vmax.f32 %v8057_v46, %v14898_v4 }
 0x806   : > { %v14925_v49 = vadd.f32 %v8763_v53, %v8531_v13 }
 0x807   : > { %11756 = vmatmul.msk.bf16.gmra.mxu0 %vm1330_vm3, %v8204_v15 }
 0x808   : > { %v8383_v60 = vpop.f32.mrf.mxu3  ;;  %v14927_v21 = vld [vmem:[#allocation2 + $0xcb] sm:$0xff]  ;;  %v14933_v27 = vpop.f32.mrf.mxu2 }
 0x809   : > { %16173 = vst [vmem:[#allocation77_spill] sm:$0xff] %v14927_v21  ;;  %v8238_v33 = vld [vmem:[#allocation2 + $0xc8] sm:$0xff] }
 0x80a   : > { %v8620_v16 = vld [vmem:[#allocation2 + $0xc9] sm:$0xff]  ;;  %7995 = vst.msk [vmem:[#allocation2 + $0xd4] sm:$0xff] %vm1330_vm3, %v14933_v27  ;;  %v8289_v53 = vpack.c.bf16 %v8238_v33, %v8269_v5  ;;  %v8154_v33 = vmax.f32 %v14927_v21, %v7951_v26 }
 0x80b   : > { %v8768_v13 = vpop.f32.mrf.mxu1  ;;  %v8671_v17 = vpack.c.bf16 %v8620_v16, %v8651_v52  ;;  %v8532_v54 = vpop.f32.mrf.mxu0  ;;  %v14948_v58 = vld [vmem:[#allocation2 + $0xc5] sm:$0xff] }
 0x80c   : > { %v8533_v23 = vadd.f32 %v8532_v54, %v8383_v60  ;;  %16178 = vst [vmem:[#allocation78_spill] sm:$0xff] %v14948_v58  ;;  %v8873_v16 = vld [vmem:[#allocation2 + $0x6a] sm:$0xff]  ;;  %v8185_v60 = vmax.f32 %v8153_v51, %v14948_v58 }
 0x80d   : > { %11733 = vmatmul.msk.bf16.gmra.mxu3 %vm1330_vm3, %v8289_v53 }
 0x80e   : > { %11781 = vmatmul.msk.bf16.gmra.mxu1 %vm1330_vm3, %v8671_v17  ;;  %v14950_v15 = vadd.f32 %v8765_v19, %v8533_v23  ;;  %v8872_v23 = vld [vmem:[#allocation2 + $0x62] sm:$0xff] }
 0x80f   : > { %v8930_v54 = vpack.c.bf16 %v8873_v16, %v8872_v23 }
 0x810   : > { %v8386_v63 = vpop.f32.mrf.mxu3  ;;  %v7956_v5 = vpop.f32.mrf.mxu2 }
 0x811   : > { %v14954_v52 = vld [vmem:[#allocation2 + $0xcd] sm:$0xff]  ;;  %7996 = vst.msk [vmem:[#allocation2 + $0xdc] sm:$0xff] %vm1330_vm3, %v7956_v5 }
 0x812   : > { %16179 = vst [vmem:[#allocation79_spill] sm:$0xff] %v14954_v52  ;;  %v8186_v8 = vmax.f32 %v8154_v33, %v14954_v52  ;;  %v14965_v57 = vld [vmem:[#allocation2 + $0xd3] sm:$0xff] }
 0x813   : > { %v8770_v53 = vpop.f32.mrf.mxu1  ;;  %v8535_v19 = vpop.f32.mrf.mxu0  ;;  %16180 = vst [vmem:[#allocation80_spill] sm:$0xff] %v14965_v57  ;;  %v8239_v51 = vld [vmem:[#allocation2 + $0xd0] sm:$0xff] }
 0x814   : > { %v8205_v4 = vpack.c.bf16 %v8186_v8, %v8185_v60  ;;  %v8536_v46 = vadd.f32 %v8535_v19, %v8386_v63  ;;  %v8621_v59 = vld [vmem:[#allocation2 + $0xd1] sm:$0xff] }
 0x815   : > { %11799 = vmatmul.msk.bf16.gmra.mxu2 %vm1330_vm3, %v8930_v54 }
 0x816   : > { %v14963_v21 = vadd.f32 %v8768_v13, %v8536_v46  ;;  %v8155_v46 = vmax.f32 %v14965_v57, %v14933_v27 }
 0x817   : > { %11757 = vmatmul.msk.bf16.gmra.mxu0 %vm1330_vm3, %v8205_v4 }
 0x818   : > { %v8388_v26 = vpop.f32.mrf.mxu3  ;;  %v14967_v33 = vld [vmem:[#allocation2 + $0xdb] sm:$0xff]  ;;  %v14969_v11 = vpop.f32.mrf.mxu2 }
 0x819   : > { %16181 = vst [vmem:[#allocation81_spill] sm:$0xff] %v14967_v33  ;;  %v8240_v17 = vld [vmem:[#allocation2 + $0xd8] sm:$0xff]  ;;  %v8156_v63 = vmax.f32 %v14967_v33, %v7956_v5 }
 0x81a   : > { %v8622_v58 = vld [vmem:[#allocation2 + $0xd9] sm:$0xff]  ;;  %7997 = vst.msk [vmem:[#allocation2 + $0xe4] sm:$0xff] %vm1330_vm3, %v14969_v11  ;;  %v8290_v60 = vpack.c.bf16 %v8240_v17, %v8239_v51 }
 0x81b   : > { %v8773_v16 = vpop.f32.mrf.mxu1  ;;  %v8672_v13 = vpack.c.bf16 %v8622_v58, %v8621_v59  ;;  %v8537_v8 = vpop.f32.mrf.mxu0  ;;  %v14977_v54 = vld [vmem:[#allocation2 + $0xd5] sm:$0xff] }
 0x81c   : > { %v8538_v23 = vadd.f32 %v8537_v8, %v8388_v26  ;;  %16182 = vst [vmem:[#allocation82_spill] sm:$0xff] %v14977_v54  ;;  %v8875_v17 = vld [vmem:[#allocation2 + $0x7a] sm:$0xff]  ;;  %v8187_v26 = vmax.f32 %v8155_v46, %v14977_v54 }
 0x81d   : > { %11734 = vmatmul.msk.bf16.gmra.mxu3 %vm1330_vm3, %v8290_v60  ;;  %v8874_v60 = vld [vmem:[#allocation2 + $0x72] sm:$0xff] }
 0x81e   : > { %11782 = vmatmul.msk.bf16.gmra.mxu1 %vm1330_vm3, %v8672_v13  ;;  %v14979_v4 = vadd.f32 %v8770_v53, %v8538_v23  ;;  %v8931_v8 = vpack.c.bf16 %v8875_v17, %v8874_v60  ;;  %v12028_v5 = vld [vmem:[%s14185_s3 + $0x58] sm:$0xff] }
 0x81f   : > { %9709 = vmatpush.bf16.msra.mxu1 %v12028_v5  ;;  %v12030_v5 = vld [vmem:[%s14185_s3 + $0x68] sm:$0xff] }
 0x820   : > { %v8391_v19 = vpop.f32.mrf.mxu3  ;;  %v7961_v52 = vpop.f32.mrf.mxu2  ;;  %9974 = vmatpush.bf16.msra.mxu2 %v12030_v5 }
 0x821   : > { %v14984_v58 = vld [vmem:[#allocation2 + $0xdd] sm:$0xff]  ;;  %7998 = vst.msk [vmem:[#allocation2 + $0xec] sm:$0xff] %vm1330_vm3, %v7961_v52 }
 0x822   : > { %16183 = vst [vmem:[#allocation83_spill] sm:$0xff] %v14984_v58  ;;  %v8188_v51 = vmax.f32 %v8156_v63, %v14984_v58  ;;  %v14996_v46 = vld [vmem:[#allocation2 + $0xe3] sm:$0xff] }
 0x823   : > { %v8775_v59 = vpop.f32.mrf.mxu1  ;;  %v8540_v13 = vpop.f32.mrf.mxu0  ;;  %16184 = vst [vmem:[#allocation84_spill] sm:$0xff] %v14996_v46  ;;  %v8241_v63 = vld [vmem:[#allocation2 + $0xe0] sm:$0xff] }
 0x824   : > { %v8206_v27 = vpack.c.bf16 %v8188_v51, %v8187_v26  ;;  %v8541_v23 = vadd.f32 %v8540_v13, %v8391_v19  ;;  %v8623_v7 = vld [vmem:[#allocation2 + $0xe1] sm:$0xff]  ;;  %v12032_v51 = vld [vmem:[%s14185_s3 + $0x78] sm:$0xff] }
 0x825   : > { %11800 = vmatmul.msk.bf16.gmra.mxu2 %vm1330_vm3, %v8931_v8  ;;  %v12027_v8 = vld [vmem:[%s14185_s3 + $0x50] sm:$0xff]  ;;  %10239 = vmatpush.bf16.msra.mxu3 %v12032_v51 }
 0x826   : > { %v14994_v33 = vadd.f32 %v8773_v16, %v8541_v23  ;;  %9710 = vmatpush.bf16.msra.mxu1 %v12027_v8 }
 0x827   : > { %11758 = vmatmul.msk.bf16.gmra.mxu0 %vm1330_vm3, %v8206_v27 }
 0x828   : > { %v8393_v57 = vpop.f32.mrf.mxu3  ;;  %v14998_v53 = vld [vmem:[#allocation2 + $0xeb] sm:$0xff]  ;;  %v15000_v17 = vpop.f32.mrf.mxu2 }
 0x829   : > { %16185 = vst [vmem:[#allocation85_spill] sm:$0xff] %v14998_v53  ;;  %v8242_v19 = vld [vmem:[#allocation2 + $0xe8] sm:$0xff] }
 0x82a   : > { %v8624_v26 = vld [vmem:[#allocation2 + $0xe9] sm:$0xff]  ;;  %7999 = vst.msk [vmem:[#allocation2 + $0xf4] sm:$0xff] %vm1330_vm3, %v15000_v17  ;;  %v8291_v60 = vpack.c.bf16 %v8242_v19, %v8241_v63  ;;  %v8157_v63 = vmax.f32 %v14996_v46, %v14969_v11 }
 0x82b   : > { %v8778_v16 = vpop.f32.mrf.mxu1  ;;  %v8673_v13 = vpack.c.bf16 %v8624_v26, %v8623_v7  ;;  %v8542_v27 = vpop.f32.mrf.mxu0  ;;  %v15010_v58 = vld [vmem:[#allocation2 + $0xe5] sm:$0xff]  ;;  %v8158_v7 = vmax.f32 %v14998_v53, %v7961_v52 }
 0x82c   : > { %v8543_v23 = vadd.f32 %v8542_v27, %v8393_v57  ;;  %16186 = vst [vmem:[#allocation86_spill] sm:$0xff] %v15010_v58  ;;  %v8876_v19 = vld [vmem:[#allocation2 + $0x82] sm:$0xff]  ;;  %v8189_v8 = vmax.f32 %v8157_v63, %v15010_v58  ;;  %v8879_v58 = vld [vmem:[#allocation2 + $0x9a] sm:$0xff] }
 0x82d   : > { %11735 = vmatmul.msk.bf16.gmra.mxu3 %vm1330_vm3, %v8291_v60  ;;  %v8877_v60 = vld [vmem:[#allocation2 + $0x8a] sm:$0xff]  ;;  %v8908_v11 = vsel %vm16188_vm15, %v8876_v19, 0.0  ;;  %vm10840_vm15 = vcmask 1042434  }
 0x82e   : > { %11783 = vmatmul.msk.bf16.gmra.mxu1 %vm1330_vm3, %v8673_v13  ;;  %v15013_v42 = vadd.f32 %v8775_v59, %v8543_v23  ;;  %v8932_v23 = vpack.c.bf16 %v8877_v60, %v8908_v11  ;;  %v12034_v53 = vld [vmem:[%s14185_s3 + $0x88] sm:$0xff] }
 0x82f   : > { %10504 = vmatpush.bf16.msra.mxu0 %v12034_v53 }
 0x830   : > { %v8396_v54 = vpop.f32.mrf.mxu3  ;;  %v7966_v26 = vpop.f32.mrf.mxu2 }
 0x831   : > { %v15018_v57 = vld [vmem:[#allocation2 + $0xed] sm:$0xff]  ;;  %8000 = vst.msk [vmem:[#allocation2 + $0xfc] sm:$0xff] %vm1330_vm3, %v7966_v26 }
 0x832   : > { %16187 = vst [vmem:[#allocation87_spill] sm:$0xff] %v15018_v57  ;;  %v8190_v59 = vmax.f32 %v8158_v7, %v15018_v57  ;;  %v15032_v63 = vld [vmem:[#allocation2 + $0xf3] sm:$0xff] }
 0x833   : > { %v8780_v13 = vpop.f32.mrf.mxu1  ;;  %v8545_v52 = vpop.f32.mrf.mxu0  ;;  %v8243_v7 = vld [vmem:[#allocation2 + $0xf0] sm:$0xff] }
 0x834   : > { %v8207_v5 = vpack.c.bf16 %v8190_v59, %v8189_v8  ;;  %v8546_v46 = vadd.f32 %v8545_v52, %v8396_v54  ;;  %v8625_v59 = vld [vmem:[#allocation2 + $0xf1] sm:$0xff] }
 0x835   : > { %11801 = vmatmul.msk.bf16.gmra.mxu2 %vm1330_vm3, %v8932_v23 }
 0x836   : > { %v15030_v61 = vadd.f32 %v8778_v16, %v8546_v46 }
 0x837   : > { %11759 = vmatmul.msk.bf16.gmra.mxu0 %vm1330_vm3, %v8207_v5 }
 0x838   : > { %v8398_v51 = vpop.f32.mrf.mxu3  ;;  %v15034_v24 = vld [vmem:[#allocation2 + $0xfb] sm:$0xff]  ;;  %v9013_v38 = vpop.f32.mrf.mxu2 }
 0x839   : > { %v8096_v27 = vld [vmem:[#allocation2 + $0xfd] sm:$0xff]  ;;  %v15037_v54 = vadd.f32 %v9013_v38, %v14834_v29  ;;  %v15039_v52 = vld [vmem:[#allocation2 + $0xf5] sm:$0xff]  ;;  %v8160_v53 = vmax.f32 %v15034_v24, %v7966_v26 }
 0x83a   : > { %v8244_v19 = vld [vmem:[#allocation2 + $0xf8] sm:$0xff]  ;;  %v15046_v5 = vsel %vm16189_vm1, %v8096_v27, 0.0  ;;  %v8128_v38 = vsel %vm16191_vm13, %v8096_v27, %v7966_v26  ;;  %vm10842_vm1 = vcmask 1043459   ;;  %vm10865_vm13 = vcmask 35840  }
 0x83b   : > { %v8783_v60 = vpop.f32.mrf.mxu1  ;;  %v8292_v8 = vpack.c.bf16 %v8244_v19, %v8243_v7  ;;  %v8626_v11 = vld [vmem:[#allocation2 + $0xf9] sm:$0xff]  ;;  %v8547_v23 = vpop.f32.mrf.mxu0  ;;  %16190 = vst [vmem:[#allocation88_spill] sm:$0xff] %v15046_v5 }
 0x83c   : > { %v8674_v46 = vpack.c.bf16 %v8626_v11, %v8625_v59  ;;  %v8548_v29 = vadd.f32 %v8547_v23, %v8398_v51  ;;  %v8192_v11 = vmax.f32 %v8160_v53, %v8128_v38  ;;  %v8881_v38 = vld [vmem:[#allocation2 + $0xaa] sm:$0xff] }
 0x83d   : > { %11736 = vmatmul.msk.bf16.gmra.mxu3 %vm1330_vm3, %v8292_v8  ;;  %v8159_v8 = vmax.f32 %v15032_v63, %v15000_v17 }
 0x83e   : > { %11784 = vmatmul.msk.bf16.gmra.mxu1 %vm1330_vm3, %v8674_v46  ;;  %v15054_v59 = vadd.f32 %v8780_v13, %v8548_v29  ;;  %v8878_v46 = vld [vmem:[#allocation2 + $0x92] sm:$0xff] }
 0x83f   : > { %v8191_v23 = vmax.f32 %v8159_v8, %v15039_v52  ;;  %v8933_v5 = vpack.c.bf16 %v8879_v58, %v8878_v46  ;;  %v9359_v8 = vld [vmem:[#allocation2 + $0xc] sm:$0xff]  ;;  %v9358_v46 = vld [vmem:[#allocation2 + $0x4] sm:$0xff] }
 0x840   : > { %v8401_v19 = vpop.f32.mrf.mxu3  ;;  %v9015_v16 = vpop.f32.mrf.mxu2 }
 0x841   : > { %v15059_v51 = vadd.f32 %v9015_v16, %v14846_v39  ;;  %v8208_v26 = vpack.c.bf16 %v8192_v11, %v8191_v23  ;;  %v16192_v16 = vpack.c.bf16 %v14503_v45, %v14507_v18  ;;  %v8880_v11 = vld [vmem:[#allocation2 + $0xa2] sm:$0xff] }
 0x842   : > { %v8934_v18 = vpack.c.bf16 %v8881_v38, %v8880_v11  ;;  %v8882_v11 = vld [vmem:[#allocation2 + $0xb2] sm:$0xff] }
 0x843   : > { %v8785_v57 = vpop.f32.mrf.mxu1  ;;  %v8550_v7 = vpop.f32.mrf.mxu0 }
 0x844   : > { %v8551_v2 = vadd.f32 %v8550_v7, %v8401_v19 }
 0x845   : > { %11802 = vmatmul.msk.bf16.gmra.mxu2 %vm1330_vm3, %v8933_v5  ;;  %v16193_v5 = vpack.c.bf16 %v14533_v3, %v14526_v40 }
 0x846   : > { %v15064_v17 = vadd.f32 %v8783_v60, %v8551_v2 }
 0x847   : > { %11760 = vmatmul.msk.bf16.gmra.mxu0 %vm1330_vm3, %v8208_v26  ;;  %v9390_v26 = vpack.c.bf16 %v9359_v8, %v9358_v46  ;;  %v9361_v8 = vld [vmem:[#allocation2 + $0x1c] sm:$0xff] }
 0x848   : > { %v8403_v13 = vpop.f32.mrf.mxu3  ;;  %v9018_v27 = vpop.f32.mrf.mxu2 }
 0x849   : > { %v15067_v29 = vadd.f32 %v9018_v27, %v14860_v31 }
 0x84b   : > { %v8788_v53 = vpop.f32.mrf.mxu1  ;;  %v8552_v39 = vpop.f32.mrf.mxu0 }
 0x84c   : > { %v8553_v58 = vadd.f32 %v8552_v39, %v8403_v13  ;;  %v16194_v39 = vpack.c.bf16 %v14551_v12, %v14549_v1 }
 0x84d   : > { %11817 = vmatmul.msk.bf16.vlgmr.msrb.gmra.mxu3 %vm1330_vm3, %v16192_v16 }
 0x84e   : > { %11865 = vmatmul.msk.bf16.vlgmr.msra.gmra.mxu1 %vm1330_vm3, %v16193_v5  ;;  %v15077_v2 = vadd.f32 %v8785_v57, %v8553_v58  ;;  %v16195_v58 = vpack.c.bf16 %v14573_v55, %v14564_v50 }
 0x850   : > { %v8406_v7 = vpop.f32.mrf.mxu3  ;;  %v9020_v60 = vpop.f32.mrf.mxu2 }
 0x851   : > { %v15080_v31 = vadd.f32 %v9020_v60, %v14875_v25  ;;  %v8883_v60 = vld [vmem:[#allocation2 + $0xba] sm:$0xff] }
 0x852   : > { %v8935_v1 = vpack.c.bf16 %v8883_v60, %v8882_v11  ;;  %v9363_v60 = vld [vmem:[#allocation2 + $0x2c] sm:$0xff]  ;;  %v9362_v11 = vld [vmem:[#allocation2 + $0x24] sm:$0xff] }
 0x853   : > { %v8790_v19 = vpop.f32.mrf.mxu1  ;;  %v8555_v45 = vpop.f32.mrf.mxu0 }
 0x854   : > { %v8556_v23 = vadd.f32 %v8555_v45, %v8406_v7  ;;  %v9360_v45 = vld [vmem:[#allocation2 + $0x14] sm:$0xff] }
 0x855   : > { %11803 = vmatmul.msk.bf16.gmra.mxu2 %vm1330_vm3, %v8934_v18  ;;  %v9391_v46 = vpack.c.bf16 %v9361_v8, %v9360_v45 }
 0x856   : > { %v15084_v3 = vadd.f32 %v8788_v53, %v8556_v23 }
 0x857   : > { %11841 = vmatmul.msk.bf16.vlgmr.msrb.gmra.mxu0 %vm1330_vm3, %v9390_v26 }
 0x858   : > { %v8408_v40 = vpop.f32.mrf.mxu3  ;;  %v9023_v57 = vpop.f32.mrf.mxu2 }
 0x859   : > { %v15087_v27 = vadd.f32 %v9023_v57, %v14891_v47 }
 0x85b   : > { %v8793_v13 = vpop.f32.mrf.mxu1  ;;  %v8557_v25 = vpop.f32.mrf.mxu0 }
 0x85c   : > { %v8558_v16 = vadd.f32 %v8557_v25, %v8408_v40  ;;  %v16196_v40 = vpack.c.bf16 %v14591_v43, %v14589_v34  ;;  %v16197_v25 = vpack.c.bf16 %v14613_v22, %v14604_v6  ;;  %v9392_v22 = vpack.c.bf16 %v9363_v60, %v9362_v11 }
 0x85d   : > { %11818 = vmatmul.msk.bf16.gmra.mxu3 %vm1330_vm3, %v16194_v39  ;;  %v16202_v11 = vpack.c.bf16 %v14704_v41, %v14696_v9 }
 0x85e   : > { %11866 = vmatmul.msk.bf16.gmra.mxu1 %vm1330_vm3, %v16195_v58  ;;  %v15097_v53 = vadd.f32 %v8790_v19, %v8558_v16  ;;  %v8884_v16 = vld [vmem:[#allocation2 + $0xc2] sm:$0xff] }
 0x85f   : > { %v8916_v43 = vsel %vm16198_vm0, %v8884_v16, 0.0  ;;  %v9364_v16 = vld [vmem:[#allocation2 + $0x34] sm:$0xff]  ;;  %vm10885_vm0 = vcmask 32768  }
 0x860   : > { %v8411_v5 = vpop.f32.mrf.mxu3  ;;  %v9025_v7 = vpop.f32.mrf.mxu2 }
 0x861   : > { %v15100_v47 = vadd.f32 %v9025_v7, %v14906_v14 }
 0x863   : > { %v8795_v38 = vpop.f32.mrf.mxu1  ;;  %v8560_v12 = vpop.f32.mrf.mxu0 }
 0x864   : > { %v8561_v18 = vadd.f32 %v8560_v12, %v8411_v5  ;;  %v8885_v5 = vld [vmem:[#allocation2 + $0xca] sm:$0xff] }
 0x865   : > { %11804 = vmatmul.msk.bf16.gmra.mxu2 %vm1330_vm3, %v8935_v1  ;;  %v8936_v8 = vpack.c.bf16 %v8885_v5, %v8916_v43 }
 0x866   : > { %v15104_v55 = vadd.f32 %v8793_v13, %v8561_v18 }
 0x867   : > { %11842 = vmatmul.msk.bf16.gmra.mxu0 %vm1330_vm3, %v9391_v46 }
 0x868   : > { %v8413_v50 = vpop.f32.mrf.mxu3  ;;  %v9028_v19 = vpop.f32.mrf.mxu2 }
 0x869   : > { %v15107_v26 = vadd.f32 %v9028_v19, %v14925_v49 }
 0x86b   : > { %v8798_v23 = vpop.f32.mrf.mxu1  ;;  %v8562_v14 = vpop.f32.mrf.mxu0 }
 0x86c   : > { %v8563_v57 = vadd.f32 %v8562_v14, %v8413_v50  ;;  %v16200_v50 = vpack.c.bf16 %v14664_v48, %v14647_v28 }
 0x86d   : > { %11819 = vmatmul.msk.bf16.gmra.mxu3 %vm1330_vm3, %v16196_v40  ;;  %v8887_v40 = vld [vmem:[#allocation2 + $0xda] sm:$0xff] }
 0x86e   : > { %11867 = vmatmul.msk.bf16.gmra.mxu1 %vm1330_vm3, %v16197_v25  ;;  %v15117_v13 = vadd.f32 %v8795_v38, %v8563_v57  ;;  %v9365_v25 = vld [vmem:[#allocation2 + $0x3c] sm:$0xff] }
 0x86f   : > { %v9393_v5 = vpack.c.bf16 %v9365_v25, %v9364_v16 }
 0x870   : > { %v8416_v39 = vpop.f32.mrf.mxu3  ;;  %v9030_v58 = vpop.f32.mrf.mxu2 }
 0x871   : > { %v15120_v7 = vadd.f32 %v9030_v58, %v14950_v15 }
 0x873   : > { %v8800_v49 = vpop.f32.mrf.mxu1  ;;  %v8565_v34 = vpop.f32.mrf.mxu0 }
 0x874   : > { %v8566_v6 = vadd.f32 %v8565_v34, %v8416_v39  ;;  %v8886_v39 = vld [vmem:[#allocation2 + $0xd2] sm:$0xff]  ;;  %v16201_v34 = vpack.c.bf16 %v14672_v44, %v14676_v37  ;;  %v8888_v44 = vld [vmem:[#allocation2 + $0xe2] sm:$0xff] }
 0x875   : > { %11805 = vmatmul.msk.bf16.gmra.mxu2 %vm1330_vm3, %v8936_v8  ;;  %v8937_v56 = vpack.c.bf16 %v8887_v40, %v8886_v39  ;;  %v16203_v39 = vpack.c.bf16 %v14722_v32, %v14720_v20 }
 0x876   : > { %v15126_v12 = vadd.f32 %v8798_v23, %v8566_v6 }
 0x877   : > { %11843 = vmatmul.msk.bf16.gmra.mxu0 %vm1330_vm3, %v9392_v22 }
 0x878   : > { %v8418_v38 = vpop.f32.mrf.mxu3  ;;  %v9033_v1 = vpop.f32.mrf.mxu2 }
 0x879   : > { %v15129_v15 = vadd.f32 %v9033_v1, %v14963_v21  ;;  %v8889_v1 = vld [vmem:[#allocation2 + $0xea] sm:$0xff] }
 0x87b   : > { %v8803_v45 = vpop.f32.mrf.mxu1  ;;  %v8567_v18 = vpop.f32.mrf.mxu0 }
 0x87c   : > { %v8568_v46 = vadd.f32 %v8567_v18, %v8418_v38  ;;  %v9367_v18 = vld [vmem:[#allocation2 + $0x4c] sm:$0xff] }
 0x87d   : > { %11820 = vmatmul.msk.bf16.gmra.mxu3 %vm1330_vm3, %v16199_v36  ;;  %v12029_v36 = vld [vmem:[%s14185_s3 + $0x60] sm:$0xff] }
 0x87e   : > { %11868 = vmatmul.msk.bf16.gmra.mxu1 %vm1330_vm3, %v16200_v50  ;;  %v15139_v23 = vadd.f32 %v8800_v49, %v8568_v46  ;;  %v8938_v46 = vpack.c.bf16 %v8889_v1, %v8888_v44  ;;  %v9366_v50 = vld [vmem:[#allocation2 + $0x44] sm:$0xff]  ;;  %9975 = vmatpush.bf16.msra.mxu2 %v12029_v36  ;;  %v16207_v44 = vld [vmem:[#allocation56_spill] sm:$0xff] }
 0x87f   : > { %v9394_v9 = vpack.c.bf16 %v9367_v18, %v9366_v50  ;;  %v16206_v36 = vld [vmem:[#allocation57_spill] sm:$0xff] }
 0x880   : > { %v8421_v19 = vpop.f32.mrf.mxu3  ;;  %v9035_v14 = vpop.f32.mrf.mxu2 }
 0x881   : > { %v15142_v21 = vadd.f32 %v9035_v14, %v14979_v4 }
 0x883   : > { %v8805_v57 = vpop.f32.mrf.mxu1 }
 0x884   : > { %v8570_v35 = vpop.f32.mrf.mxu0 }
 0x885   : > { %v8571_v58 = vadd.f32 %v8570_v35, %v8421_v19  ;;  %11806 = vmatmul.msk.bf16.gmra.mxu2 %vm1330_vm3, %v8937_v56  ;;  %v16204_v56 = vpack.c.bf16 %v14742_v0, %v14733_v30 }
 0x887   : > { %11844 = vmatmul.msk.bf16.gmra.mxu0 %vm1330_vm3, %v9393_v5  ;;  %v15146_v48 = vadd.f32 %v8803_v45, %v8571_v58 }
 0x888   : > { %v8423_v28 = vpop.f32.mrf.mxu3  ;;  %v9038_v49 = vpop.f32.mrf.mxu2 }
 0x889   : > { %v15149_v4 = vadd.f32 %v9038_v49, %v14994_v33 }
 0x88b   : > { %v8808_v60 = vpop.f32.mrf.mxu1 }
 0x88c   : > { %v8572_v43 = vpop.f32.mrf.mxu0 }
 0x88d   : > { %11821 = vmatmul.msk.bf16.gmra.mxu3 %vm1330_vm3, %v16201_v34  ;;  %v8573_v8 = vadd.f32 %v8572_v43, %v8423_v28  ;;  %v8891_v28 = vld [vmem:[#allocation2 + $0xfa] sm:$0xff]  ;;  %v8890_v43 = vld [vmem:[#allocation2 + $0xf2] sm:$0xff] }
 0x88e   : > { %11869 = vmatmul.msk.bf16.gmra.mxu1 %vm1330_vm3, %v16202_v11  ;;  %v8939_v32 = vpack.c.bf16 %v8891_v28, %v8890_v43  ;;  %v9368_v34 = vld [vmem:[#allocation2 + $0x54] sm:$0xff]  ;;  %v12033_v28 = vld [vmem:[%s14185_s3 + $0x80] sm:$0xff] }
 0x88f   : > { %v15159_v22 = vadd.f32 %v8805_v57, %v8573_v8  ;;  %10505 = vmatpush.bf16.msra.mxu0 %v12033_v28 }
 0x890   : > { %v8426_v6 = vpop.f32.mrf.mxu3  ;;  %v9040_v38 = vpop.f32.mrf.mxu2 }
 0x891   : > { %v15162_v33 = vadd.f32 %v9040_v38, %v15013_v42 }
 0x893   : > { %v8810_v45 = vpop.f32.mrf.mxu1 }
 0x894   : > { %v8575_v37 = vpop.f32.mrf.mxu0 }
 0x895   : > { %v8576_v19 = vadd.f32 %v8575_v37, %v8426_v6  ;;  %11807 = vmatmul.msk.bf16.gmra.mxu2 %vm1330_vm3, %v8938_v46  ;;  %v16208_v37 = vpack.c.bf16 %v16206_v36, %v16207_v44  ;;  %v9373_v44 = vld [vmem:[#allocation2 + $0x7c] sm:$0xff] }
 0x897   : > { %11845 = vmatmul.msk.bf16.gmra.mxu0 %vm1330_vm3, %v9394_v9  ;;  %v15167_v14 = vadd.f32 %v8808_v60, %v8576_v19  ;;  %v9369_v60 = vld [vmem:[#allocation2 + $0x5c] sm:$0xff]  ;;  %v12031_v19 = vld [vmem:[%s14185_s3 + $0x70] sm:$0xff] }
 0x898   : > { %v8428_v41 = vpop.f32.mrf.mxu3  ;;  %v9043_v40 = vpop.f32.mrf.mxu2  ;;  %v9395_v11 = vpack.c.bf16 %v9369_v60, %v9368_v34  ;;  %10240 = vmatpush.bf16.msra.mxu3 %v12031_v19 }
 0x899   : > { %v15170_v42 = vadd.f32 %v9043_v40, %v15030_v61 }
 0x89b   : > { %v8813_v57 = vpop.f32.mrf.mxu1 }
 0x89c   : > { %v8577_v25 = vpop.f32.mrf.mxu0 }
 0x89d   : > { %11822 = vmatmul.msk.bf16.gmra.mxu3 %vm1330_vm3, %v16203_v39  ;;  %v8578_v35 = vadd.f32 %v8577_v25, %v8428_v41  ;;  %v9370_v39 = vld [vmem:[#allocation2 + $0x64] sm:$0xff] }
 0x89e   : > { %11870 = vmatmul.msk.bf16.gmra.mxu1 %vm1330_vm3, %v16204_v56 }
 0x89f   : > { %v15180_v58 = vadd.f32 %v8810_v45, %v8578_v35  ;;  %v16205_v45 = vpack.c.bf16 %v14757_v62, %v14755_v10  ;;  %v9371_v10 = vld [vmem:[#allocation2 + $0x6c] sm:$0xff] }
 0x8a0   : > { %v8431_v16 = vpop.f32.mrf.mxu3  ;;  %v9045_v5 = vpop.f32.mrf.mxu2  ;;  %v9824_v62 = vld [vmem:[#allocation2 + $0x6] sm:$0xff]  ;;  %v9396_v56 = vpack.c.bf16 %v9371_v10, %v9370_v39 }
 0x8a1   : > { %v15183_v61 = vadd.f32 %v9045_v5, %v15054_v59 }
 0x8a3   : > { %v8815_v49 = vpop.f32.mrf.mxu1 }
 0x8a4   : > { %v8580_v20 = vpop.f32.mrf.mxu0 }
 0x8a5   : > { %v8581_v8 = vadd.f32 %v8580_v20, %v8431_v16  ;;  %11808 = vmatmul.msk.bf16.gmra.mxu2 %vm1330_vm3, %v8939_v32  ;;  %v16209_v20 = vld [vmem:[#allocation59_spill] sm:$0xff]  ;;  %v16210_v32 = vld [vmem:[#allocation58_spill] sm:$0xff] }
 0x8a6   : > { %v16211_v34 = vpack.c.bf16 %v16209_v20, %v16210_v32 }
 0x8a7   : > { %11846 = vmatmul.msk.bf16.gmra.mxu0 %vm1330_vm3, %v9395_v11  ;;  %v15187_v0 = vadd.f32 %v8813_v57, %v8581_v8  ;;  %v16212_v11 = vld [vmem:[#allocation61_spill] sm:$0xff] }
 0x8a8   : > { %v8433_v30 = vpop.f32.mrf.mxu3  ;;  %v9048_v6 = vpop.f32.mrf.mxu2 }
 0x8a9   : > { %v15190_v59 = vadd.f32 %v9048_v6, %v15064_v17  ;;  %v9825_v17 = vld [vmem:[#allocation2 + $0xe] sm:$0xff] }
 0x8aa   : > { %v9888_v25 = vpack.c.bf16 %v9825_v17, %v9824_v62 }
 0x8ab   : > { %v8818_v38 = vpop.f32.mrf.mxu1 }
 0x8ac   : > { %v8582_v1 = vpop.f32.mrf.mxu0 }
 0x8ad   : > { %11823 = vmatmul.msk.bf16.gmra.mxu3 %vm1330_vm3, %v16205_v45  ;;  %v8583_v18 = vadd.f32 %v8582_v1, %v8433_v30  ;;  %v16213_v30 = vld [vmem:[#allocation60_spill] sm:$0xff] }
 0x8ae   : > { %11871 = vmatmul.msk.bf16.gmra.mxu1 %vm1330_vm3, %v16208_v37  ;;  %v16214_v6 = vpack.c.bf16 %v16212_v11, %v16213_v30  ;;  %v9826_v37 = vld [vmem:[#allocation2 + $0x16] sm:$0xff] }
 0x8af   : > { %v15200_v50 = vadd.f32 %v8815_v49, %v8583_v18  ;;  %v9827_v18 = vld [vmem:[#allocation2 + $0x1e] sm:$0xff] }
 0x8b0   : > { %v8436_v46 = vpop.f32.mrf.mxu3  ;;  %v9050_v9 = vpop.f32.mrf.mxu2  ;;  %v9889_v19 = vpack.c.bf16 %v9827_v18, %v9826_v37 }
 0x8b1   : > { %v15204_v40 = vadd.f32 %v9050_v9, %v15077_v2  ;;  %v9372_v9 = vld [vmem:[#allocation2 + $0x74] sm:$0xff] }
 0x8b2   : > { %v9397_v10 = vpack.c.bf16 %v9373_v44, %v9372_v9  ;;  %v9374_v44 = vld [vmem:[#allocation2 + $0x84] sm:$0xff] }
 0x8b3   : > { %v8820_v41 = vpop.f32.mrf.mxu1 }
 0x8b4   : > { %v8585_v57 = vpop.f32.mrf.mxu0 }
 0x8b5   : > { %v8586_v35 = vadd.f32 %v8585_v57, %v8436_v46  ;;  %11889 = vmatmul.msk.bf16.vlgmr.msra.gmra.mxu2 %vm1330_vm3, %v9888_v25 }
 0x8b7   : > { %11847 = vmatmul.msk.bf16.gmra.mxu0 %vm1330_vm3, %v9396_v56  ;;  %v15208_v5 = vadd.f32 %v8818_v38, %v8586_v35  ;;  %v16215_v35 = vld [vmem:[#allocation62_spill] sm:$0xff] }
 0x8b8   : > { %v8438_v16 = vpop.f32.mrf.mxu3  ;;  %v9053_v49 = vpop.f32.mrf.mxu2  ;;  %v16216_v56 = vld [vmem:[#allocation22_spill] sm:$0xff] }
 0x8b9   : > { %v15212_v2 = vadd.f32 %v9053_v49, %v15084_v3  ;;  %v16218_v49 = vld [vmem:[#allocation64_spill] sm:$0xff] }
 0x8bb   : > { %v8823_v60 = vpop.f32.mrf.mxu1 }
 0x8bc   : > { %v8587_v43 = vpop.f32.mrf.mxu0 }
 0x8bd   : > { %11824 = vmatmul.msk.bf16.gmra.mxu3 %vm1330_vm3, %v16211_v34  ;;  %v8588_v8 = vadd.f32 %v8587_v43, %v8438_v16  ;;  %v16217_v16 = vpack.c.bf16 %v16215_v35, %v16216_v56  ;;  %v16219_v43 = vld [vmem:[#allocation63_spill] sm:$0xff]  ;;  %v16224_v56 = vld [vmem:[#allocation68_spill] sm:$0xff] }
 0x8be   : > { %11872 = vmatmul.msk.bf16.gmra.mxu1 %vm1330_vm3, %v16214_v6  ;;  %v16220_v20 = vpack.c.bf16 %v16218_v49, %v16219_v43  ;;  %v9375_v6 = vld [vmem:[#allocation2 + $0x8c] sm:$0xff] }
 0x8bf   : > { %v15222_v1 = vadd.f32 %v8820_v41, %v8588_v8  ;;  %v9829_v8 = vld [vmem:[#allocation2 + $0x2e] sm:$0xff] }
 0x8c0   : > { %v8441_v38 = vpop.f32.mrf.mxu3  ;;  %v9055_v45 = vpop.f32.mrf.mxu2 }
 0x8c1   : > { %v15225_v36 = vadd.f32 %v9055_v45, %v15097_v53 }
 0x8c3   : > { %v8825_v3 = vpop.f32.mrf.mxu1 }
 0x8c4   : > { %v8590_v46 = vpop.f32.mrf.mxu0 }
 0x8c5   : > { %v8591_v17 = vadd.f32 %v8590_v46, %v8441_v38  ;;  %11890 = vmatmul.msk.bf16.gmra.mxu2 %vm1330_vm3, %v9889_v19  ;;  %v9828_v38 = vld [vmem:[#allocation2 + $0x26] sm:$0xff]  ;;  %v9398_v46 = vpack.c.bf16 %v9375_v6, %v9374_v44  ;;  %v9830_v6 = vld [vmem:[#allocation2 + $0x36] sm:$0xff] }
 0x8c6   : > { %v9890_v18 = vpack.c.bf16 %v9829_v8, %v9828_v38  ;;  %v9377_v8 = vld [vmem:[#allocation2 + $0x9c] sm:$0xff] }
 0x8c7   : > { %11848 = vmatmul.msk.bf16.gmra.mxu0 %vm1330_vm3, %v9397_v10  ;;  %v15229_v41 = vadd.f32 %v8823_v60, %v8591_v17  ;;  %v16221_v10 = vld [vmem:[#allocation66_spill] sm:$0xff] }
 0x8c8   : > { %v8443_v62 = vpop.f32.mrf.mxu3  ;;  %v9058_v57 = vpop.f32.mrf.mxu2 }
 0x8c9   : > { %v15232_v25 = vadd.f32 %v9058_v57, %v15104_v55 }
 0x8cb   : > { %v9712_v53 = vpop.f32.mrf.mxu1 }
 0x8cc   : > { %v8592_v39 = vpop.f32.mrf.mxu0 }
 0x8cd   : > { %11825 = vmatmul.msk.bf16.gmra.mxu3 %vm1330_vm3, %v16217_v16  ;;  %v8593_v28 = vadd.f32 %v8592_v39, %v8443_v62  ;;  %v16222_v62 = vld [vmem:[#allocation65_spill] sm:$0xff]  ;;  %v16225_v16 = vld [vmem:[#allocation67_spill] sm:$0xff] }
 0x8ce   : > { %11873 = vmatmul.msk.bf16.gmra.mxu1 %vm1330_vm3, %v16220_v20  ;;  %v16223_v57 = vpack.c.bf16 %v16221_v10, %v16222_v62  ;;  %v16227_v20 = vld [vmem:[#allocation19_spill] sm:$0xff]  ;;  %v16230_v10 = vld [vmem:[#allocation69_spill] sm:$0xff] }
 0x8cf   : > { %v15242_v60 = vadd.f32 %v8825_v3, %v8593_v28  ;;  %v16226_v28 = vpack.c.bf16 %v16224_v56, %v16225_v16  ;;  %vm16228_vm4 = vcmp.lt.s32.totalorder %v16227_v20, 62  ;;  %v16233_v56 = vld [vmem:[#allocation71_spill] sm:$0xff]  ;;  %vm16266_vm7 = vcmp.lt.s32.totalorder %v16227_v20, 61 }
 0x8d0   : > { %v9246_v32 = vpop.f32.mrf.mxu3  ;;  %v9060_v55 = vpop.f32.mrf.mxu2  ;;  %vm16267_vm8 = vcmp.lt.s32.totalorder %v16227_v20, 60  ;;  %v10097_v20 = vld [vmem:[#allocation2 + $0x47] sm:$0xff] }
 0x8d1   : > { %v9326_v34 = vadd.f32 %v9246_v32, %v15037_v54  ;;  %v15246_v11 = vadd.f32 %v9060_v55, %v15117_v13 }
 0x8d3   : > { %v9714_v30 = vpop.f32.mrf.mxu1 }
 0x8d4   : > { %v9479_v45 = vpop.f32.mrf.mxu0 }
 0x8d5   : > { %v9559_v37 = vadd.f32 %v9479_v45, %v9326_v34  ;;  %11891 = vmatmul.msk.bf16.gmra.mxu2 %vm1330_vm3, %v9890_v18  ;;  %v9376_v18 = vld [vmem:[#allocation2 + $0x94] sm:$0xff] }
 0x8d7   : > { %11849 = vmatmul.msk.bf16.gmra.mxu0 %vm1330_vm3, %v9398_v46  ;;  %v15250_v3 = vadd.f32 %v9712_v53, %v9559_v37  ;;  %v9831_v53 = vld [vmem:[#allocation2 + $0x3e] sm:$0xff]  ;;  %v9399_v37 = vpack.c.bf16 %v9377_v8, %v9376_v18 }
 0x8d8   : > { %v9248_v19 = vpop.f32.mrf.mxu3  ;;  %v9063_v9 = vpop.f32.mrf.mxu2  ;;  %v9863_v32 = vsel %vm16228_vm4, %v9831_v53, 0.0  ;;  %v9833_v53 = vld [vmem:[#allocation2 + $0x4e] sm:$0xff] }
 0x8d9   : > { %v9327_v54 = vadd.f32 %v9248_v19, %v15059_v51  ;;  %v15254_v13 = vadd.f32 %v9063_v9, %v15126_v12  ;;  %v9891_v45 = vpack.c.bf16 %v9863_v32, %v9830_v6  ;;  %v16229_v9 = vld [vmem:[#allocation70_spill] sm:$0xff] }
 0x8da   : > { %v16231_v62 = vpack.c.bf16 %v16229_v9, %v16230_v10  ;;  %v9832_v32 = vld [vmem:[#allocation2 + $0x46] sm:$0xff] }
 0x8db   : > { %v9717_v17 = vpop.f32.mrf.mxu1  ;;  %v9892_v6 = vpack.c.bf16 %v9833_v53, %v9832_v32  ;;  %v9834_v53 = vld [vmem:[#allocation2 + $0x56] sm:$0xff] }
 0x8dc   : > { %v9481_v39 = vpop.f32.mrf.mxu0 }
 0x8dd   : > { %11826 = vmatmul.msk.bf16.gmra.mxu3 %vm1330_vm3, %v16223_v57  ;;  %v9560_v35 = vadd.f32 %v9481_v39, %v9327_v54 }
 0x8de   : > { %11874 = vmatmul.msk.bf16.gmra.mxu1 %vm1330_vm3, %v16226_v28 }
 0x8df   : > { %v15264_v51 = vadd.f32 %v9714_v30, %v9560_v35  ;;  %v16232_v35 = vld [vmem:[#allocation72_spill] sm:$0xff] }
 0x8e0   : > { %v9251_v49 = vpop.f32.mrf.mxu3  ;;  %v9065_v43 = vpop.f32.mrf.mxu2  ;;  %v16234_v16 = vpack.c.bf16 %v16232_v35, %v16233_v56 }
 0x8e1   : > { %v9328_v12 = vadd.f32 %v9251_v49, %v15067_v29  ;;  %v15270_v34 = vadd.f32 %v9065_v43, %v15139_v23  ;;  %v9379_v43 = vld [vmem:[#allocation2 + $0xac] sm:$0xff] }
 0x8e3   : > { %v9719_v55 = vpop.f32.mrf.mxu1 }
 0x8e4   : > { %v9484_v38 = vpop.f32.mrf.mxu0 }
 0x8e5   : > { %v9561_v44 = vadd.f32 %v9484_v38, %v9328_v12  ;;  %11892 = vmatmul.msk.bf16.gmra.mxu2 %vm1330_vm3, %v9891_v45  ;;  %v9378_v38 = vld [vmem:[#allocation2 + $0xa4] sm:$0xff] }
 0x8e6   : > { %v9400_v18 = vpack.c.bf16 %v9379_v43, %v9378_v38 }
 0x8e7   : > { %11850 = vmatmul.msk.bf16.gmra.mxu0 %vm1330_vm3, %v9399_v37  ;;  %v15274_v29 = vadd.f32 %v9717_v17, %v9561_v44 }
 0x8e8   : > { %v9253_v30 = vpop.f32.mrf.mxu3  ;;  %v9068_v19 = vpop.f32.mrf.mxu2 }
 0x8e9   : > { %v9329_v46 = vadd.f32 %v9253_v30, %v15080_v31  ;;  %v15278_v23 = vadd.f32 %v9068_v19, %v15146_v48  ;;  %v16236_v19 = vld [vmem:[#allocation73_spill] sm:$0xff] }
 0x8eb   : > { %v9722_v54 = vpop.f32.mrf.mxu1 }
 0x8ec   : > { %v9486_v57 = vpop.f32.mrf.mxu0 }
 0x8ed   : > { %11827 = vmatmul.msk.bf16.gmra.mxu3 %vm1330_vm3, %v16231_v62  ;;  %v9562_v39 = vadd.f32 %v9486_v57, %v9329_v46  ;;  %v16235_v46 = vld [vmem:[#allocation74_spill] sm:$0xff]  ;;  %v16238_v57 = vld [vmem:[#allocation76_spill] sm:$0xff] }
 0x8ee   : > { %11875 = vmatmul.msk.bf16.gmra.mxu1 %vm1330_vm3, %v16234_v16  ;;  %v16237_v9 = vpack.c.bf16 %v16235_v46, %v16236_v19  ;;  %v9835_v16 = vld [vmem:[#allocation2 + $0x5e] sm:$0xff] }
 0x8ef   : > { %v15288_v28 = vadd.f32 %v9719_v55, %v9562_v39  ;;  %v16239_v39 = vld [vmem:[#allocation75_spill] sm:$0xff]  ;;  %v9893_v32 = vpack.c.bf16 %v9835_v16, %v9834_v53  ;;  %v9836_v16 = vld [vmem:[#allocation2 + $0x66] sm:$0xff] }
 0x8f0   : > { %v9256_v17 = vpop.f32.mrf.mxu3  ;;  %v9070_v48 = vpop.f32.mrf.mxu2  ;;  %v16240_v35 = vpack.c.bf16 %v16238_v57, %v16239_v39 }
 0x8f1   : > { %v9330_v31 = vadd.f32 %v9256_v17, %v15087_v27  ;;  %v15292_v49 = vadd.f32 %v9070_v48, %v15159_v22  ;;  %v9381_v48 = vld [vmem:[#allocation2 + $0xbc] sm:$0xff] }
 0x8f3   : > { %v9724_v12 = vpop.f32.mrf.mxu1 }
 0x8f4   : > { %v9489_v8 = vpop.f32.mrf.mxu0 }
 0x8f5   : > { %v9563_v45 = vadd.f32 %v9489_v8, %v9330_v31  ;;  %11893 = vmatmul.msk.bf16.gmra.mxu2 %vm1330_vm3, %v9892_v6  ;;  %v9380_v8 = vld [vmem:[#allocation2 + $0xb4] sm:$0xff] }
 0x8f6   : > { %v9401_v38 = vpack.c.bf16 %v9381_v48, %v9380_v8 }
 0x8f7   : > { %11851 = vmatmul.msk.bf16.gmra.mxu0 %vm1330_vm3, %v9400_v18  ;;  %v15296_v55 = vadd.f32 %v9722_v54, %v9563_v45 }
 0x8f8   : > { %v9258_v44 = vpop.f32.mrf.mxu3  ;;  %v9073_v37 = vpop.f32.mrf.mxu2 }
 0x8f9   : > { %v9331_v27 = vadd.f32 %v9258_v44, %v15100_v47  ;;  %v15300_v22 = vadd.f32 %v9073_v37, %v15167_v14  ;;  %v16242_v37 = vld [vmem:[#allocation24_spill] sm:$0xff] }
 0x8fb   : > { %v9727_v30 = vpop.f32.mrf.mxu1 }
 0x8fc   : > { %v9491_v10 = vpop.f32.mrf.mxu0 }
 0x8fd   : > { %11828 = vmatmul.msk.bf16.gmra.mxu3 %vm1330_vm3, %v16237_v9  ;;  %v9564_v62 = vadd.f32 %v9491_v10, %v9331_v27  ;;  %v16241_v27 = vld [vmem:[#allocation77_spill] sm:$0xff]  ;;  %v16244_v10 = vld [vmem:[#allocation79_spill] sm:$0xff] }
 0x8fe   : > { %11876 = vmatmul.msk.bf16.gmra.mxu1 %vm1330_vm3, %v16240_v35  ;;  %v16243_v46 = vpack.c.bf16 %v16241_v27, %v16242_v37  ;;  %v9837_v35 = vld [vmem:[#allocation2 + $0x6e] sm:$0xff] }
 0x8ff   : > { %v15310_v56 = vadd.f32 %v9724_v12, %v9564_v62  ;;  %v16245_v62 = vld [vmem:[#allocation78_spill] sm:$0xff]  ;;  %v9894_v53 = vpack.c.bf16 %v9837_v35, %v9836_v16  ;;  %v9838_v16 = vld [vmem:[#allocation2 + $0x76] sm:$0xff] }
 0x900   : > { %v9261_v54 = vpop.f32.mrf.mxu3  ;;  %v9075_v14 = vpop.f32.mrf.mxu2  ;;  %v16246_v57 = vpack.c.bf16 %v16244_v10, %v16245_v62  ;;  %v9839_v10 = vld [vmem:[#allocation2 + $0x7e] sm:$0xff] }
 0x901   : > { %v9332_v47 = vadd.f32 %v9261_v54, %v15107_v26  ;;  %v15314_v17 = vadd.f32 %v9075_v14, %v15180_v58  ;;  %v9383_v14 = vld [vmem:[#allocation2 + $0xcc] sm:$0xff] }
 0x903   : > { %v9729_v31 = vpop.f32.mrf.mxu1 }
 0x904   : > { %v9494_v43 = vpop.f32.mrf.mxu0 }
 0x905   : > { %v9565_v6 = vadd.f32 %v9494_v43, %v9332_v47  ;;  %11894 = vmatmul.msk.bf16.gmra.mxu2 %vm1330_vm3, %v9893_v32  ;;  %v9382_v43 = vld [vmem:[#allocation2 + $0xc4] sm:$0xff] }
 0x906   : > { %v9402_v8 = vpack.c.bf16 %v9383_v14, %v9382_v43  ;;  %v9385_v14 = vld [vmem:[#allocation2 + $0xdc] sm:$0xff]  ;;  %v9384_v43 = vld [vmem:[#allocation2 + $0xd4] sm:$0xff] }
 0x907   : > { %11852 = vmatmul.msk.bf16.gmra.mxu0 %vm1330_vm3, %v9401_v38  ;;  %v15318_v12 = vadd.f32 %v9727_v30, %v9565_v6 }
 0x908   : > { %v9263_v45 = vpop.f32.mrf.mxu3  ;;  %v9078_v18 = vpop.f32.mrf.mxu2 }
 0x909   : > { %v9333_v26 = vadd.f32 %v9263_v45, %v15120_v7  ;;  %v15322_v58 = vadd.f32 %v9078_v18, %v15187_v0  ;;  %v16247_v45 = vld [vmem:[#allocation81_spill] sm:$0xff] }
 0x90b   : > { %v15324_v44 = vpop.f32.mrf.mxu1 }
 0x90c   : > { %v9496_v19 = vpop.f32.mrf.mxu0 }
 0x90d   : > { %11829 = vmatmul.msk.bf16.gmra.mxu3 %vm1330_vm3, %v16243_v46  ;;  %v9566_v9 = vadd.f32 %v9496_v19, %v9333_v26  ;;  %v16248_v26 = vld [vmem:[#allocation80_spill] sm:$0xff]  ;;  %v16250_v46 = vld [vmem:[#allocation83_spill] sm:$0xff]  ;;  %v16251_v19 = vld [vmem:[#allocation82_spill] sm:$0xff] }
 0x90e   : > { %11877 = vmatmul.msk.bf16.gmra.mxu1 %vm1330_vm3, %v16246_v57  ;;  %v16249_v18 = vpack.c.bf16 %v16247_v45, %v16248_v26  ;;  %v16255_v26 = vld [vmem:[#allocation85_spill] sm:$0xff] }
 0x90f   : > { %v15334_v7 = vadd.f32 %v9729_v31, %v9566_v9  ;;  %v16252_v9 = vpack.c.bf16 %v16250_v46, %v16251_v19  ;;  %v16258_v19 = vld [vmem:[#allocation87_spill] sm:$0xff] }
 0x910   : > { %v9266_v30 = vpop.f32.mrf.mxu3  ;;  %v9080_v39 = vpop.f32.mrf.mxu2 }
 0x911   : > { %v9334_v0 = vadd.f32 %v9266_v30, %v15129_v15  ;;  %v15338_v54 = vadd.f32 %v9080_v39, %v15200_v50  ;;  %v16253_v30 = vld [vmem:[#allocation21_spill] sm:$0xff] }
 0x912   : > { %vm16254_vm5 = vcmp.lt.s32.totalorder %v16253_v30, 62  ;;  %vm16270_vm10 = vcmp.lt.s32.totalorder %v16253_v30, 61  ;;  %vm16271_vm12 = vcmp.lt.s32.totalorder %v16253_v30, 60 }
 0x913   : > { %v9734_v47 = vpop.f32.mrf.mxu1 }
 0x914   : > { %v9499_v48 = vpop.f32.mrf.mxu0 }
 0x915   : > { %v15340_v32 = vadd.f32 %v9499_v48, %v9334_v0  ;;  %11895 = vmatmul.msk.bf16.gmra.mxu2 %vm1330_vm3, %v9894_v53  ;;  %v9871_v0 = vsel %vm16254_vm5, %v9839_v10, 0.0 }
 0x916   : > { %v9895_v53 = vpack.c.bf16 %v9871_v0, %v9838_v16  ;;  %v9840_v16 = vld [vmem:[#allocation2 + $0x86] sm:$0xff] }
 0x917   : > { %11853 = vmatmul.msk.bf16.gmra.mxu0 %vm1330_vm3, %v9402_v8 }
 0x918   : > { %v9268_v31 = vpop.f32.mrf.mxu3  ;;  %v9083_v6 = vpop.f32.mrf.mxu2 }
 0x919   : > { %v9335_v15 = vadd.f32 %v9268_v31, %v15142_v21  ;;  %v15346_v50 = vadd.f32 %v9083_v6, %v15208_v5  ;;  %v9403_v31 = vpack.c.bf16 %v9385_v14, %v9384_v43  ;;  %v9387_v14 = vld [vmem:[#allocation2 + $0xec] sm:$0xff]  ;;  %v9386_v43 = vld [vmem:[#allocation2 + $0xe4] sm:$0xff] }
 0x91b   : > { %v9737_v38 = vpop.f32.mrf.mxu1 }
 0x91c   : > { %v9501_v27 = vpop.f32.mrf.mxu0 }
 0x91d   : > { %11830 = vmatmul.msk.bf16.gmra.mxu3 %vm1330_vm3, %v16249_v18  ;;  %v9568_v37 = vadd.f32 %v9501_v27, %v9335_v15  ;;  %v16256_v18 = vld [vmem:[#allocation84_spill] sm:$0xff] }
 0x91e   : > { %11878 = vmatmul.msk.bf16.gmra.mxu1 %vm1330_vm3, %v16252_v9  ;;  %v16257_v27 = vpack.c.bf16 %v16255_v26, %v16256_v18  ;;  %v16259_v9 = vld [vmem:[#allocation86_spill] sm:$0xff]  ;;  %v16261_v26 = vpack.c.bf16 %v15034_v24, %v15032_v63  ;;  %v9389_v24 = vld [vmem:[#allocation2 + $0xfc] sm:$0xff] }
 0x91f   : > { %v15356_v21 = vadd.f32 %v9734_v47, %v9568_v37  ;;  %v16260_v10 = vpack.c.bf16 %v16258_v19, %v16259_v9  ;;  %v9842_v63 = vld [vmem:[#allocation2 + $0x96] sm:$0xff] }
 0x920   : > { %v9271_v62 = vpop.f32.mrf.mxu3  ;;  %v9085_v57 = vpop.f32.mrf.mxu2 }
 0x921   : > { %v9336_v5 = vadd.f32 %v9271_v62, %v15149_v4  ;;  %v15362_v39 = vadd.f32 %v9085_v57, %v15222_v1 }
 0x923   : > { %v9739_v35 = vpop.f32.mrf.mxu1 }
 0x924   : > { %v9504_v48 = vpop.f32.mrf.mxu0 }
 0x925   : > { %v9569_v8 = vadd.f32 %v9504_v48, %v9336_v5  ;;  %11896 = vmatmul.msk.bf16.gmra.mxu2 %vm1330_vm3, %v9895_v53  ;;  %v9841_v5 = vld [vmem:[#allocation2 + $0x8e] sm:$0xff] }
 0x926   : > { %v9896_v53 = vpack.c.bf16 %v9841_v5, %v9840_v16  ;;  %v9388_v5 = vld [vmem:[#allocation2 + $0xf4] sm:$0xff] }
 0x927   : > { %11854 = vmatmul.msk.bf16.gmra.mxu0 %vm1330_vm3, %v9403_v31  ;;  %v15366_v4 = vadd.f32 %v9737_v38, %v9569_v8  ;;  %v9404_v31 = vpack.c.bf16 %v9387_v14, %v9386_v43 }
 0x928   : > { %v9273_v47 = vpop.f32.mrf.mxu3  ;;  %v9088_v6 = vpop.f32.mrf.mxu2 }
 0x929   : > { %v9337_v15 = vadd.f32 %v9273_v47, %v15162_v33  ;;  %v15370_v1 = vadd.f32 %v9088_v6, %v15229_v41 }
 0x92b   : > { %v9742_v45 = vpop.f32.mrf.mxu1 }
 0x92c   : > { %v9506_v37 = vpop.f32.mrf.mxu0 }
 0x92d   : > { %11831 = vmatmul.msk.bf16.gmra.mxu3 %vm1330_vm3, %v16257_v27  ;;  %v9570_v46 = vadd.f32 %v9506_v37, %v9337_v15  ;;  %v16262_v37 = vld [vmem:[#allocation88_spill] sm:$0xff] }
 0x92e   : > { %11879 = vmatmul.msk.bf16.gmra.mxu1 %vm1330_vm3, %v16260_v10 }
 0x92f   : > { %v15380_v62 = vadd.f32 %v9739_v35, %v9570_v46  ;;  %v16263_v46 = vpack.c.bf16 %v16262_v37, %v15039_v52  ;;  %v9405_v52 = vpack.c.bf16 %v9389_v24, %v9388_v5  ;;  %v10355_v37 = vld [vmem:[#allocation2 + $0x10] sm:$0xff] }
 0x930   : > { %v9276_v38 = vpop.f32.mrf.mxu3  ;;  %v9090_v41 = vpop.f32.mrf.mxu2 }
 0x931   : > { %v9338_v33 = vadd.f32 %v9276_v38, %v15170_v42  ;;  %v15384_v57 = vadd.f32 %v9090_v41, %v15242_v60 }
 0x933   : > { %v9744_v0 = vpop.f32.mrf.mxu1 }
 0x934   : > { %v9509_v48 = vpop.f32.mrf.mxu0 }
 0x935   : > { %v9571_v8 = vadd.f32 %v9509_v48, %v9338_v33  ;;  %11897 = vmatmul.msk.bf16.gmra.mxu2 %vm1330_vm3, %v9896_v53 }
 0x937   : > { %11855 = vmatmul.msk.bf16.gmra.mxu0 %vm1330_vm3, %v9404_v31  ;;  %v15388_v35 = vadd.f32 %v9742_v45, %v9571_v8 }
 0x938   : > { %v9278_v47 = vpop.f32.mrf.mxu3  ;;  %v9977_v15 = vpop.f32.mrf.mxu2 }
 0x939   : > { %v9339_v42 = vadd.f32 %v9278_v47, %v15183_v61  ;;  %v15392_v6 = vadd.f32 %v9977_v15, %v15250_v3  ;;  %v9843_v3 = vld [vmem:[#allocation2 + $0x9e] sm:$0xff] }
 0x93a   : > { %v9897_v41 = vpack.c.bf16 %v9843_v3, %v9842_v63 }
 0x93b   : > { %v9747_v60 = vpop.f32.mrf.mxu1 }
 0x93c   : > { %v9511_v18 = vpop.f32.mrf.mxu0 }
 0x93d   : > { %11832 = vmatmul.msk.bf16.gmra.mxu3 %vm1330_vm3, %v16261_v26  ;;  %v9572_v27 = vadd.f32 %v9511_v18, %v9339_v42 }
 0x93e   : > { %11880 = vmatmul.msk.bf16.gmra.mxu1 %vm1330_vm3, %v16263_v46  ;;  %v9844_v46 = vld [vmem:[#allocation2 + $0xa6] sm:$0xff] }
 0x93f   : > { %v15402_v19 = vadd.f32 %v9744_v0, %v9572_v27  ;;  %v10090_v0 = vld [vmem:[#allocation2 + $0xf] sm:$0xff] }
 0x940   : > { %v9281_v45 = vpop.f32.mrf.mxu3  ;;  %v9979_v9 = vpop.f32.mrf.mxu2  ;;  %v9845_v27 = vld [vmem:[#allocation2 + $0xae] sm:$0xff] }
 0x941   : > { %v9340_v61 = vadd.f32 %v9281_v45, %v15190_v59  ;;  %v15406_v38 = vadd.f32 %v9979_v9, %v15264_v51  ;;  %v10089_v51 = vld [vmem:[#allocation2 + $0x7] sm:$0xff] }
 0x942   : > { %v10153_v31 = vpack.c.bf16 %v10090_v0, %v10089_v51  ;;  %v10354_v9 = vld [vmem:[#allocation2 + $0x8] sm:$0xff] }
 0x943   : > { %v9749_v10 = vpop.f32.mrf.mxu1  ;;  %v10418_v24 = vpack.c.bf16 %v10355_v37, %v10354_v9 }
 0x944   : > { %v9514_v33 = vpop.f32.mrf.mxu0 }
 0x945   : > { %v9573_v14 = vadd.f32 %v9514_v33, %v9340_v61  ;;  %11898 = vmatmul.msk.bf16.gmra.mxu2 %vm1330_vm3, %v9897_v41  ;;  %v9898_v61 = vpack.c.bf16 %v9845_v27, %v9844_v46  ;;  %v10091_v41 = vld [vmem:[#allocation2 + $0x17] sm:$0xff] }
 0x946   : > { %v10356_v27 = vld [vmem:[#allocation2 + $0x18] sm:$0xff] }
 0x947   : > { %11856 = vmatmul.msk.bf16.gmra.mxu0 %vm1330_vm3, %v9405_v52  ;;  %v15410_v59 = vadd.f32 %v9747_v60, %v9573_v14 }
 0x948   : > { %v9283_v16 = vpop.f32.mrf.mxu3  ;;  %v9982_v53 = vpop.f32.mrf.mxu2 }
 0x949   : > { %v9341_v48 = vadd.f32 %v9283_v16, %v15204_v40  ;;  %v15414_v8 = vadd.f32 %v9982_v53, %v15274_v29 }
 0x94b   : > { %v9752_v43 = vpop.f32.mrf.mxu1 }
 0x94c   : > { %v9516_v47 = vpop.f32.mrf.mxu0 }
 0x94d   : > { %11913 = vmatmul.msk.bf16.vlgmr.msra.gmra.mxu3 %vm1330_vm3, %v10153_v31  ;;  %v9574_v42 = vadd.f32 %v9516_v47, %v9341_v48  ;;  %v9847_v48 = vld [vmem:[#allocation2 + $0xbe] sm:$0xff]  ;;  %v16264_v47 = vld [vmem:[#allocation23_spill] sm:$0xff] }
 0x94e   : > { %vm16265_vm6 = vcmp.lt.s32.totalorder %v16264_v47, 62 }
 0x94f   : > { %v15417_v26 = vadd.f32 %v9749_v10, %v9574_v42  ;;  %v10092_v10 = vld [vmem:[#allocation2 + $0x1f] sm:$0xff] }
 0x950   : > { %v9286_v15 = vpop.f32.mrf.mxu3  ;;  %v9984_v60 = vpop.f32.mrf.mxu2  ;;  %v10154_v14 = vpack.c.bf16 %v10092_v10, %v10091_v41 }
 0x951   : > { %v9342_v18 = vadd.f32 %v9286_v15, %v15212_v2  ;;  %v15421_v40 = vadd.f32 %v9984_v60, %v15288_v28  ;;  %v9846_v15 = vld [vmem:[#allocation2 + $0xb6] sm:$0xff] }
 0x953   : > { %v9754_v45 = vpop.f32.mrf.mxu1 }
 0x954   : > { %v9519_v29 = vpop.f32.mrf.mxu0 }
 0x955   : > { %v9575_v3 = vadd.f32 %v9519_v29, %v9342_v18  ;;  %11899 = vmatmul.msk.bf16.gmra.mxu2 %vm1330_vm3, %v9898_v61 }
 0x957   : > { %11937 = vmatmul.msk.bf16.vlgmr.msra.gmra.mxu0 %vm1330_vm3, %v10418_v24  ;;  %v15425_v2 = vadd.f32 %v9752_v43, %v9575_v3  ;;  %v10093_v3 = vld [vmem:[#allocation2 + $0x27] sm:$0xff] }
 0x958   : > { %v9288_v63 = vpop.f32.mrf.mxu3  ;;  %v9987_v28 = vpop.f32.mrf.mxu2 }
 0x959   : > { %v9343_v33 = vadd.f32 %v9288_v63, %v15225_v36  ;;  %v15429_v5 = vadd.f32 %v9987_v28, %v15296_v55  ;;  %v9879_v36 = vsel %vm16265_vm6, %v9847_v48, 0.0  ;;  %v10357_v55 = vld [vmem:[#allocation2 + $0x20] sm:$0xff]  ;;  %v10359_v48 = vld [vmem:[#allocation2 + $0x30] sm:$0xff] }
 0x95a   : > { %v9899_v60 = vpack.c.bf16 %v9879_v36, %v9846_v15  ;;  %v10419_v46 = vpack.c.bf16 %v10357_v55, %v10356_v27  ;;  %v10096_v36 = vld [vmem:[#allocation2 + $0x3f] sm:$0xff]  ;;  %v9800_v27 = vadd.f32 %v15324_v44, %v15340_v32 }
 0x95b   : > { %v9757_v0 = vpop.f32.mrf.mxu1 }
 0x95c   : > { %v9521_v52 = vpop.f32.mrf.mxu0 }
 0x95d   : > { %11914 = vmatmul.msk.bf16.gmra.mxu3 %vm1330_vm3, %v10154_v14  ;;  %v9576_v16 = vadd.f32 %v9521_v52, %v9343_v33 }
 0x95f   : > { %v15432_v51 = vadd.f32 %v9754_v45, %v9576_v16  ;;  %v9849_v16 = vld [vmem:[#allocation2 + $0xce] sm:$0xff] }
 0x960   : > { %v9291_v53 = vpop.f32.mrf.mxu3  ;;  %v9989_v31 = vpop.f32.mrf.mxu2 }
 0x961   : > { %v9344_v43 = vadd.f32 %v9291_v53, %v15232_v25  ;;  %v15438_v42 = vadd.f32 %v9989_v31, %v15310_v56  ;;  %v10094_v25 = vld [vmem:[#allocation2 + $0x2f] sm:$0xff]  ;;  %v9848_v53 = vld [vmem:[#allocation2 + $0xc6] sm:$0xff] }
 0x962   : > { %v10155_v63 = vpack.c.bf16 %v10094_v25, %v10093_v3  ;;  %v10358_v31 = vld [vmem:[#allocation2 + $0x28] sm:$0xff] }
 0x963   : > { %v9759_v61 = vpop.f32.mrf.mxu1  ;;  %v10420_v15 = vpack.c.bf16 %v10359_v48, %v10358_v31 }
 0x964   : > { %v9524_v18 = vpop.f32.mrf.mxu0 }
 0x965   : > { %v9577_v37 = vadd.f32 %v9524_v18, %v9344_v43  ;;  %11900 = vmatmul.msk.bf16.gmra.mxu2 %vm1330_vm3, %v9899_v60  ;;  %v9900_v43 = vpack.c.bf16 %v9849_v16, %v9848_v53 }
 0x967   : > { %11938 = vmatmul.msk.bf16.gmra.mxu0 %vm1330_vm3, %v10419_v46  ;;  %v15442_v29 = vadd.f32 %v9757_v0, %v9577_v37  ;;  %v10095_v46 = vld [vmem:[#allocation2 + $0x37] sm:$0xff] }
 0x968   : > { %v9293_v45 = vpop.f32.mrf.mxu3  ;;  %v9992_v56 = vpop.f32.mrf.mxu2 }
 0x969   : > { %v9345_v9 = vadd.f32 %v9293_v45, %v15246_v11  ;;  %v15446_v24 = vadd.f32 %v9992_v56, %v15318_v12 }
 0x96b   : > { %v9762_v0 = vpop.f32.mrf.mxu1 }
 0x96c   : > { %v9526_v10 = vpop.f32.mrf.mxu0 }
 0x96d   : > { %11915 = vmatmul.msk.bf16.gmra.mxu3 %vm1330_vm3, %v10155_v63  ;;  %v9578_v33 = vadd.f32 %v9526_v10, %v9345_v9  ;;  %v10361_v63 = vld [vmem:[#allocation2 + $0x40] sm:$0xff] }
 0x96e   : > { %v10393_v32 = vsel %vm16267_vm8, %v10361_v63, 0.0 }
 0x96f   : > { %v15449_v41 = vadd.f32 %v9759_v61, %v9578_v33 }
 0x970   : > { %v9296_v28 = vpop.f32.mrf.mxu3  ;;  %v9994_v52 = vpop.f32.mrf.mxu2 }
 0x971   : > { %v9346_v14 = vadd.f32 %v9296_v28, %v15254_v13  ;;  %v15453_v11 = vadd.f32 %v9994_v52, %v15334_v7  ;;  %v10128_v13 = vsel %vm16266_vm7, %v10096_v36, 0.0  ;;  %v9851_v28 = vld [vmem:[#allocation2 + $0xde] sm:$0xff] }
 0x972   : > { %v10156_v25 = vpack.c.bf16 %v10128_v13, %v10095_v46  ;;  %v9853_v46 = vld [vmem:[#allocation2 + $0xee] sm:$0xff] }
 0x973   : > { %v9764_v61 = vpop.f32.mrf.mxu1 }
 0x974   : > { %v9529_v12 = vpop.f32.mrf.mxu0 }
 0x975   : > { %v9579_v55 = vadd.f32 %v9529_v12, %v9346_v14  ;;  %11901 = vmatmul.msk.bf16.gmra.mxu2 %vm1330_vm3, %v9900_v43  ;;  %v9850_v14 = vld [vmem:[#allocation2 + $0xd6] sm:$0xff] }
 0x976   : > { %v9901_v16 = vpack.c.bf16 %v9851_v28, %v9850_v14 }
 0x977   : > { %11939 = vmatmul.msk.bf16.gmra.mxu0 %vm1330_vm3, %v10420_v15  ;;  %v15459_v60 = vadd.f32 %v9762_v0, %v9579_v55  ;;  %v10360_v0 = vld [vmem:[#allocation2 + $0x38] sm:$0xff] }
 0x978   : > { %v9298_v18 = vpop.f32.mrf.mxu3  ;;  %v9997_v37 = vpop.f32.mrf.mxu2  ;;  %v10421_v53 = vpack.c.bf16 %v10393_v32, %v10360_v0  ;;  %v10099_v32 = vld [vmem:[#allocation2 + $0x57] sm:$0xff] }
 0x979   : > { %v9347_v7 = vadd.f32 %v9298_v18, %v15270_v34  ;;  %v15464_v45 = vadd.f32 %v9997_v37, %v9800_v27  ;;  %v9855_v0 = vld [vmem:[#allocation2 + $0xfe] sm:$0xff] }
 0x97b   : > { %v9767_v12 = vpop.f32.mrf.mxu1 }
 0x97c   : > { %v9531_v9 = vpop.f32.mrf.mxu0 }
 0x97d   : > { %11916 = vmatmul.msk.bf16.gmra.mxu3 %vm1330_vm3, %v10156_v25  ;;  %v9580_v56 = vadd.f32 %v9531_v9, %v9347_v7 }
 0x97f   : > { %v15467_v10 = vadd.f32 %v9764_v61, %v9580_v56  ;;  %v9852_v61 = vld [vmem:[#allocation2 + $0xe6] sm:$0xff] }
 0x980   : > { %v9301_v3 = vpop.f32.mrf.mxu3  ;;  %v9999_v34 = vpop.f32.mrf.mxu2  ;;  %v9902_v56 = vpack.c.bf16 %v9853_v46, %v9852_v61 }
 0x981   : > { %v9348_v33 = vadd.f32 %v9301_v3, %v15278_v23  ;;  %v15471_v44 = vadd.f32 %v9999_v34, %v15356_v21  ;;  %v10098_v23 = vld [vmem:[#allocation2 + $0x4f] sm:$0xff]  ;;  %v10100_v34 = vld [vmem:[#allocation2 + $0x5f] sm:$0xff] }
 0x982   : > { %v10157_v15 = vpack.c.bf16 %v10098_v23, %v10097_v20  ;;  %v10158_v14 = vpack.c.bf16 %v10100_v34, %v10099_v32  ;;  %v16268_v23 = vld [vmem:[#allocation25_spill] sm:$0xff] }
 0x983   : > { %vm16269_vm9 = vcmp.lt.s32.totalorder %v16268_v23, 62  ;;  %v10104_v32 = vld [vmem:[#allocation2 + $0x7f] sm:$0xff]  ;;  %vm16297_vm14 = vcmp.lt.s32.totalorder %v16268_v23, 61  ;;  %v12424_v23 = vmov 64.0  }
 0x984   : > { %v9534_v52 = vpop.f32.mrf.mxu0  ;;  %12140 = vrcp.f32 %v12424_v23 }
 0x985   : > { %v9581_v48 = vadd.f32 %v9534_v52, %v9348_v33  ;;  %11902 = vmatmul.msk.bf16.gmra.mxu2 %vm1330_vm3, %v9901_v16 }
 0x987   : > { %11940 = vmatmul.msk.bf16.gmra.mxu0 %vm1330_vm3, %v10421_v53  ;;  %v15477_v31 = vadd.f32 %v9767_v12, %v9581_v48 }
 0x988   : > { %v9303_v43 = vpop.f32.mrf.mxu3  ;;  %v10002_v36 = vpop.f32.mrf.mxu2 }
 0x989   : > { %v9349_v21 = vadd.f32 %v9303_v43, %v15292_v49  ;;  %v15481_v55 = vadd.f32 %v10002_v36, %v15366_v4  ;;  %v10363_v49 = vld [vmem:[#allocation2 + $0x50] sm:$0xff]  ;;  %v10362_v4 = vld [vmem:[#allocation2 + $0x48] sm:$0xff] }
 0x98a   : > { %v10422_v63 = vpack.c.bf16 %v10363_v49, %v10362_v4  ;;  %v9854_v43 = vld [vmem:[#allocation2 + $0xf6] sm:$0xff]  ;;  %v10101_v49 = vld [vmem:[#allocation2 + $0x67] sm:$0xff] }
 0x98c   : > { %v9536_v18 = vpop.f32.mrf.mxu0 }
 0x98d   : > { %11917 = vmatmul.msk.bf16.gmra.mxu3 %vm1330_vm3, %v10157_v15  ;;  %v15484_v13 = vadd.f32 %v9536_v18, %v9349_v21  ;;  %v10364_v15 = vld [vmem:[#allocation2 + $0x58] sm:$0xff] }
 0x990   : > { %v9306_v7 = vpop.f32.mrf.mxu3  ;;  %v10004_v37 = vpop.f32.mrf.mxu2 }
 0x991   : > { %v9350_v27 = vadd.f32 %v9306_v7, %v15300_v22  ;;  %v15488_v25 = vadd.f32 %v10004_v37, %v15380_v62 }
 0x994   : > { %v9539_v9 = vpop.f32.mrf.mxu0 }
 0x995   : > { %v15490_v3 = vadd.f32 %v9539_v9, %v9350_v27  ;;  %11903 = vmatmul.msk.bf16.gmra.mxu2 %vm1330_vm3, %v9902_v56 }
 0x997   : > { %11941 = vmatmul.msk.bf16.gmra.mxu0 %vm1330_vm3, %v10422_v63 }
 0x998   : > { %v9308_v33 = vpop.f32.mrf.mxu3  ;;  %v10007_v28 = vpop.f32.mrf.mxu2 }
 0x999   : > { %v9351_v22 = vadd.f32 %v9308_v33, %v15314_v17  ;;  %v15496_v62 = vadd.f32 %v10007_v28, %v15388_v35  ;;  %v9887_v17 = vsel %vm16269_vm9, %v9855_v0, 0.0  ;;  %v10365_v35 = vld [vmem:[#allocation2 + $0x60] sm:$0xff]  ;;  %v10366_v28 = vld [vmem:[#allocation2 + $0x68] sm:$0xff]  ;;  %v10136_v0 = vsel %vm16270_vm10, %v10104_v32, 0.0 }
 0x99a   : > { %v9903_v20 = vpack.c.bf16 %v9887_v17, %v9854_v43  ;;  %v10423_v7 = vpack.c.bf16 %v10365_v35, %v10364_v15 }
 0x99c   : > { %v9541_v52 = vpop.f32.mrf.mxu0 }
 0x99d   : > { %11918 = vmatmul.msk.bf16.gmra.mxu3 %vm1330_vm3, %v10158_v14  ;;  %v15499_v16 = vadd.f32 %v9541_v52, %v9351_v22  ;;  %v10367_v22 = vld [vmem:[#allocation2 + $0x70] sm:$0xff] }
 0x9a0   : > { %v9311_v48 = vpop.f32.mrf.mxu3  ;;  %v10009_v12 = vpop.f32.mrf.mxu2 }
 0x9a1   : > { %v9352_v53 = vadd.f32 %v9311_v48, %v15322_v58  ;;  %v15505_v21 = vadd.f32 %v10009_v12, %v15402_v19  ;;  %v10102_v58 = vld [vmem:[#allocation2 + $0x6f] sm:$0xff] }
 0x9a2   : > { %v10159_v61 = vpack.c.bf16 %v10102_v58, %v10101_v49  ;;  %v10106_v49 = vld [vmem:[#allocation2 + $0x8f] sm:$0xff] }
 0x9a4   : > { %v9544_v36 = vpop.f32.mrf.mxu0 }
 0x9a5   : > { %v15507_v18 = vadd.f32 %v9544_v36, %v9352_v53  ;;  %11904 = vmatmul.msk.bf16.gmra.mxu2 %vm1330_vm3, %v9903_v20  ;;  %v10103_v53 = vld [vmem:[#allocation2 + $0x77] sm:$0xff]  ;;  %v10369_v36 = vld [vmem:[#allocation2 + $0x80] sm:$0xff] }
 0x9a6   : > { %v10160_v12 = vpack.c.bf16 %v10136_v0, %v10103_v53  ;;  %v10108_v53 = vld [vmem:[#allocation2 + $0x9f] sm:$0xff] }
 0x9a7   : > { %11942 = vmatmul.msk.bf16.gmra.mxu0 %vm1330_vm3, %v10423_v7 }
 0x9a8   : > { %v9313_v27 = vpop.f32.mrf.mxu3  ;;  %v10012_v46 = vpop.f32.mrf.mxu2 }
 0x9a9   : > { %v9353_v37 = vadd.f32 %v9313_v27, %v15338_v54  ;;  %v15513_v19 = vadd.f32 %v10012_v46, %v15410_v59  ;;  %v10424_v59 = vpack.c.bf16 %v10367_v22, %v10366_v28  ;;  %v10829_v22 = vld [vmem:[%s12614_s12 + $0x78] sm:$0xff] }
 0x9aa   : > { %10845 = vmatpush.msrb.mxu1 %v10829_v22 }
 0x9ac   : > { %v9546_v9 = vpop.f32.mrf.mxu0 }
 0x9ad   : > { %11919 = vmatmul.msk.bf16.gmra.mxu3 %vm1330_vm3, %v10159_v61  ;;  %v15516_v56 = vadd.f32 %v9546_v9, %v9353_v37  ;;  %v10105_v9 = vld [vmem:[#allocation2 + $0x87] sm:$0xff] }
 0x9ae   : > { %v10161_v30 = vpack.c.bf16 %v10106_v49, %v10105_v9  ;;  %v16272_v49 = vld [vmem:[#allocation26_spill] sm:$0xff] }
 0x9b0   : > { %v9316_v4 = vpop.f32.mrf.mxu3  ;;  %v10014_v33 = vpop.f32.mrf.mxu2 }
 0x9b1   : > { %v9354_v63 = vadd.f32 %v9316_v4, %v15346_v50  ;;  %v15520_v34 = vadd.f32 %v10014_v33, %v15417_v26 }
 0x9b4   : > { %v9549_v54 = vpop.f32.mrf.mxu0 }
 0x9b5   : > { %v15522_v14 = vadd.f32 %v9549_v54, %v9354_v63 }
 0x9b7   : > { %11943 = vmatmul.msk.bf16.gmra.mxu0 %vm1330_vm3, %v10424_v59 }
 0x9b8   : > { %v9318_v52 = vpop.f32.mrf.mxu3  ;;  %v10017_v50 = vpop.f32.mrf.mxu2 }
 0x9b9   : > { %v9355_v48 = vadd.f32 %v9318_v52, %v15362_v39  ;;  %v15529_v26 = vadd.f32 %v10017_v50, %v15425_v2  ;;  %v10401_v39 = vsel %vm16271_vm12, %v10369_v36, 0.0  ;;  %v10368_v2 = vld [vmem:[#allocation2 + $0x78] sm:$0xff]  ;;  %v10370_v52 = vld [vmem:[#allocation2 + $0x88] sm:$0xff] }
 0x9ba   : > { %v10425_v37 = vpack.c.bf16 %v10401_v39, %v10368_v2 }
 0x9bc   : > { %v9551_v43 = vpop.f32.mrf.mxu0 }
 0x9bd   : > { %11920 = vmatmul.msk.bf16.gmra.mxu3 %vm1330_vm3, %v10160_v12  ;;  %v15532_v17 = vadd.f32 %v9551_v43, %v9355_v48  ;;  %v10107_v43 = vld [vmem:[#allocation2 + $0x97] sm:$0xff] }
 0x9be   : > { %v10162_v36 = vpack.c.bf16 %v10108_v53, %v10107_v43 }
 0x9c0   : > { %v9321_v35 = vpop.f32.mrf.mxu3  ;;  %v10019_v15 = vpop.f32.mrf.mxu2 }
 0x9c1   : > { %v9356_v20 = vadd.f32 %v9321_v35, %v15370_v1  ;;  %v15536_v7 = vadd.f32 %v10019_v15, %v15432_v51 }
 0x9c4   : > { %v9554_v27 = vpop.f32.mrf.mxu0 }
 0x9c5   : > { %v15540_v58 = vadd.f32 %v9554_v27, %v9356_v20 }
 0x9c7   : > { %11944 = vmatmul.msk.bf16.gmra.mxu0 %vm1330_vm3, %v10425_v37  ;;  %v10828_v37 = vld [vmem:[%s12614_s12 + $0x70] sm:$0xff] }
 0x9c8   : > { %v9323_v46 = vpop.f32.mrf.mxu3  ;;  %v10022_v61 = vpop.f32.mrf.mxu2  ;;  %10846 = vmatpush.msrb.mxu1 %v10828_v37 }
 0x9c9   : > { %v9357_v1 = vadd.f32 %v9323_v46, %v15384_v57  ;;  %v15545_v51 = vadd.f32 %v10022_v61, %v15442_v29  ;;  %v10371_v57 = vld [vmem:[#allocation2 + $0x90] sm:$0xff]  ;;  %v15560_v29 = vld [vmem:[%s705_s18] ss:$0 sm:$0xff] }
 0x9ca   : > { %v10426_v48 = vpack.c.bf16 %v10371_v57, %v10370_v52 }
 0x9cc   : > { %v9556_v4 = vpop.f32.mrf.mxu0 }
 0x9cd   : > { %11921 = vmatmul.msk.bf16.gmra.mxu3 %vm1330_vm3, %v10161_v30  ;;  %v15548_v63 = vadd.f32 %v9556_v4, %v9357_v1  ;;  %v10373_v30 = vld [vmem:[#allocation2 + $0xa0] sm:$0xff]  ;;  %v16274_v4 = vld [vmem:[#allocation28_spill] sm:$0xff] }
 0x9d0   : > { %v10242_v33 = vpop.f32.mrf.mxu3  ;;  %v10024_v28 = vpop.f32.mrf.mxu2 }
 0x9d1   : > { %v10322_v54 = vadd.f32 %v10242_v33, %v15392_v6  ;;  %v15553_v32 = vadd.f32 %v10024_v28, %v15449_v41  ;;  %v16275_v33 = vmax.f32 %v16274_v4, 0.0  ;;  %v10372_v28 = vld [vmem:[#allocation2 + $0x98] sm:$0xff] }
 0x9d4   : > { %v10507_v59 = vpop.f32.mrf.mxu0 }
 0x9d5   : > { %v10587_v0 = vadd.f32 %v10507_v59, %v10322_v54 }
 0x9d7   : > { %v10623_v50 = vadd.f32 %v15560_v29, %v10587_v0  ;;  %11945 = vmatmul.msk.bf16.gmra.mxu0 %vm1330_vm3, %v10426_v48  ;;  %v10427_v0 = vpack.c.bf16 %v10373_v30, %v10372_v28 }
 0x9d8   : > { %v10244_v6 = vpop.f32.mrf.mxu3  ;;  %v10027_v12 = vpop.f32.mrf.mxu2 }
 0x9d9   : > { %v10323_v41 = vadd.f32 %v10244_v6, %v15406_v38  ;;  %v15566_v35 = vadd.f32 %v10027_v12, %v15459_v60  ;;  %v10655_v15 = vmax.f32 %v10623_v50, 0.0  ;;  %v16273_v38 = vmax.f32 %v16272_v49, 0.0  ;;  %v10110_v6 = vld [vmem:[#allocation2 + $0xaf] sm:$0xff]  ;;  %v10109_v12 = vld [vmem:[#allocation2 + $0xa7] sm:$0xff] }
 0x9db   : > { %v10687_v1 = vadd.f32 %v10655_v15, %v16273_v38 }
 0x9dc   : > { %v10509_v20 = vpop.f32.mrf.mxu0 }
 0x9dd   : > { %11922 = vmatmul.msk.bf16.gmra.mxu3 %vm1330_vm3, %v10162_v36  ;;  %v10588_v39 = vadd.f32 %v10509_v20, %v10323_v41  ;;  %v10719_v57 = vmax.f32 %v10687_v1, 0.0  ;;  %v10163_v36 = vpack.c.bf16 %v10110_v6, %v10109_v12  ;;  %v16276_v20 = vld [vmem:[#allocation27_spill] sm:$0xff] }
 0x9de   : > { %v16277_v15 = vmax.f32 %v16276_v20, 0.0  ;;  %v10111_v6 = vld [vmem:[#allocation2 + $0xb7] sm:$0xff] }
 0x9df   : > { %v10624_v27 = vadd.f32 %v15560_v29, %v10588_v39 }
 0x9e0   : > { %v10247_v2 = vpop.f32.mrf.mxu3  ;;  %v10029_v9 = vpop.f32.mrf.mxu2 }
 0x9e1   : > { %v10324_v46 = vadd.f32 %v10247_v2, %v15414_v8  ;;  %v10656_v61 = vmax.f32 %v10624_v27, 0.0  ;;  %v15575_v60 = vadd.f32 %v10029_v9, %v15467_v10  ;;  %v16278_v9 = vld [vmem:[#allocation29_spill] sm:$0xff] }
 0x9e2   : > { %v16279_v30 = vmax.f32 %v16278_v9, 0.0  ;;  %v10376_v9 = vld [vmem:[#allocation2 + $0xb8] sm:$0xff] }
 0x9e3   : > { %v10688_v22 = vadd.f32 %v10656_v61, %v16275_v33 }
 0x9e4   : > { %v10512_v54 = vpop.f32.mrf.mxu0 }
 0x9e5   : > { %v10720_v59 = vmax.f32 %v10688_v22, 0.0  ;;  %v10589_v52 = vadd.f32 %v10512_v54, %v10324_v46  ;;  %v10374_v22 = vld [vmem:[#allocation2 + $0xa8] sm:$0xff]  ;;  %v10112_v54 = vld [vmem:[#allocation2 + $0xbf] sm:$0xff] }
 0x9e7   : > { %v10751_v8 = vadd.f32 %v10720_v59, %v10719_v57  ;;  %v10625_v48 = vadd.f32 %v15560_v29, %v10589_v52  ;;  %11946 = vmatmul.msk.bf16.gmra.mxu0 %vm1330_vm3, %v10427_v0 }
 0x9e8   : > { %v10249_v50 = vpop.f32.mrf.mxu3  ;;  %v10032_v41 = vpop.f32.mrf.mxu2 }
 0x9e9   : > { %v10325_v10 = vadd.f32 %v10249_v50, %v15421_v40  ;;  %v10657_v53 = vmax.f32 %v10625_v48, 0.0  ;;  %v15583_v43 = vadd.f32 %v10032_v41, %v15477_v31  ;;  %v10827_v40 = vld [vmem:[%s12614_s12 + $0x68] sm:$0xff] }
 0x9ea   : > { %10847 = vmatpush.msrb.mxu1 %v10827_v40  ;;  %v10375_v31 = vld [vmem:[#allocation2 + $0xb0] sm:$0xff] }
 0x9eb   : > { %v10689_v39 = vadd.f32 %v10657_v53, %v16277_v15  ;;  %v10428_v59 = vpack.c.bf16 %v10375_v31, %v10374_v22  ;;  %v16280_v53 = vld [vmem:[#allocation31_spill] sm:$0xff] }
 0x9ec   : > { %v10514_v27 = vpop.f32.mrf.mxu0  ;;  %v16281_v41 = vmax.f32 %v16280_v53, 0.0 }
 0x9ed   : > { %11923 = vmatmul.msk.bf16.gmra.mxu3 %vm1330_vm3, %v10163_v36  ;;  %v10721_v2 = vmax.f32 %v10689_v39, 0.0  ;;  %v10590_v37 = vadd.f32 %v10514_v27, %v10325_v10 }
 0x9ef   : > { %v10752_v46 = vadd.f32 %v10751_v8, %v10721_v2  ;;  %v10626_v49 = vadd.f32 %v15560_v29, %v10590_v37  ;;  %v10377_v37 = vld [vmem:[#allocation2 + $0xc0] sm:$0xff] }
 0x9f0   : > { %v10252_v38 = vpop.f32.mrf.mxu3 }
 0x9f1   : > { %v10326_v1 = vadd.f32 %v10252_v38, %v15429_v5  ;;  %v10658_v61 = vmax.f32 %v10626_v49, 0.0  ;;  %v10144_v5 = vsel %vm4178_vm11, %v10112_v54, 0.0  ;;  %vm16282_vm11 = vcmp.lt.s32.totalorder %v16264_v47, 60  ;;  %v16283_v38 = vld [vmem:[#allocation32_spill] sm:$0xff] }
 0x9f2   : > { %v10164_v10 = vpack.c.bf16 %v10144_v5, %v10111_v6  ;;  %v10409_v49 = vsel %vm16282_vm11, %v10377_v37, 0.0  ;;  %v16284_v40 = vmax.f32 %v16283_v38, 0.0  ;;  %v10378_v37 = vld [vmem:[#allocation2 + $0xc8] sm:$0xff] }
 0x9f3   : > { %v10690_v4 = vadd.f32 %v10658_v61, %v16279_v30  ;;  %v10826_v61 = vld [vmem:[%s12614_s12 + $0x60] sm:$0xff] }
 0x9f4   : > { %v10517_v33 = vpop.f32.mrf.mxu0  ;;  %10848 = vmatpush.msrb.mxu1 %v10826_v61 }
 0x9f5   : > { %v10722_v28 = vmax.f32 %v10690_v4, 0.0  ;;  %v10591_v57 = vadd.f32 %v10517_v33, %v10326_v1  ;;  %v10429_v33 = vpack.c.bf16 %v10409_v49, %v10376_v9 }
 0x9f7   : > { %v10753_v52 = vadd.f32 %v10752_v46, %v10722_v28  ;;  %v10627_v0 = vadd.f32 %v15560_v29, %v10591_v57  ;;  %11947 = vmatmul.msk.bf16.gmra.mxu0 %vm1330_vm3, %v10428_v59  ;;  %v10113_v59 = vld [vmem:[#allocation2 + $0xc7] sm:$0xff] }
 0x9f8   : > { %v10254_v8 = vpop.f32.mrf.mxu3 }
 0x9f9   : > { %v10327_v48 = vadd.f32 %v10254_v8, %v15438_v42  ;;  %v10659_v50 = vmax.f32 %v10627_v0, 0.0  ;;  %v16285_v0 = vld [vmem:[#allocation41_spill] sm:$0xff] }
 0x9fa   : > { %v16286_v8 = vmax.f32 %v16285_v0, 0.0  ;;  %v10381_v0 = vld [vmem:[#allocation2 + $0xe0] sm:$0xff] }
 0x9fb   : > { %v10691_v12 = vadd.f32 %v10659_v50, %v16281_v41 }
 0x9fc   : > { %v10519_v36 = vpop.f32.mrf.mxu0 }
 0x9fd   : > { %11924 = vmatmul.msk.bf16.gmra.mxu3 %vm1330_vm3, %v10164_v10  ;;  %v10723_v20 = vmax.f32 %v10691_v12, 0.0  ;;  %v10592_v15 = vadd.f32 %v10519_v36, %v10327_v48  ;;  %v10825_v12 = vld [vmem:[%s12614_s12 + $0x58] sm:$0xff] }
 0x9fe   : > { %10849 = vmatpush.msrb.mxu1 %v10825_v12 }
 0x9ff   : > { %v10754_v39 = vadd.f32 %v10753_v52, %v10723_v20  ;;  %v10628_v27 = vadd.f32 %v15560_v29, %v10592_v15  ;;  %v10379_v20 = vld [vmem:[#allocation2 + $0xd0] sm:$0xff]  ;;  %v16287_v15 = vld [vmem:[#allocation42_spill] sm:$0xff] }
 0xa00   : > { %v10257_v2 = vpop.f32.mrf.mxu3  ;;  %v10430_v49 = vpack.c.bf16 %v10379_v20, %v10378_v37 }
 0xa01   : > { %v10328_v46 = vadd.f32 %v10257_v2, %v15446_v24  ;;  %v10660_v42 = vmax.f32 %v10628_v27, 0.0  ;;  %v10114_v24 = vld [vmem:[#allocation2 + $0xcf] sm:$0xff] }
 0xa02   : > { %v10165_v52 = vpack.c.bf16 %v10114_v24, %v10113_v59 }
 0xa03   : > { %v10692_v1 = vadd.f32 %v10660_v42, %v16284_v40 }
 0xa04   : > { %v10522_v31 = vpop.f32.mrf.mxu0 }
 0xa05   : > { %v10724_v30 = vmax.f32 %v10692_v1, 0.0  ;;  %v10593_v4 = vadd.f32 %v10522_v31, %v10328_v46  ;;  %v10115_v31 = vld [vmem:[#allocation2 + $0xd7] sm:$0xff] }
 0xa07   : > { %v10755_v22 = vadd.f32 %v10754_v39, %v10724_v30  ;;  %v10629_v54 = vadd.f32 %v15560_v29, %v10593_v4  ;;  %11948 = vmatmul.msk.bf16.gmra.mxu0 %vm1330_vm3, %v10429_v33  ;;  %v16288_v39 = vmax.f32 %v16287_v15, 0.0 }
 0xa08   : > { %v10259_v28 = vpop.f32.mrf.mxu3 }
 0xa09   : > { %v10329_v47 = vadd.f32 %v10259_v28, %v15453_v11  ;;  %v10661_v57 = vmax.f32 %v10629_v54, 0.0  ;;  %v10824_v28 = vld [vmem:[%s12614_s12 + $0x50] sm:$0xff] }
 0xa0a   : > { %10850 = vmatpush.msrb.mxu1 %v10824_v28  ;;  %v10382_v28 = vld [vmem:[#allocation2 + $0xe8] sm:$0xff] }
 0xa0b   : > { %v10693_v5 = vadd.f32 %v10661_v57, %v16286_v8 }
 0xa0c   : > { %v10524_v48 = vpop.f32.mrf.mxu0 }
 0xa0d   : > { %11925 = vmatmul.msk.bf16.gmra.mxu3 %vm1330_vm3, %v10165_v52  ;;  %v10725_v50 = vmax.f32 %v10693_v5, 0.0  ;;  %v10594_v6 = vadd.f32 %v10524_v48, %v10329_v47  ;;  %v16289_v47 = vld [vmem:[#allocation33_spill] sm:$0xff] }
 0xa0e   : > { %v16290_v57 = vmax.f32 %v16289_v47, 0.0 }
 0xa0f   : > { %v10756_v10 = vadd.f32 %v10755_v22, %v10725_v50  ;;  %v10630_v53 = vadd.f32 %v15560_v29, %v10594_v6  ;;  %v10380_v50 = vld [vmem:[#allocation2 + $0xd8] sm:$0xff] }
 0xa10   : > { %v10262_v41 = vpop.f32.mrf.mxu3 }
 0xa11   : > { %v10330_v36 = vadd.f32 %v10262_v41, %v15464_v45  ;;  %v10662_v11 = vmax.f32 %v10630_v53, 0.0  ;;  %v10116_v45 = vld [vmem:[#allocation2 + $0xdf] sm:$0xff]  ;;  %v10431_v41 = vpack.c.bf16 %v10381_v0, %v10380_v50 }
 0xa12   : > { %v10166_v9 = vpack.c.bf16 %v10116_v45, %v10115_v31  ;;  %v10823_v31 = vld [vmem:[%s12614_s12 + $0x48] sm:$0xff] }
 0xa13   : > { %v10694_v27 = vadd.f32 %v10662_v11, %v16288_v39  ;;  %v10118_v11 = vld [vmem:[#allocation2 + $0xef] sm:$0xff]  ;;  %v10117_v39 = vld [vmem:[#allocation2 + $0xe7] sm:$0xff]  ;;  %10851 = vmatpush.msrb.mxu1 %v10823_v31 }
 0xa14   : > { %v10527_v2 = vpop.f32.mrf.mxu0 }
 0xa15   : > { %v10726_v46 = vmax.f32 %v10694_v27, 0.0  ;;  %v10595_v42 = vadd.f32 %v10527_v2, %v10330_v36  ;;  %v10167_v27 = vpack.c.bf16 %v10118_v11, %v10117_v39  ;;  %v16293_v2 = vld [vmem:[#allocation35_spill] sm:$0xff] }
 0xa16   : > { %v16294_v37 = vmax.f32 %v16293_v2, 0.0 }
 0xa17   : > { %v15619_v38 = vadd.f32 %v10756_v10, %v10726_v46  ;;  %v10631_v40 = vadd.f32 %v15560_v29, %v10595_v42  ;;  %11949 = vmatmul.msk.bf16.gmra.mxu0 %vm1330_vm3, %v10430_v49 }
 0xa18   : > { %v10264_v1 = vpop.f32.mrf.mxu3 }
 0xa19   : > { %v10331_v61 = vadd.f32 %v10264_v1, %v15471_v44  ;;  %v10663_v4 = vmax.f32 %v10631_v40, 0.0  ;;  %v16291_v44 = vld [vmem:[#allocation34_spill] sm:$0xff] }
 0xa1a   : > { %v16292_v8 = vmax.f32 %v16291_v44, 0.0 }
 0xa1b   : > { %v10695_v59 = vadd.f32 %v10663_v4, %v16290_v57  ;;  %v16295_v4 = vld [vmem:[#allocation36_spill] sm:$0xff] }
 0xa1c   : > { %v10529_v30 = vpop.f32.mrf.mxu0 }
 0xa1d   : > { %11926 = vmatmul.msk.bf16.gmra.mxu3 %vm1330_vm3, %v10166_v9  ;;  %v10596_v33 = vadd.f32 %v10529_v30, %v10331_v61  ;;  %v10727_v6 = vmax.f32 %v10695_v59, 0.0  ;;  %v10383_v30 = vld [vmem:[#allocation2 + $0xf0] sm:$0xff] }
 0xa1e   : > { %v10432_v59 = vpack.c.bf16 %v10383_v30, %v10382_v28 }
 0xa1f   : > { %v10632_v22 = vadd.f32 %v15560_v29, %v10596_v33  ;;  %v16296_v33 = vmax.f32 %v16295_v4, 0.0  ;;  %v16302_v4 = vld [vmem:[#allocation39_spill] sm:$0xff] }
 0xa20   : > { %v10267_v54 = vpop.f32.mrf.mxu3 }
 0xa21   : > { %v10332_v24 = vadd.f32 %v10267_v54, %v15481_v55  ;;  %v10664_v52 = vmax.f32 %v10632_v22, 0.0 }
 0xa23   : > { %v10696_v5 = vadd.f32 %v10664_v52, %v16292_v8  ;;  %v10119_v8 = vld [vmem:[#allocation2 + $0xf7] sm:$0xff] }
 0xa24   : > { %v10532_v48 = vpop.f32.mrf.mxu0 }
 0xa25   : > { %v10728_v10 = vmax.f32 %v10696_v5, 0.0  ;;  %v10597_v53 = vadd.f32 %v10532_v48, %v10332_v24  ;;  %v10120_v24 = vld [vmem:[#allocation2 + $0xff] sm:$0xff] }
 0xa27   : > { %v10764_v12 = vadd.f32 %v10728_v10, %v10727_v6  ;;  %v10633_v36 = vadd.f32 %v15560_v29, %v10597_v53  ;;  %11950 = vmatmul.msk.bf16.gmra.mxu0 %vm1330_vm3, %v10431_v41  ;;  %v16298_v6 = vld [vmem:[#allocation43_spill] sm:$0xff] }
 0xa28   : > { %v10269_v55 = vpop.f32.mrf.mxu3  ;;  %v16299_v10 = vmax.f32 %v16298_v6, 0.0 }
 0xa29   : > { %v10333_v20 = vadd.f32 %v10269_v55, %v15488_v25  ;;  %v10665_v15 = vmax.f32 %v10633_v36, 0.0 }
 0xa2b   : > { %v10697_v46 = vadd.f32 %v10665_v15, %v16294_v37  ;;  %v10385_v15 = vld [vmem:[#allocation2 + $0x100] sm:$0xff]  ;;  %v16300_v37 = vld [vmem:[#allocation38_spill] sm:$0xff] }
 0xa2c   : > { %v10534_v42 = vpop.f32.mrf.mxu0  ;;  %v10417_v2 = vsel %vm4547_vm2, %v10385_v15, 0.0  ;;  %vm10838_vm2 = vcmask 1041409  }
 0xa2d   : > { %11927 = vmatmul.msk.bf16.gmra.mxu3 %vm1330_vm3, %v10167_v27  ;;  %v10729_v49 = vmax.f32 %v10697_v46, 0.0  ;;  %v10598_v40 = vadd.f32 %v10534_v42, %v10333_v20  ;;  %v16301_v46 = vmax.f32 %v16300_v37, 0.0 }
 0xa2f   : > { %v10765_v1 = vadd.f32 %v10764_v12, %v10729_v49  ;;  %v10634_v45 = vadd.f32 %v15560_v29, %v10598_v40  ;;  %v10822_v49 = vld [vmem:[%s12614_s12 + $0x40] sm:$0xff] }
 0xa30   : > { %v10272_v61 = vpop.f32.mrf.mxu3  ;;  %10852 = vmatpush.msrb.mxu1 %v10822_v49 }
 0xa31   : > { %v10334_v9 = vadd.f32 %v10272_v61, %v15496_v62  ;;  %v10666_v25 = vmax.f32 %v10634_v45, 0.0  ;;  %v10152_v62 = vsel %vm16297_vm14, %v10120_v24, 0.0 }
 0xa32   : > { %v10168_v50 = vpack.c.bf16 %v10152_v62, %v10119_v8 }
 0xa33   : > { %v10698_v22 = vadd.f32 %v10666_v25, %v16296_v33  ;;  %v16303_v33 = vmax.f32 %v16302_v4, 0.0 }
 0xa34   : > { %v10537_v54 = vpop.f32.mrf.mxu0 }
 0xa35   : > { %v10730_v47 = vmax.f32 %v10698_v22, 0.0  ;;  %v10599_v57 = vadd.f32 %v10537_v54, %v10334_v9  ;;  %v10758_v54 = vrot.slane %v15619_v38, 4 }
 0xa37   : > { %v10766_v52 = vadd.f32 %v10765_v1, %v10730_v47  ;;  %v10635_v0 = vadd.f32 %v15560_v29, %v10599_v57  ;;  %11951 = vmatmul.msk.bf16.gmra.mxu0 %vm1330_vm3, %v10432_v59  ;;  %v12141_v57 = vpop.eup %12140  ;;  %v10759_v8 = vadd.f32 %v10758_v54, %v15619_v38 }
 0xa38   : > { %v10274_v44 = vpop.f32.mrf.mxu3 }
 0xa39   : > { %v10335_v5 = vadd.f32 %v10274_v44, %v15505_v21  ;;  %v10667_v48 = vmax.f32 %v10635_v0, 0.0  ;;  %v10384_v21 = vld [vmem:[#allocation2 + $0xf8] sm:$0xff]  ;;  %v10821_v44 = vld [vmem:[%s12614_s12 + $0x38] sm:$0xff] }
 0xa3a   : > { %v10433_v61 = vpack.c.bf16 %v10417_v2, %v10384_v21  ;;  %10853 = vmatpush.msrb.mxu1 %v10821_v44 }
 0xa3b   : > { %v10699_v53 = vadd.f32 %v10667_v48, %v16299_v10  ;;  %v16304_v48 = vld [vmem:[#allocation37_spill] sm:$0xff]  ;;  %v10760_v10 = vrot.slane %v10759_v8, 2 }
 0xa3c   : > { %v10539_v41 = vpop.f32.mrf.mxu0 }
 0xa3d   : > { %11928 = vmatmul.msk.bf16.gmra.mxu3 %vm1330_vm3, %v10168_v50  ;;  %v10731_v12 = vmax.f32 %v10699_v53, 0.0  ;;  %v10600_v36 = vadd.f32 %v10539_v41, %v10335_v5  ;;  %v10804_v5 = vmul.f32 64.0, %v12141_v57  ;;  %v16305_v50 = vmax.f32 %v16304_v48, 0.0  ;;  %v16311_v48 = vld [vmem:[#allocation45_spill] sm:$0xff] }
 0xa3e   : > { %v10761_v15 = vadd.f32 %v10760_v10, %v10759_v8 }
 0xa3f   : > { %v10767_v55 = vadd.f32 %v10766_v52, %v10731_v12  ;;  %v10636_v11 = vadd.f32 %v15560_v29, %v10600_v36  ;;  %v10805_v36 = vsub.f32 1.0, %v10804_v5 }
 0xa40   : > { %v10277_v20 = vpop.f32.mrf.mxu3  ;;  %v10762_v21 = vrot.slane %v10761_v15, 1 }
 0xa41   : > { %v10336_v39 = vadd.f32 %v10277_v20, %v15513_v19  ;;  %v10668_v27 = vmax.f32 %v10636_v11, 0.0 }
 0xa43   : > { %v10700_v42 = vadd.f32 %v10668_v27, %v16301_v46 }
 0xa44   : > { %v10542_v40 = vpop.f32.mrf.mxu0 }
 0xa45   : > { %v10732_v1 = vmax.f32 %v10700_v42, 0.0  ;;  %v10601_v45 = vadd.f32 %v10542_v40, %v10336_v39  ;;  %v10806_v39 = vmul.f32 %v12141_v57, %v10805_v36 }
 0xa47   : > { %v10768_v31 = vadd.f32 %v10767_v55, %v10732_v1  ;;  %v10637_v9 = vadd.f32 %v15560_v29, %v10601_v45  ;;  %11952 = vmatmul.msk.bf16.gmra.mxu0 %vm1330_vm3, %v10433_v61  ;;  %v10807_v49 = vadd.f32 %v12141_v57, %v10806_v39  ;;  %vm10808_vm3 = vweird.f32 %v12141_v57  ;;  %v10820_v61 = vld [vmem:[%s12614_s12 + $0x30] sm:$0xff] }
 0xa48   : > { %v10279_v25 = vpop.f32.mrf.mxu3  ;;  %10854 = vmatpush.msrb.mxu1 %v10820_v61 }
 0xa49   : > { %v10337_v19 = vadd.f32 %v10279_v25, %v15520_v34  ;;  %v10669_v30 = vmax.f32 %v10637_v9, 0.0  ;;  %v16306_v25 = vld [vmem:[#allocation40_spill] sm:$0xff]  ;;  %v15677_v4 = vsel %vm10808_vm3, %v12141_v57, %v10807_v49 }
 0xa4b   : > { %v10701_v22 = vadd.f32 %v10669_v30, %v16303_v33 }
 0xa4c   : > { %v10544_v28 = vpop.f32.mrf.mxu0 }
 0xa4d   : > { %v10733_v24 = vmax.f32 %v10701_v22, 0.0  ;;  %v10602_v47 = vadd.f32 %v10544_v28, %v10337_v19  ;;  %v16307_v19 = vmax.f32 %v16306_v25, 0.0  ;;  %v16308_v22 = vld [vmem:[#allocation44_spill] sm:$0xff] }
 0xa4e   : > { %v16309_v54 = vmax.f32 %v16308_v22, 0.0 }
 0xa4f   : > { %v10769_v59 = vadd.f32 %v10768_v31, %v10733_v24  ;;  %v10638_v52 = vadd.f32 %v15560_v29, %v10602_v47  ;;  %v10763_v31 = vadd.f32 %v10762_v21, %v10761_v15  ;;  %v16313_v15 = vld [vmem:[#allocation46_spill] sm:$0xff] }
 0xa50   : > { %v10282_v0 = vpop.f32.mrf.mxu3 }
 0xa51   : > { %v10338_v34 = vadd.f32 %v10282_v0, %v15529_v26  ;;  %v10670_v62 = vmax.f32 %v10638_v52, 0.0  ;;  %v10810_v47 = vmul.f32 %v15677_v4, %v10763_v31 }
 0xa53   : > { %v10702_v6 = vadd.f32 %v10670_v62, %v16305_v50  ;;  %v16312_v50 = vmax.f32 %v16311_v48, 0.0 }
 0xa54   : > { %v10547_v53 = vpop.f32.mrf.mxu0 }
 0xa55   : > { %v10734_v41 = vmax.f32 %v10702_v6, 0.0  ;;  %v10603_v12 = vadd.f32 %v10547_v53, %v10338_v34 }
 0xa57   : > { %v10770_v55 = vadd.f32 %v10769_v59, %v10734_v41  ;;  %v10639_v11 = vadd.f32 %v15560_v29, %v10603_v12 }
 0xa58   : > { %v10284_v20 = vpop.f32.mrf.mxu3 }
 0xa59   : > { %v10339_v38 = vadd.f32 %v10284_v20, %v15536_v7  ;;  %v10771_v26 = vrot.slane %v10770_v55, 4  ;;  %v10671_v46 = vmax.f32 %v10639_v11, 0.0  ;;  %v10819_v11 = vld [vmem:[%s12614_s12 + $0x28] sm:$0xff] }
 0xa5a   : > { %10855 = vmatpush.msrb.mxu1 %v10819_v11 }
 0xa5b   : > { %v10772_v27 = vadd.f32 %v10771_v26, %v10770_v55  ;;  %v10703_v23 = vadd.f32 %v10671_v46, %v16307_v19 }
 0xa5c   : > { %v10549_v2 = vpop.f32.mrf.mxu0 }
 0xa5d   : > { %v10773_v37 = vrot.slane %v10772_v27, 2  ;;  %v10604_v42 = vadd.f32 %v10549_v2, %v10339_v38  ;;  %v10735_v59 = vmax.f32 %v10703_v23, 0.0  ;;  %v16314_v38 = vmax.f32 %v16313_v15, 0.0 }
 0xa5f   : > { %v10774_v40 = vadd.f32 %v10773_v37, %v10772_v27  ;;  %v10640_v1 = vadd.f32 %v15560_v29, %v10604_v42  ;;  %v9769_v27 = vpop.f32.mrf.mxu1  ;;  %v10034_v37 = vpop.f32.mrf.mxu2 }
 0xa60   : > { %v10287_v45 = vpop.f32.mrf.mxu3 }
 0xa61   : > { %v10340_v9 = vadd.f32 %v10287_v45, %v15545_v51  ;;  %v10775_v7 = vrot.slane %v10774_v40, 1  ;;  %v10672_v30 = vmax.f32 %v10640_v1, 0.0  ;;  %v16315_v45 = vld [vmem:[#allocation18_spill] sm:$0xff] }
 0xa63   : > { %v10776_v33 = vadd.f32 %v10775_v7, %v10774_v40  ;;  %v10704_v28 = vadd.f32 %v10672_v30, %v16309_v54 }
 0xa64   : > { %v10552_v24 = vpop.f32.mrf.mxu0 }
 0xa65   : > { %v10736_v52 = vmax.f32 %v10704_v28, 0.0  ;;  %v10605_v51 = vadd.f32 %v10552_v24, %v10340_v9  ;;  %v10811_v0 = vmul.f32 %v15677_v4, %v10776_v33  ;;  %v16317_v28 = vld [vmem:[#allocation47_spill] sm:$0xff] }
 0xa66   : > { %v16318_v24 = vmax.f32 %v16317_v28, 0.0 }
 0xa67   : > { %v10777_v44 = vadd.f32 %v10736_v52, %v10735_v59  ;;  %v10641_v8 = vadd.f32 %v15560_v29, %v10605_v51  ;;  %v15684_v57 = vsel %vm10838_vm2, %v10811_v0, %v10810_v47  ;;  %v9772_v25 = vpop.f32.mrf.mxu1  ;;  %v10037_v33 = vpop.f32.mrf.mxu2  ;;  %v9815_v0 = vadd.f32 %v9769_v27, %v15484_v13 }
 0xa68   : > { %v10289_v34 = vpop.f32.mrf.mxu3 }
 0xa69   : > { %v10341_v62 = vadd.f32 %v10289_v34, %v15553_v32  ;;  %v10673_v5 = vmax.f32 %v10641_v8, 0.0 }
 0xa6b   : > { %v10705_v6 = vadd.f32 %v10673_v5, %v16312_v50  ;;  %v10080_v5 = vadd.f32 %v10034_v37, %v9815_v0  ;;  %v16319_v50 = vld [vmem:[#allocation48_spill] sm:$0xff] }
 0xa6c   : > { %v10554_v10 = vpop.f32.mrf.mxu0 }
 0xa6d   : > { %v10737_v53 = vmax.f32 %v10705_v6, 0.0  ;;  %v10606_v41 = vadd.f32 %v10554_v10, %v10341_v62  ;;  %v16320_v6 = vmax.f32 %v16319_v50, 0.0 }
 0xa6f   : > { %v10778_v12 = vadd.f32 %v10777_v44, %v10737_v53  ;;  %v10642_v36 = vadd.f32 %v15560_v29, %v10606_v41  ;;  %v9774_v62 = vpop.f32.mrf.mxu1 }
 0xa70   : > { %v10292_v55 = vpop.f32.mrf.mxu3 }
 0xa71   : > { %v10342_v20 = vadd.f32 %v10292_v55, %v15566_v35  ;;  %v10674_v32 = vmax.f32 %v10642_v36, 0.0  ;;  %v16316_v35 = vmax.f32 %v16315_v45, 0.0  ;;  %v9816_v55 = vadd.f32 %v9772_v25, %v15490_v3 }
 0xa73   : > { %v10706_v26 = vadd.f32 %v10674_v32, %v16314_v38  ;;  %v10817_v32 = vld [vmem:[%s12614_s12 + $0x18] sm:$0xff]  ;;  %v10081_v15 = vadd.f32 %v10037_v33, %v9816_v55 }
 0xa74   : > { %v10557_v39 = vpop.f32.mrf.mxu0 }
 0xa75   : > { %v10738_v21 = vmax.f32 %v10706_v26, 0.0  ;;  %v10607_v2 = vadd.f32 %v10557_v39, %v10342_v20  ;;  %v16321_v39 = vld [vmem:[#allocation49_spill] sm:$0xff] }
 0xa76   : > { %v16322_v27 = vmax.f32 %v16321_v39, 0.0 }
 0xa77   : > { %v10779_v46 = vadd.f32 %v10778_v12, %v10738_v21  ;;  %v10643_v42 = vadd.f32 %v15560_v29, %v10607_v2  ;;  %v9777_v26 = vpop.f32.mrf.mxu1 }
 0xa78   : > { %v10294_v49 = vpop.f32.mrf.mxu3 }
 0xa79   : > { %v10343_v40 = vadd.f32 %v10294_v49, %v15575_v60  ;;  %v10675_v1 = vmax.f32 %v10643_v42, 0.0  ;;  %v10818_v60 = vld [vmem:[%s12614_s12 + $0x20] sm:$0xff] }
 0xa7a   : > { %10856 = vmatpush.msrb.mxu1 %v10818_v60 }
 0xa7b   : > { %v10707_v61 = vadd.f32 %v10675_v1, %v16316_v35 }
 0xa7c   : > { %v10559_v31 = vpop.f32.mrf.mxu0  ;;  %10857 = vmatpush.msrb.mxu1 %v10817_v32  ;;  %v16327_v32 = vld [vmem:[#allocation52_spill] sm:$0xff] }
 0xa7d   : > { %v10739_v9 = vmax.f32 %v10707_v61, 0.0  ;;  %v10608_v7 = vadd.f32 %v10559_v31, %v10343_v40  ;;  %v9817_v40 = vadd.f32 %v9774_v62, %v15499_v16 }
 0xa7f   : > { %v10780_v19 = vadd.f32 %v10779_v46, %v10739_v9  ;;  %v10644_v23 = vadd.f32 %v15560_v29, %v10608_v7  ;;  %v9779_v25 = vpop.f32.mrf.mxu1 }
 0xa80   : > { %v10297_v30 = vpop.f32.mrf.mxu3 }
 0xa81   : > { %v10344_v22 = vadd.f32 %v10297_v30, %v15583_v43  ;;  %v10676_v54 = vmax.f32 %v10644_v23, 0.0  ;;  %v10039_v43 = vpop.f32.mrf.mxu2 }
 0xa82   : > { %v10082_v35 = vadd.f32 %v10039_v43, %v9817_v40 }
 0xa83   : > { %v10708_v47 = vadd.f32 %v10676_v54, %v16318_v24  ;;  %v10816_v24 = vld [vmem:[%s12614_s12 + $0x10] sm:$0xff] }
 0xa84   : > { %v10562_v59 = vpop.f32.mrf.mxu0  ;;  %10858 = vmatpush.msrb.mxu1 %v10816_v24 }
 0xa85   : > { %v10740_v52 = vmax.f32 %v10708_v47, 0.0  ;;  %v10609_v51 = vadd.f32 %v10562_v59, %v10344_v22  ;;  %v9818_v22 = vadd.f32 %v9777_v26, %v15507_v18  ;;  %v16323_v59 = vld [vmem:[#allocation50_spill] sm:$0xff] }
 0xa87   : > { %v10781_v44 = vadd.f32 %v10780_v19, %v10740_v52  ;;  %v10645_v8 = vadd.f32 %v15560_v29, %v10609_v51  ;;  %v16324_v52 = vmax.f32 %v16323_v59, 0.0 }
 0xa88   : > { %v10299_v34 = vpop.f32.mrf.mxu3 }
 0xa89   : > { %v10677_v48 = vmax.f32 %v10645_v8, 0.0  ;;  %v10345_v53 = vadd.f32 %v10299_v34, %v10080_v5  ;;  %v10042_v37 = vpop.f32.mrf.mxu2  ;;  %v16325_v8 = vld [vmem:[#allocation51_spill] sm:$0xff] }
 0xa8a   : > { %v10083_v47 = vadd.f32 %v10042_v37, %v9818_v22  ;;  %v16326_v34 = vmax.f32 %v16325_v8, 0.0 }
 0xa8b   : > { %v10709_v10 = vadd.f32 %v10677_v48, %v16320_v6 }
 0xa8c   : > { %v10564_v41 = vpop.f32.mrf.mxu0 }
 0xa8d   : > { %v10741_v12 = vmax.f32 %v10709_v10, 0.0  ;;  %v10610_v36 = vadd.f32 %v10564_v41, %v10345_v53  ;;  %v9782_v10 = vpop.f32.mrf.mxu1  ;;  %v9819_v53 = vadd.f32 %v9779_v25, %v15516_v56 }
 0xa8e   : > { %v9820_v56 = vadd.f32 %v9782_v10, %v15522_v14 }
 0xa8f   : > { %v10782_v11 = vadd.f32 %v10781_v44, %v10741_v12  ;;  %v10646_v13 = vadd.f32 %v15560_v29, %v10610_v36 }
 0xa90   : > { %v10302_v20 = vpop.f32.mrf.mxu3 }
 0xa91   : > { %v10678_v38 = vmax.f32 %v10646_v13, 0.0  ;;  %v10346_v2 = vadd.f32 %v10302_v20, %v10081_v15  ;;  %v10044_v33 = vpop.f32.mrf.mxu2  ;;  %v16328_v15 = vmax.f32 %v16327_v32, 0.0  ;;  %v16335_v32 = vld [vmem:[#allocation30_spill] sm:$0xff] }
 0xa92   : > { %v10084_v13 = vadd.f32 %v10044_v33, %v9819_v53 }
 0xa93   : > { %v10710_v21 = vadd.f32 %v10678_v38, %v16322_v27 }
 0xa94   : > { %v10567_v46 = vpop.f32.mrf.mxu0 }
 0xa95   : > { %v10742_v42 = vmax.f32 %v10710_v21, 0.0  ;;  %v10611_v49 = vadd.f32 %v10567_v46, %v10346_v2 }
 0xa97   : > { %v10783_v3 = vadd.f32 %v10782_v11, %v10742_v42  ;;  %v10647_v1 = vadd.f32 %v15560_v29, %v10611_v49  ;;  %v10815_v42 = vld [vmem:[%s12614_s12 + $0x8] sm:$0xff] }
 0xa98   : > { %v10304_v45 = vpop.f32.mrf.mxu3  ;;  %10859 = vmatpush.msrb.mxu1 %v10815_v42 }
 0xa99   : > { %v10784_v61 = vrot.slane %v10783_v3, 4  ;;  %v10347_v9 = vadd.f32 %v10304_v45, %v10082_v35  ;;  %v10679_v23 = vmax.f32 %v10647_v1, 0.0  ;;  %v10047_v11 = vpop.f32.mrf.mxu2  ;;  %v16329_v1 = vld [vmem:[#allocation53_spill] sm:$0xff] }
 0xa9a   : > { %v10085_v49 = vadd.f32 %v10047_v11, %v9820_v56  ;;  %v16330_v45 = vmax.f32 %v16329_v1, 0.0 }
 0xa9b   : > { %v10785_v31 = vadd.f32 %v10784_v61, %v10783_v3  ;;  %v10711_v51 = vadd.f32 %v10679_v23, %v16324_v52 }
 0xa9c   : > { %v10569_v7 = vpop.f32.mrf.mxu0 }
 0xa9d   : > { %v10786_v19 = vrot.slane %v10785_v31, 2  ;;  %v10612_v30 = vadd.f32 %v10569_v7, %v10347_v9  ;;  %v10743_v18 = vmax.f32 %v10711_v51, 0.0 }
 0xa9f   : > { %v10787_v54 = vadd.f32 %v10786_v19, %v10785_v31  ;;  %v10648_v16 = vadd.f32 %v15560_v29, %v10612_v30 }
 0xaa0   : > { %v10307_v28 = vpop.f32.mrf.mxu3 }
 0xaa1   : > { %v10788_v60 = vrot.slane %v10787_v54, 1  ;;  %v10680_v0 = vmax.f32 %v10648_v16, 0.0  ;;  %v10348_v5 = vadd.f32 %v10307_v28, %v10083_v47  ;;  %v10049_v3 = vpop.f32.mrf.mxu2 }
 0xaa3   : > { %v10789_v44 = vadd.f32 %v10788_v60, %v10787_v54  ;;  %v10712_v62 = vadd.f32 %v10680_v0, %v16326_v34  ;;  %v16331_v54 = vld [vmem:[#allocation20_spill] sm:$0xff] }
 0xaa4   : > { %v10572_v48 = vpop.f32.mrf.mxu0  ;;  %v16332_v16 = vmax.f32 %v16331_v54, 0.0 }
 0xaa5   : > { %v10744_v43 = vmax.f32 %v10712_v62, 0.0  ;;  %v10613_v50 = vadd.f32 %v10572_v48, %v10348_v5  ;;  %v10812_v6 = vmul.f32 %v15677_v4, %v10789_v44  ;;  %v10814_v62 = vld [vmem:[%s12614_s12] sm:$0xff] }
 0xaa6   : > { %10860 = vmatpush.msrb.mxu1 %v10814_v62  ;;  %v16333_v5 = vld [vmem:[#allocation54_spill] sm:$0xff] }
 0xaa7   : > { %v10790_v41 = vadd.f32 %v10744_v43, %v10743_v18  ;;  %v10649_v12 = vadd.f32 %v15560_v29, %v10613_v50  ;;  %v15729_v55 = vsel %vm10840_vm15, %v10812_v6, %v15684_v57  ;;  %v9784_v57 = vpop.f32.mrf.mxu1  ;;  %v16334_v48 = vmax.f32 %v16333_v5, 0.0 }
 0xaa8   : > { %v10309_v36 = vpop.f32.mrf.mxu3  ;;  %v9821_v25 = vadd.f32 %v9784_v57, %v15532_v17 }
 0xaa9   : > { %v10681_v20 = vmax.f32 %v10649_v12, 0.0  ;;  %v10349_v26 = vadd.f32 %v10309_v36, %v10084_v13  ;;  %v10052_v47 = vpop.f32.mrf.mxu2 }
 0xaaa   : > { %v10086_v30 = vadd.f32 %v10049_v3, %v9821_v25 }
 0xaab   : > { %v10713_v38 = vadd.f32 %v10681_v20, %v16328_v15  ;;  %v16336_v15 = vmax.f32 %v16335_v32, 0.0 }
 0xaac   : > { %v10574_v39 = vpop.f32.mrf.mxu0 }
 0xaad   : > { %v10745_v27 = vmax.f32 %v10713_v38, 0.0  ;;  %v10614_v21 = vadd.f32 %v10574_v39, %v10349_v26 }
 0xaaf   : > { %v10791_v2 = vadd.f32 %v10790_v41, %v10745_v27  ;;  %v10650_v37 = vadd.f32 %v15560_v29, %v10614_v21  ;;  %v9787_v22 = vpop.f32.mrf.mxu1 }
 0xab0   : > { %v10312_v46 = vpop.f32.mrf.mxu3  ;;  %v9822_v51 = vadd.f32 %v9787_v22, %v15540_v58 }
 0xab1   : > { %v10682_v40 = vmax.f32 %v10650_v37, 0.0  ;;  %v10350_v61 = vadd.f32 %v10312_v46, %v10085_v49  ;;  %v10054_v41 = vpop.f32.mrf.mxu2  ;;  %v16337_v46 = vld [vmem:[#allocation55_spill] sm:$0xff] }
 0xab2   : > { %v10087_v8 = vadd.f32 %v10052_v47, %v9822_v51 }
 0xab3   : > { %v10714_v35 = vadd.f32 %v10682_v40, %v16330_v45 }
 0xab4   : > { %v10577_v31 = vpop.f32.mrf.mxu0 }
 0xab5   : > { %v10746_v9 = vmax.f32 %v10714_v35, 0.0  ;;  %v10615_v7 = vadd.f32 %v10577_v31, %v10350_v61 }
 0xab7   : > { %v10792_v14 = vadd.f32 %v10791_v2, %v10746_v9  ;;  %v10651_v19 = vadd.f32 %v15560_v29, %v10615_v7  ;;  %v9789_v53 = vpop.f32.mrf.mxu1 }
 0xab8   : > { %v10314_v23 = vpop.f32.mrf.mxu3  ;;  %v9823_v12 = vadd.f32 %v9789_v53, %v15548_v63  ;;  %v16338_v63 = vmax.f32 %v16337_v46, 0.0 }
 0xab9   : > { %v10683_v33 = vmax.f32 %v10651_v19, 0.0  ;;  %v10351_v24 = vadd.f32 %v10314_v23, %v10086_v30 }
 0xaba   : > { %v10088_v13 = vadd.f32 %v10054_v41, %v9823_v12 }
 0xabb   : > { %v10715_v28 = vadd.f32 %v10683_v33, %v16332_v16 }
 0xabc   : > { %v10579_v60 = vpop.f32.mrf.mxu0 }
 0xabd   : > { %v10747_v59 = vmax.f32 %v10715_v28, 0.0  ;;  %v10616_v52 = vadd.f32 %v10579_v60, %v10351_v24 }
 0xabf   : > { %v10793_v0 = vadd.f32 %v10792_v14, %v10747_v59  ;;  %v10652_v17 = vadd.f32 %v15560_v29, %v10616_v52 }
 0xac0   : > { %v10317_v44 = vpop.f32.mrf.mxu3 }
 0xac1   : > { %v10684_v34 = vmax.f32 %v10652_v17, 0.0  ;;  %v10352_v43 = vadd.f32 %v10317_v44, %v10087_v8 }
 0xac3   : > { %v10716_v18 = vadd.f32 %v10684_v34, %v16334_v48 }
 0xac4   : > { %v10582_v50 = vpop.f32.mrf.mxu0 }
 0xac5   : > { %v10748_v6 = vmax.f32 %v10716_v18, 0.0  ;;  %v10617_v10 = vadd.f32 %v10582_v50, %v10352_v43 }
 0xac7   : > { %v10794_v58 = vadd.f32 %v10793_v0, %v10748_v6  ;;  %v10653_v36 = vadd.f32 %v15560_v29, %v10617_v10 }
 0xac8   : > { %v10319_v11 = vpop.f32.mrf.mxu3 }
 0xac9   : > { %v10685_v20 = vmax.f32 %v10653_v36, 0.0  ;;  %v10353_v26 = vadd.f32 %v10319_v11, %v10088_v13 }
 0xacb   : > { %v10717_v38 = vadd.f32 %v10685_v20, %v16336_v15 }
 0xacc   : > { %v10584_v39 = vpop.f32.mrf.mxu0 }
 0xacd   : > { %v10749_v27 = vmax.f32 %v10717_v38, 0.0  ;;  %v10618_v21 = vadd.f32 %v10584_v39, %v10353_v26 }
 0xacf   : > { %v10795_v56 = vadd.f32 %v10794_v58, %v10749_v27  ;;  %v10654_v2 = vadd.f32 %v15560_v29, %v10618_v21  ;;  %v12139_v29 = vld [vmem:[%s708_s2] ss:$0 sm:$0xff] }
 0xad1   : > { %v10686_v37 = vmax.f32 %v10654_v2, 0.0 }
 0xad3   : > { %v10718_v42 = vadd.f32 %v10686_v37, %v16338_v63 }
 0xad5   : > { %v10750_v57 = vmax.f32 %v10718_v42, 0.0 }
 0xad7   : > { %v10796_v49 = vadd.f32 %v10795_v56, %v10750_v57 }
 0xad9   : > { %v10797_v40 = vrot.slane %v10796_v49, 4 }
 0xadb   : > { %v10798_v3 = vadd.f32 %v10797_v40, %v10796_v49 }
 0xadd   : > { %v10799_v1 = vrot.slane %v10798_v3, 2 }
 0xadf   : > { %v10800_v45 = vadd.f32 %v10799_v1, %v10798_v3 }
 0xae1   : > { %v10801_v35 = vrot.slane %v10800_v45, 1 }
 0xae3   : > { %v10802_v61 = vadd.f32 %v10801_v35, %v10800_v45 }
 0xae5   : > { %v10813_v31 = vmul.f32 %v15677_v4, %v10802_v61 }
 0xae7   : > { %v10843_v9 = vsel %vm10842_vm1, %v10813_v31, %v15729_v55 }
 0xae8   : > { %10861 = vmatmul.f32.vlgmr.msrb.gmra.mxu1 %v10843_v9 }
 0xb65   : > { %v10862_v7 = vpop.f32.mrf.mxu1 }
 0xb66   : > { %v10863_v25 = vadd.f32 %v12139_v29, %v10862_v7 }
 0xb68   : > { %v10866_v14 = vsel %vm10865_vm13, %v10863_v25, -inf }
 0xb69   : > { %10867 = vmax.xlane.f32.xlu0 %v10866_v14 }
 0xbdc   : > { %v10868_v19 = vpop.xlane.xlu0 %10867 }
 0xbdd   : > { %v10869_v23 = vsub.f32 %v10863_v25, %v10868_v19 }
 0xbdf   : > { %v10870_v30 = vmul.f32 1.442695, %v10869_v23 }
 0xbe1   : > { %12142 = vpow2.f32 %v10870_v30 }
 0xbe7   : > { %v12143_v4 = vpop.eup %12142 }
 0xbe8   : > { %v10872_v33 = vsel %vm10865_vm13, %v12143_v4, 0.0 }
 0xbe9   : > { %10873 = vadd.xlane.f32.xlu0 %v10872_v33 }
 0xc5c   : > { %v10874_v55 = vpop.xlane.xlu0 %10873 }
 0xc5d   : > { %12144 = vlog2.f32 %v10874_v55 }
 0xc63   : > { %v12145_v22 = vpop.eup %12144 }
 0xc64   : > { %v10876_v54 = vmul.f32 0.6931472, %v12145_v22 }
 0xc66   : > { %v10877_v16 = vsub.f32 %v10869_v23, %v10876_v54 }
 0xc68   : > { %v10879_v28 = vrot.slane %v10877_v16, 1  ;;  %v10880_v24 = vrot.slane %v10877_v16, 2  ;;  %v10881_v47 = vrot.slane %v10877_v16, 3  ;;  %10886 = vst.msk [vmem:[%s716_s24] sm:$0x1] %vm10885_vm0, %v10877_v16 }
 0xc6a   : > { %10887 = vst.msk [vmem:[%s716_s24 + $0x1] sm:$0x1] %vm10885_vm0, %v10879_v28 }
 0xc6b   : > { %10888 = vst.msk [vmem:[%s716_s24 + $0x2] sm:$0x1] %vm10885_vm0, %v10880_v24 }
 0xc6c   : > { %10889 = vst.msk [vmem:[%s716_s24 + $0x3] sm:$0x1] %vm10885_vm0, %v10881_v47 }
 0xc6d PF: > { %s31_s28 = sadd.s32 1, %s12417_s28   ;;  %s16340_s25 = sld [smem:[#allocation13_spill]] }
 0xc6e   : > { %p28_p2 = scmp.ge.s32.totalorder %s31_s28, 6   ;;  %s16341_s23 = sld [smem:[#allocation17_spill]] }
 0xc6f   : > { %s16342_s24 = sld [smem:[#allocation14_spill]]  ;;  %s16345_s21 = smov %s12393_s22 }
 0xc70   : > { %s16343_s26 = sld [smem:[#allocation15_spill]] }
 0xc71   : > { %s16344_s30 = sld [smem:[#allocation16_spill]] }
 0xc73   : > { %s16346_s22 = smov %s16340_s25  ;;  %s16347_s25 = smov %s12413_s27 }
 0xc74   :  { %30 = sbr.rel (!%p28_p2) target bundleno = 20 (0x14), region = 169 }
 0xc77   : > { %s16348_s27 = smov %s16344_s30 }
 0xc79   :  { %10918 = vsyncpa [#allocation4], 1 }
 0xc7a   :  { %10920 = vsyncpa [#allocation4 + $0x1], 1 }
 0xc7b   :  { %10921 = vsyncpa [#allocation6], 1 }
 0xc7c   :  { %10923 = vsyncpa [#allocation6 + $0x1], 1 }
 0xc7d   :  { %10924 = vsyncpa [#allocation9], 1 }
 0xc7e   :  { %10926 = vsyncpa [#allocation9 + $0x1], 1 }

</bundles_post_ra>
